<compile_context>
chip_gen: v5e
topology: v5e:2x2
jax: 0.10.0
libtpu: 0.0.40
codegen_flags: <defaults>
</compile_context>

<pallas_src>
import functools

import jax
import jax.numpy as jnp
from jax.experimental import pallas as pl
from jax.experimental.pallas import tpu as pltpu

HIDDEN_DIM = 256
INPUT_DIM = 10
LAYER_DIM = 3
OUTPUT_DIM = 9

H = HIDDEN_DIM
G4 = 4 * HIDDEN_DIM
O_PAD = 128      # fc output dim padded to one lane tile (sliced back in wrapper)
B_SUB = 8        # f32 sublane count -- pad batch to a multiple of this


def _round_up(x, m):
    return (x + m - 1) // m * m


def _sigmoid(x):
    # sigmoid(x) = 0.5 * (tanh(0.5 x) + 1): single EUP push instead of exp + recip.
    return 0.5 * jnp.tanh(0.5 * x) + 0.5


# ----------------------------------------------------------------------------
# Kernel body: one grid step == one LSTM layer
# ----------------------------------------------------------------------------
def _fused_lstm_kernel(x_ref,                      # (S*B, 256) bf16, feature-padded input
                       w_ih_ref, w_hh_ref, b_ref,  # (256,4H) bf16 / (256,4H) bf16 / (1,4H) f32
                       fc_w_ref, fc_b_ref,         # (256,O_PAD) bf16 / (1,O_PAD) f32
                       out_ref,                    # (B, O_PAD) f32
                       gates_scr,                  # (S*B, 4H) f32 scratch
                       hseq_scr,                   # (S*B, 256) bf16 scratch (persistent)
                       *, S, B):
    l = pl.program_id(0)

    # Layer 0: seed the sequence scratch with the (padded) input features.
    @pl.when(l == 0)
    def _():
        hseq_scr[...] = x_ref[...]

    # Hoisted time-invariant input projection for this layer:
    #   (S*B, 256) @ (256, 4H) + (b_ih + b_hh)   -> f32 gate pre-activations.
    gates_scr[...] = (
        jnp.dot(hseq_scr[...], w_ih_ref[...], preferred_element_type=jnp.float32)
        + b_ref[...])

    # Serial recurrence: only h_{t-1} @ W_hh^T + elementwise remain per step.
    h = jnp.zeros((B, H), jnp.float32)
    c = jnp.zeros((B, H), jnp.float32)
    for t in range(S):  # trace-time unroll; static, sublane-aligned slices
        gx = gates_scr[t * B:(t + 1) * B, :]                       # (B, 4H) f32
        gates = gx + jnp.dot(h.astype(jnp.bfloat16), w_hh_ref[...],
                             preferred_element_type=jnp.float32)   # (B, 4H) f32
        i_g = _sigmoid(gates[:, 0 * H:1 * H])
        f_g = _sigmoid(gates[:, 1 * H:2 * H])
        g_g = jnp.tanh(gates[:, 2 * H:3 * H])
        o_g = _sigmoid(gates[:, 3 * H:4 * H])
        c = f_g * c + i_g * g_g
        h = o_g * jnp.tanh(c)
        hseq_scr[t * B:(t + 1) * B, :] = h.astype(jnp.bfloat16)    # bf16 sequence scratch

    # FC epilogue only after the last layer, on the final hidden state.
    @pl.when(l == pl.num_programs(0) - 1)
    def _():
        h_last = hseq_scr[(S - 1) * B:S * B, :]                    # (B, 256) bf16
        out_ref[...] = (jnp.dot(h_last, fc_w_ref[...],
                                preferred_element_type=jnp.float32)
                        + fc_b_ref[...]).astype(out_ref.dtype)


# ----------------------------------------------------------------------------
# pallas_call wrapper: single launch, layer grid pipelines the weight DMAs
# ----------------------------------------------------------------------------
def _fused_forward(x2d, params, *, S, B_pad):
    kernel = functools.partial(_fused_lstm_kernel, S=S, B=B_pad)
    grid_spec = pltpu.PrefetchScalarGridSpec(
        num_scalar_prefetch=0,
        grid=(LAYER_DIM,),
        in_specs=[
            pl.BlockSpec((S * B_pad, H), lambda l: (0, 0)),      # x (resident, fetched once)
            pl.BlockSpec((None, H, G4), lambda l: (l, 0, 0)),    # W_ih^T, per-layer block
            pl.BlockSpec((None, H, G4), lambda l: (l, 0, 0)),    # W_hh^T, per-layer block
            pl.BlockSpec((None, 1, G4), lambda l: (l, 0, 0)),    # b_ih + b_hh, per-layer
            pl.BlockSpec((H, O_PAD), lambda l: (0, 0)),          # fc W^T (resident)
            pl.BlockSpec((1, O_PAD), lambda l: (0, 0)),          # fc b   (resident)
        ],
        out_specs=pl.BlockSpec((B_pad, O_PAD), lambda l: (0, 0)),
        scratch_shapes=[
            pltpu.VMEM((S * B_pad, G4), jnp.float32),            # hoisted gate pre-activations
            pltpu.VMEM((S * B_pad, H), jnp.bfloat16),            # hidden-state sequence (bf16)
        ],
    )
    return pl.pallas_call(
        kernel,
        out_shape=jax.ShapeDtypeStruct((B_pad, O_PAD), jnp.float32),
        grid_spec=grid_spec,
        compiler_params=pltpu.CompilerParams(
            dimension_semantics=("arbitrary",),          # serial layer dependency
            vmem_limit_bytes=32 * 1024 * 1024),          # explicit headroom for batch scaling
    )(x2d,
      params["w_ih"], params["w_hh"], params["b"],
      params["fc_w"], params["fc_b"])


# ----------------------------------------------------------------------------
# Parameter init (mimics PyTorch's uniform(-1/sqrt(H), 1/sqrt(H)))
# Weights pre-transposed, layer-stacked, zero-padded, and cast to bf16.
# ----------------------------------------------------------------------------
def init_params(key, input_dim=INPUT_DIM, hidden_dim=HIDDEN_DIM,
                layer_dim=LAYER_DIM, output_dim=OUTPUT_DIM):
    k = 1.0 / jnp.sqrt(jnp.float32(hidden_dim))
    w_ih_l, w_hh_l, b_l = [], [], []
    for layer in range(layer_dim):
        d_in = input_dim if layer == 0 else hidden_dim
        key, k1, k2, k3, k4 = jax.random.split(key, 5)
        w_ih_t = jax.random.uniform(k1, (d_in, 4 * hidden_dim),
                                    minval=-k, maxval=k, dtype=jnp.float32)
        w_ih_t = jnp.pad(w_ih_t, ((0, hidden_dim - d_in), (0, 0)))   # pad rows to 256
        w_hh_t = jax.random.uniform(k2, (hidden_dim, 4 * hidden_dim),
                                    minval=-k, maxval=k, dtype=jnp.float32)
        b_ih = jax.random.uniform(k3, (4 * hidden_dim,),
                                  minval=-k, maxval=k, dtype=jnp.float32)
        b_hh = jax.random.uniform(k4, (4 * hidden_dim,),
                                  minval=-k, maxval=k, dtype=jnp.float32)
        w_ih_l.append(w_ih_t)
        w_hh_l.append(w_hh_t)
        b_l.append((b_ih + b_hh)[None, :])

    key, k1, k2 = jax.random.split(key, 3)
    fc_w = jax.random.uniform(k1, (hidden_dim, output_dim),
                              minval=-k, maxval=k, dtype=jnp.float32)
    fc_b = jax.random.uniform(k2, (output_dim,),
                              minval=-k, maxval=k, dtype=jnp.float32)

    return {
        "w_ih": jnp.stack(w_ih_l).astype(jnp.bfloat16),   # (L, 256, 4H)
        "w_hh": jnp.stack(w_hh_l).astype(jnp.bfloat16),   # (L, 256, 4H)
        "b":    jnp.stack(b_l),                           # (L, 1, 4H) f32
        "fc_w": jnp.pad(fc_w, ((0, 0), (0, O_PAD - output_dim))).astype(jnp.bfloat16),
        "fc_b": jnp.pad(fc_b, (0, O_PAD - output_dim))[None, :],
    }


# ----------------------------------------------------------------------------
# Full forward pass == LSTMClassifier.forward
# ----------------------------------------------------------------------------
@jax.jit
def lstm_classifier_forward(x, params):
    """x: (B, S, input_dim) batch-first (PyTorch convention). Returns (B, output_dim)."""
    B, S, D = x.shape
    B_pad = _round_up(B, B_SUB)
    xs = jnp.transpose(x, (1, 0, 2))                                  # time-major (S, B, D)
    xs = jnp.pad(xs, ((0, 0), (0, B_pad - B), (0, H - D)))            # pad batch & features to 256
    x2d = xs.reshape(S * B_pad, H).astype(jnp.bfloat16)
    out_pad = _fused_forward(x2d, params, S=S, B_pad=B_pad)           # (B_pad, O_PAD)
    return out_pad[:B, :OUTPUT_DIM]


# ----------------------------------------------------------------------------
# Pure-JAX f32 reference (for correctness check)
# ----------------------------------------------------------------------------
def _reference_forward(x, params):
    w_ih_all = params["w_ih"].astype(jnp.float32)
    w_hh_all = params["w_hh"].astype(jnp.float32)
    b_all = params["b"]
    B, S, D = x.shape
    inp = x.astype(jnp.float32)
    for layer in range(LAYER_DIM):
        d_in = D if layer == 0 else H
        w_ih = w_ih_all[layer, :d_in, :]
        w_hh = w_hh_all[layer]
        b = b_all[layer]
        h = jnp.zeros((B, H), jnp.float32)
        c = jnp.zeros((B, H), jnp.float32)
        outs = []
        for t in range(S):
            gates = inp[:, t, :] @ w_ih + h @ w_hh + b
            i_g = jax.nn.sigmoid(gates[:, 0 * H:1 * H])
            f_g = jax.nn.sigmoid(gates[:, 1 * H:2 * H])
            g_g = jnp.tanh(gates[:, 2 * H:3 * H])
            o_g = jax.nn.sigmoid(gates[:, 3 * H:4 * H])
            c = f_g * c + i_g * g_g
            h = o_g * jnp.tanh(c)
            outs.append(h)
        inp = jnp.stack(outs, axis=1)
    fc_w = params["fc_w"].astype(jnp.float32)[:, :OUTPUT_DIM]
    fc_b = params["fc_b"][0, :OUTPUT_DIM]
    return inp[:, -1, :] @ fc_w + fc_b


if __name__ == "__main__":
    key = jax.random.PRNGKey(0)
    key, pkey, xkey = jax.random.split(key, 3)

    batch, seq = 2, 8
    params = init_params(pkey)
    x = jax.random.normal(xkey, (batch, seq, INPUT_DIM), dtype=jnp.float32)

    out = lstm_classifier_forward(x, params)
    jax.block_until_ready(out)
    assert out.shape == (batch, OUTPUT_DIM), out.shape
    assert bool(jnp.all(jnp.isfinite(out)))

    # bf16 weights / activations inside the kernel -> allow ~1e-2-level drift.
    ref = _reference_forward(x, params)
    max_err = float(jnp.max(jnp.abs(out - ref)))
    assert max_err < 7e-2, f"max abs diff vs f32 reference: {max_err}"

    print("KERNEL_OK")
</pallas_src>

<mosaic_0001>
module attributes {stable_mosaic.version = 11 : i64} {
  func.func @_fused_lstm_kernel(%arg0: i32, %arg1: memref<64x256xbf16, #tpu.memory_space<vmem>>, %arg2: memref<1x256x1024xbf16, #tpu.memory_space<vmem>>, %arg3: memref<1x256x1024xbf16, #tpu.memory_space<vmem>>, %arg4: memref<1x1x1024xf32, #tpu.memory_space<vmem>>, %arg5: memref<256x128xbf16, #tpu.memory_space<vmem>>, %arg6: memref<1x128xf32, #tpu.memory_space<vmem>>, %arg7: memref<8x128xf32, #tpu.memory_space<vmem>>, %arg8: memref<64x1024xf32, #tpu.memory_space<vmem>>, %arg9: memref<64x256xbf16, #tpu.memory_space<vmem>>) attributes {dimension_semantics = [#tpu.dimension_semantics<arbitrary>], iteration_bounds = array<i64: 3>, scalar_prefetch = 0 : i64, scratch_operands = 2 : i64, tpu.core_type = #tpu.core_type<tc>, window_params = [{pipeline_mode = #tpu.pipeline_mode<synchronous>, transform_indices = @transform_0, window_bounds = array<i64: 64, 256>}, {transform_indices = @transform_1, window_bounds = array<i64: 1, 256, 1024>}, {transform_indices = @transform_2, window_bounds = array<i64: 1, 256, 1024>}, {transform_indices = @transform_3, window_bounds = array<i64: 1, 1, 1024>}, {pipeline_mode = #tpu.pipeline_mode<synchronous>, transform_indices = @transform_4, window_bounds = array<i64: 256, 128>}, {pipeline_mode = #tpu.pipeline_mode<synchronous>, transform_indices = @transform_5, window_bounds = array<i64: 1, 128>}, {pipeline_mode = #tpu.pipeline_mode<synchronous>, transform_indices = @transform_6, window_bounds = array<i64: 8, 128>}]} {
    %c0_i32 = arith.constant 0 : i32
    %0 = arith.cmpi eq, %arg0, %c0_i32 : i32
    %1 = arith.extui %0 : i1 to i32
    %c0_i32_0 = arith.constant 0 : i32
    %2 = arith.cmpi ne, %1, %c0_i32_0 : i32
    scf.if %2 {
      %c0_142 = arith.constant 0 : index
      %c0_143 = arith.constant 0 : index
      %329 = vector.load %arg1[%c0_142, %c0_143] : memref<64x256xbf16, #tpu.memory_space<vmem>>, vector<64x256xbf16>
      %c0_144 = arith.constant 0 : index
      %c0_145 = arith.constant 0 : index
      %330 = vector.load %arg9[%c0_144, %c0_145] : memref<64x256xbf16, #tpu.memory_space<vmem>>, vector<64x256xbf16>
      tpu.vector_store %arg9[%c0_144, %c0_145], %329 {strides = array<i32>} : memref<64x256xbf16, #tpu.memory_space<vmem>>, vector<64x256xbf16>,
    } else {
    }
    %c0 = arith.constant 0 : index
    %c0_1 = arith.constant 0 : index
    %3 = vector.load %arg9[%c0, %c0_1] : memref<64x256xbf16, #tpu.memory_space<vmem>>, vector<64x256xbf16>
    %c0_2 = arith.constant 0 : index
    %c0_3 = arith.constant 0 : index
    %c0_4 = arith.constant 0 : index
    %4 = vector.load %arg2[%c0_2, %c0_3, %c0_4] : memref<1x256x1024xbf16, #tpu.memory_space<vmem>>, vector<1x256x1024xbf16>
    %5 = vector.shape_cast %4 : vector<1x256x1024xbf16> to vector<256x1024xbf16>
    %cst = arith.constant dense<0.000000e+00> : vector<64x1024xf32>
    %6 = tpu.matmul %3, %5, %cst {dimension_numbers = #tpu.dot_dimension_numbers<[1], [0], [0], [1], [0, 0, 1, 1], [], []>} : vector<64x256xbf16>, vector<256x1024xbf16>, vector<64x1024xf32> -> vector<64x1024xf32>
    %c0_5 = arith.constant 0 : index
    %c0_6 = arith.constant 0 : index
    %c0_7 = arith.constant 0 : index
    %7 = vector.load %arg4[%c0_5, %c0_6, %c0_7] : memref<1x1x1024xf32, #tpu.memory_space<vmem>>, vector<1x1x1024xf32>
    %8 = vector.shape_cast %7 : vector<1x1x1024xf32> to vector<1x1024xf32>
    %9 = vector.broadcast %8 : vector<1x1024xf32> to vector<64x1024xf32>
    %10 = arith.addf %6, %9 : vector<64x1024xf32>
    %c0_8 = arith.constant 0 : index
    %c0_9 = arith.constant 0 : index
    %11 = vector.load %arg8[%c0_8, %c0_9] : memref<64x1024xf32, #tpu.memory_space<vmem>>, vector<64x1024xf32>
    tpu.vector_store %arg8[%c0_8, %c0_9], %10 {strides = array<i32>} : memref<64x1024xf32, #tpu.memory_space<vmem>>, vector<64x1024xf32>,
    %cst_10 = arith.constant 0.000000e+00 : f32
    %12 = vector.broadcast %cst_10 : f32 to vector<8x256xf32>
    %cst_11 = arith.constant 0.000000e+00 : f32
    %13 = vector.broadcast %cst_11 : f32 to vector<8x256xf32>
    %c0_12 = arith.constant 0 : index
    %c0_13 = arith.constant 0 : index
    %14 = vector.load %arg8[%c0_12, %c0_13] : memref<64x1024xf32, #tpu.memory_space<vmem>>, vector<8x1024xf32>
    %15 = arith.truncf %12 : vector<8x256xf32> to vector<8x256xbf16>
    %c0_14 = arith.constant 0 : index
    %c0_15 = arith.constant 0 : index
    %c0_16 = arith.constant 0 : index
    %16 = vector.load %arg3[%c0_14, %c0_15, %c0_16] : memref<1x256x1024xbf16, #tpu.memory_space<vmem>>, vector<1x256x1024xbf16>
    %17 = vector.shape_cast %16 : vector<1x256x1024xbf16> to vector<256x1024xbf16>
    %cst_17 = arith.constant dense<0.000000e+00> : vector<8x1024xf32>
    %18 = tpu.matmul %15, %17, %cst_17 {dimension_numbers = #tpu.dot_dimension_numbers<[1], [0], [0], [1], [0, 0, 1, 1], [], []>} : vector<8x256xbf16>, vector<256x1024xbf16>, vector<8x1024xf32> -> vector<8x1024xf32>
    %19 = arith.addf %14, %18 : vector<8x1024xf32>
    %20 = vector.extract_strided_slice %19 {offsets = [0, 0], sizes = [8, 256], strides = [1, 1]} : vector<8x1024xf32> to vector<8x256xf32>
    %cst_18 = arith.constant 5.000000e-01 : f32
    %21 = vector.broadcast %cst_18 : f32 to vector<8x256xf32>
    %22 = arith.mulf %21, %20 : vector<8x256xf32>
    %23 = math.tanh %22 : vector<8x256xf32>
    %cst_19 = arith.constant 5.000000e-01 : f32
    %24 = vector.broadcast %cst_19 : f32 to vector<8x256xf32>
    %25 = arith.mulf %24, %23 : vector<8x256xf32>
    %cst_20 = arith.constant 5.000000e-01 : f32
    %26 = vector.broadcast %cst_20 : f32 to vector<8x256xf32>
    %27 = arith.addf %25, %26 : vector<8x256xf32>
    %28 = vector.extract_strided_slice %19 {offsets = [0, 256], sizes = [8, 256], strides = [1, 1]} : vector<8x1024xf32> to vector<8x256xf32>
    %cst_21 = arith.constant 5.000000e-01 : f32
    %29 = vector.broadcast %cst_21 : f32 to vector<8x256xf32>
    %30 = arith.mulf %29, %28 : vector<8x256xf32>
    %31 = math.tanh %30 : vector<8x256xf32>
    %cst_22 = arith.constant 5.000000e-01 : f32
    %32 = vector.broadcast %cst_22 : f32 to vector<8x256xf32>
    %33 = arith.mulf %32, %31 : vector<8x256xf32>
    %cst_23 = arith.constant 5.000000e-01 : f32
    %34 = vector.broadcast %cst_23 : f32 to vector<8x256xf32>
    %35 = arith.addf %33, %34 : vector<8x256xf32>
    %36 = vector.extract_strided_slice %19 {offsets = [0, 512], sizes = [8, 256], strides = [1, 1]} : vector<8x1024xf32> to vector<8x256xf32>
    %37 = math.tanh %36 : vector<8x256xf32>
    %38 = vector.extract_strided_slice %19 {offsets = [0, 768], sizes = [8, 256], strides = [1, 1]} : vector<8x1024xf32> to vector<8x256xf32>
    %cst_24 = arith.constant 5.000000e-01 : f32
    %39 = vector.broadcast %cst_24 : f32 to vector<8x256xf32>
    %40 = arith.mulf %39, %38 : vector<8x256xf32>
    %41 = math.tanh %40 : vector<8x256xf32>
    %cst_25 = arith.constant 5.000000e-01 : f32
    %42 = vector.broadcast %cst_25 : f32 to vector<8x256xf32>
    %43 = arith.mulf %42, %41 : vector<8x256xf32>
    %cst_26 = arith.constant 5.000000e-01 : f32
    %44 = vector.broadcast %cst_26 : f32 to vector<8x256xf32>
    %45 = arith.addf %43, %44 : vector<8x256xf32>
    %46 = arith.mulf %35, %13 : vector<8x256xf32>
    %47 = arith.mulf %27, %37 : vector<8x256xf32>
    %48 = arith.addf %46, %47 : vector<8x256xf32>
    %49 = math.tanh %48 : vector<8x256xf32>
    %50 = arith.mulf %45, %49 : vector<8x256xf32>
    %51 = arith.truncf %50 : vector<8x256xf32> to vector<8x256xbf16>
    %c0_27 = arith.constant 0 : index
    %c0_28 = arith.constant 0 : index
    %52 = vector.load %arg9[%c0_27, %c0_28] : memref<64x256xbf16, #tpu.memory_space<vmem>>, vector<8x256xbf16>
    tpu.vector_store %arg9[%c0_27, %c0_28], %51 {strides = array<i32>} : memref<64x256xbf16, #tpu.memory_space<vmem>>, vector<8x256xbf16>,
    %c8 = arith.constant 8 : index
    %c0_29 = arith.constant 0 : index
    %53 = vector.load %arg8[%c8, %c0_29] : memref<64x1024xf32, #tpu.memory_space<vmem>>, vector<8x1024xf32>
    %54 = arith.truncf %50 : vector<8x256xf32> to vector<8x256xbf16>
    %c0_30 = arith.constant 0 : index
    %c0_31 = arith.constant 0 : index
    %c0_32 = arith.constant 0 : index
    %55 = vector.load %arg3[%c0_30, %c0_31, %c0_32] : memref<1x256x1024xbf16, #tpu.memory_space<vmem>>, vector<1x256x1024xbf16>
    %56 = vector.shape_cast %55 : vector<1x256x1024xbf16> to vector<256x1024xbf16>
    %cst_33 = arith.constant dense<0.000000e+00> : vector<8x1024xf32>
    %57 = tpu.matmul %54, %56, %cst_33 {dimension_numbers = #tpu.dot_dimension_numbers<[1], [0], [0], [1], [0, 0, 1, 1], [], []>} : vector<8x256xbf16>, vector<256x1024xbf16>, vector<8x1024xf32> -> vector<8x1024xf32>
    %58 = arith.addf %53, %57 : vector<8x1024xf32>
    %59 = vector.extract_strided_slice %58 {offsets = [0, 0], sizes = [8, 256], strides = [1, 1]} : vector<8x1024xf32> to vector<8x256xf32>
    %cst_34 = arith.constant 5.000000e-01 : f32
    %60 = vector.broadcast %cst_34 : f32 to vector<8x256xf32>
    %61 = arith.mulf %60, %59 : vector<8x256xf32>
    %62 = math.tanh %61 : vector<8x256xf32>
    %cst_35 = arith.constant 5.000000e-01 : f32
    %63 = vector.broadcast %cst_35 : f32 to vector<8x256xf32>
    %64 = arith.mulf %63, %62 : vector<8x256xf32>
    %cst_36 = arith.constant 5.000000e-01 : f32
    %65 = vector.broadcast %cst_36 : f32 to vector<8x256xf32>
    %66 = arith.addf %64, %65 : vector<8x256xf32>
    %67 = vector.extract_strided_slice %58 {offsets = [0, 256], sizes = [8, 256], strides = [1, 1]} : vector<8x1024xf32> to vector<8x256xf32>
    %cst_37 = arith.constant 5.000000e-01 : f32
    %68 = vector.broadcast %cst_37 : f32 to vector<8x256xf32>
    %69 = arith.mulf %68, %67 : vector<8x256xf32>
    %70 = math.tanh %69 : vector<8x256xf32>
    %cst_38 = arith.constant 5.000000e-01 : f32
    %71 = vector.broadcast %cst_38 : f32 to vector<8x256xf32>
    %72 = arith.mulf %71, %70 : vector<8x256xf32>
    %cst_39 = arith.constant 5.000000e-01 : f32
    %73 = vector.broadcast %cst_39 : f32 to vector<8x256xf32>
    %74 = arith.addf %72, %73 : vector<8x256xf32>
    %75 = vector.extract_strided_slice %58 {offsets = [0, 512], sizes = [8, 256], strides = [1, 1]} : vector<8x1024xf32> to vector<8x256xf32>
    %76 = math.tanh %75 : vector<8x256xf32>
    %77 = vector.extract_strided_slice %58 {offsets = [0, 768], sizes = [8, 256], strides = [1, 1]} : vector<8x1024xf32> to vector<8x256xf32>
    %cst_40 = arith.constant 5.000000e-01 : f32
    %78 = vector.broadcast %cst_40 : f32 to vector<8x256xf32>
    %79 = arith.mulf %78, %77 : vector<8x256xf32>
    %80 = math.tanh %79 : vector<8x256xf32>
    %cst_41 = arith.constant 5.000000e-01 : f32
    %81 = vector.broadcast %cst_41 : f32 to vector<8x256xf32>
    %82 = arith.mulf %81, %80 : vector<8x256xf32>
    %cst_42 = arith.constant 5.000000e-01 : f32
    %83 = vector.broadcast %cst_42 : f32 to vector<8x256xf32>
    %84 = arith.addf %82, %83 : vector<8x256xf32>
    %85 = arith.mulf %74, %48 : vector<8x256xf32>
    %86 = arith.mulf %66, %76 : vector<8x256xf32>
    %87 = arith.addf %85, %86 : vector<8x256xf32>
    %88 = math.tanh %87 : vector<8x256xf32>
    %89 = arith.mulf %84, %88 : vector<8x256xf32>
    %90 = arith.truncf %89 : vector<8x256xf32> to vector<8x256xbf16>
    %c8_43 = arith.constant 8 : index
    %c0_44 = arith.constant 0 : index
    %91 = vector.load %arg9[%c8_43, %c0_44] : memref<64x256xbf16, #tpu.memory_space<vmem>>, vector<8x256xbf16>
    tpu.vector_store %arg9[%c8_43, %c0_44], %90 {strides = array<i32>} : memref<64x256xbf16, #tpu.memory_space<vmem>>, vector<8x256xbf16>,
    %c16 = arith.constant 16 : index
    %c0_45 = arith.constant 0 : index
    %92 = vector.load %arg8[%c16, %c0_45] : memref<64x1024xf32, #tpu.memory_space<vmem>>, vector<8x1024xf32>
    %93 = arith.truncf %89 : vector<8x256xf32> to vector<8x256xbf16>
    %c0_46 = arith.constant 0 : index
    %c0_47 = arith.constant 0 : index
    %c0_48 = arith.constant 0 : index
    %94 = vector.load %arg3[%c0_46, %c0_47, %c0_48] : memref<1x256x1024xbf16, #tpu.memory_space<vmem>>, vector<1x256x1024xbf16>
    %95 = vector.shape_cast %94 : vector<1x256x1024xbf16> to vector<256x1024xbf16>
    %cst_49 = arith.constant dense<0.000000e+00> : vector<8x1024xf32>
    %96 = tpu.matmul %93, %95, %cst_49 {dimension_numbers = #tpu.dot_dimension_numbers<[1], [0], [0], [1], [0, 0, 1, 1], [], []>} : vector<8x256xbf16>, vector<256x1024xbf16>, vector<8x1024xf32> -> vector<8x1024xf32>
    %97 = arith.addf %92, %96 : vector<8x1024xf32>
    %98 = vector.extract_strided_slice %97 {offsets = [0, 0], sizes = [8, 256], strides = [1, 1]} : vector<8x1024xf32> to vector<8x256xf32>
    %cst_50 = arith.constant 5.000000e-01 : f32
    %99 = vector.broadcast %cst_50 : f32 to vector<8x256xf32>
    %100 = arith.mulf %99, %98 : vector<8x256xf32>
    %101 = math.tanh %100 : vector<8x256xf32>
    %cst_51 = arith.constant 5.000000e-01 : f32
    %102 = vector.broadcast %cst_51 : f32 to vector<8x256xf32>
    %103 = arith.mulf %102, %101 : vector<8x256xf32>
    %cst_52 = arith.constant 5.000000e-01 : f32
    %104 = vector.broadcast %cst_52 : f32 to vector<8x256xf32>
    %105 = arith.addf %103, %104 : vector<8x256xf32>
    %106 = vector.extract_strided_slice %97 {offsets = [0, 256], sizes = [8, 256], strides = [1, 1]} : vector<8x1024xf32> to vector<8x256xf32>
    %cst_53 = arith.constant 5.000000e-01 : f32
    %107 = vector.broadcast %cst_53 : f32 to vector<8x256xf32>
    %108 = arith.mulf %107, %106 : vector<8x256xf32>
    %109 = math.tanh %108 : vector<8x256xf32>
    %cst_54 = arith.constant 5.000000e-01 : f32
    %110 = vector.broadcast %cst_54 : f32 to vector<8x256xf32>
    %111 = arith.mulf %110, %109 : vector<8x256xf32>
    %cst_55 = arith.constant 5.000000e-01 : f32
    %112 = vector.broadcast %cst_55 : f32 to vector<8x256xf32>
    %113 = arith.addf %111, %112 : vector<8x256xf32>
    %114 = vector.extract_strided_slice %97 {offsets = [0, 512], sizes = [8, 256], strides = [1, 1]} : vector<8x1024xf32> to vector<8x256xf32>
    %115 = math.tanh %114 : vector<8x256xf32>
    %116 = vector.extract_strided_slice %97 {offsets = [0, 768], sizes = [8, 256], strides = [1, 1]} : vector<8x1024xf32> to vector<8x256xf32>
    %cst_56 = arith.constant 5.000000e-01 : f32
    %117 = vector.broadcast %cst_56 : f32 to vector<8x256xf32>
    %118 = arith.mulf %117, %116 : vector<8x256xf32>
    %119 = math.tanh %118 : vector<8x256xf32>
    %cst_57 = arith.constant 5.000000e-01 : f32
    %120 = vector.broadcast %cst_57 : f32 to vector<8x256xf32>
    %121 = arith.mulf %120, %119 : vector<8x256xf32>
    %cst_58 = arith.constant 5.000000e-01 : f32
    %122 = vector.broadcast %cst_58 : f32 to vector<8x256xf32>
    %123 = arith.addf %121, %122 : vector<8x256xf32>
    %124 = arith.mulf %113, %87 : vector<8x256xf32>
    %125 = arith.mulf %105, %115 : vector<8x256xf32>
    %126 = arith.addf %124, %125 : vector<8x256xf32>
    %127 = math.tanh %126 : vector<8x256xf32>
    %128 = arith.mulf %123, %127 : vector<8x256xf32>
    %129 = arith.truncf %128 : vector<8x256xf32> to vector<8x256xbf16>
    %c16_59 = arith.constant 16 : index
    %c0_60 = arith.constant 0 : index
    %130 = vector.load %arg9[%c16_59, %c0_60] : memref<64x256xbf16, #tpu.memory_space<vmem>>, vector<8x256xbf16>
    tpu.vector_store %arg9[%c16_59, %c0_60], %129 {strides = array<i32>} : memref<64x256xbf16, #tpu.memory_space<vmem>>, vector<8x256xbf16>,
    %c24 = arith.constant 24 : index
    %c0_61 = arith.constant 0 : index
    %131 = vector.load %arg8[%c24, %c0_61] : memref<64x1024xf32, #tpu.memory_space<vmem>>, vector<8x1024xf32>
    %132 = arith.truncf %128 : vector<8x256xf32> to vector<8x256xbf16>
    %c0_62 = arith.constant 0 : index
    %c0_63 = arith.constant 0 : index
    %c0_64 = arith.constant 0 : index
    %133 = vector.load %arg3[%c0_62, %c0_63, %c0_64] : memref<1x256x1024xbf16, #tpu.memory_space<vmem>>, vector<1x256x1024xbf16>
    %134 = vector.shape_cast %133 : vector<1x256x1024xbf16> to vector<256x1024xbf16>
    %cst_65 = arith.constant dense<0.000000e+00> : vector<8x1024xf32>
    %135 = tpu.matmul %132, %134, %cst_65 {dimension_numbers = #tpu.dot_dimension_numbers<[1], [0], [0], [1], [0, 0, 1, 1], [], []>} : vector<8x256xbf16>, vector<256x1024xbf16>, vector<8x1024xf32> -> vector<8x1024xf32>
    %136 = arith.addf %131, %135 : vector<8x1024xf32>
    %137 = vector.extract_strided_slice %136 {offsets = [0, 0], sizes = [8, 256], strides = [1, 1]} : vector<8x1024xf32> to vector<8x256xf32>
    %cst_66 = arith.constant 5.000000e-01 : f32
    %138 = vector.broadcast %cst_66 : f32 to vector<8x256xf32>
    %139 = arith.mulf %138, %137 : vector<8x256xf32>
    %140 = math.tanh %139 : vector<8x256xf32>
    %cst_67 = arith.constant 5.000000e-01 : f32
    %141 = vector.broadcast %cst_67 : f32 to vector<8x256xf32>
    %142 = arith.mulf %141, %140 : vector<8x256xf32>
    %cst_68 = arith.constant 5.000000e-01 : f32
    %143 = vector.broadcast %cst_68 : f32 to vector<8x256xf32>
    %144 = arith.addf %142, %143 : vector<8x256xf32>
    %145 = vector.extract_strided_slice %136 {offsets = [0, 256], sizes = [8, 256], strides = [1, 1]} : vector<8x1024xf32> to vector<8x256xf32>
    %cst_69 = arith.constant 5.000000e-01 : f32
    %146 = vector.broadcast %cst_69 : f32 to vector<8x256xf32>
    %147 = arith.mulf %146, %145 : vector<8x256xf32>
    %148 = math.tanh %147 : vector<8x256xf32>
    %cst_70 = arith.constant 5.000000e-01 : f32
    %149 = vector.broadcast %cst_70 : f32 to vector<8x256xf32>
    %150 = arith.mulf %149, %148 : vector<8x256xf32>
    %cst_71 = arith.constant 5.000000e-01 : f32
    %151 = vector.broadcast %cst_71 : f32 to vector<8x256xf32>
    %152 = arith.addf %150, %151 : vector<8x256xf32>
    %153 = vector.extract_strided_slice %136 {offsets = [0, 512], sizes = [8, 256], strides = [1, 1]} : vector<8x1024xf32> to vector<8x256xf32>
    %154 = math.tanh %153 : vector<8x256xf32>
    %155 = vector.extract_strided_slice %136 {offsets = [0, 768], sizes = [8, 256], strides = [1, 1]} : vector<8x1024xf32> to vector<8x256xf32>
    %cst_72 = arith.constant 5.000000e-01 : f32
    %156 = vector.broadcast %cst_72 : f32 to vector<8x256xf32>
    %157 = arith.mulf %156, %155 : vector<8x256xf32>
    %158 = math.tanh %157 : vector<8x256xf32>
    %cst_73 = arith.constant 5.000000e-01 : f32
    %159 = vector.broadcast %cst_73 : f32 to vector<8x256xf32>
    %160 = arith.mulf %159, %158 : vector<8x256xf32>
    %cst_74 = arith.constant 5.000000e-01 : f32
    %161 = vector.broadcast %cst_74 : f32 to vector<8x256xf32>
    %162 = arith.addf %160, %161 : vector<8x256xf32>
    %163 = arith.mulf %152, %126 : vector<8x256xf32>
    %164 = arith.mulf %144, %154 : vector<8x256xf32>
    %165 = arith.addf %163, %164 : vector<8x256xf32>
    %166 = math.tanh %165 : vector<8x256xf32>
    %167 = arith.mulf %162, %166 : vector<8x256xf32>
    %168 = arith.truncf %167 : vector<8x256xf32> to vector<8x256xbf16>
    %c24_75 = arith.constant 24 : index
    %c0_76 = arith.constant 0 : index
    %169 = vector.load %arg9[%c24_75, %c0_76] : memref<64x256xbf16, #tpu.memory_space<vmem>>, vector<8x256xbf16>
    tpu.vector_store %arg9[%c24_75, %c0_76], %168 {strides = array<i32>} : memref<64x256xbf16, #tpu.memory_space<vmem>>, vector<8x256xbf16>,
    %c32 = arith.constant 32 : index
    %c0_77 = arith.constant 0 : index
    %170 = vector.load %arg8[%c32, %c0_77] : memref<64x1024xf32, #tpu.memory_space<vmem>>, vector<8x1024xf32>
    %171 = arith.truncf %167 : vector<8x256xf32> to vector<8x256xbf16>
    %c0_78 = arith.constant 0 : index
    %c0_79 = arith.constant 0 : index
    %c0_80 = arith.constant 0 : index
    %172 = vector.load %arg3[%c0_78, %c0_79, %c0_80] : memref<1x256x1024xbf16, #tpu.memory_space<vmem>>, vector<1x256x1024xbf16>
    %173 = vector.shape_cast %172 : vector<1x256x1024xbf16> to vector<256x1024xbf16>
    %cst_81 = arith.constant dense<0.000000e+00> : vector<8x1024xf32>
    %174 = tpu.matmul %171, %173, %cst_81 {dimension_numbers = #tpu.dot_dimension_numbers<[1], [0], [0], [1], [0, 0, 1, 1], [], []>} : vector<8x256xbf16>, vector<256x1024xbf16>, vector<8x1024xf32> -> vector<8x1024xf32>
    %175 = arith.addf %170, %174 : vector<8x1024xf32>
    %176 = vector.extract_strided_slice %175 {offsets = [0, 0], sizes = [8, 256], strides = [1, 1]} : vector<8x1024xf32> to vector<8x256xf32>
    %cst_82 = arith.constant 5.000000e-01 : f32
    %177 = vector.broadcast %cst_82 : f32 to vector<8x256xf32>
    %178 = arith.mulf %177, %176 : vector<8x256xf32>
    %179 = math.tanh %178 : vector<8x256xf32>
    %cst_83 = arith.constant 5.000000e-01 : f32
    %180 = vector.broadcast %cst_83 : f32 to vector<8x256xf32>
    %181 = arith.mulf %180, %179 : vector<8x256xf32>
    %cst_84 = arith.constant 5.000000e-01 : f32
    %182 = vector.broadcast %cst_84 : f32 to vector<8x256xf32>
    %183 = arith.addf %181, %182 : vector<8x256xf32>
    %184 = vector.extract_strided_slice %175 {offsets = [0, 256], sizes = [8, 256], strides = [1, 1]} : vector<8x1024xf32> to vector<8x256xf32>
    %cst_85 = arith.constant 5.000000e-01 : f32
    %185 = vector.broadcast %cst_85 : f32 to vector<8x256xf32>
    %186 = arith.mulf %185, %184 : vector<8x256xf32>
    %187 = math.tanh %186 : vector<8x256xf32>
    %cst_86 = arith.constant 5.000000e-01 : f32
    %188 = vector.broadcast %cst_86 : f32 to vector<8x256xf32>
    %189 = arith.mulf %188, %187 : vector<8x256xf32>
    %cst_87 = arith.constant 5.000000e-01 : f32
    %190 = vector.broadcast %cst_87 : f32 to vector<8x256xf32>
    %191 = arith.addf %189, %190 : vector<8x256xf32>
    %192 = vector.extract_strided_slice %175 {offsets = [0, 512], sizes = [8, 256], strides = [1, 1]} : vector<8x1024xf32> to vector<8x256xf32>
    %193 = math.tanh %192 : vector<8x256xf32>
    %194 = vector.extract_strided_slice %175 {offsets = [0, 768], sizes = [8, 256], strides = [1, 1]} : vector<8x1024xf32> to vector<8x256xf32>
    %cst_88 = arith.constant 5.000000e-01 : f32
    %195 = vector.broadcast %cst_88 : f32 to vector<8x256xf32>
    %196 = arith.mulf %195, %194 : vector<8x256xf32>
    %197 = math.tanh %196 : vector<8x256xf32>
    %cst_89 = arith.constant 5.000000e-01 : f32
    %198 = vector.broadcast %cst_89 : f32 to vector<8x256xf32>
    %199 = arith.mulf %198, %197 : vector<8x256xf32>
    %cst_90 = arith.constant 5.000000e-01 : f32
    %200 = vector.broadcast %cst_90 : f32 to vector<8x256xf32>
    %201 = arith.addf %199, %200 : vector<8x256xf32>
    %202 = arith.mulf %191, %165 : vector<8x256xf32>
    %203 = arith.mulf %183, %193 : vector<8x256xf32>
    %204 = arith.addf %202, %203 : vector<8x256xf32>
    %205 = math.tanh %204 : vector<8x256xf32>
    %206 = arith.mulf %201, %205 : vector<8x256xf32>
    %207 = arith.truncf %206 : vector<8x256xf32> to vector<8x256xbf16>
    %c32_91 = arith.constant 32 : index
    %c0_92 = arith.constant 0 : index
    %208 = vector.load %arg9[%c32_91, %c0_92] : memref<64x256xbf16, #tpu.memory_space<vmem>>, vector<8x256xbf16>
    tpu.vector_store %arg9[%c32_91, %c0_92], %207 {strides = array<i32>} : memref<64x256xbf16, #tpu.memory_space<vmem>>, vector<8x256xbf16>,
    %c40 = arith.constant 40 : index
    %c0_93 = arith.constant 0 : index
    %209 = vector.load %arg8[%c40, %c0_93] : memref<64x1024xf32, #tpu.memory_space<vmem>>, vector<8x1024xf32>
    %210 = arith.truncf %206 : vector<8x256xf32> to vector<8x256xbf16>
    %c0_94 = arith.constant 0 : index
    %c0_95 = arith.constant 0 : index
    %c0_96 = arith.constant 0 : index
    %211 = vector.load %arg3[%c0_94, %c0_95, %c0_96] : memref<1x256x1024xbf16, #tpu.memory_space<vmem>>, vector<1x256x1024xbf16>
    %212 = vector.shape_cast %211 : vector<1x256x1024xbf16> to vector<256x1024xbf16>
    %cst_97 = arith.constant dense<0.000000e+00> : vector<8x1024xf32>
    %213 = tpu.matmul %210, %212, %cst_97 {dimension_numbers = #tpu.dot_dimension_numbers<[1], [0], [0], [1], [0, 0, 1, 1], [], []>} : vector<8x256xbf16>, vector<256x1024xbf16>, vector<8x1024xf32> -> vector<8x1024xf32>
    %214 = arith.addf %209, %213 : vector<8x1024xf32>
    %215 = vector.extract_strided_slice %214 {offsets = [0, 0], sizes = [8, 256], strides = [1, 1]} : vector<8x1024xf32> to vector<8x256xf32>
    %cst_98 = arith.constant 5.000000e-01 : f32
    %216 = vector.broadcast %cst_98 : f32 to vector<8x256xf32>
    %217 = arith.mulf %216, %215 : vector<8x256xf32>
    %218 = math.tanh %217 : vector<8x256xf32>
    %cst_99 = arith.constant 5.000000e-01 : f32
    %219 = vector.broadcast %cst_99 : f32 to vector<8x256xf32>
    %220 = arith.mulf %219, %218 : vector<8x256xf32>
    %cst_100 = arith.constant 5.000000e-01 : f32
    %221 = vector.broadcast %cst_100 : f32 to vector<8x256xf32>
    %222 = arith.addf %220, %221 : vector<8x256xf32>
    %223 = vector.extract_strided_slice %214 {offsets = [0, 256], sizes = [8, 256], strides = [1, 1]} : vector<8x1024xf32> to vector<8x256xf32>
    %cst_101 = arith.constant 5.000000e-01 : f32
    %224 = vector.broadcast %cst_101 : f32 to vector<8x256xf32>
    %225 = arith.mulf %224, %223 : vector<8x256xf32>
    %226 = math.tanh %225 : vector<8x256xf32>
    %cst_102 = arith.constant 5.000000e-01 : f32
    %227 = vector.broadcast %cst_102 : f32 to vector<8x256xf32>
    %228 = arith.mulf %227, %226 : vector<8x256xf32>
    %cst_103 = arith.constant 5.000000e-01 : f32
    %229 = vector.broadcast %cst_103 : f32 to vector<8x256xf32>
    %230 = arith.addf %228, %229 : vector<8x256xf32>
    %231 = vector.extract_strided_slice %214 {offsets = [0, 512], sizes = [8, 256], strides = [1, 1]} : vector<8x1024xf32> to vector<8x256xf32>
    %232 = math.tanh %231 : vector<8x256xf32>
    %233 = vector.extract_strided_slice %214 {offsets = [0, 768], sizes = [8, 256], strides = [1, 1]} : vector<8x1024xf32> to vector<8x256xf32>
    %cst_104 = arith.constant 5.000000e-01 : f32
    %234 = vector.broadcast %cst_104 : f32 to vector<8x256xf32>
    %235 = arith.mulf %234, %233 : vector<8x256xf32>
    %236 = math.tanh %235 : vector<8x256xf32>
    %cst_105 = arith.constant 5.000000e-01 : f32
    %237 = vector.broadcast %cst_105 : f32 to vector<8x256xf32>
    %238 = arith.mulf %237, %236 : vector<8x256xf32>
    %cst_106 = arith.constant 5.000000e-01 : f32
    %239 = vector.broadcast %cst_106 : f32 to vector<8x256xf32>
    %240 = arith.addf %238, %239 : vector<8x256xf32>
    %241 = arith.mulf %230, %204 : vector<8x256xf32>
    %242 = arith.mulf %222, %232 : vector<8x256xf32>
    %243 = arith.addf %241, %242 : vector<8x256xf32>
    %244 = math.tanh %243 : vector<8x256xf32>
    %245 = arith.mulf %240, %244 : vector<8x256xf32>
    %246 = arith.truncf %245 : vector<8x256xf32> to vector<8x256xbf16>
    %c40_107 = arith.constant 40 : index
    %c0_108 = arith.constant 0 : index
    %247 = vector.load %arg9[%c40_107, %c0_108] : memref<64x256xbf16, #tpu.memory_space<vmem>>, vector<8x256xbf16>
    tpu.vector_store %arg9[%c40_107, %c0_108], %246 {strides = array<i32>} : memref<64x256xbf16, #tpu.memory_space<vmem>>, vector<8x256xbf16>,
    %c48 = arith.constant 48 : index
    %c0_109 = arith.constant 0 : index
    %248 = vector.load %arg8[%c48, %c0_109] : memref<64x1024xf32, #tpu.memory_space<vmem>>, vector<8x1024xf32>
    %249 = arith.truncf %245 : vector<8x256xf32> to vector<8x256xbf16>
    %c0_110 = arith.constant 0 : index
    %c0_111 = arith.constant 0 : index
    %c0_112 = arith.constant 0 : index
    %250 = vector.load %arg3[%c0_110, %c0_111, %c0_112] : memref<1x256x1024xbf16, #tpu.memory_space<vmem>>, vector<1x256x1024xbf16>
    %251 = vector.shape_cast %250 : vector<1x256x1024xbf16> to vector<256x1024xbf16>
    %cst_113 = arith.constant dense<0.000000e+00> : vector<8x1024xf32>
    %252 = tpu.matmul %249, %251, %cst_113 {dimension_numbers = #tpu.dot_dimension_numbers<[1], [0], [0], [1], [0, 0, 1, 1], [], []>} : vector<8x256xbf16>, vector<256x1024xbf16>, vector<8x1024xf32> -> vector<8x1024xf32>
    %253 = arith.addf %248, %252 : vector<8x1024xf32>
    %254 = vector.extract_strided_slice %253 {offsets = [0, 0], sizes = [8, 256], strides = [1, 1]} : vector<8x1024xf32> to vector<8x256xf32>
    %cst_114 = arith.constant 5.000000e-01 : f32
    %255 = vector.broadcast %cst_114 : f32 to vector<8x256xf32>
    %256 = arith.mulf %255, %254 : vector<8x256xf32>
    %257 = math.tanh %256 : vector<8x256xf32>
    %cst_115 = arith.constant 5.000000e-01 : f32
    %258 = vector.broadcast %cst_115 : f32 to vector<8x256xf32>
    %259 = arith.mulf %258, %257 : vector<8x256xf32>
    %cst_116 = arith.constant 5.000000e-01 : f32
    %260 = vector.broadcast %cst_116 : f32 to vector<8x256xf32>
    %261 = arith.addf %259, %260 : vector<8x256xf32>
    %262 = vector.extract_strided_slice %253 {offsets = [0, 256], sizes = [8, 256], strides = [1, 1]} : vector<8x1024xf32> to vector<8x256xf32>
    %cst_117 = arith.constant 5.000000e-01 : f32
    %263 = vector.broadcast %cst_117 : f32 to vector<8x256xf32>
    %264 = arith.mulf %263, %262 : vector<8x256xf32>
    %265 = math.tanh %264 : vector<8x256xf32>
    %cst_118 = arith.constant 5.000000e-01 : f32
    %266 = vector.broadcast %cst_118 : f32 to vector<8x256xf32>
    %267 = arith.mulf %266, %265 : vector<8x256xf32>
    %cst_119 = arith.constant 5.000000e-01 : f32
    %268 = vector.broadcast %cst_119 : f32 to vector<8x256xf32>
    %269 = arith.addf %267, %268 : vector<8x256xf32>
    %270 = vector.extract_strided_slice %253 {offsets = [0, 512], sizes = [8, 256], strides = [1, 1]} : vector<8x1024xf32> to vector<8x256xf32>
    %271 = math.tanh %270 : vector<8x256xf32>
    %272 = vector.extract_strided_slice %253 {offsets = [0, 768], sizes = [8, 256], strides = [1, 1]} : vector<8x1024xf32> to vector<8x256xf32>
    %cst_120 = arith.constant 5.000000e-01 : f32
    %273 = vector.broadcast %cst_120 : f32 to vector<8x256xf32>
    %274 = arith.mulf %273, %272 : vector<8x256xf32>
    %275 = math.tanh %274 : vector<8x256xf32>
    %cst_121 = arith.constant 5.000000e-01 : f32
    %276 = vector.broadcast %cst_121 : f32 to vector<8x256xf32>
    %277 = arith.mulf %276, %275 : vector<8x256xf32>
    %cst_122 = arith.constant 5.000000e-01 : f32
    %278 = vector.broadcast %cst_122 : f32 to vector<8x256xf32>
    %279 = arith.addf %277, %278 : vector<8x256xf32>
    %280 = arith.mulf %269, %243 : vector<8x256xf32>
    %281 = arith.mulf %261, %271 : vector<8x256xf32>
    %282 = arith.addf %280, %281 : vector<8x256xf32>
    %283 = math.tanh %282 : vector<8x256xf32>
    %284 = arith.mulf %279, %283 : vector<8x256xf32>
    %285 = arith.truncf %284 : vector<8x256xf32> to vector<8x256xbf16>
    %c48_123 = arith.constant 48 : index
    %c0_124 = arith.constant 0 : index
    %286 = vector.load %arg9[%c48_123, %c0_124] : memref<64x256xbf16, #tpu.memory_space<vmem>>, vector<8x256xbf16>
    tpu.vector_store %arg9[%c48_123, %c0_124], %285 {strides = array<i32>} : memref<64x256xbf16, #tpu.memory_space<vmem>>, vector<8x256xbf16>,
    %c56 = arith.constant 56 : index
    %c0_125 = arith.constant 0 : index
    %287 = vector.load %arg8[%c56, %c0_125] : memref<64x1024xf32, #tpu.memory_space<vmem>>, vector<8x1024xf32>
    %288 = arith.truncf %284 : vector<8x256xf32> to vector<8x256xbf16>
    %c0_126 = arith.constant 0 : index
    %c0_127 = arith.constant 0 : index
    %c0_128 = arith.constant 0 : index
    %289 = vector.load %arg3[%c0_126, %c0_127, %c0_128] : memref<1x256x1024xbf16, #tpu.memory_space<vmem>>, vector<1x256x1024xbf16>
    %290 = vector.shape_cast %289 : vector<1x256x1024xbf16> to vector<256x1024xbf16>
    %cst_129 = arith.constant dense<0.000000e+00> : vector<8x1024xf32>
    %291 = tpu.matmul %288, %290, %cst_129 {dimension_numbers = #tpu.dot_dimension_numbers<[1], [0], [0], [1], [0, 0, 1, 1], [], []>} : vector<8x256xbf16>, vector<256x1024xbf16>, vector<8x1024xf32> -> vector<8x1024xf32>
    %292 = arith.addf %287, %291 : vector<8x1024xf32>
    %293 = vector.extract_strided_slice %292 {offsets = [0, 0], sizes = [8, 256], strides = [1, 1]} : vector<8x1024xf32> to vector<8x256xf32>
    %cst_130 = arith.constant 5.000000e-01 : f32
    %294 = vector.broadcast %cst_130 : f32 to vector<8x256xf32>
    %295 = arith.mulf %294, %293 : vector<8x256xf32>
    %296 = math.tanh %295 : vector<8x256xf32>
    %cst_131 = arith.constant 5.000000e-01 : f32
    %297 = vector.broadcast %cst_131 : f32 to vector<8x256xf32>
    %298 = arith.mulf %297, %296 : vector<8x256xf32>
    %cst_132 = arith.constant 5.000000e-01 : f32
    %299 = vector.broadcast %cst_132 : f32 to vector<8x256xf32>
    %300 = arith.addf %298, %299 : vector<8x256xf32>
    %301 = vector.extract_strided_slice %292 {offsets = [0, 256], sizes = [8, 256], strides = [1, 1]} : vector<8x1024xf32> to vector<8x256xf32>
    %cst_133 = arith.constant 5.000000e-01 : f32
    %302 = vector.broadcast %cst_133 : f32 to vector<8x256xf32>
    %303 = arith.mulf %302, %301 : vector<8x256xf32>
    %304 = math.tanh %303 : vector<8x256xf32>
    %cst_134 = arith.constant 5.000000e-01 : f32
    %305 = vector.broadcast %cst_134 : f32 to vector<8x256xf32>
    %306 = arith.mulf %305, %304 : vector<8x256xf32>
    %cst_135 = arith.constant 5.000000e-01 : f32
    %307 = vector.broadcast %cst_135 : f32 to vector<8x256xf32>
    %308 = arith.addf %306, %307 : vector<8x256xf32>
    %309 = vector.extract_strided_slice %292 {offsets = [0, 512], sizes = [8, 256], strides = [1, 1]} : vector<8x1024xf32> to vector<8x256xf32>
    %310 = math.tanh %309 : vector<8x256xf32>
    %311 = vector.extract_strided_slice %292 {offsets = [0, 768], sizes = [8, 256], strides = [1, 1]} : vector<8x1024xf32> to vector<8x256xf32>
    %cst_136 = arith.constant 5.000000e-01 : f32
    %312 = vector.broadcast %cst_136 : f32 to vector<8x256xf32>
    %313 = arith.mulf %312, %311 : vector<8x256xf32>
    %314 = math.tanh %313 : vector<8x256xf32>
    %cst_137 = arith.constant 5.000000e-01 : f32
    %315 = vector.broadcast %cst_137 : f32 to vector<8x256xf32>
    %316 = arith.mulf %315, %314 : vector<8x256xf32>
    %cst_138 = arith.constant 5.000000e-01 : f32
    %317 = vector.broadcast %cst_138 : f32 to vector<8x256xf32>
    %318 = arith.addf %316, %317 : vector<8x256xf32>
    %319 = arith.mulf %308, %282 : vector<8x256xf32>
    %320 = arith.mulf %300, %310 : vector<8x256xf32>
    %321 = arith.addf %319, %320 : vector<8x256xf32>
    %322 = math.tanh %321 : vector<8x256xf32>
    %323 = arith.mulf %318, %322 : vector<8x256xf32>
    %324 = arith.truncf %323 : vector<8x256xf32> to vector<8x256xbf16>
    %c56_139 = arith.constant 56 : index
    %c0_140 = arith.constant 0 : index
    %325 = vector.load %arg9[%c56_139, %c0_140] : memref<64x256xbf16, #tpu.memory_space<vmem>>, vector<8x256xbf16>
    tpu.vector_store %arg9[%c56_139, %c0_140], %324 {strides = array<i32>} : memref<64x256xbf16, #tpu.memory_space<vmem>>, vector<8x256xbf16>,
    %c2_i32 = arith.constant 2 : i32
    %326 = arith.cmpi eq, %arg0, %c2_i32 : i32
    %327 = arith.extui %326 : i1 to i32
    %c0_i32_141 = arith.constant 0 : i32
    %328 = arith.cmpi ne, %327, %c0_i32_141 : i32
    scf.if %328 {
      %c56_142 = arith.constant 56 : index
      %c0_143 = arith.constant 0 : index
      %329 = vector.load %arg9[%c56_142, %c0_143] : memref<64x256xbf16, #tpu.memory_space<vmem>>, vector<8x256xbf16>
      %c0_144 = arith.constant 0 : index
      %c0_145 = arith.constant 0 : index
      %330 = vector.load %arg5[%c0_144, %c0_145] : memref<256x128xbf16, #tpu.memory_space<vmem>>, vector<256x128xbf16>
      %cst_146 = arith.constant dense<0.000000e+00> : vector<8x128xf32>
      %331 = tpu.matmul %329, %330, %cst_146 {dimension_numbers = #tpu.dot_dimension_numbers<[1], [0], [0], [1], [0, 0, 1, 1], [], []>} : vector<8x256xbf16>, vector<256x128xbf16>, vector<8x128xf32> -> vector<8x128xf32>
      %c0_147 = arith.constant 0 : index
      %c0_148 = arith.constant 0 : index
      %332 = vector.load %arg6[%c0_147, %c0_148] : memref<1x128xf32, #tpu.memory_space<vmem>>, vector<1x128xf32>
      %333 = vector.broadcast %332 : vector<1x128xf32> to vector<8x128xf32>
      %334 = arith.addf %331, %333 : vector<8x128xf32>
      %c0_149 = arith.constant 0 : index
      %c0_150 = arith.constant 0 : index
      %335 = vector.load %arg7[%c0_149, %c0_150] : memref<8x128xf32, #tpu.memory_space<vmem>>, vector<8x128xf32>
      tpu.vector_store %arg7[%c0_149, %c0_150], %334 {strides = array<i32>} : memref<8x128xf32, #tpu.memory_space<vmem>>, vector<8x128xf32>,
    } else {
    }
    return
  }
  func.func @transform_0(%arg0: i32) -> (i32, i32) {
    %c0_i32 = arith.constant 0 : i32
    %c0_i32_0 = arith.constant 0 : i32
    %c0_i32_1 = arith.constant 0 : i32
    return %c0_i32, %c0_i32_0 : i32, i32
  }
  func.func @transform_1(%arg0: i32) -> (i32, i32, i32) {
    %c0_i32 = arith.constant 0 : i32
    %c0_i32_0 = arith.constant 0 : i32
    %c0_i32_1 = arith.constant 0 : i32
    return %arg0, %c0_i32, %c0_i32_0 : i32, i32, i32
  }
  func.func @transform_2(%arg0: i32) -> (i32, i32, i32) {
    %c0_i32 = arith.constant 0 : i32
    %c0_i32_0 = arith.constant 0 : i32
    %c0_i32_1 = arith.constant 0 : i32
    return %arg0, %c0_i32, %c0_i32_0 : i32, i32, i32
  }
  func.func @transform_3(%arg0: i32) -> (i32, i32, i32) {
    %c0_i32 = arith.constant 0 : i32
    %c0_i32_0 = arith.constant 0 : i32
    %c0_i32_1 = arith.constant 0 : i32
    return %arg0, %c0_i32, %c0_i32_0 : i32, i32, i32
  }
  func.func @transform_4(%arg0: i32) -> (i32, i32) {
    %c0_i32 = arith.constant 0 : i32
    %c0_i32_0 = arith.constant 0 : i32
    %c0_i32_1 = arith.constant 0 : i32
    return %c0_i32, %c0_i32_0 : i32, i32
  }
  func.func @transform_5(%arg0: i32) -> (i32, i32) {
    %c0_i32 = arith.constant 0 : i32
    %c0_i32_0 = arith.constant 0 : i32
    %c0_i32_1 = arith.constant 0 : i32
    return %c0_i32, %c0_i32_0 : i32, i32
  }
  func.func @transform_6(%arg0: i32) -> (i32, i32) {
    %c0_i32 = arith.constant 0 : i32
    %c0_i32_0 = arith.constant 0 : i32
    %c0_i32_1 = arith.constant 0 : i32
    return %c0_i32, %c0_i32_0 : i32, i32
  }
}

</mosaic_0001>

<bundles_post_ra>
// kernel: lstm_classifier_forward.1
= control target key start
LH: loop header
LB: loop body
LE: loop exit
PB: predicated region body
PF: predicated region fallthrough
CT: control target
= control target key end

     0   :  { %s19875_s0 = inlined_call_operand.vmem [shape: bf16[64,256], index: 0, kind: input, shape index: {}]   ;;  %s19876_s1 = inlined_call_operand.hbm [shape: bf16[3,256,1024], index: 1, kind: input, shape index: {}]   ;;  %s19877_s2 = inlined_call_operand.hbm [shape: bf16[3,256,1024], index: 2, kind: input, shape index: {}]   ;;  %s19878_s3 = inlined_call_operand.hbm [shape: f32[3,1,1024], index: 3, kind: input, shape index: {}]   ;;  %s19879_s4 = inlined_call_operand.hbm [shape: bf16[256,128], index: 4, kind: input, shape index: {}]   ;;  %s19880_s5 = inlined_call_operand.hbm [shape: f32[1,128], index: 5, kind: input, shape index: {}]   ;;  %s19881_s6 = inlined_call_operand.vmem [shape: f32[8,128], index: 6, kind: output, shape index: {}]  }
   0x1   :  { %19888 = sst [smem:[#allocation64_spill]] %s19877_s2 }
   0x2   :  { %19889 = sst [smem:[#allocation65_spill]] %s19879_s4 }
   0x3   :  { %11 = vsyncpa [#allocation5], 0 }
   0x4   :  { %13 = vsyncpa [#allocation5 + $0x1], 0 }
   0x5   :  { %14 = vsyncpa [#allocation7], 0 }
   0x6   :  { %16 = vsyncpa [#allocation7 + $0x1], 0 }
   0x7   :  { %17 = vsyncpa [#allocation10], 0  ;;  %s16690_s21 = smov 0   ;;  %s16692_s22 = smov 0  }
   0x8   :  { %s16694_s23 = smov 0   ;;  %s16696_s24 = smov 0  }
   0x9 LB: > { %19890 = sst [smem:[#allocation15_spill]] %s16642_s23  ;;  %s16709_s25 = sadd.s32 4294967295, %s16646_s24   ;;  %s16646_s24 = sphi %s16696_s24, %s19998_s24   ;;  %s16642_s23 = sphi %s16694_s23, %s19995_s23   ;;  %s16638_s22 = sphi %s16692_s22, %s19997_s22   ;;  %s16634_s21 = sphi %s16690_s21, %s19996_s21  }
   0xa   : > { %p64_p0 = scmp.ne.s32.totalorder %s16638_s22, %s16634_s21  ;;  %p65_p1 = scmp.eq.s32.totalorder %s16709_s25, 0 }
   0xb   : > { %p10313_p2 = scmp.ge.s32.totalorder %s16646_s24, 1  ;;  %p190_p3 = scmp.lt.s32.totalorder %s16646_s24, 4 }
   0xc   : > { %p10314_p4 = scmp.ne.s32.totalorder %s16709_s25, 0  ;;  %p16718_p5 = por %p65_p1, %p64_p0 }
   0xd   : > { %s19892_s4 = sld [smem:[#allocation65_spill]]  ;;  %p16725_p6 = pnand %p10313_p2, %p190_p3 }
   0xe   : > { %s16648_s7 = smov [#allocation9]   ;;  %s16738_s10 = sadd.s32 1, %s16646_s24  }
   0xf   : > { %p16231_p7 = pneg %p16725_p6  ;;  %s206_s8 = sshll.u32 %s16648_s7, 4  ;;  %s207_s8 = int_to_ptr.vmem [resolvable:$true] %s206_s8 }
  0x10   : > { %s16649_s11 = smov 64   ;;  %s16650_s12 = smov 4  }
  0x11   : > { %p16733_p8 = pnand %p16231_p7, %p65_p1  ;;  %s48_s13 = ssub.s32 %s16646_s24, %s16738_s10 }
  0x12   : > { %s51_s14 = sadd.s32 1, %s16642_s23  ;;  %p49_p9 = scmp.eq.s32.totalorder %s48_s13, 0 }
  0x13   : > { %s204_s29 = sshll.u32 %s19892_s4, 4  ;;  %p58_p10 = scmp.ne.s32.totalorder %s16642_s23, %s16638_s22  ;;  %s205_s29 = int_to_ptr.hbm [resolvable:$true] %s204_s29 }
  0x14   : > { %16234 = dma.hbm_to_vmem [thread:$0]  (!%p16733_p8), %s205_s29, 2048, %s207_s8, [#allocation10], %s16649_s11, %s16649_s11, %s16650_s12  }
  0x15   : > { %p59_p11 = scmp.eq.s32.totalorder %s16646_s24, 0  ;;  %p16250_p12 = scmp.lt.s32.totalorder %s16646_s24, 3 }
  0x16   : > { %s16750_s15 = scalar_select %p49_p9, %s16642_s23, %s51_s14  }
  0x17   : > { %p60_p13 = por %p59_p11, %p58_p10  ;;  %s16753_s16 = sand.u32 1, %s16642_s23  }
  0x18   : > { %19895 = sst [smem:[#allocation16_spill]] %s16750_s15  ;;  %s19882_s17 = sshll.u32 %s16753_s16, 10 }
  0x19   : > { %s15039_s18 = sshll.u32 %s16646_s24, 10  ;;  %p16757_p0 = pnand %p16250_p12, %p60_p13 }
  0x1a   : > { %s254_s20 = sand.u32 1, %s16646_s24   ;;  %s19897_s2 = sld [smem:[#allocation64_spill]] }
  0x1b   : > { %s258_s7 = scalar_lea.vmem [#allocation6], %s19882_s17  ;;  %s16769_s11 = scalar_lea.sflag [#allocation7], %s254_s20 }
  0x1c   : > { %s266_s8 = sshll.u32 %s258_s7, 4  ;;  %p16488_p3 = pneg %p16757_p0  ;;  %s267_s8 = int_to_ptr.vmem [resolvable:$true] %s266_s8 }
  0x20   : > { %s263_s28 = scalar_lea.hbm %s19897_s2, %s15039_s18  ;;  %s16491_s27 = scalar_lea.hbm %s19897_s2, 3072 }
  0x21   : > { %s264_s29 = sshll.u32 %s263_s28, 4  ;;  %s265_s29 = int_to_ptr.hbm [resolvable:$true] %s264_s29 }
  0x22   : > { %s16484_s12 = sshra.s32 %s265_s29, 4  ;;  %s16485_s12 = int_to_ptr.hbm [resolvable:$true] %s16484_s12 }
  0x23   : > { %s16486_s13 = scalar_lea.hbm %s16485_s12, 1024  ;;  %p16492_p10 = scmp.lt.s32.totalorder %s16485_s12, %s19897_s2 }
  0x24   : > { %p16487_p2 = scmp.ne.s32.totalorder %s16485_s12, %s16486_s13  ;;  %p16493_p11 = scmp.lt.s32.totalorder %s16491_s27, %s16486_s13 }
  0x26   : > { %p16489_p7 = pnand %p16488_p3, %p16487_p2  ;;  %p16494_p12 = por %p16493_p11, %p16492_p10 }
  0x28   : > { %p16490_p9 = pneg %p16489_p7 }
  0x2a   : > { %p16495_p13 = pnand %p16494_p12, %p16490_p9 }
  0x2c   : > { %16498 = shalt.err (!%p16495_p13)
}
  0x2d   : > { %s16651_s20 = smov 512   ;;  %s16652_s17 = smov 32  }
  0x2e   : > { %16244 = dma.hbm_to_vmem [thread:$0]  (!%p16757_p0), %s265_s29, 16384, %s267_s8, %s16769_s11, %s16651_s20, %s16651_s20, %s16652_s17  }
  0x2f   : > { %s219_s12 = sshll.u32 %s19880_s5, 4  ;;  %s16653_s13 = smov [#allocation11]   ;;  %s220_s12 = int_to_ptr.hbm [resolvable:$true] %s219_s12 }
  0x30   : > { %s221_s27 = sshll.u32 %s16653_s13, 4  ;;  %s241_s2 = scalar_lea.hbm %s19876_s1, %s15039_s18  ;;  %s222_s27 = int_to_ptr.vmem [resolvable:$true] %s221_s27 }
  0x31   : > { %16237 = dma.hbm_to_vmem [thread:$0]  (!%p16733_p8), %s220_s12, 16, %s222_s27, [#allocation10]  }
  0x32   : > { %s242_s4 = sshll.u32 %s241_s2, 4  ;;  %s19898_s15 = sshll.u32 %s16753_s16, 10  ;;  %s243_s4 = int_to_ptr.hbm [resolvable:$true] %s242_s4 }
  0x33   : > { %s236_s23 = scalar_lea.vmem [#allocation4], %s19898_s15  ;;  %s233_s8 = scalar_lea.sflag [#allocation5], %s16753_s16 }
  0x34   : > { %s244_s29 = sshll.u32 %s236_s23, 4  ;;  %s16544_s14 = sshra.s32 %s243_s4, 4  ;;  %s245_s29 = int_to_ptr.vmem [resolvable:$true] %s244_s29  ;;  %s16545_s14 = int_to_ptr.hbm [resolvable:$true] %s16544_s14 }
  0x35   : > { %s16546_s21 = scalar_lea.hbm %s16545_s14, 1024  ;;  %s16551_s13 = scalar_lea.hbm %s19876_s1, 3072 }
  0x36   : > { %p16547_p2 = scmp.ne.s32.totalorder %s16545_s14, %s16546_s21  ;;  %p16552_p9 = scmp.lt.s32.totalorder %s16545_s14, %s19876_s1 }
  0x37   : > { %p16553_p10 = scmp.lt.s32.totalorder %s16551_s13, %s16546_s21 }
  0x38   : > { %p16549_p7 = pnand %p16547_p2, %p16488_p3 }
  0x39   : > { %p16554_p11 = por %p16553_p10, %p16552_p9 }
  0x3a   : > { %p16550_p8 = pneg %p16549_p7 }
  0x3c   : > { %p16555_p12 = pnand %p16554_p11, %p16550_p8 }
  0x3e   : > { %16558 = shalt.err (!%p16555_p12)
}
  0x3f   : > { %16241 = dma.hbm_to_vmem [thread:$0]  (!%p16757_p0), %s243_s4, 16384, %s245_s29, %s233_s8, %s16651_s20, %s16651_s20, %s16652_s17  }
  0x40   : > { %s10323_s23 = sshll.u32 %s16753_s16, 3  ;;  %s10324_s15 = sshll.u32 %s16646_s24, 3 }
  0x41   : > { %s284_s7 = scalar_lea.hbm %s19878_s3, %s10324_s15  ;;  %s280_s21 = scalar_lea.vmem [#allocation8], %s10323_s23 }
  0x42   : > { %s286_s14 = sshll.u32 %s284_s7, 4  ;;  %s288_s9 = sshll.u32 %s280_s21, 4  ;;  %s287_s14 = int_to_ptr.hbm [resolvable:$true] %s286_s14  ;;  %s289_s9 = int_to_ptr.vmem [resolvable:$true] %s288_s9 }
  0x43   : > { %s16574_s12 = sshra.s32 %s287_s14, 4  ;;  %s16581_s24 = scalar_lea.hbm %s19878_s3, 24  ;;  %s16575_s12 = int_to_ptr.hbm [resolvable:$true] %s16574_s12 }
  0x44   : > { %s16576_s13 = scalar_lea.hbm %s16575_s12, 8  ;;  %p16582_p8 = scmp.lt.s32.totalorder %s16575_s12, %s19878_s3 }
  0x45   : > { %p16577_p13 = scmp.ne.s32.totalorder %s16575_s12, %s16576_s13  ;;  %p16583_p9 = scmp.lt.s32.totalorder %s16581_s24, %s16576_s13 }
  0x47   : > { %p16579_p2 = pnand %p16577_p13, %p16488_p3  ;;  %p16584_p10 = por %p16583_p9, %p16582_p8 }
  0x49   : > { %p16580_p7 = pneg %p16579_p2 }
  0x4b   : > { %p16585_p11 = pnand %p16584_p10, %p16580_p7 }
  0x4d   : > { %16588 = shalt.err (!%p16585_p11)
}
  0x4e   : > { %16247 = dma.hbm_to_vmem [thread:$0]  (!%p16757_p0), %s287_s14, 128, %s289_s9, %s16769_s11  }
  0x4f   : > { %297 = sbr.rel (%p16725_p6) target bundleno = 2347 (0x92b), region = 44 }
  0x54   : > { %s299_s29 = sand.u32 1, %s16638_s22  }
  0x55   : > { %s10326_s8 = sshll.u32 %s299_s29, 10  ;;  %s300_s18 = scalar_lea.sflag [#allocation5], %s299_s29 }
  0x56   : > { %s16835_s2 = scalar_lea.vmem [#allocation4], %s10326_s8 }
  0x57   : > { %16621 = dma.done.wait (%p16718_p5), %s300_s18, 16384  }
  0x58   : > { %16623 = vsyncadd (%p16718_p5), %s300_s18, 4294950912  ;;  %s309_s19 = sand.u32 1, %s16709_s25   ;;  %s16842_s11 = scalar_lea.vmem [#allocation6], %s10326_s8 }
  0x59   : > { %s310_s23 = scalar_lea.sflag [#allocation7], %s309_s19 }
  0x5a   : > { %16625 = dma.done.wait (%p16718_p5), %s310_s23, 16512  }
  0x5b   : > { %16627 = vsyncadd (%p16718_p5), %s310_s23, 4294950784  ;;  %s10328_s30 = sshll.u32 %s299_s29, 3 }
  0x5c   : > { %s16848_s15 = scalar_lea.vmem [#allocation8], %s10328_s30 }
  0x5d   : > { %16629 = dma.done.wait (%p65_p1), [#allocation10], 2064  }
  0x5e   : > { %16631 = vsyncadd (%p65_p1), [#allocation10], 4294965232  ;;  %372 = sbr.rel (%p10314_p4) target bundleno = 108 (0x6c), region = 68 }
  0x63   : > { %v373_v0 = vld [vmem:[%s19875_s0] sm:$0xff]  ;;  %v374_v1 = vld [vmem:[%s19875_s0 + $0x8] sm:$0xff]  ;;  %v375_v2 = vld [vmem:[%s19875_s0 + $0x10] sm:$0xff] }
  0x64   : > { %381 = vst [vmem:[#allocation3] sm:$0xff] %v373_v0  ;;  %v376_v3 = vld [vmem:[%s19875_s0 + $0x18] sm:$0xff]  ;;  %v377_v4 = vld [vmem:[%s19875_s0 + $0x20] sm:$0xff]  ;;  %v378_v5 = vld [vmem:[%s19875_s0 + $0x28] sm:$0xff] }
  0x65   : > { %382 = vst [vmem:[#allocation3 + $0x8] sm:$0xff] %v374_v1  ;;  %v379_v6 = vld [vmem:[%s19875_s0 + $0x30] sm:$0xff]  ;;  %v380_v7 = vld [vmem:[%s19875_s0 + $0x38] sm:$0xff] }
  0x66   : > { %383 = vst [vmem:[#allocation3 + $0x10] sm:$0xff] %v375_v2 }
  0x67   : > { %384 = vst [vmem:[#allocation3 + $0x18] sm:$0xff] %v376_v3 }
  0x68   : > { %385 = vst [vmem:[#allocation3 + $0x20] sm:$0xff] %v377_v4 }
  0x69   : > { %386 = vst [vmem:[#allocation3 + $0x28] sm:$0xff] %v378_v5 }
  0x6a   : > { %387 = vst [vmem:[#allocation3 + $0x30] sm:$0xff] %v379_v6 }
  0x6b   : > { %388 = vst [vmem:[#allocation3 + $0x38] sm:$0xff] %v380_v7 }
  0x6c PF: > { %v10590_v8 = vld [vmem:[%s16835_s2 + $0x1c0] sm:$0xf]  ;;  %v15105_v13 = vld [vmem:[%s16835_s2 + $0x1c4] sm:$0xf]  ;;  %p14972_p1 = scmp.ne.s32.totalorder %s16709_s25, 2 }
  0x6d   : > { %v15109_v9 = vld [vmem:[%s16835_s2 + $0x1dc] sm:$0xf0]  ;;  %v10592_v14 = vld [vmem:[%s16835_s2 + $0x1e0] sm:$0xf0] }
  0x6e   : > { %v10846_v10 = vld [vmem:[%s16835_s2 + $0x3c0] sm:$0xf]  ;;  %v10591_v11 = vor.u32 %v15109_v9, %v10590_v8  ;;  %v10595_v16 = vor.u32 %v15105_v13, %v10592_v14  ;;  %v15169_v17 = vld [vmem:[%s16835_s2 + $0x3c4] sm:$0xf] }
  0x6f   : > { %v15173_v12 = vld [vmem:[%s16835_s2 + $0x3dc] sm:$0xf0]  ;;  %v10848_v18 = vld [vmem:[%s16835_s2 + $0x3e0] sm:$0xf0] }
  0x70   : > { %v10847_v15 = vor.u32 %v15173_v12, %v10846_v10  ;;  %v10558_v19 = vld [vmem:[%s16835_s2 + $0x180] sm:$0xf]  ;;  %1223 = vmatpush.bf16.msra.mxu0 %v10591_v11  ;;  %v10851_v20 = vor.u32 %v15169_v17, %v10848_v18  ;;  %1281 = vmatpush.bf16.msra.mxu2 %v10595_v16  ;;  %v15097_v26 = vld [vmem:[%s16835_s2 + $0x184] sm:$0xf] }
  0x71   : > { %v15101_v21 = vld [vmem:[%s16835_s2 + $0x19c] sm:$0xf0]  ;;  %v10560_v27 = vld [vmem:[%s16835_s2 + $0x1a0] sm:$0xf0] }
  0x72   : > { %v10814_v22 = vld [vmem:[%s16835_s2 + $0x380] sm:$0xf]  ;;  %1252 = vmatpush.bf16.msra.mxu1 %v10847_v15  ;;  %v10559_v24 = vor.u32 %v15101_v21, %v10558_v19  ;;  %v15161_v28 = vld [vmem:[%s16835_s2 + $0x384] sm:$0xf]  ;;  %1310 = vmatpush.bf16.msra.mxu3 %v10851_v20  ;;  %v10563_v29 = vor.u32 %v15097_v26, %v10560_v27 }
  0x73   : > { %v15165_v23 = vld [vmem:[%s16835_s2 + $0x39c] sm:$0xf0]  ;;  %v10816_v30 = vld [vmem:[%s16835_s2 + $0x3a0] sm:$0xf0] }
  0x74   : > { %v10815_v25 = vor.u32 %v15165_v23, %v10814_v22  ;;  %v10526_v31 = vld [vmem:[%s16835_s2 + $0x140] sm:$0xf]  ;;  %v10819_v33 = vor.u32 %v15161_v28, %v10816_v30  ;;  %v15089_v36 = vld [vmem:[%s16835_s2 + $0x144] sm:$0xf]  ;;  %1224 = vmatpush.bf16.msra.mxu0 %v10559_v24  ;;  %1282 = vmatpush.bf16.msra.mxu2 %v10563_v29 }
  0x75   : > { %v15093_v32 = vld [vmem:[%s16835_s2 + $0x15c] sm:$0xf0]  ;;  %v10528_v38 = vld [vmem:[%s16835_s2 + $0x160] sm:$0xf0] }
  0x76   : > { %v10782_v34 = vld [vmem:[%s16835_s2 + $0x340] sm:$0xf]  ;;  %v10527_v37 = vor.u32 %v15093_v32, %v10526_v31  ;;  %v15153_v39 = vld [vmem:[%s16835_s2 + $0x344] sm:$0xf]  ;;  %1253 = vmatpush.bf16.msra.mxu1 %v10815_v25  ;;  %v10531_v42 = vor.u32 %v15089_v36, %v10528_v38  ;;  %1311 = vmatpush.bf16.msra.mxu3 %v10819_v33  ;;  %v15042_v38 = vld [vmem:[#allocation3 + $0x4] sm:$0xf0] }
  0x77   : > { %v15157_v35 = vld [vmem:[%s16835_s2 + $0x35c] sm:$0xf0]  ;;  %v10784_v40 = vld [vmem:[%s16835_s2 + $0x360] sm:$0xf0] }
  0x78   : > { %v10783_v41 = vor.u32 %v15157_v35, %v10782_v34  ;;  %v10494_v43 = vld [vmem:[%s16835_s2 + $0x100] sm:$0xf]  ;;  %v10787_v46 = vor.u32 %v15153_v39, %v10784_v40  ;;  %v15081_v48 = vld [vmem:[%s16835_s2 + $0x104] sm:$0xf]  ;;  %1225 = vmatpush.bf16.msra.mxu0 %v10527_v37  ;;  %1283 = vmatpush.bf16.msra.mxu2 %v10531_v42  ;;  %v10336_v42 = vld [vmem:[#allocation3 + $0x8] sm:$0xf0] }
  0x79   : > { %v15085_v44 = vld [vmem:[%s16835_s2 + $0x11c] sm:$0xf0]  ;;  %v10496_v49 = vld [vmem:[%s16835_s2 + $0x120] sm:$0xf0] }
  0x7a   : > { %v10750_v45 = vld [vmem:[%s16835_s2 + $0x300] sm:$0xf]  ;;  %v15145_v50 = vld [vmem:[%s16835_s2 + $0x304] sm:$0xf]  ;;  %v10495_v52 = vor.u32 %v15085_v44, %v10494_v43  ;;  %1254 = vmatpush.bf16.msra.mxu1 %v10783_v41  ;;  %v10499_v54 = vor.u32 %v15081_v48, %v10496_v49  ;;  %1312 = vmatpush.bf16.msra.mxu3 %v10787_v46  ;;  %v10598_v46 = vld [vmem:[%s16835_s2 + $0x1c8] sm:$0xf] }
  0x7b   : > { %v15149_v47 = vld [vmem:[%s16835_s2 + $0x31c] sm:$0xf0]  ;;  %v10752_v51 = vld [vmem:[%s16835_s2 + $0x320] sm:$0xf0]  ;;  %v10854_v48 = vld [vmem:[%s16835_s2 + $0x3c8] sm:$0xf] }
  0x7c   : > { %v10751_v53 = vor.u32 %v15149_v47, %v10750_v45  ;;  %v10462_v55 = vld [vmem:[%s16835_s2 + $0xc0] sm:$0xf]  ;;  %v10755_v58 = vor.u32 %v15145_v50, %v10752_v51  ;;  %v15073_v60 = vld [vmem:[%s16835_s2 + $0xc4] sm:$0xf]  ;;  %1226 = vmatpush.bf16.msra.mxu0 %v10495_v52  ;;  %1284 = vmatpush.bf16.msra.mxu2 %v10499_v54  ;;  %v15110_v47 = vld [vmem:[%s16835_s2 + $0x1e4] sm:$0xf0] }
  0x7d   : > { %v15077_v56 = vld [vmem:[%s16835_s2 + $0xdc] sm:$0xf0]  ;;  %v10464_v61 = vld [vmem:[%s16835_s2 + $0xe0] sm:$0xf0]  ;;  %v10599_v49 = vor.u32 %v15110_v47, %v10598_v46  ;;  %v15174_v50 = vld [vmem:[%s16835_s2 + $0x3e4] sm:$0xf0] }
  0x7e   : > { %v10718_v57 = vld [vmem:[%s16835_s2 + $0x2c0] sm:$0xf]  ;;  %v15137_v62 = vld [vmem:[%s16835_s2 + $0x2c4] sm:$0xf]  ;;  %v10463_v0 = vor.u32 %v15077_v56, %v10462_v55  ;;  %1255 = vmatpush.bf16.msra.mxu1 %v10751_v53  ;;  %v10467_v2 = vor.u32 %v15073_v60, %v10464_v61  ;;  %1313 = vmatpush.bf16.msra.mxu3 %v10755_v58  ;;  %v15106_v51 = vld [vmem:[%s16835_s2 + $0x1cc] sm:$0xf]  ;;  %v10855_v53 = vor.u32 %v15174_v50, %v10854_v48 }
  0x7f   : > { %v15141_v59 = vld [vmem:[%s16835_s2 + $0x2dc] sm:$0xf0]  ;;  %v10720_v63 = vld [vmem:[%s16835_s2 + $0x2e0] sm:$0xf0]  ;;  %v10600_v52 = vld [vmem:[%s16835_s2 + $0x1e8] sm:$0xf0] }
  0x80   : > { %v10719_v1 = vor.u32 %v15141_v59, %v10718_v57  ;;  %v10430_v3 = vld [vmem:[%s16835_s2 + $0x80] sm:$0xf]  ;;  %v10723_v6 = vor.u32 %v15137_v62, %v10720_v63  ;;  %v15065_v8 = vld [vmem:[%s16835_s2 + $0x84] sm:$0xf]  ;;  %1227 = vmatpush.bf16.msra.mxu0 %v10463_v0  ;;  %1285 = vmatpush.bf16.msra.mxu2 %v10467_v2  ;;  %v10603_v54 = vor.u32 %v15106_v51, %v10600_v52  ;;  %v15170_v55 = vld [vmem:[%s16835_s2 + $0x3cc] sm:$0xf] }
  0x81   : > { %v15069_v4 = vld [vmem:[%s16835_s2 + $0x9c] sm:$0xf0]  ;;  %v10432_v9 = vld [vmem:[%s16835_s2 + $0xa0] sm:$0xf0]  ;;  %v10856_v56 = vld [vmem:[%s16835_s2 + $0x3e8] sm:$0xf0] }
  0x82   : > { %v10686_v5 = vld [vmem:[%s16835_s2 + $0x280] sm:$0xf]  ;;  %v15129_v10 = vld [vmem:[%s16835_s2 + $0x284] sm:$0xf]  ;;  %v10431_v12 = vor.u32 %v15069_v4, %v10430_v3  ;;  %1256 = vmatpush.bf16.msra.mxu1 %v10719_v1  ;;  %v10435_v14 = vor.u32 %v15065_v8, %v10432_v9  ;;  %1314 = vmatpush.bf16.msra.mxu3 %v10723_v6  ;;  %v10566_v57 = vld [vmem:[%s16835_s2 + $0x188] sm:$0xf]  ;;  %v10859_v58 = vor.u32 %v15170_v55, %v10856_v56 }
  0x83   : > { %v15133_v7 = vld [vmem:[%s16835_s2 + $0x29c] sm:$0xf0]  ;;  %v10688_v11 = vld [vmem:[%s16835_s2 + $0x2a0] sm:$0xf0]  ;;  %v15102_v59 = vld [vmem:[%s16835_s2 + $0x1a4] sm:$0xf0] }
  0x84   : > { %v10687_v13 = vor.u32 %v15133_v7, %v10686_v5  ;;  %v10398_v15 = vld [vmem:[%s16835_s2 + $0x40] sm:$0xf]  ;;  %v10691_v18 = vor.u32 %v15129_v10, %v10688_v11  ;;  %v15057_v20 = vld [vmem:[%s16835_s2 + $0x44] sm:$0xf]  ;;  %1228 = vmatpush.bf16.msra.mxu0 %v10431_v12  ;;  %1286 = vmatpush.bf16.msra.mxu2 %v10435_v14  ;;  %v10822_v60 = vld [vmem:[%s16835_s2 + $0x388] sm:$0xf]  ;;  %v10567_v62 = vor.u32 %v15102_v59, %v10566_v57 }
  0x85   : > { %v15061_v16 = vld [vmem:[%s16835_s2 + $0x5c] sm:$0xf0]  ;;  %v10400_v21 = vld [vmem:[%s16835_s2 + $0x60] sm:$0xf0]  ;;  %v15166_v61 = vld [vmem:[%s16835_s2 + $0x3a4] sm:$0xf0] }
  0x86   : > { %v10654_v17 = vld [vmem:[%s16835_s2 + $0x240] sm:$0xf]  ;;  %v15121_v22 = vld [vmem:[%s16835_s2 + $0x244] sm:$0xf]  ;;  %v10399_v24 = vor.u32 %v15061_v16, %v10398_v15  ;;  %1257 = vmatpush.bf16.msra.mxu1 %v10687_v13  ;;  %v10403_v26 = vor.u32 %v15057_v20, %v10400_v21  ;;  %1315 = vmatpush.bf16.msra.mxu3 %v10691_v18  ;;  %v10823_v63 = vor.u32 %v15166_v61, %v10822_v60  ;;  %v15098_v0 = vld [vmem:[%s16835_s2 + $0x18c] sm:$0xf] }
  0x87   : > { %v15125_v19 = vld [vmem:[%s16835_s2 + $0x25c] sm:$0xf0]  ;;  %v10656_v23 = vld [vmem:[%s16835_s2 + $0x260] sm:$0xf0]  ;;  %v10568_v1 = vld [vmem:[%s16835_s2 + $0x1a8] sm:$0xf0] }
  0x88   : > { %v10655_v25 = vor.u32 %v15125_v19, %v10654_v17  ;;  %v10366_v27 = vld [vmem:[%s16835_s2] sm:$0xf]  ;;  %v10659_v30 = vor.u32 %v15121_v22, %v10656_v23  ;;  %v15049_v32 = vld [vmem:[%s16835_s2 + $0x4] sm:$0xf]  ;;  %1229 = vmatpush.bf16.msra.mxu0 %v10399_v24  ;;  %1287 = vmatpush.bf16.msra.mxu2 %v10403_v26  ;;  %v15162_v2 = vld [vmem:[%s16835_s2 + $0x38c] sm:$0xf]  ;;  %v10571_v3 = vor.u32 %v15098_v0, %v10568_v1 }
  0x89   : > { %v15053_v28 = vld [vmem:[%s16835_s2 + $0x1c] sm:$0xf0]  ;;  %v10368_v33 = vld [vmem:[%s16835_s2 + $0x20] sm:$0xf0]  ;;  %v10824_v4 = vld [vmem:[%s16835_s2 + $0x3a8] sm:$0xf0] }
  0x8a   : > { %v10622_v29 = vld [vmem:[%s16835_s2 + $0x200] sm:$0xf]  ;;  %v15113_v34 = vld [vmem:[%s16835_s2 + $0x204] sm:$0xf]  ;;  %v10367_v36 = vor.u32 %v15053_v28, %v10366_v27  ;;  %1258 = vmatpush.bf16.msra.mxu1 %v10655_v25  ;;  %v10371_v40 = vor.u32 %v15049_v32, %v10368_v33  ;;  %1316 = vmatpush.bf16.msra.mxu3 %v10659_v30  ;;  %v10534_v5 = vld [vmem:[%s16835_s2 + $0x148] sm:$0xf]  ;;  %v10827_v7 = vor.u32 %v15162_v2, %v10824_v4 }
  0x8b   : > { %v15117_v31 = vld [vmem:[%s16835_s2 + $0x21c] sm:$0xf0]  ;;  %v10624_v35 = vld [vmem:[%s16835_s2 + $0x220] sm:$0xf0]  ;;  %v15094_v6 = vld [vmem:[%s16835_s2 + $0x164] sm:$0xf0] }
  0x8c   : > { %v10334_v37 = vld [vmem:[#allocation3] sm:$0xf]  ;;  %v10623_v39 = vor.u32 %v15117_v31, %v10622_v29  ;;  %v15041_v41 = vld [vmem:[#allocation3 + $0x4] sm:$0xf]  ;;  %v10627_v43 = vor.u32 %v15113_v34, %v10624_v35  ;;  %1230 = vmatpush.bf16.msra.mxu0 %v10367_v36  ;;  %1288 = vmatpush.bf16.msra.mxu2 %v10371_v40  ;;  %v10790_v8 = vld [vmem:[%s16835_s2 + $0x348] sm:$0xf]  ;;  %v10535_v11 = vor.u32 %v15094_v6, %v10534_v5 }
  0x8d   : > { %v16944_v44 = vor.u32 %v15042_v38, %v10334_v37  ;;  %v16946_v45 = vor.u32 %v15041_v41, %v10336_v42  ;;  %v15158_v9 = vld [vmem:[%s16835_s2 + $0x364] sm:$0xf0]  ;;  %v15090_v10 = vld [vmem:[%s16835_s2 + $0x14c] sm:$0xf]  ;;  %v10342_v15 = vld [vmem:[#allocation3 + $0x10] sm:$0xf] }
  0x8e   : > { %1259 = vmatpush.bf16.msra.mxu1 %v10623_v39  ;;  %1317 = vmatpush.bf16.msra.mxu3 %v10627_v43  ;;  %v10536_v12 = vld [vmem:[%s16835_s2 + $0x168] sm:$0xf0]  ;;  %v10791_v16 = vor.u32 %v15158_v9, %v10790_v8  ;;  %v10502_v18 = vld [vmem:[%s16835_s2 + $0x108] sm:$0xf]  ;;  %v15044_v20 = vld [vmem:[#allocation3 + $0x14] sm:$0xf0] }
  0x8f   : > { %1231 = vmatmul.bf16.vlgmr.msra.gmra.mxu0 %v16944_v44  ;;  %1289 = vmatmul.bf16.vlgmr.msra.gmra.mxu2 %v16944_v44  ;;  %v15154_v13 = vld [vmem:[%s16835_s2 + $0x34c] sm:$0xf]  ;;  %v10539_v17 = vor.u32 %v15090_v10, %v10536_v12  ;;  %v15086_v19 = vld [vmem:[%s16835_s2 + $0x124] sm:$0xf0]  ;;  %v15043_v24 = vld [vmem:[#allocation3 + $0x14] sm:$0xf]  ;;  %v16982_v29 = vor.u32 %v15044_v20, %v10342_v15 }
  0x90   : > { %1339 = vmatpush.bf16.msrb.mxu0 %v10599_v49  ;;  %1397 = vmatpush.bf16.msrb.mxu2 %v10603_v54  ;;  %v10792_v14 = vld [vmem:[%s16835_s2 + $0x368] sm:$0xf0]  ;;  %v10758_v22 = vld [vmem:[%s16835_s2 + $0x308] sm:$0xf]  ;;  %v10344_v25 = vld [vmem:[#allocation3 + $0x18] sm:$0xf0]  ;;  %v10503_v26 = vor.u32 %v15086_v19, %v10502_v18 }
  0x91   : > { %1260 = vmatmul.bf16.vlgmr.msra.gmra.mxu1 %v16946_v45  ;;  %1318 = vmatmul.bf16.vlgmr.msra.gmra.mxu3 %v16946_v45  ;;  %v10795_v21 = vor.u32 %v15154_v13, %v10792_v14  ;;  %v15150_v23 = vld [vmem:[%s16835_s2 + $0x324] sm:$0xf0]  ;;  %v15082_v27 = vld [vmem:[%s16835_s2 + $0x10c] sm:$0xf]  ;;  %v16986_v33 = vor.u32 %v15043_v24, %v10344_v25  ;;  %v10350_v1 = vld [vmem:[#allocation3 + $0x20] sm:$0xf] }
  0x92   : > { %1368 = vmatpush.bf16.msrb.mxu1 %v10855_v53  ;;  %1426 = vmatpush.bf16.msrb.mxu3 %v10859_v58  ;;  %v10504_v28 = vld [vmem:[%s16835_s2 + $0x128] sm:$0xf0]  ;;  %v10759_v30 = vor.u32 %v15150_v23, %v10758_v22  ;;  %v10470_v36 = vld [vmem:[%s16835_s2 + $0xc8] sm:$0xf]  ;;  %v15045_v14 = vld [vmem:[#allocation3 + $0x24] sm:$0xf] }
  0x93   : > { %v15146_v31 = vld [vmem:[%s16835_s2 + $0x30c] sm:$0xf]  ;;  %v10507_v34 = vor.u32 %v15082_v27, %v10504_v28  ;;  %v15078_v37 = vld [vmem:[%s16835_s2 + $0xe4] sm:$0xf0]  ;;  %v10358_v28 = vld [vmem:[#allocation3 + $0x30] sm:$0xf] }
  0x94   : > { %1340 = vmatpush.bf16.msrb.mxu0 %v10567_v62  ;;  %1398 = vmatpush.bf16.msrb.mxu2 %v10571_v3  ;;  %v10760_v32 = vld [vmem:[%s16835_s2 + $0x328] sm:$0xf0]  ;;  %v10726_v38 = vld [vmem:[%s16835_s2 + $0x2c8] sm:$0xf]  ;;  %v10471_v39 = vor.u32 %v15078_v37, %v10470_v36  ;;  %v10606_v36 = vld [vmem:[%s16835_s2 + $0x1d0] sm:$0xf] }
  0x95   : > { %v10763_v35 = vor.u32 %v15146_v31, %v10760_v32  ;;  %v15142_v40 = vld [vmem:[%s16835_s2 + $0x2e4] sm:$0xf0]  ;;  %v15074_v41 = vld [vmem:[%s16835_s2 + $0xcc] sm:$0xf]  ;;  %v15047_v31 = vld [vmem:[#allocation3 + $0x34] sm:$0xf] }
  0x96   : > { %1369 = vmatpush.bf16.msrb.mxu1 %v10823_v63  ;;  %1427 = vmatpush.bf16.msrb.mxu3 %v10827_v7  ;;  %v10472_v42 = vld [vmem:[%s16835_s2 + $0xe8] sm:$0xf0]  ;;  %v10727_v43 = vor.u32 %v15142_v40, %v10726_v38  ;;  %v10438_v49 = vld [vmem:[%s16835_s2 + $0x88] sm:$0xf]  ;;  %v10360_v32 = vld [vmem:[#allocation3 + $0x38] sm:$0xf0] }
  0x97   : > { %v10475_v46 = vor.u32 %v15074_v41, %v10472_v42  ;;  %v15138_v47 = vld [vmem:[%s16835_s2 + $0x2cc] sm:$0xf]  ;;  %v15070_v51 = vld [vmem:[%s16835_s2 + $0xa4] sm:$0xf0]  ;;  %v15111_v37 = vld [vmem:[%s16835_s2 + $0x1ec] sm:$0xf0] }
  0x98   : > { %1341 = vmatpush.bf16.msrb.mxu0 %v10535_v11  ;;  %1399 = vmatpush.bf16.msrb.mxu2 %v10539_v17  ;;  %v10728_v48 = vld [vmem:[%s16835_s2 + $0x2e8] sm:$0xf0]  ;;  %v10694_v52 = vld [vmem:[%s16835_s2 + $0x288] sm:$0xf]  ;;  %v10439_v54 = vor.u32 %v15070_v51, %v10438_v49  ;;  %v10862_v38 = vld [vmem:[%s16835_s2 + $0x3d0] sm:$0xf] }
  0x99   : > { %v10731_v50 = vor.u32 %v15138_v47, %v10728_v48  ;;  %v15134_v53 = vld [vmem:[%s16835_s2 + $0x2a4] sm:$0xf0]  ;;  %v15066_v56 = vld [vmem:[%s16835_s2 + $0x8c] sm:$0xf]  ;;  %v15175_v40 = vld [vmem:[%s16835_s2 + $0x3ec] sm:$0xf0] }
  0x9a   : > { %1370 = vmatpush.bf16.msrb.mxu1 %v10791_v16  ;;  %1428 = vmatpush.bf16.msrb.mxu3 %v10795_v21  ;;  %v10695_v55 = vor.u32 %v15134_v53, %v10694_v52  ;;  %v10440_v57 = vld [vmem:[%s16835_s2 + $0xa8] sm:$0xf0]  ;;  %v10406_v60 = vld [vmem:[%s16835_s2 + $0x48] sm:$0xf]  ;;  %v15107_v41 = vld [vmem:[%s16835_s2 + $0x1d4] sm:$0xf] }
  0x9b   : > { %v15130_v58 = vld [vmem:[%s16835_s2 + $0x28c] sm:$0xf]  ;;  %v15062_v61 = vld [vmem:[%s16835_s2 + $0x64] sm:$0xf0]  ;;  %v10443_v62 = vor.u32 %v15066_v56, %v10440_v57  ;;  %v10608_v42 = vld [vmem:[%s16835_s2 + $0x1f0] sm:$0xf0] }
  0x9c   : > { %1342 = vmatpush.bf16.msrb.mxu0 %v10503_v26  ;;  %1400 = vmatpush.bf16.msrb.mxu2 %v10507_v34  ;;  %v10696_v59 = vld [vmem:[%s16835_s2 + $0x2a8] sm:$0xf0]  ;;  %v10662_v63 = vld [vmem:[%s16835_s2 + $0x248] sm:$0xf]  ;;  %v10407_v3 = vor.u32 %v15062_v61, %v10406_v60  ;;  %v15171_v47 = vld [vmem:[%s16835_s2 + $0x3d4] sm:$0xf] }
  0x9d   : > { %v15126_v0 = vld [vmem:[%s16835_s2 + $0x264] sm:$0xf0]  ;;  %v10699_v2 = vor.u32 %v15130_v58, %v10696_v59  ;;  %v15058_v4 = vld [vmem:[%s16835_s2 + $0x4c] sm:$0xf]  ;;  %v10864_v48 = vld [vmem:[%s16835_s2 + $0x3f0] sm:$0xf0] }
  0x9e   : > { %1371 = vmatpush.bf16.msrb.mxu1 %v10759_v30  ;;  %1429 = vmatpush.bf16.msrb.mxu3 %v10763_v35  ;;  %v10408_v5 = vld [vmem:[%s16835_s2 + $0x68] sm:$0xf0]  ;;  %v10663_v7 = vor.u32 %v15126_v0, %v10662_v63  ;;  %v10374_v9 = vld [vmem:[%s16835_s2 + $0x8] sm:$0xf]  ;;  %v15048_v30 = vld [vmem:[#allocation3 + $0x34] sm:$0xf0]  ;;  %v17034_v35 = vor.u32 %v15047_v31, %v10360_v32 }
  0x9f   : > { %1236 = vmatmul.bf16.gmra.mxu0 %v16982_v29  ;;  %1294 = vmatmul.bf16.gmra.mxu2 %v16982_v29  ;;  %v15122_v6 = vld [vmem:[%s16835_s2 + $0x24c] sm:$0xf]  ;;  %v15054_v10 = vld [vmem:[%s16835_s2 + $0x24] sm:$0xf0]  ;;  %v10411_v16 = vor.u32 %v15058_v4, %v10408_v5  ;;  %v17032_v34 = vor.u32 %v15048_v30, %v10358_v28  ;;  %v10574_v49 = vld [vmem:[%s16835_s2 + $0x190] sm:$0xf] }
  0xa0   : > { %1343 = vmatpush.bf16.msrb.mxu0 %v10471_v39  ;;  %1401 = vmatpush.bf16.msrb.mxu2 %v10475_v46  ;;  %v10664_v8 = vld [vmem:[%s16835_s2 + $0x268] sm:$0xf0]  ;;  %v15046_v11 = vld [vmem:[#allocation3 + $0x24] sm:$0xf0]  ;;  %v10375_v18 = vor.u32 %v15054_v10, %v10374_v9  ;;  %v10607_v39 = vor.u32 %v15111_v37, %v10606_v36  ;;  %v10611_v46 = vor.u32 %v15107_v41, %v10608_v42  ;;  %v15103_v51 = vld [vmem:[%s16835_s2 + $0x1ac] sm:$0xf0] }
  0xa1   : > { %1265 = vmatmul.bf16.gmra.mxu1 %v16986_v33  ;;  %1323 = vmatmul.bf16.gmra.mxu3 %v16986_v33  ;;  %v10630_v12 = vld [vmem:[%s16835_s2 + $0x208] sm:$0xf]  ;;  %v10352_v15 = vld [vmem:[#allocation3 + $0x28] sm:$0xf0]  ;;  %v10667_v17 = vor.u32 %v15122_v6, %v10664_v8  ;;  %v17022_v21 = vor.u32 %v15046_v11, %v10350_v1  ;;  %v10830_v52 = vld [vmem:[%s16835_s2 + $0x390] sm:$0xf] }
  0xa2   : > { %1372 = vmatpush.bf16.msrb.mxu1 %v10727_v43  ;;  %1430 = vmatpush.bf16.msrb.mxu3 %v10731_v50  ;;  %v15118_v13 = vld [vmem:[%s16835_s2 + $0x224] sm:$0xf0]  ;;  %v15050_v19 = vld [vmem:[%s16835_s2 + $0xc] sm:$0xf]  ;;  %v17026_v25 = vor.u32 %v15045_v14, %v10352_v15  ;;  %v10863_v43 = vor.u32 %v15175_v40, %v10862_v38  ;;  %v10867_v50 = vor.u32 %v15171_v47, %v10864_v48  ;;  %v15167_v53 = vld [vmem:[%s16835_s2 + $0x3ac] sm:$0xf0] }
  0xa3   : > { %v10376_v20 = vld [vmem:[%s16835_s2 + $0x28] sm:$0xf0]  ;;  %v10631_v22 = vor.u32 %v15118_v13, %v10630_v12  ;;  %v15099_v56 = vld [vmem:[%s16835_s2 + $0x194] sm:$0xf]  ;;  %v10542_v61 = vld [vmem:[%s16835_s2 + $0x150] sm:$0xf] }
  0xa4   : > { %1344 = vmatpush.bf16.msrb.mxu0 %v10439_v54  ;;  %1402 = vmatpush.bf16.msrb.mxu2 %v10443_v62  ;;  %v15114_v23 = vld [vmem:[%s16835_s2 + $0x20c] sm:$0xf]  ;;  %v10379_v26 = vor.u32 %v15050_v19, %v10376_v20  ;;  %v10575_v54 = vor.u32 %v15103_v51, %v10574_v49  ;;  %v10576_v57 = vld [vmem:[%s16835_s2 + $0x1b0] sm:$0xf0]  ;;  %v15095_v62 = vld [vmem:[%s16835_s2 + $0x16c] sm:$0xf0] }
  0xa5   : > { %v10632_v24 = vld [vmem:[%s16835_s2 + $0x228] sm:$0xf0]  ;;  %v15163_v58 = vld [vmem:[%s16835_s2 + $0x394] sm:$0xf]  ;;  %v10579_v59 = vor.u32 %v15099_v56, %v10576_v57  ;;  %v10798_v0 = vld [vmem:[%s16835_s2 + $0x350] sm:$0xf] }
  0xa6   : > { %1373 = vmatpush.bf16.msrb.mxu1 %v10695_v55  ;;  %1431 = vmatpush.bf16.msrb.mxu3 %v10699_v2  ;;  %v10635_v27 = vor.u32 %v15114_v23, %v10632_v24  ;;  %v10831_v55 = vor.u32 %v15167_v53, %v10830_v52  ;;  %v10832_v60 = vld [vmem:[%s16835_s2 + $0x3b0] sm:$0xf0]  ;;  %v15159_v1 = vld [vmem:[%s16835_s2 + $0x36c] sm:$0xf0] }
  0xa7   : > { %v10835_v63 = vor.u32 %v15163_v58, %v10832_v60  ;;  %v15091_v2 = vld [vmem:[%s16835_s2 + $0x154] sm:$0xf]  ;;  %v10510_v9 = vld [vmem:[%s16835_s2 + $0x110] sm:$0xf] }
  0xa8   : > { %1345 = vmatpush.bf16.msrb.mxu0 %v10407_v3  ;;  %1403 = vmatpush.bf16.msrb.mxu2 %v10411_v16  ;;  %v10543_v3 = vor.u32 %v15095_v62, %v10542_v61  ;;  %v10544_v4 = vld [vmem:[%s16835_s2 + $0x170] sm:$0xf0]  ;;  %v15087_v10 = vld [vmem:[%s16835_s2 + $0x12c] sm:$0xf0] }
  0xa9   : > { %v15155_v5 = vld [vmem:[%s16835_s2 + $0x354] sm:$0xf]  ;;  %v10547_v8 = vor.u32 %v15091_v2, %v10544_v4  ;;  %v10766_v12 = vld [vmem:[%s16835_s2 + $0x310] sm:$0xf]  ;;  %v10511_v14 = vor.u32 %v15087_v10, %v10510_v9 }
  0xaa   : > { %1374 = vmatpush.bf16.msrb.mxu1 %v10663_v7  ;;  %1432 = vmatpush.bf16.msrb.mxu3 %v10667_v17  ;;  %v10800_v6 = vld [vmem:[%s16835_s2 + $0x370] sm:$0xf0]  ;;  %v10799_v7 = vor.u32 %v15159_v1, %v10798_v0  ;;  %v15151_v13 = vld [vmem:[%s16835_s2 + $0x32c] sm:$0xf0] }
  0xab   : > { %v10803_v11 = vor.u32 %v15155_v5, %v10800_v6  ;;  %v15083_v15 = vld [vmem:[%s16835_s2 + $0x114] sm:$0xf]  ;;  %v10767_v17 = vor.u32 %v15151_v13, %v10766_v12  ;;  %v10478_v23 = vld [vmem:[%s16835_s2 + $0xd0] sm:$0xf] }
  0xac   : > { %1346 = vmatpush.bf16.msrb.mxu0 %v10375_v18  ;;  %1404 = vmatpush.bf16.msrb.mxu2 %v10379_v26  ;;  %v10512_v16 = vld [vmem:[%s16835_s2 + $0x130] sm:$0xf0]  ;;  %v15079_v24 = vld [vmem:[%s16835_s2 + $0xec] sm:$0xf0] }
  0xad   : > { %v15147_v18 = vld [vmem:[%s16835_s2 + $0x314] sm:$0xf]  ;;  %v10515_v20 = vor.u32 %v15083_v15, %v10512_v16  ;;  %v10734_v26 = vld [vmem:[%s16835_s2 + $0x2d0] sm:$0xf] }
  0xae   : > { %1375 = vmatpush.bf16.msrb.mxu1 %v10631_v22  ;;  %1433 = vmatpush.bf16.msrb.mxu3 %v10635_v27  ;;  %v10768_v19 = vld [vmem:[%s16835_s2 + $0x330] sm:$0xf0]  ;;  %v10479_v27 = vor.u32 %v15079_v24, %v10478_v23  ;;  %v15143_v28 = vld [vmem:[%s16835_s2 + $0x2ec] sm:$0xf0]  ;;  %v15112_v23 = vld [vmem:[%s16835_s2 + $0x1f4] sm:$0xf0] }
  0xaf   : > { %1241 = vmatmul.bf16.gmra.mxu0 %v17022_v21  ;;  %1299 = vmatmul.bf16.gmra.mxu2 %v17022_v21  ;;  %v10771_v22 = vor.u32 %v15147_v18, %v10768_v19  ;;  %v15075_v30 = vld [vmem:[%s16835_s2 + $0xd4] sm:$0xf]  ;;  %v10735_v32 = vor.u32 %v15143_v28, %v10734_v26  ;;  %v15071_v41 = vld [vmem:[%s16835_s2 + $0xac] sm:$0xf0]  ;;  %v10870_v24 = vld [vmem:[%s16835_s2 + $0x3d8] sm:$0xf] }
  0xb0   : > { %1455 = vmatpush.bf16.msra.mxu0 %v10607_v39  ;;  %1513 = vmatpush.bf16.msra.mxu2 %v10611_v46  ;;  %v10480_v31 = vld [vmem:[%s16835_s2 + $0xf0] sm:$0xf0]  ;;  %v10446_v39 = vld [vmem:[%s16835_s2 + $0x90] sm:$0xf]  ;;  %v15108_v28 = vld [vmem:[%s16835_s2 + $0x1dc] sm:$0xf] }
  0xb1   : > { %1270 = vmatmul.bf16.gmra.mxu1 %v17026_v25  ;;  %1328 = vmatmul.bf16.gmra.mxu3 %v17026_v25  ;;  %v10483_v36 = vor.u32 %v15075_v30, %v10480_v31  ;;  %v15139_v37 = vld [vmem:[%s16835_s2 + $0x2d4] sm:$0xf]  ;;  %v10702_v42 = vld [vmem:[%s16835_s2 + $0x290] sm:$0xf]  ;;  %v10447_v46 = vor.u32 %v15071_v41, %v10446_v39  ;;  %v10616_v30 = vld [vmem:[%s16835_s2 + $0x1f8] sm:$0xf0] }
  0xb2   : > { %1484 = vmatpush.bf16.msra.mxu1 %v10863_v43  ;;  %1542 = vmatpush.bf16.msra.mxu3 %v10867_v50  ;;  %v10736_v38 = vld [vmem:[%s16835_s2 + $0x2f0] sm:$0xf0]  ;;  %v15135_v43 = vld [vmem:[%s16835_s2 + $0x2ac] sm:$0xf0]  ;;  %v15104_v41 = vld [vmem:[%s16835_s2 + $0x1b4] sm:$0xf0] }
  0xb3   : > { %v10739_v40 = vor.u32 %v15139_v37, %v10736_v38  ;;  %v10703_v47 = vor.u32 %v15135_v43, %v10702_v42  ;;  %v15067_v48 = vld [vmem:[%s16835_s2 + $0x94] sm:$0xf]  ;;  %v10414_v52 = vld [vmem:[%s16835_s2 + $0x50] sm:$0xf]  ;;  %v10872_v37 = vld [vmem:[%s16835_s2 + $0x3f8] sm:$0xf0] }
  0xb4   : > { %1456 = vmatpush.bf16.msra.mxu0 %v10575_v54  ;;  %1514 = vmatpush.bf16.msra.mxu2 %v10579_v59  ;;  %v10448_v49 = vld [vmem:[%s16835_s2 + $0xb0] sm:$0xf0]  ;;  %v15063_v53 = vld [vmem:[%s16835_s2 + $0x6c] sm:$0xf0]  ;;  %v10838_v42 = vld [vmem:[%s16835_s2 + $0x398] sm:$0xf] }
  0xb5   : > { %v15131_v50 = vld [vmem:[%s16835_s2 + $0x294] sm:$0xf]  ;;  %v10451_v54 = vor.u32 %v15067_v48, %v10448_v49  ;;  %v15127_v56 = vld [vmem:[%s16835_s2 + $0x26c] sm:$0xf0]  ;;  %v10415_v58 = vor.u32 %v15063_v53, %v10414_v52  ;;  %v15168_v49 = vld [vmem:[%s16835_s2 + $0x3b4] sm:$0xf0] }
  0xb6   : > { %1485 = vmatpush.bf16.msra.mxu1 %v10831_v55  ;;  %1543 = vmatpush.bf16.msra.mxu3 %v10835_v63  ;;  %v10704_v51 = vld [vmem:[%s16835_s2 + $0x2b0] sm:$0xf0]  ;;  %v10670_v55 = vld [vmem:[%s16835_s2 + $0x250] sm:$0xf] }
  0xb7   : > { %v10707_v57 = vor.u32 %v15131_v50, %v10704_v51  ;;  %v15059_v59 = vld [vmem:[%s16835_s2 + $0x54] sm:$0xf]  ;;  %v10671_v61 = vor.u32 %v15127_v56, %v10670_v55  ;;  %v10382_v2 = vld [vmem:[%s16835_s2 + $0x10] sm:$0xf]  ;;  %v15100_v50 = vld [vmem:[%s16835_s2 + $0x19c] sm:$0xf] }
  0xb8   : > { %1457 = vmatpush.bf16.msra.mxu0 %v10543_v3  ;;  %1515 = vmatpush.bf16.msra.mxu2 %v10547_v8  ;;  %v10416_v60 = vld [vmem:[%s16835_s2 + $0x70] sm:$0xf0]  ;;  %v15055_v3 = vld [vmem:[%s16835_s2 + $0x2c] sm:$0xf0]  ;;  %v10584_v51 = vld [vmem:[%s16835_s2 + $0x1b8] sm:$0xf0] }
  0xb9   : > { %v15123_v62 = vld [vmem:[%s16835_s2 + $0x254] sm:$0xf]  ;;  %v10419_v0 = vor.u32 %v15059_v59, %v10416_v60  ;;  %v10638_v4 = vld [vmem:[%s16835_s2 + $0x210] sm:$0xf]  ;;  %v10383_v5 = vor.u32 %v15055_v3, %v10382_v2  ;;  %v10587_v55 = vor.u32 %v15100_v50, %v10584_v51  ;;  %v15164_v56 = vld [vmem:[%s16835_s2 + $0x39c] sm:$0xf] }
  0xba   : > { %1486 = vmatpush.bf16.msra.mxu1 %v10799_v7  ;;  %1544 = vmatpush.bf16.msra.mxu3 %v10803_v11  ;;  %v10672_v63 = vld [vmem:[%s16835_s2 + $0x270] sm:$0xf0]  ;;  %v15119_v6 = vld [vmem:[%s16835_s2 + $0x22c] sm:$0xf0]  ;;  %v15092_v2 = vld [vmem:[%s16835_s2 + $0x15c] sm:$0xf] }
  0xbb   : > { %v10675_v1 = vor.u32 %v15123_v62, %v10672_v63  ;;  %v15051_v7 = vld [vmem:[%s16835_s2 + $0x14] sm:$0xf]  ;;  %v10639_v9 = vor.u32 %v15119_v6, %v10638_v4  ;;  %v15096_v62 = vld [vmem:[%s16835_s2 + $0x174] sm:$0xf0]  ;;  %v10552_v3 = vld [vmem:[%s16835_s2 + $0x178] sm:$0xf0] }
  0xbc   : > { %1458 = vmatpush.bf16.msra.mxu0 %v10511_v14  ;;  %1516 = vmatpush.bf16.msra.mxu2 %v10515_v20  ;;  %v10384_v8 = vld [vmem:[%s16835_s2 + $0x30] sm:$0xf0]  ;;  %v17121_v14 = vld [vmem:[%s16848_s15] sm:$0xff]  ;;  %v10806_v63 = vld [vmem:[%s16835_s2 + $0x358] sm:$0xf] }
  0xbd   : > { %v10387_v10 = vor.u32 %v15051_v7, %v10384_v8  ;;  %v15115_v11 = vld [vmem:[%s16835_s2 + $0x214] sm:$0xf]  ;;  %v17124_v15 = vperm.slane %v17121_v14, 0  ;;  %v17128_v19 = vperm.slane %v17121_v14, 1  ;;  %v15156_v6 = vld [vmem:[%s16835_s2 + $0x35c] sm:$0xf] }
  0xbe   : > { %1487 = vmatpush.bf16.msra.mxu1 %v10767_v17  ;;  %1545 = vmatpush.bf16.msra.mxu3 %v10771_v22  ;;  %v10640_v12 = vld [vmem:[%s16835_s2 + $0x230] sm:$0xf0]  ;;  %v10614_v22 = vld [vmem:[%s16835_s2 + $0x1d8] sm:$0xf]  ;;  %v10808_v7 = vld [vmem:[%s16835_s2 + $0x378] sm:$0xf0] }
  0xbf   : > { %1246 = vmatmul.bf16.gmra.mxu0 %v17032_v34  ;;  %1304 = vmatmul.bf16.gmra.mxu2 %v17032_v34  ;;  %v10643_v13 = vor.u32 %v15115_v11, %v10640_v12  ;;  %v10615_v26 = vor.u32 %v15112_v23, %v10614_v22  ;;  %v10811_v8 = vor.u32 %v15156_v6, %v10808_v7  ;;  %v15088_v11 = vld [vmem:[%s16835_s2 + $0x134] sm:$0xf0]  ;;  %v15084_v23 = vld [vmem:[%s16835_s2 + $0x11c] sm:$0xf] }
  0xc0   : > { %1459 = vmatpush.bf16.msra.mxu0 %v10479_v27  ;;  %1517 = vmatpush.bf16.msra.mxu2 %v10483_v36  ;;  %v15176_v27 = vld [vmem:[%s16835_s2 + $0x3f4] sm:$0xf0]  ;;  %v15172_v36 = vld [vmem:[%s16835_s2 + $0x3dc] sm:$0xf] }
  0xc1   : > { %1275 = vmatmul.bf16.gmra.mxu1 %v17034_v35  ;;  %1333 = vmatmul.bf16.gmra.mxu3 %v17034_v35  ;;  %v10871_v31 = vor.u32 %v15176_v27, %v10870_v24  ;;  %v10875_v38 = vor.u32 %v15172_v36, %v10872_v37  ;;  %v10774_v12 = vld [vmem:[%s16835_s2 + $0x318] sm:$0xf]  ;;  %v10520_v24 = vld [vmem:[%s16835_s2 + $0x138] sm:$0xf0] }
  0xc2   : > { %1488 = vmatpush.bf16.msra.mxu1 %v10735_v32  ;;  %1546 = vmatpush.bf16.msra.mxu3 %v10739_v40  ;;  %v10619_v32 = vor.u32 %v15108_v28, %v10616_v30  ;;  %v10582_v40 = vld [vmem:[%s16835_s2 + $0x198] sm:$0xf]  ;;  %v10523_v30 = vor.u32 %v15084_v23, %v10520_v24  ;;  %v15140_v50 = vld [vmem:[%s16835_s2 + $0x2dc] sm:$0xf] }
  0xc3   : > { %v10583_v48 = vor.u32 %v15104_v41, %v10582_v40  ;;  %v15152_v22 = vld [vmem:[%s16835_s2 + $0x334] sm:$0xf0]  ;;  %v10744_v51 = vld [vmem:[%s16835_s2 + $0x2f8] sm:$0xf0] }
  0xc4   : > { %1460 = vmatpush.bf16.msra.mxu0 %v10447_v46  ;;  %1518 = vmatpush.bf16.msra.mxu2 %v10451_v54  ;;  %v10839_v54 = vor.u32 %v15168_v49, %v10838_v42  ;;  %v10775_v28 = vor.u32 %v15152_v22, %v10774_v12  ;;  %v15080_v40 = vld [vmem:[%s16835_s2 + $0xf4] sm:$0xf0]  ;;  %v15132_v6 = vld [vmem:[%s16835_s2 + $0x29c] sm:$0xf] }
  0xc5   : > { %v10742_v41 = vld [vmem:[%s16835_s2 + $0x2d8] sm:$0xf]  ;;  %v10712_v7 = vld [vmem:[%s16835_s2 + $0x2b8] sm:$0xf0] }
  0xc6   : > { %1489 = vmatpush.bf16.msra.mxu1 %v10703_v47  ;;  %1547 = vmatpush.bf16.msra.mxu3 %v10707_v57  ;;  %v10840_v57 = vld [vmem:[%s16835_s2 + $0x3b8] sm:$0xf0]  ;;  %v15064_v12 = vld [vmem:[%s16835_s2 + $0x74] sm:$0xf0] }
  0xc7   : > { %v10843_v59 = vor.u32 %v15164_v56, %v10840_v57  ;;  %v10710_v56 = vld [vmem:[%s16835_s2 + $0x298] sm:$0xf]  ;;  %v10424_v22 = vld [vmem:[%s16835_s2 + $0x78] sm:$0xf0] }
  0xc8   : > { %1461 = vmatpush.bf16.msra.mxu0 %v10415_v58  ;;  %1519 = vmatpush.bf16.msra.mxu2 %v10419_v0 }
  0xca   : > { %1490 = vmatpush.bf16.msra.mxu1 %v10671_v61  ;;  %1548 = vmatpush.bf16.msra.mxu3 %v10675_v1  ;;  %v10550_v61 = vld [vmem:[%s16835_s2 + $0x158] sm:$0xf] }
  0xcb   : > { %v10551_v0 = vor.u32 %v15096_v62, %v10550_v61  ;;  %v15160_v1 = vld [vmem:[%s16835_s2 + $0x374] sm:$0xf0] }
  0xcc   : > { %1462 = vmatpush.bf16.msra.mxu0 %v10383_v5  ;;  %1520 = vmatpush.bf16.msra.mxu2 %v10387_v10  ;;  %v10807_v4 = vor.u32 %v15160_v1, %v10806_v63  ;;  %v10555_v5 = vor.u32 %v15092_v2, %v10552_v3  ;;  %v10518_v10 = vld [vmem:[%s16835_s2 + $0x118] sm:$0xf]  ;;  %v10456_v1 = vld [vmem:[%s16835_s2 + $0xb8] sm:$0xf0] }
  0xcd   : > { %v15136_v63 = vld [vmem:[%s16835_s2 + $0x2b4] sm:$0xf0] }
  0xce   : > { %1491 = vmatpush.bf16.msra.mxu1 %v10639_v9  ;;  %1549 = vmatpush.bf16.msra.mxu3 %v10643_v13 }
  0xcf   : > { %1347 = vmatmul.bf16.vlgmr.msrb.gmra.mxu0 %v16944_v44  ;;  %1405 = vmatmul.bf16.vlgmr.msrb.gmra.mxu2 %v16944_v44 }
  0xd0   : > { %1571 = vmatpush.bf16.msrb.mxu0 %v10615_v26  ;;  %1629 = vmatpush.bf16.msrb.mxu2 %v10619_v32  ;;  %v10776_v32 = vld [vmem:[%s16835_s2 + $0x338] sm:$0xf0] }
  0xd1   : > { %1376 = vmatmul.bf16.vlgmr.msrb.gmra.mxu1 %v16946_v45  ;;  %1434 = vmatmul.bf16.vlgmr.msrb.gmra.mxu3 %v16946_v45 }
  0xd2   : > { %1600 = vmatpush.bf16.msrb.mxu1 %v10871_v31  ;;  %1658 = vmatpush.bf16.msrb.mxu3 %v10875_v38  ;;  %v15148_v31 = vld [vmem:[%s16835_s2 + $0x31c] sm:$0xf] }
  0xd3   : > { %v10779_v37 = vor.u32 %v15148_v31, %v10776_v32  ;;  %v10390_v31 = vld [vmem:[%s16835_s2 + $0x18] sm:$0xf] }
  0xd4   : > { %1572 = vmatpush.bf16.msrb.mxu0 %v10583_v48  ;;  %1630 = vmatpush.bf16.msrb.mxu2 %v10587_v55  ;;  %v15072_v55 = vld [vmem:[%s16835_s2 + $0xb4] sm:$0xf0] }
  0xd5   : > { %v15056_v32 = vld [vmem:[%s16835_s2 + $0x34] sm:$0xf0] }
  0xd6   : > { %1601 = vmatpush.bf16.msrb.mxu1 %v10839_v54  ;;  %1659 = vmatpush.bf16.msrb.mxu3 %v10843_v59  ;;  %v10454_v54 = vld [vmem:[%s16835_s2 + $0x98] sm:$0xf] }
  0xd7   : > { %v10455_v62 = vor.u32 %v15072_v55, %v10454_v54 }
  0xd8   : > { %1573 = vmatpush.bf16.msrb.mxu0 %v10551_v0  ;;  %1631 = vmatpush.bf16.msrb.mxu2 %v10555_v5  ;;  %v15068_v0 = vld [vmem:[%s16835_s2 + $0x9c] sm:$0xf] }
  0xd9   : > { %v10459_v5 = vor.u32 %v15068_v0, %v10456_v1  ;;  %v15237_v0 = vld [vmem:[%s16842_s11 + $0x1dc] sm:$0xf0] }
  0xda   : > { %1602 = vmatpush.bf16.msrb.mxu1 %v10807_v4  ;;  %1660 = vmatpush.bf16.msrb.mxu3 %v10811_v8  ;;  %v10711_v4 = vor.u32 %v15136_v63, %v10710_v56  ;;  %v11102_v63 = vld [vmem:[%s16842_s11 + $0x1c0] sm:$0xf] }
  0xdb   : > { %v11358_v1 = vld [vmem:[%s16842_s11 + $0x3c0] sm:$0xf] }
  0xdc   : > { %1632 = vmatpush.bf16.msrb.mxu2 %v10523_v30 }
  0xde   : > { %1603 = vmatpush.bf16.msrb.mxu1 %v10775_v28  ;;  %1661 = vmatpush.bf16.msrb.mxu3 %v10779_v37  ;;  %v10646_v37 = vld [vmem:[%s16835_s2 + $0x218] sm:$0xf] }
  0xdf   : > { %1352 = vmatmul.bf16.gmra.mxu0 %v16982_v29  ;;  %1410 = vmatmul.bf16.gmra.mxu2 %v16982_v29 }
  0xe1   : > { %1381 = vmatmul.bf16.gmra.mxu1 %v16986_v33  ;;  %1439 = vmatmul.bf16.gmra.mxu3 %v16986_v33 }
  0xef   : > { %1357 = vmatmul.bf16.gmra.mxu0 %v17022_v21  ;;  %1415 = vmatmul.bf16.gmra.mxu2 %v17022_v21 }
  0xf1   : > { %1386 = vmatmul.bf16.gmra.mxu1 %v17026_v25  ;;  %1444 = vmatmul.bf16.gmra.mxu3 %v17026_v25 }
  0xff   : > { %1362 = vmatmul.bf16.gmra.mxu0 %v17032_v34  ;;  %1420 = vmatmul.bf16.gmra.mxu2 %v17032_v34 }
 0x101   : > { %1391 = vmatmul.bf16.gmra.mxu1 %v17034_v35  ;;  %1449 = vmatmul.bf16.gmra.mxu3 %v17034_v35 }
 0x10c   : > { %v1232_v16 = vpop.f32.mrf.mxu0 }
 0x10d   : > { %v1233_v17 = vadd.f32 %v1232_v16, %v17124_v15 }
 0x10e   : > { %v1261_v18 = vpop.f32.mrf.mxu1 }
 0x10f   : > { %v17130_v20 = vadd.f32 %v1261_v18, %v1233_v17  ;;  %1463 = vmatmul.bf16.vlgmr.msra.gmra.mxu0 %v16944_v44  ;;  %1521 = vmatmul.bf16.vlgmr.msra.gmra.mxu2 %v16944_v44  ;;  %v10519_v18 = vor.u32 %v15088_v11, %v10518_v10  ;;  %v10422_v11 = vld [vmem:[%s16835_s2 + $0x58] sm:$0xf] }
 0x111   : > { %1492 = vmatmul.bf16.vlgmr.msra.gmra.mxu1 %v16946_v45  ;;  %1550 = vmatmul.bf16.vlgmr.msra.gmra.mxu3 %v16946_v45 }
 0x112   : > { %v1290_v39 = vpop.f32.mrf.mxu2  ;;  %1574 = vmatpush.bf16.msrb.mxu0 %v10519_v18  ;;  %v15060_v18 = vld [vmem:[%s16835_s2 + $0x5c] sm:$0xf] }
 0x113   : > { %v1291_v43 = vadd.f32 %v1290_v39, %v17128_v19  ;;  %v10486_v39 = vld [vmem:[%s16835_s2 + $0xd8] sm:$0xf]  ;;  %v10427_v24 = vor.u32 %v15060_v18, %v10424_v22  ;;  %v11070_v22 = vld [vmem:[%s16842_s11 + $0x180] sm:$0xf] }
 0x114   : > { %v1319_v46 = vpop.f32.mrf.mxu3  ;;  %v1234_v47 = vpop.f32.mrf.mxu0  ;;  %v10487_v42 = vor.u32 %v15080_v40, %v10486_v39 }
 0x115   : > { %v1235_v52 = vadd.f32 %v1234_v47, %v17124_v15  ;;  %v17154_v58 = vadd.f32 %v1319_v46, %v1291_v43  ;;  %v15144_v43 = vld [vmem:[%s16835_s2 + $0x2f4] sm:$0xf0]  ;;  %v15076_v46 = vld [vmem:[%s16835_s2 + $0xdc] sm:$0xf] }
 0x116   : > { %v1263_v53 = vpop.f32.mrf.mxu1  ;;  %v10488_v47 = vld [vmem:[%s16835_s2 + $0xf8] sm:$0xf0]  ;;  %v10743_v48 = vor.u32 %v15144_v43, %v10742_v41  ;;  %1575 = vmatpush.bf16.msrb.mxu0 %v10487_v42  ;;  %v10391_v42 = vor.u32 %v15056_v32, %v10390_v31  ;;  %v15120_v43 = vld [vmem:[%s16835_s2 + $0x234] sm:$0xf0] }
 0x117   : > { %v17156_v60 = vadd.f32 %v1263_v53, %v1235_v52  ;;  %v10491_v49 = vor.u32 %v15076_v46, %v10488_v47  ;;  %v10747_v52 = vor.u32 %v15140_v50, %v10744_v51  ;;  %v15052_v46 = vld [vmem:[%s16835_s2 + $0x1c] sm:$0xf]  ;;  %v10647_v50 = vor.u32 %v15120_v43, %v10646_v37  ;;  %v15289_v37 = vld [vmem:[%s16842_s11 + $0x384] sm:$0xf] }
 0x118   : > { %1604 = vmatpush.bf16.msrb.mxu1 %v10743_v48  ;;  %v10392_v47 = vld [vmem:[%s16835_s2 + $0x38] sm:$0xf0] }
 0x119   : > { %1633 = vmatpush.bf16.msrb.mxu2 %v10491_v49  ;;  %1662 = vmatpush.bf16.msrb.mxu3 %v10747_v52  ;;  %v10395_v51 = vor.u32 %v15052_v46, %v10392_v47  ;;  %v15116_v52 = vld [vmem:[%s16835_s2 + $0x21c] sm:$0xf]  ;;  %v11038_v47 = vld [vmem:[%s16842_s11 + $0x140] sm:$0xf] }
 0x11a   : > { %v1292_v9 = vpop.f32.mrf.mxu2  ;;  %1576 = vmatpush.bf16.msrb.mxu0 %v10455_v62 }
 0x11b   : > { %v1293_v13 = vadd.f32 %v1292_v9, %v17128_v19  ;;  %v10715_v9 = vor.u32 %v15132_v6, %v10712_v7  ;;  %v15233_v6 = vld [vmem:[%s16842_s11 + $0x1c4] sm:$0xf] }
 0x11c   : > { %v1321_v16 = vpop.f32.mrf.mxu3  ;;  %v1237_v17 = vpop.f32.mrf.mxu0  ;;  %1605 = vmatpush.bf16.msrb.mxu1 %v10711_v4  ;;  %v11103_v4 = vor.u32 %v15237_v0, %v11102_v63  ;;  %v11104_v7 = vld [vmem:[%s16842_s11 + $0x1e0] sm:$0xf0] }
 0x11d   : > { %v1238_v26 = vadd.f32 %v1237_v17, %v17124_v15  ;;  %v17176_v36 = vadd.f32 %v1321_v16, %v1293_v13  ;;  %v10678_v13 = vld [vmem:[%s16835_s2 + $0x258] sm:$0xf]  ;;  %v10423_v16 = vor.u32 %v15064_v12, %v10422_v11  ;;  %1634 = vmatpush.bf16.msrb.mxu2 %v10459_v5  ;;  %1663 = vmatpush.bf16.msrb.mxu3 %v10715_v9  ;;  %v15301_v5 = vld [vmem:[%s16842_s11 + $0x3dc] sm:$0xf0]  ;;  %v15281_v63 = vld [vmem:[%s16842_s11 + $0x344] sm:$0xf] }
 0x11e   : > { %v1266_v27 = vpop.f32.mrf.mxu1  ;;  %v15128_v17 = vld [vmem:[%s16835_s2 + $0x274] sm:$0xf0]  ;;  %v11359_v11 = vor.u32 %v15301_v5, %v11358_v1  ;;  %v11107_v12 = vor.u32 %v15233_v6, %v11104_v7  ;;  %v11296_v0 = vld [vmem:[%s16842_s11 + $0x360] sm:$0xf0]  ;;  %v11262_v5 = vld [vmem:[%s16842_s11 + $0x300] sm:$0xf] }
 0x11f   : > { %v17178_v38 = vadd.f32 %v1266_v27, %v1238_v26  ;;  %1468 = vmatmul.bf16.gmra.mxu0 %v16982_v29  ;;  %1526 = vmatmul.bf16.gmra.mxu2 %v16982_v29  ;;  %v10679_v23 = vor.u32 %v15128_v17, %v10678_v13  ;;  %v15124_v26 = vld [vmem:[%s16835_s2 + $0x25c] sm:$0xf]  ;;  %v15297_v13 = vld [vmem:[%s16842_s11 + $0x3c4] sm:$0xf]  ;;  %v15277_v7 = vld [vmem:[%s16842_s11 + $0x31c] sm:$0xf0] }
 0x120   : > { %v10680_v27 = vld [vmem:[%s16835_s2 + $0x278] sm:$0xf0]  ;;  %1577 = vmatpush.bf16.msrb.mxu0 %v10423_v16  ;;  %v11360_v16 = vld [vmem:[%s16842_s11 + $0x3e0] sm:$0xf0] }
 0x121   : > { %1497 = vmatmul.bf16.gmra.mxu1 %v16986_v33  ;;  %1555 = vmatmul.bf16.gmra.mxu3 %v16986_v33  ;;  %v10683_v28 = vor.u32 %v15124_v26, %v10680_v27  ;;  %v11363_v18 = vor.u32 %v15297_v13, %v11360_v16  ;;  %v15293_v27 = vld [vmem:[%s16842_s11 + $0x39c] sm:$0xf0]  ;;  %v11263_v13 = vor.u32 %v15277_v7, %v11262_v5 }
 0x122   : > { %v1295_v53 = vpop.f32.mrf.mxu2  ;;  %1606 = vmatpush.bf16.msrb.mxu1 %v10679_v23  ;;  %1635 = vmatpush.bf16.msrb.mxu2 %v10427_v24  ;;  %v15229_v23 = vld [vmem:[%s16842_s11 + $0x19c] sm:$0xf0] }
 0x123   : > { %v1296_v57 = vadd.f32 %v1295_v53, %v17128_v19  ;;  %v10648_v53 = vld [vmem:[%s16835_s2 + $0x238] sm:$0xf0]  ;;  %1664 = vmatpush.bf16.msrb.mxu3 %v10683_v28  ;;  %v11326_v24 = vld [vmem:[%s16842_s11 + $0x380] sm:$0xf]  ;;  %v11071_v26 = vor.u32 %v15229_v23, %v11070_v22  ;;  %v15225_v28 = vld [vmem:[%s16842_s11 + $0x184] sm:$0xf] }
 0x124   : > { %v1324_v59 = vpop.f32.mrf.mxu3  ;;  %v1239_v61 = vpop.f32.mrf.mxu0  ;;  %1578 = vmatpush.bf16.msrb.mxu0 %v10391_v42  ;;  %v10651_v55 = vor.u32 %v15116_v52, %v10648_v53  ;;  %v11327_v31 = vor.u32 %v15293_v27, %v11326_v24  ;;  %v15285_v53 = vld [vmem:[%s16842_s11 + $0x35c] sm:$0xf0]  ;;  %v11264_v22 = vld [vmem:[%s16842_s11 + $0x320] sm:$0xf0] }
 0x125   : > { %v1240_v2 = vadd.f32 %v1239_v61, %v17124_v15  ;;  %v17202_v8 = vadd.f32 %v1324_v59, %v1296_v57 }
 0x126   : > { %v1268_v3 = vpop.f32.mrf.mxu1  ;;  %1607 = vmatpush.bf16.msrb.mxu1 %v10647_v50  ;;  %1636 = vmatpush.bf16.msrb.mxu2 %v10395_v51 }
 0x127   : > { %v17204_v10 = vadd.f32 %v1268_v3, %v1240_v2  ;;  %1665 = vmatpush.bf16.msrb.mxu3 %v10651_v55  ;;  %v15217_v55 = vld [vmem:[%s16842_s11 + $0x144] sm:$0xf] }
 0x128   : > { %2527 = vmatpush.bf16.msra.mxu0 %v11103_v4  ;;  %v15213_v4 = vld [vmem:[%s16842_s11 + $0x11c] sm:$0xf0] }
 0x12a   : > { %v1297_v30 = vpop.f32.mrf.mxu2  ;;  %2540 = vmatpush.bf16.msra.mxu1 %v11359_v11  ;;  %2553 = vmatpush.bf16.msra.mxu2 %v11107_v12  ;;  %v15209_v11 = vld [vmem:[%s16842_s11 + $0x104] sm:$0xf] }
 0x12b   : > { %v1298_v39 = vadd.f32 %v1297_v30, %v17128_v19  ;;  %v11072_v30 = vld [vmem:[%s16842_s11 + $0x1a0] sm:$0xf0]  ;;  %2566 = vmatpush.bf16.msra.mxu3 %v11363_v18 }
 0x12c   : > { %v1326_v40 = vpop.f32.mrf.mxu3  ;;  %v1242_v41 = vpop.f32.mrf.mxu0  ;;  %v11075_v32 = vor.u32 %v15225_v28, %v11072_v30  ;;  %2528 = vmatpush.bf16.msra.mxu0 %v11071_v26  ;;  %v11008_v12 = vld [vmem:[%s16842_s11 + $0x120] sm:$0xf0]  ;;  %v10974_v30 = vld [vmem:[%s16842_s11 + $0xc0] sm:$0xf] }
 0x12d   : > { %v1243_v48 = vadd.f32 %v1242_v41, %v17124_v15  ;;  %v17224_v54 = vadd.f32 %v1326_v40, %v1298_v39  ;;  %v11328_v39 = vld [vmem:[%s16842_s11 + $0x3a0] sm:$0xf0]  ;;  %v11011_v16 = vor.u32 %v15209_v11, %v11008_v12 }
 0x12e   : > { %v1271_v49 = vpop.f32.mrf.mxu1  ;;  %v11331_v40 = vor.u32 %v15289_v37, %v11328_v39  ;;  %2541 = vmatpush.bf16.msra.mxu1 %v11327_v31  ;;  %2554 = vmatpush.bf16.msra.mxu2 %v11075_v32  ;;  %v15273_v18 = vld [vmem:[%s16842_s11 + $0x304] sm:$0xf]  ;;  %v15205_v31 = vld [vmem:[%s16842_s11 + $0xdc] sm:$0xf0] }
 0x12f   : > { %v17226_v56 = vadd.f32 %v1271_v49, %v1243_v48  ;;  %1473 = vmatmul.bf16.gmra.mxu0 %v17022_v21  ;;  %1531 = vmatmul.bf16.gmra.mxu2 %v17022_v21  ;;  %v15221_v48 = vld [vmem:[%s16842_s11 + $0x15c] sm:$0xf0]  ;;  %v11267_v24 = vor.u32 %v15273_v18, %v11264_v22 }
 0x130   : > { %v11294_v49 = vld [vmem:[%s16842_s11 + $0x340] sm:$0xf]  ;;  %2567 = vmatpush.bf16.msra.mxu3 %v11331_v40  ;;  %v11039_v52 = vor.u32 %v15221_v48, %v11038_v47  ;;  %v10975_v40 = vor.u32 %v15205_v31, %v10974_v30  ;;  %v10912_v30 = vld [vmem:[%s16842_s11 + $0x60] sm:$0xf0] }
 0x131   : > { %19899 = vst [vmem:[#allocation17_spill] sm:$0xff] %v17226_v56  ;;  %1502 = vmatmul.bf16.gmra.mxu1 %v17026_v25  ;;  %1560 = vmatmul.bf16.gmra.mxu3 %v17026_v25  ;;  %v11230_v32 = vld [vmem:[%s16842_s11 + $0x2c0] sm:$0xf]  ;;  %v11808_v56 = vld [vmem:[%s16842_s11 + $0x360] sm:$0xf0] }
 0x132   : > { %v1300_v57 = vpop.f32.mrf.mxu2  ;;  %2529 = vmatpush.bf16.msra.mxu0 %v11039_v52  ;;  %v10942_v52 = vld [vmem:[%s16842_s11 + $0x80] sm:$0xf] }
 0x133   : > { %v1301_v59 = vadd.f32 %v1300_v57, %v17128_v19  ;;  %v11040_v57 = vld [vmem:[%s16842_s11 + $0x160] sm:$0xf0]  ;;  %v15189_v18 = vld [vmem:[%s16842_s11 + $0x5c] sm:$0xf0] }
 0x134   : > { %v1329_v61 = vpop.f32.mrf.mxu3  ;;  %v1244_v62 = vpop.f32.mrf.mxu0  ;;  %v11166_v22 = vld [vmem:[%s16842_s11 + $0x240] sm:$0xf] }
 0x135   : > { %v1245_v2 = vadd.f32 %v1244_v62, %v17124_v15  ;;  %v17240_v9 = vadd.f32 %v1329_v61, %v1301_v59  ;;  %v11295_v61 = vor.u32 %v15285_v53, %v11294_v49  ;;  %v11043_v62 = vor.u32 %v15217_v55, %v11040_v57  ;;  %v11232_v49 = vld [vmem:[%s16842_s11 + $0x2e0] sm:$0xf0]  ;;  %v15197_v53 = vld [vmem:[%s16842_s11 + $0x9c] sm:$0xf0] }
 0x136   : > { %v1273_v3 = vpop.f32.mrf.mxu1  ;;  %v11198_v55 = vld [vmem:[%s16842_s11 + $0x280] sm:$0xf] }
 0x137   : > { %19900 = vst [vmem:[#allocation18_spill] sm:$0xff] %v17240_v9  ;;  %v17244_v17 = vadd.f32 %v1273_v3, %v1245_v2  ;;  %v11299_v2 = vor.u32 %v15281_v63, %v11296_v0  ;;  %v11006_v3 = vld [vmem:[%s16842_s11 + $0x100] sm:$0xf]  ;;  %2542 = vmatpush.bf16.msra.mxu1 %v11295_v61  ;;  %2555 = vmatpush.bf16.msra.mxu2 %v11043_v62  ;;  %v15193_v61 = vld [vmem:[%s16842_s11 + $0x84] sm:$0xf]  ;;  %v17301_v63 = vperm.slane %v17121_v14, 2 }
 0x138   : > { %v11007_v6 = vor.u32 %v15213_v4, %v11006_v3  ;;  %v15261_v57 = vld [vmem:[%s16842_s11 + $0x29c] sm:$0xf0]  ;;  %v10944_v62 = vld [vmem:[%s16842_s11 + $0xa0] sm:$0xf0]  ;;  %v10943_v0 = vor.u32 %v15197_v53, %v10942_v52 }
 0x139   : > { %19901 = vst [vmem:[#allocation19_spill] sm:$0xff] %v17244_v17  ;;  %2568 = vmatpush.bf16.msra.mxu3 %v11299_v2  ;;  %v15257_v2 = vld [vmem:[%s16842_s11 + $0x284] sm:$0xf]  ;;  %v11199_v4 = vor.u32 %v15261_v57, %v11198_v55  ;;  %v10947_v5 = vor.u32 %v15193_v61, %v10944_v62  ;;  %v11110_v57 = vld [vmem:[%s16842_s11 + $0x1c8] sm:$0xf] }
 0x13a   : > { %v1302_v41 = vpop.f32.mrf.mxu2  ;;  %2530 = vmatpush.bf16.msra.mxu0 %v11007_v6  ;;  %19906 = vst [vmem:[#allocation24_spill] sm:$0xff] %v17301_v63  ;;  %v11200_v3 = vld [vmem:[%s16842_s11 + $0x2a0] sm:$0xf0]  ;;  %v15238_v62 = vld [vmem:[%s16842_s11 + $0x1e4] sm:$0xf0] }
 0x13b   : > { %v1303_v42 = vadd.f32 %v1302_v41, %v17128_v19  ;;  %v15269_v41 = vld [vmem:[%s16842_s11 + $0x2dc] sm:$0xf0]  ;;  %2543 = vmatpush.bf16.msra.mxu1 %v11263_v13  ;;  %2556 = vmatpush.bf16.msra.mxu2 %v11011_v16  ;;  %v11203_v7 = vor.u32 %v15257_v2, %v11200_v3  ;;  %v11136_v55 = vld [vmem:[%s16842_s11 + $0x220] sm:$0xf0]  ;;  %v15302_v2 = vld [vmem:[%s16842_s11 + $0x3e4] sm:$0xf0] }
 0x13c   : > { %v1331_v43 = vpop.f32.mrf.mxu3  ;;  %v1247_v46 = vpop.f32.mrf.mxu0  ;;  %v11231_v47 = vor.u32 %v15269_v41, %v11230_v32  ;;  %v10910_v16 = vld [vmem:[%s16842_s11 + $0x40] sm:$0xf]  ;;  %v17321_v41 = vperm.slane %v17121_v14, 3 }
 0x13d   : > { %v1248_v50 = vadd.f32 %v1247_v46, %v17124_v15  ;;  %v17262_v59 = vadd.f32 %v1331_v43, %v1303_v42  ;;  %v15201_v42 = vld [vmem:[%s16842_s11 + $0xc4] sm:$0xf]  ;;  %2569 = vmatpush.bf16.msra.mxu3 %v11267_v24  ;;  %v15245_v14 = vld [vmem:[%s16842_s11 + $0x21c] sm:$0xf0] }
 0x13e   : > { %v1276_v51 = vpop.f32.mrf.mxu1  ;;  %v10976_v43 = vld [vmem:[%s16842_s11 + $0xe0] sm:$0xf0]  ;;  %2531 = vmatpush.bf16.msra.mxu0 %v10975_v40  ;;  %19908 = vst [vmem:[#allocation26_spill] sm:$0xff] %v17321_v41  ;;  %v15365_v17 = vld [vmem:[%s16842_s11 + $0x1dc] sm:$0xf0] }
 0x13f   : > { %19902 = vst [vmem:[#allocation20_spill] sm:$0xff] %v17262_v59  ;;  %v17266_v1 = vadd.f32 %v1276_v51, %v1248_v50  ;;  %1478 = vmatmul.bf16.gmra.mxu0 %v17032_v34  ;;  %1536 = vmatmul.bf16.gmra.mxu2 %v17032_v34  ;;  %v10979_v48 = vor.u32 %v15201_v42, %v10976_v43  ;;  %v10878_v43 = vld [vmem:[%s16842_s11] sm:$0xf]  ;;  %v15296_v59 = vld [vmem:[%s16842_s11 + $0x3b4] sm:$0xf0] }
 0x140   : > { %2544 = vmatpush.bf16.msra.mxu1 %v11231_v47  ;;  %v15181_v47 = vld [vmem:[%s16842_s11 + $0x1c] sm:$0xf0] }
 0x141   : > { %19903 = vst [vmem:[#allocation21_spill] sm:$0xff] %v17266_v1  ;;  %1507 = vmatmul.bf16.gmra.mxu1 %v17034_v35  ;;  %1565 = vmatmul.bf16.gmra.mxu3 %v17034_v35  ;;  %v15357_v9 = vld [vmem:[%s16842_s11 + $0x19c] sm:$0xf0] }
 0x142   : > { %v1305_v23 = vpop.f32.mrf.mxu2  ;;  %2557 = vmatpush.bf16.msra.mxu2 %v10979_v48  ;;  %2532 = vmatpush.bf16.msra.mxu0 %v10943_v0  ;;  %v11134_v48 = vld [vmem:[%s16842_s11 + $0x200] sm:$0xf]  ;;  %v11366_v0 = vld [vmem:[%s16842_s11 + $0x3c8] sm:$0xf] }
 0x143   : > { %v1306_v26 = vadd.f32 %v1305_v23, %v17128_v19  ;;  %v11135_v52 = vor.u32 %v15245_v14, %v11134_v48 }
 0x144   : > { %v1334_v27 = vpop.f32.mrf.mxu3  ;;  %v1249_v28 = vpop.f32.mrf.mxu0  ;;  %2545 = vmatpush.bf16.msra.mxu1 %v11199_v4 }
 0x145   : > { %v1250_v37 = vadd.f32 %v1249_v28, %v17124_v15  ;;  %v17288_v46 = vadd.f32 %v1334_v27, %v1306_v26  ;;  %v15265_v15 = vld [vmem:[%s16842_s11 + $0x2c4] sm:$0xf]  ;;  %v10911_v26 = vor.u32 %v15189_v18, %v10910_v16  ;;  %v15253_v27 = vld [vmem:[%s16842_s11 + $0x25c] sm:$0xf0] }
 0x146   : > { %v1278_v39 = vpop.f32.mrf.mxu1  ;;  %v11235_v51 = vor.u32 %v15265_v15, %v11232_v49  ;;  %v15185_v28 = vld [vmem:[%s16842_s11 + $0x44] sm:$0xf]  ;;  %2558 = vmatpush.bf16.msra.mxu2 %v10947_v5  ;;  %v10879_v15 = vor.u32 %v15181_v47, %v10878_v43  ;;  %v15290_v43 = vld [vmem:[%s16842_s11 + $0x38c] sm:$0xf] }
 0x147   : > { %19904 = vst [vmem:[#allocation22_spill] sm:$0xff] %v17288_v46  ;;  %v17292_v50 = vadd.f32 %v1278_v39, %v1250_v37  ;;  %v10915_v32 = vor.u32 %v15185_v28, %v10912_v30  ;;  %v15249_v37 = vld [vmem:[%s16842_s11 + $0x244] sm:$0xf]  ;;  %2533 = vmatpush.bf16.msra.mxu0 %v10911_v26  ;;  %v15230_v26 = vld [vmem:[%s16842_s11 + $0x1a4] sm:$0xf0] }
 0x148   : > { %2570 = vmatpush.bf16.msra.mxu3 %v11235_v51  ;;  %v11168_v39 = vld [vmem:[%s16842_s11 + $0x260] sm:$0xf0]  ;;  %v11334_v30 = vld [vmem:[%s16842_s11 + $0x388] sm:$0xf]  ;;  %v11336_v47 = vld [vmem:[%s16842_s11 + $0x3a8] sm:$0xf0] }
 0x149   : > { %19905 = vst [vmem:[#allocation23_spill] sm:$0xff] %v17292_v50  ;;  %v11171_v42 = vor.u32 %v15249_v37, %v11168_v39  ;;  %v15177_v49 = vld [vmem:[%s16842_s11 + $0x4] sm:$0xf]  ;;  %v11339_v14 = vor.u32 %v15290_v43, %v11336_v47  ;;  %v15206_v43 = vld [vmem:[%s16842_s11 + $0xe4] sm:$0xf0] }
 0x14a   : > { %v1307_v6 = vpop.f32.mrf.mxu2  ;;  %v10880_v51 = vld [vmem:[%s16842_s11 + $0x20] sm:$0xf0]  ;;  %2559 = vmatpush.bf16.msra.mxu2 %v10915_v32  ;;  %v15226_v32 = vld [vmem:[%s16842_s11 + $0x18c] sm:$0xf]  ;;  %v11238_v47 = vld [vmem:[%s16842_s11 + $0x2c8] sm:$0xf] }
 0x14b   : > { %v1308_v11 = vadd.f32 %v1307_v6, %v17128_v19  ;;  %v11167_v19 = vor.u32 %v15253_v27, %v11166_v22  ;;  %v10883_v53 = vor.u32 %v15177_v49, %v10880_v51  ;;  %v11111_v6 = vor.u32 %v15238_v62, %v11110_v57  ;;  %2534 = vmatpush.bf16.msra.mxu0 %v10879_v15  ;;  %v11046_v49 = vld [vmem:[%s16842_s11 + $0x148] sm:$0xf]  ;;  %v11048_v57 = vld [vmem:[%s16842_s11 + $0x168] sm:$0xf0]  ;;  %v11152_v46 = vld [vmem:[%s16842_s11 + $0x230] sm:$0xf0] }
 0x14c   : > { %v1336_v12 = vpop.f32.mrf.mxu3  ;;  %v1348_v13 = vpop.f32.mrf.mxu0  ;;  %2571 = vmatpush.bf16.msra.mxu3 %v11203_v7  ;;  %v11367_v7 = vor.u32 %v15302_v2, %v11366_v0  ;;  %v15222_v51 = vld [vmem:[%s16842_s11 + $0x164] sm:$0xf0]  ;;  %v15282_v0 = vld [vmem:[%s16842_s11 + $0x34c] sm:$0xf] }
 0x14d   : > { %v1349_v23 = vadd.f32 %v1348_v13, %v17301_v63  ;;  %v17313_v31 = vadd.f32 %v1336_v12, %v1308_v11  ;;  %2546 = vmatpush.bf16.msra.mxu1 %v11167_v19  ;;  %v15234_v11 = vld [vmem:[%s16842_s11 + $0x1cc] sm:$0xf]  ;;  %v15294_v19 = vld [vmem:[%s16842_s11 + $0x3a4] sm:$0xf0] }
 0x14e   : > { %v1377_v24 = vpop.f32.mrf.mxu1  ;;  %v11112_v12 = vld [vmem:[%s16842_s11 + $0x1e8] sm:$0xf0]  ;;  %2560 = vmatpush.bf16.msra.mxu2 %v10883_v53  ;;  %v11335_v48 = vor.u32 %v15294_v19, %v11334_v30 }
 0x14f   : > { %19907 = vst [vmem:[#allocation25_spill] sm:$0xff] %v17313_v31  ;;  %v17317_v40 = vadd.f32 %v1377_v24, %v1349_v23  ;;  %1579 = vmatmul.bf16.vlgmr.msrb.gmra.mxu0 %v16944_v44  ;;  %1637 = vmatmul.bf16.vlgmr.msrb.gmra.mxu2 %v16944_v44  ;;  %v15241_v44 = vld [vmem:[%s16842_s11 + $0x204] sm:$0xf]  ;;  %v15298_v13 = vld [vmem:[%s16842_s11 + $0x3cc] sm:$0xf]  ;;  %v11115_v22 = vor.u32 %v15234_v11, %v11112_v12 }
 0x150   : > { %2572 = vmatpush.bf16.msra.mxu3 %v11171_v42  ;;  %v11368_v23 = vld [vmem:[%s16842_s11 + $0x3e8] sm:$0xf0]  ;;  %v11078_v24 = vld [vmem:[%s16842_s11 + $0x188] sm:$0xf]  ;;  %2579 = vmatpush.bf16.msrb.mxu0 %v11111_v6  ;;  %v15211_v31 = vld [vmem:[%s16842_s11 + $0x114] sm:$0xf] }
 0x151   : > { %1608 = vmatmul.bf16.vlgmr.msrb.gmra.mxu1 %v16946_v45  ;;  %1666 = vmatmul.bf16.vlgmr.msrb.gmra.mxu3 %v16946_v45  ;;  %v11139_v45 = vor.u32 %v15241_v44, %v11136_v55  ;;  %v11371_v28 = vor.u32 %v15298_v13, %v11368_v23  ;;  %v11079_v39 = vor.u32 %v15230_v26, %v11078_v24  ;;  %v11080_v42 = vld [vmem:[%s16842_s11 + $0x1a8] sm:$0xf0]  ;;  %v15286_v44 = vld [vmem:[%s16842_s11 + $0x364] sm:$0xf0] }
 0x152   : > { %v1406_v61 = vpop.f32.mrf.mxu2  ;;  %2547 = vmatpush.bf16.msra.mxu1 %v11135_v52  ;;  %2605 = vmatpush.bf16.msrb.mxu2 %v11115_v22  ;;  %v11083_v15 = vor.u32 %v15226_v32, %v11080_v42  ;;  %v11302_v52 = vld [vmem:[%s16842_s11 + $0x348] sm:$0xf]  ;;  %v15218_v55 = vld [vmem:[%s16842_s11 + $0x14c] sm:$0xf] }
 0x153   : > { %v1407_v3 = vadd.f32 %v1406_v61, %v17321_v41  ;;  %v11304_v2 = vld [vmem:[%s16842_s11 + $0x368] sm:$0xf0]  ;;  %v11051_v11 = vor.u32 %v15218_v55, %v11048_v57  ;;  %v11014_v12 = vld [vmem:[%s16842_s11 + $0x108] sm:$0xf] }
 0x154   : > { %v1435_v4 = vpop.f32.mrf.mxu3  ;;  %v1350_v5 = vpop.f32.mrf.mxu0  ;;  %2573 = vmatpush.bf16.msra.mxu3 %v11139_v45  ;;  %2580 = vmatpush.bf16.msrb.mxu0 %v11079_v39  ;;  %v15214_v13 = vld [vmem:[%s16842_s11 + $0x124] sm:$0xf0]  ;;  %v11307_v22 = vor.u32 %v15282_v0, %v11304_v2  ;;  %v15210_v24 = vld [vmem:[%s16842_s11 + $0x10c] sm:$0xf] }
 0x155   : > { %v1351_v16 = vadd.f32 %v1350_v5, %v17301_v63  ;;  %v17346_v27 = vadd.f32 %v1435_v4, %v1407_v3  ;;  %v11047_v5 = vor.u32 %v15222_v51, %v11046_v49  ;;  %v15278_v23 = vld [vmem:[%s16842_s11 + $0x324] sm:$0xf0]  ;;  %v11016_v26 = vld [vmem:[%s16842_s11 + $0x128] sm:$0xf0]  ;;  %v11015_v19 = vor.u32 %v15214_v13, %v11014_v12 }
 0x156   : > { %v1379_v18 = vpop.f32.mrf.mxu1  ;;  %2592 = vmatpush.bf16.msrb.mxu1 %v11367_v7  ;;  %2606 = vmatpush.bf16.msrb.mxu2 %v11083_v15  ;;  %v11303_v7 = vor.u32 %v15286_v44, %v11302_v52  ;;  %v11272_v30 = vld [vmem:[%s16842_s11 + $0x328] sm:$0xf0]  ;;  %v11019_v39 = vor.u32 %v15210_v24, %v11016_v26  ;;  %v10982_v42 = vld [vmem:[%s16842_s11 + $0xc8] sm:$0xf] }
 0x157   : > { %v17351_v37 = vadd.f32 %v1379_v18, %v1351_v16  ;;  %v11270_v16 = vld [vmem:[%s16842_s11 + $0x308] sm:$0xf]  ;;  %v10984_v49 = vld [vmem:[%s16842_s11 + $0xe8] sm:$0xf0] }
 0x158   : > { %2618 = vmatpush.bf16.msrb.mxu3 %v11371_v28  ;;  %v15274_v28 = vld [vmem:[%s16842_s11 + $0x30c] sm:$0xf]  ;;  %2581 = vmatpush.bf16.msrb.mxu0 %v11047_v5  ;;  %v11271_v32 = vor.u32 %v15278_v23, %v11270_v16  ;;  %v15270_v15 = vld [vmem:[%s16842_s11 + $0x2e4] sm:$0xf0] }
 0x159   : > { %v11240_v44 = vld [vmem:[%s16842_s11 + $0x2e8] sm:$0xf0]  ;;  %v10950_v2 = vld [vmem:[%s16842_s11 + $0x88] sm:$0xf] }
 0x15a   : > { %v1408_v53 = vpop.f32.mrf.mxu2  ;;  %2593 = vmatpush.bf16.msrb.mxu1 %v11335_v48  ;;  %2607 = vmatpush.bf16.msrb.mxu2 %v11051_v11  ;;  %v15262_v11 = vld [vmem:[%s16842_s11 + $0x2a4] sm:$0xf0]  ;;  %v15194_v12 = vld [vmem:[%s16842_s11 + $0x8c] sm:$0xf] }
 0x15b   : > { %v1409_v61 = vadd.f32 %v1408_v53, %v17321_v41  ;;  %v15266_v53 = vld [vmem:[%s16842_s11 + $0x2cc] sm:$0xf] }
 0x15c   : > { %v1437_v45 = vpop.f32.mrf.mxu3  ;;  %v1353_v62 = vpop.f32.mrf.mxu0  ;;  %2619 = vmatpush.bf16.msrb.mxu3 %v11339_v14  ;;  %v15202_v14 = vld [vmem:[%s16842_s11 + $0xcc] sm:$0xf]  ;;  %2582 = vmatpush.bf16.msrb.mxu0 %v11015_v19  ;;  %v11174_v19 = vld [vmem:[%s16842_s11 + $0x248] sm:$0xf] }
 0x15d   : > { %v1354_v3 = vadd.f32 %v1353_v62, %v17301_v63  ;;  %v17366_v6 = vadd.f32 %v1437_v45, %v1409_v61  ;;  %v10983_v61 = vor.u32 %v15206_v43, %v10982_v42  ;;  %v11239_v62 = vor.u32 %v15270_v15, %v11238_v47  ;;  %v10952_v13 = vld [vmem:[%s16842_s11 + $0xa8] sm:$0xf0]  ;;  %v15254_v42 = vld [vmem:[%s16842_s11 + $0x264] sm:$0xf0] }
 0x15e   : > { %v1382_v4 = vpop.f32.mrf.mxu1  ;;  %2594 = vmatpush.bf16.msrb.mxu1 %v11303_v7  ;;  %2608 = vmatpush.bf16.msrb.mxu2 %v11019_v39  ;;  %v10987_v0 = vor.u32 %v15202_v14, %v10984_v49  ;;  %v11243_v7 = vor.u32 %v15266_v53, %v11240_v44  ;;  %v15258_v16 = vld [vmem:[%s16842_s11 + $0x28c] sm:$0xf]  ;;  %v10955_v26 = vor.u32 %v15194_v12, %v10952_v13 }
 0x15f   : > { %v17371_v18 = vadd.f32 %v1382_v4, %v1354_v3  ;;  %1584 = vmatmul.bf16.gmra.mxu0 %v16982_v29  ;;  %1642 = vmatmul.bf16.gmra.mxu2 %v16982_v29  ;;  %v11275_v29 = vor.u32 %v15274_v28, %v11272_v30  ;;  %v15198_v3 = vld [vmem:[%s16842_s11 + $0xa4] sm:$0xf0]  ;;  %v15186_v43 = vld [vmem:[%s16842_s11 + $0x4c] sm:$0xf]  ;;  %v11175_v44 = vor.u32 %v15254_v42, %v11174_v19 }
 0x160   : > { %2620 = vmatpush.bf16.msrb.mxu3 %v11307_v22  ;;  %v11206_v4 = vld [vmem:[%s16842_s11 + $0x288] sm:$0xf]  ;;  %v11208_v22 = vld [vmem:[%s16842_s11 + $0x2a8] sm:$0xf0]  ;;  %2583 = vmatpush.bf16.msrb.mxu0 %v10983_v61  ;;  %v10951_v23 = vor.u32 %v15198_v3, %v10950_v2 }
 0x161   : > { %1613 = vmatmul.bf16.gmra.mxu1 %v16986_v33  ;;  %1671 = vmatmul.bf16.gmra.mxu3 %v16986_v33  ;;  %v11207_v24 = vor.u32 %v15262_v11, %v11206_v4  ;;  %v10918_v28 = vld [vmem:[%s16842_s11 + $0x48] sm:$0xf]  ;;  %v11211_v39 = vor.u32 %v15258_v16, %v11208_v22  ;;  %v10920_v47 = vld [vmem:[%s16842_s11 + $0x68] sm:$0xf0] }
 0x162   : > { %v1411_v48 = vpop.f32.mrf.mxu2  ;;  %2595 = vmatpush.bf16.msrb.mxu1 %v11271_v32  ;;  %2609 = vmatpush.bf16.msrb.mxu2 %v10987_v0  ;;  %v15190_v30 = vld [vmem:[%s16842_s11 + $0x64] sm:$0xf0]  ;;  %v15250_v14 = vld [vmem:[%s16842_s11 + $0x24c] sm:$0xf] }
 0x163   : > { %v1412_v33 = vadd.f32 %v1411_v48, %v17321_v41  ;;  %v11176_v49 = vld [vmem:[%s16842_s11 + $0x268] sm:$0xf0]  ;;  %v15182_v61 = vld [vmem:[%s16842_s11 + $0x24] sm:$0xf0] }
 0x164   : > { %v1440_v51 = vpop.f32.mrf.mxu3  ;;  %v1355_v52 = vpop.f32.mrf.mxu0  ;;  %2621 = vmatpush.bf16.msrb.mxu3 %v11275_v29  ;;  %2584 = vmatpush.bf16.msrb.mxu0 %v10951_v23  ;;  %v11179_v2 = vor.u32 %v15250_v14, %v11176_v49  ;;  %v15246_v3 = vld [vmem:[%s16842_s11 + $0x224] sm:$0xf0]  ;;  %v15178_v4 = vld [vmem:[%s16842_s11 + $0xc] sm:$0xf] }
 0x165   : > { %v1356_v55 = vadd.f32 %v1355_v52, %v17301_v63  ;;  %v17392_v45 = vadd.f32 %v1440_v51, %v1412_v33  ;;  %v10919_v52 = vor.u32 %v15190_v30, %v10918_v28  ;;  %v15242_v11 = vld [vmem:[%s16842_s11 + $0x20c] sm:$0xf] }
 0x166   : > { %v1384_v57 = vpop.f32.mrf.mxu1  ;;  %2596 = vmatpush.bf16.msrb.mxu1 %v11239_v62  ;;  %2610 = vmatpush.bf16.msrb.mxu2 %v10955_v26  ;;  %v11142_v62 = vld [vmem:[%s16842_s11 + $0x208] sm:$0xf]  ;;  %v11144_v12 = vld [vmem:[%s16842_s11 + $0x228] sm:$0xf0] }
 0x167   : > { %v17397_v5 = vadd.f32 %v1384_v57, %v1356_v55  ;;  %v10923_v55 = vor.u32 %v15186_v43, %v10920_v47  ;;  %v10886_v57 = vld [vmem:[%s16842_s11 + $0x8] sm:$0xf]  ;;  %v11143_v16 = vor.u32 %v15246_v3, %v11142_v62  ;;  %v11374_v62 = vld [vmem:[%s16842_s11 + $0x3d0] sm:$0xf] }
 0x168   : > { %2622 = vmatpush.bf16.msrb.mxu3 %v11243_v7  ;;  %v10888_v7 = vld [vmem:[%s16842_s11 + $0x28] sm:$0xf0]  ;;  %2585 = vmatpush.bf16.msrb.mxu0 %v10919_v52  ;;  %v10887_v13 = vor.u32 %v15182_v61, %v10886_v57  ;;  %v15303_v3 = vld [vmem:[%s16842_s11 + $0x3ec] sm:$0xf0] }
 0x169   : > { %v10891_v22 = vor.u32 %v15178_v4, %v10888_v7  ;;  %v17454_v57 = vld [vmem:[%s16848_s15] sm:$0xff]  ;;  %v15235_v4 = vld [vmem:[%s16842_s11 + $0x1d4] sm:$0xf] }
 0x16a   : > { %v1413_v32 = vpop.f32.mrf.mxu2  ;;  %2597 = vmatpush.bf16.msrb.mxu1 %v11207_v24  ;;  %2611 = vmatpush.bf16.msrb.mxu2 %v10923_v55  ;;  %v11147_v24 = vor.u32 %v15242_v11, %v11144_v12  ;;  %v17457_v61 = vperm.slane %v17454_v57, 4  ;;  %v11120_v7 = vld [vmem:[%s16842_s11 + $0x1f0] sm:$0xf0] }
 0x16b   : > { %v1414_v48 = vadd.f32 %v1413_v32, %v17321_v41 }
 0x16c   : > { %v1442_v29 = vpop.f32.mrf.mxu3  ;;  %v1358_v15 = vpop.f32.mrf.mxu0  ;;  %2623 = vmatpush.bf16.msrb.mxu3 %v11211_v39  ;;  %2586 = vmatpush.bf16.msrb.mxu0 %v10887_v13  ;;  %v15299_v13 = vld [vmem:[%s16842_s11 + $0x3d4] sm:$0xf] }
 0x16d   : > { %v1359_v33 = vadd.f32 %v1358_v15, %v17301_v63  ;;  %v17414_v53 = vadd.f32 %v1442_v29, %v1414_v48 }
 0x16e   : > { %v1387_v51 = vpop.f32.mrf.mxu1  ;;  %2598 = vmatpush.bf16.msrb.mxu1 %v11175_v44  ;;  %2612 = vmatpush.bf16.msrb.mxu2 %v10891_v22 }
 0x16f   : > { %v17419_v0 = vadd.f32 %v1387_v51, %v1359_v33  ;;  %1589 = vmatmul.bf16.gmra.mxu0 %v17022_v21  ;;  %1647 = vmatmul.bf16.gmra.mxu2 %v17022_v21 }
 0x170   : > { %2624 = vmatpush.bf16.msrb.mxu3 %v11179_v2 }
 0x171   : > { %19909 = vst [vmem:[#allocation27_spill] sm:$0xff] %v17419_v0  ;;  %1618 = vmatmul.bf16.gmra.mxu1 %v17026_v25  ;;  %1676 = vmatmul.bf16.gmra.mxu3 %v17026_v25  ;;  %v15349_v0 = vld [vmem:[%s16842_s11 + $0x15c] sm:$0xf0] }
 0x172   : > { %v1416_v23 = vpop.f32.mrf.mxu2  ;;  %2599 = vmatpush.bf16.msrb.mxu1 %v11143_v16  ;;  %v11376_v16 = vld [vmem:[%s16842_s11 + $0x3f0] sm:$0xf0] }
 0x173   : > { %v1417_v26 = vadd.f32 %v1416_v23, %v17321_v41 }
 0x174   : > { %v1445_v28 = vpop.f32.mrf.mxu3  ;;  %v1360_v30 = vpop.f32.mrf.mxu0  ;;  %2625 = vmatpush.bf16.msrb.mxu3 %v11147_v24 }
 0x175   : > { %v1361_v19 = vadd.f32 %v1360_v30, %v17301_v63  ;;  %v17432_v32 = vadd.f32 %v1445_v28, %v1417_v26  ;;  %v11375_v26 = vor.u32 %v15303_v3, %v11374_v62  ;;  %v11123_v28 = vor.u32 %v15235_v4, %v11120_v7  ;;  %v11086_v30 = vld [vmem:[%s16842_s11 + $0x190] sm:$0xf] }
 0x176   : > { %v1389_v21 = vpop.f32.mrf.mxu1  ;;  %v11054_v3 = vld [vmem:[%s16842_s11 + $0x150] sm:$0xf] }
 0x177   : > { %19910 = vst [vmem:[#allocation28_spill] sm:$0xff] %v17432_v32  ;;  %v17434_v25 = vadd.f32 %v1389_v21, %v1361_v19  ;;  %v15231_v19 = vld [vmem:[%s16842_s11 + $0x1ac] sm:$0xf0] }
 0x178   : > { %v11342_v21 = vld [vmem:[%s16842_s11 + $0x390] sm:$0xf] }
 0x179   : > { %19911 = vst [vmem:[#allocation29_spill] sm:$0xff] %v17434_v25  ;;  %v15223_v4 = vld [vmem:[%s16842_s11 + $0x16c] sm:$0xf0]  ;;  %v10936_v25 = vld [vmem:[%s16842_s11 + $0x78] sm:$0xf0] }
 0x17a   : > { %v1418_v39 = vpop.f32.mrf.mxu2  ;;  %v11310_v7 = vld [vmem:[%s16842_s11 + $0x350] sm:$0xf] }
 0x17b   : > { %v1419_v42 = vadd.f32 %v1418_v39, %v17321_v41 }
 0x17c   : > { %v1447_v43 = vpop.f32.mrf.mxu3  ;;  %v1363_v47 = vpop.f32.mrf.mxu0 }
 0x17d   : > { %v1364_v48 = vadd.f32 %v1363_v47, %v17301_v63  ;;  %v17438_v15 = vadd.f32 %v1447_v43, %v1419_v42  ;;  %v19884_v42 = vmov 0   ;;  %v11379_v43 = vor.u32 %v15299_v13, %v11376_v16  ;;  %v15295_v47 = vld [vmem:[%s16842_s11 + $0x3ac] sm:$0xf0] }
 0x17e   : > { %v1392_v29 = vpop.f32.mrf.mxu1  ;;  %v15287_v16 = vld [vmem:[%s16842_s11 + $0x36c] sm:$0xf0] }
 0x17f   : > { %19912 = vst [vmem:[#allocation30_spill] sm:$0xff] %v17438_v15  ;;  %v17440_v14 = vadd.f32 %v1392_v29, %v1364_v48  ;;  %1594 = vmatmul.bf16.gmra.mxu0 %v17032_v34  ;;  %1652 = vmatmul.bf16.gmra.mxu2 %v17032_v34  ;;  %v11118_v34 = vld [vmem:[%s16842_s11 + $0x1d0] sm:$0xf]  ;;  %v15227_v48 = vld [vmem:[%s16842_s11 + $0x194] sm:$0xf] }
 0x180   : > { %v11088_v29 = vld [vmem:[%s16842_s11 + $0x1b0] sm:$0xf0]  ;;  %v11256_v15 = vld [vmem:[%s16842_s11 + $0x2f8] sm:$0xf0] }
 0x181   : > { %19913 = vst [vmem:[#allocation31_spill] sm:$0xff] %v17440_v14  ;;  %1623 = vmatmul.bf16.gmra.mxu1 %v17034_v35  ;;  %1681 = vmatmul.bf16.gmra.mxu3 %v17034_v35  ;;  %v15239_v35 = vld [vmem:[%s16842_s11 + $0x1ec] sm:$0xf0]  ;;  %v11091_v62 = vor.u32 %v15227_v48, %v11088_v29  ;;  %v11311_v48 = vor.u32 %v15287_v16, %v11310_v7 }
 0x182   : > { %v1421_v49 = vpop.f32.mrf.mxu2  ;;  %v11119_v24 = vor.u32 %v15239_v35, %v11118_v34  ;;  %v11087_v34 = vor.u32 %v15231_v19, %v11086_v30  ;;  %v11343_v35 = vor.u32 %v15295_v47, %v11342_v21  ;;  %v11312_v19 = vld [vmem:[%s16842_s11 + $0x370] sm:$0xf0]  ;;  %v10990_v16 = vld [vmem:[%s16842_s11 + $0xd0] sm:$0xf] }
 0x183   : > { %v1422_v33 = vadd.f32 %v1421_v49, %v17321_v41  ;;  %v17484_v49 = vperm.slane %v17454_v57, 5  ;;  %v15187_v41 = vld [vmem:[%s16842_s11 + $0x54] sm:$0xf] }
 0x184   : > { %v1450_v51 = vpop.f32.mrf.mxu3  ;;  %v17447_v52 = vpop.f32.mrf.mxu0 }
 0x185   : > { %19914 = vst [vmem:[#allocation32_spill] sm:$0xff] %v17447_v52  ;;  %v17451_v55 = vadd.f32 %v1450_v51, %v1422_v33  ;;  %v15291_v33 = vld [vmem:[%s16842_s11 + $0x394] sm:$0xf] }
 0x186   : > { %v17449_v44 = vpop.f32.mrf.mxu1  ;;  %v11344_v51 = vld [vmem:[%s16842_s11 + $0x3b0] sm:$0xf0] }
 0x187   : > { %19915 = vst [vmem:[#allocation33_spill] sm:$0xff] %v17449_v44  ;;  %v11347_v13 = vor.u32 %v15291_v33, %v11344_v51  ;;  %v11022_v33 = vld [vmem:[%s16842_s11 + $0x110] sm:$0xf]  ;;  %v10928_v44 = vld [vmem:[%s16842_s11 + $0x70] sm:$0xf0] }
 0x188   : > { %19916 = vst [vmem:[#allocation34_spill] sm:$0xff] %v17451_v55  ;;  %v15215_v51 = vld [vmem:[%s16842_s11 + $0x12c] sm:$0xf0]  ;;  %v15179_v52 = vld [vmem:[%s16842_s11 + $0x14] sm:$0xf] }
 0x189   : > { %v11126_v55 = vld [vmem:[%s16842_s11 + $0x1d8] sm:$0xf] }
 0x18a   : > { %v17462_v2 = vpop.f32.mrf.mxu2 }
 0x18b   : > { %19917 = vst [vmem:[#allocation35_spill] sm:$0xff] %v17462_v2  ;;  %v19919_v2 = vmov 0  }
 0x18c   : > { %v17467_v11 = vpop.f32.mrf.mxu3  ;;  %v1464_v12 = vpop.f32.mrf.mxu0 }
 0x18d   : > { %19918 = vst [vmem:[#allocation36_spill] sm:$0xff] %v17467_v11  ;;  %v1465_v22 = vadd.f32 %v1464_v12, %v17457_v61  ;;  %v11024_v11 = vld [vmem:[%s16842_s11 + $0x130] sm:$0xf0] }
 0x18e   : > { %v1493_v23 = vpop.f32.mrf.mxu1  ;;  %v11027_v7 = vor.u32 %v15211_v31, %v11024_v11 }
 0x18f   : > { %v17475_v39 = vadd.f32 %v1493_v23, %v1465_v22  ;;  %2535 = vmatmul.bf16.vlgmr.msra.gmra.mxu0 %v19884_v42  ;;  %2561 = vmatmul.bf16.vlgmr.msra.gmra.mxu2 %v19884_v42  ;;  %v15219_v22 = vld [vmem:[%s16842_s11 + $0x154] sm:$0xf] }
 0x190   : > { %2631 = vmatpush.bf16.msra.mxu0 %v11119_v24  ;;  %2657 = vmatpush.bf16.msra.mxu2 %v11123_v28  ;;  %v11056_v23 = vld [vmem:[%s16842_s11 + $0x170] sm:$0xf0] }
 0x191   : > { %2548 = vmatmul.bf16.vlgmr.msra.gmra.mxu1 %v19884_v42  ;;  %2574 = vmatmul.bf16.vlgmr.msra.gmra.mxu3 %v19884_v42  ;;  %v15283_v28 = vld [vmem:[%s16842_s11 + $0x354] sm:$0xf]  ;;  %v11059_v29 = vor.u32 %v15219_v22, %v11056_v23  ;;  %v15207_v22 = vld [vmem:[%s16842_s11 + $0xec] sm:$0xf0] }
 0x192   : > { %2644 = vmatpush.bf16.msra.mxu1 %v11375_v26  ;;  %2670 = vmatpush.bf16.msra.mxu3 %v11379_v43  ;;  %v1522_v12 = vpop.f32.mrf.mxu2  ;;  %v11055_v43 = vor.u32 %v15223_v4, %v11054_v3  ;;  %v11315_v42 = vor.u32 %v15283_v28, %v11312_v19  ;;  %v15275_v3 = vld [vmem:[%s16842_s11 + $0x314] sm:$0xf] }
 0x193   : > { %v1523_v24 = vadd.f32 %v1522_v12, %v17484_v49  ;;  %v11278_v12 = vld [vmem:[%s16842_s11 + $0x310] sm:$0xf]  ;;  %v11280_v4 = vld [vmem:[%s16842_s11 + $0x330] sm:$0xf0] }
 0x194   : > { %v1551_v26 = vpop.f32.mrf.mxu3  ;;  %v17496_v30 = vpop.f32.mrf.mxu0  ;;  %2632 = vmatpush.bf16.msra.mxu0 %v11087_v34  ;;  %2658 = vmatpush.bf16.msra.mxu2 %v11091_v62  ;;  %v15279_v34 = vld [vmem:[%s16842_s11 + $0x32c] sm:$0xf0]  ;;  %v15203_v28 = vld [vmem:[%s16842_s11 + $0xd4] sm:$0xf] }
 0x195   : > { %v17502_v47 = vadd.f32 %v1551_v26, %v1523_v24  ;;  %v11279_v62 = vor.u32 %v15279_v34, %v11278_v12  ;;  %v11283_v24 = vor.u32 %v15275_v3, %v11280_v4  ;;  %v15271_v26 = vld [vmem:[%s16842_s11 + $0x2ec] sm:$0xf0]  ;;  %v10992_v19 = vld [vmem:[%s16842_s11 + $0xf0] sm:$0xf0] }
 0x196   : > { %v17500_v21 = vpop.f32.mrf.mxu1  ;;  %2645 = vmatpush.bf16.msra.mxu1 %v11343_v35  ;;  %2671 = vmatpush.bf16.msra.mxu3 %v11347_v13  ;;  %v11023_v35 = vor.u32 %v15215_v51, %v11022_v33  ;;  %v11246_v13 = vld [vmem:[%s16842_s11 + $0x2d0] sm:$0xf]  ;;  %v15267_v33 = vld [vmem:[%s16842_s11 + $0x2d4] sm:$0xf]  ;;  %v10995_v12 = vor.u32 %v15203_v28, %v10992_v19 }
 0x197   : > { %v11247_v51 = vor.u32 %v15271_v26, %v11246_v13  ;;  %v10958_v34 = vld [vmem:[%s16842_s11 + $0x90] sm:$0xf] }
 0x198   : > { %2633 = vmatpush.bf16.msra.mxu0 %v11055_v43  ;;  %2659 = vmatpush.bf16.msra.mxu2 %v11059_v29  ;;  %v11248_v29 = vld [vmem:[%s16842_s11 + $0x2f0] sm:$0xf0]  ;;  %v15199_v3 = vld [vmem:[%s16842_s11 + $0xac] sm:$0xf0] }
 0x199   : > { %v11214_v4 = vld [vmem:[%s16842_s11 + $0x290] sm:$0xf]  ;;  %v10959_v13 = vor.u32 %v15199_v3, %v10958_v34  ;;  %v15251_v34 = vld [vmem:[%s16842_s11 + $0x254] sm:$0xf] }
 0x19a   : > { %2646 = vmatpush.bf16.msra.mxu1 %v11311_v48  ;;  %2672 = vmatpush.bf16.msra.mxu3 %v11315_v42  ;;  %v17515_v23 = vpop.f32.mrf.mxu2  ;;  %v10991_v42 = vor.u32 %v15207_v22, %v10990_v16  ;;  %v15195_v16 = vld [vmem:[%s16842_s11 + $0x94] sm:$0xf]  ;;  %v10926_v28 = vld [vmem:[%s16842_s11 + $0x50] sm:$0xf] }
 0x19b   : > { %v11216_v22 = vld [vmem:[%s16842_s11 + $0x2b0] sm:$0xf0]  ;;  %v15191_v19 = vld [vmem:[%s16842_s11 + $0x6c] sm:$0xf0] }
 0x19c   : > { %v17520_v43 = vpop.f32.mrf.mxu3  ;;  %v1469_v48 = vpop.f32.mrf.mxu0  ;;  %2634 = vmatpush.bf16.msra.mxu0 %v11023_v35  ;;  %2660 = vmatpush.bf16.msra.mxu2 %v11027_v7  ;;  %v11251_v35 = vor.u32 %v15267_v33, %v11248_v29  ;;  %v15259_v7 = vld [vmem:[%s16842_s11 + $0x294] sm:$0xf]  ;;  %v11182_v33 = vld [vmem:[%s16842_s11 + $0x250] sm:$0xf] }
 0x19d   : > { %v1470_v31 = vadd.f32 %v1469_v48, %v17457_v61  ;;  %v15263_v48 = vld [vmem:[%s16842_s11 + $0x2ac] sm:$0xf0]  ;;  %v11184_v3 = vld [vmem:[%s16842_s11 + $0x270] sm:$0xf0] }
 0x19e   : > { %v1498_v11 = vpop.f32.mrf.mxu1  ;;  %2647 = vmatpush.bf16.msra.mxu1 %v11279_v62  ;;  %2673 = vmatpush.bf16.msra.mxu3 %v11283_v24  ;;  %v10960_v62 = vld [vmem:[%s16842_s11 + $0xb0] sm:$0xf0]  ;;  %v11215_v24 = vor.u32 %v15263_v48, %v11214_v4  ;;  %v10894_v48 = vld [vmem:[%s16842_s11 + $0x10] sm:$0xf]  ;;  %v11187_v63 = vor.u32 %v15251_v34, %v11184_v3  ;;  %v11384_v34 = vld [vmem:[%s16842_s11 + $0x3f8] sm:$0xf0] }
 0x19f   : > { %v17528_v50 = vadd.f32 %v1498_v11, %v1470_v31  ;;  %2587 = vmatmul.bf16.vlgmr.msrb.gmra.mxu0 %v19919_v2  ;;  %2613 = vmatmul.bf16.vlgmr.msrb.gmra.mxu2 %v19919_v2  ;;  %v10963_v26 = vor.u32 %v15195_v16, %v10960_v62  ;;  %v11219_v31 = vor.u32 %v15259_v7, %v11216_v22  ;;  %v15255_v11 = vld [vmem:[%s16842_s11 + $0x26c] sm:$0xf0] }
 0x1a0   : > { %2635 = vmatpush.bf16.msra.mxu0 %v10991_v42  ;;  %2661 = vmatpush.bf16.msra.mxu2 %v10995_v12  ;;  %v15183_v16 = vld [vmem:[%s16842_s11 + $0x2c] sm:$0xf0]  ;;  %v11183_v7 = vor.u32 %v15255_v11, %v11182_v33  ;;  %v10931_v22 = vor.u32 %v15187_v41, %v10928_v44  ;;  %v15236_v33 = vld [vmem:[%s16842_s11 + $0x1dc] sm:$0xf] }
 0x1a1   : > { %2600 = vmatmul.bf16.vlgmr.msrb.gmra.mxu1 %v19919_v2  ;;  %2626 = vmatmul.bf16.vlgmr.msrb.gmra.mxu3 %v19919_v2  ;;  %v11128_v41 = vld [vmem:[%s16842_s11 + $0x1f8] sm:$0xf0] }
 0x1a2   : > { %2648 = vmatpush.bf16.msra.mxu1 %v11247_v51  ;;  %2674 = vmatpush.bf16.msra.mxu3 %v11251_v35  ;;  %v1527_v29 = vpop.f32.mrf.mxu2  ;;  %v10927_v35 = vor.u32 %v15191_v19, %v10926_v28  ;;  %v10896_v28 = vld [vmem:[%s16842_s11 + $0x30] sm:$0xf0]  ;;  %v15300_v11 = vld [vmem:[%s16842_s11 + $0x3dc] sm:$0xf]  ;;  %v11131_v1 = vor.u32 %v15236_v33, %v11128_v41  ;;  %v11062_v33 = vld [vmem:[%s16842_s11 + $0x158] sm:$0xf] }
 0x1a3   : > { %v1528_v42 = vadd.f32 %v1527_v29, %v17484_v49  ;;  %v15247_v29 = vld [vmem:[%s16842_s11 + $0x22c] sm:$0xf0]  ;;  %v15243_v19 = vld [vmem:[%s16842_s11 + $0x214] sm:$0xf]  ;;  %v15224_v41 = vld [vmem:[%s16842_s11 + $0x174] sm:$0xf0] }
 0x1a4   : > { %v1556_v51 = vpop.f32.mrf.mxu3  ;;  %v17546_v12 = vpop.f32.mrf.mxu0  ;;  %2636 = vmatpush.bf16.msra.mxu0 %v10959_v13  ;;  %2662 = vmatpush.bf16.msra.mxu2 %v10963_v26  ;;  %v11150_v13 = vld [vmem:[%s16842_s11 + $0x210] sm:$0xf]  ;;  %v15304_v26 = vld [vmem:[%s16842_s11 + $0x3f4] sm:$0xf0] }
 0x1a5   : > { %v17554_v62 = vadd.f32 %v1556_v51, %v1528_v42  ;;  %v15240_v42 = vld [vmem:[%s16842_s11 + $0x1f4] sm:$0xf0]  ;;  %v11151_v44 = vor.u32 %v15247_v29, %v11150_v13 }
 0x1a6   : > { %v17550_v4 = vpop.f32.mrf.mxu1  ;;  %2649 = vmatpush.bf16.msra.mxu1 %v11215_v24  ;;  %2675 = vmatpush.bf16.msra.mxu3 %v11219_v31  ;;  %v11382_v51 = vld [vmem:[%s16842_s11 + $0x3d8] sm:$0xf]  ;;  %v10895_v24 = vor.u32 %v15183_v16, %v10894_v48  ;;  %v10899_v31 = vor.u32 %v15179_v52, %v10896_v28  ;;  %v11127_v48 = vor.u32 %v15240_v42, %v11126_v55  ;;  %v11096_v55 = vld [vmem:[%s16842_s11 + $0x1b8] sm:$0xf0] }
 0x1a7   : > { %v15232_v13 = vld [vmem:[%s16842_s11 + $0x1b4] sm:$0xf0]  ;;  %v11387_v28 = vor.u32 %v15300_v11, %v11384_v34  ;;  %v11352_v42 = vld [vmem:[%s16842_s11 + $0x3b8] sm:$0xf0] }
 0x1a8   : > { %2637 = vmatpush.bf16.msra.mxu0 %v10927_v35  ;;  %2663 = vmatpush.bf16.msra.mxu2 %v10931_v22  ;;  %v11155_v35 = vor.u32 %v15243_v19, %v11152_v46  ;;  %v11094_v22 = vld [vmem:[%s16842_s11 + $0x198] sm:$0xf]  ;;  %v15228_v46 = vld [vmem:[%s16842_s11 + $0x19c] sm:$0xf] }
 0x1a9   : > { %v11350_v52 = vld [vmem:[%s16842_s11 + $0x398] sm:$0xf]  ;;  %v15292_v19 = vld [vmem:[%s16842_s11 + $0x39c] sm:$0xf] }
 0x1aa   : > { %2650 = vmatpush.bf16.msra.mxu1 %v11183_v7  ;;  %2676 = vmatpush.bf16.msra.mxu3 %v11187_v63  ;;  %v17570_v3 = vpop.f32.mrf.mxu2  ;;  %v11383_v7 = vor.u32 %v15304_v26, %v11382_v51  ;;  %v11099_v26 = vor.u32 %v15228_v46, %v11096_v55  ;;  %v15288_v11 = vld [vmem:[%s16842_s11 + $0x374] sm:$0xf0]  ;;  %v15220_v34 = vld [vmem:[%s16842_s11 + $0x15c] sm:$0xf] }
 0x1ab   : > { %v15216_v46 = vld [vmem:[%s16842_s11 + $0x134] sm:$0xf0] }
 0x1ac   : > { %v17572_v16 = vpop.f32.mrf.mxu3  ;;  %v1474_v14 = vpop.f32.mrf.mxu0  ;;  %2638 = vmatpush.bf16.msra.mxu0 %v10895_v24  ;;  %2664 = vmatpush.bf16.msra.mxu2 %v10899_v31  ;;  %v11351_v24 = vor.u32 %v15296_v59, %v11350_v52  ;;  %v11355_v31 = vor.u32 %v15292_v19, %v11352_v42  ;;  %v11320_v59 = vld [vmem:[%s16842_s11 + $0x378] sm:$0xf0]  ;;  %v11286_v55 = vld [vmem:[%s16842_s11 + $0x318] sm:$0xf] }
 0x1ad   : > { %v1475_v29 = vadd.f32 %v1474_v14, %v17457_v61  ;;  %v11095_v14 = vor.u32 %v15232_v13, %v11094_v22 }
 0x1ae   : > { %v1503_v63 = vpop.f32.mrf.mxu1  ;;  %2651 = vmatpush.bf16.msra.mxu1 %v11151_v44  ;;  %2677 = vmatpush.bf16.msra.mxu3 %v11155_v35  ;;  %v11318_v44 = vld [vmem:[%s16842_s11 + $0x358] sm:$0xf]  ;;  %v11064_v35 = vld [vmem:[%s16842_s11 + $0x178] sm:$0xf0] }
 0x1af   : > { %v17583_v51 = vadd.f32 %v1503_v63, %v1475_v29  ;;  %2639 = vmatmul.bf16.vlgmr.msra.gmra.mxu0 %v19919_v2  ;;  %2665 = vmatmul.bf16.vlgmr.msra.gmra.mxu2 %v19919_v2  ;;  %v11319_v29 = vor.u32 %v15288_v11, %v11318_v44  ;;  %v11067_v63 = vor.u32 %v15220_v34, %v11064_v35  ;;  %v11288_v44 = vld [vmem:[%s16842_s11 + $0x338] sm:$0xf0]  ;;  %v10998_v35 = vld [vmem:[%s16842_s11 + $0xd8] sm:$0xf] }
 0x1b0   : > { %2683 = vmatpush.bf16.msrb.mxu0 %v11127_v48  ;;  %2709 = vmatpush.bf16.msrb.mxu2 %v11131_v1  ;;  %v15284_v1 = vld [vmem:[%s16842_s11 + $0x35c] sm:$0xf] }
 0x1b1   : > { %19920 = vst [vmem:[#allocation37_spill] sm:$0xff] %v17583_v51  ;;  %2652 = vmatmul.bf16.vlgmr.msra.gmra.mxu1 %v19919_v2  ;;  %2678 = vmatmul.bf16.vlgmr.msra.gmra.mxu3 %v19919_v2  ;;  %v11323_v42 = vor.u32 %v15284_v1, %v11320_v59  ;;  %v15208_v1 = vld [vmem:[%s16842_s11 + $0xf4] sm:$0xf0] }
 0x1b2   : > { %2696 = vmatpush.bf16.msrb.mxu1 %v11383_v7  ;;  %2722 = vmatpush.bf16.msrb.mxu3 %v11387_v28  ;;  %v1532_v48 = vpop.f32.mrf.mxu2  ;;  %v11063_v7 = vor.u32 %v15224_v41, %v11062_v33  ;;  %v11030_v28 = vld [vmem:[%s16842_s11 + $0x118] sm:$0xf]  ;;  %v15276_v41 = vld [vmem:[%s16842_s11 + $0x31c] sm:$0xf] }
 0x1b3   : > { %v1533_v22 = vadd.f32 %v1532_v48, %v17484_v49  ;;  %v11031_v11 = vor.u32 %v15216_v46, %v11030_v28  ;;  %v11254_v59 = vld [vmem:[%s16842_s11 + $0x2d8] sm:$0xf]  ;;  %v11291_v48 = vor.u32 %v15276_v41, %v11288_v44 }
 0x1b4   : > { %2684 = vmatpush.bf16.msrb.mxu0 %v11095_v14  ;;  %2710 = vmatpush.bf16.msrb.mxu2 %v11099_v26  ;;  %v1561_v13 = vpop.f32.mrf.mxu3  ;;  %v17598_v52 = vpop.f32.mrf.mxu0  ;;  %v15280_v14 = vld [vmem:[%s16842_s11 + $0x334] sm:$0xf0]  ;;  %v11032_v26 = vld [vmem:[%s16842_s11 + $0x138] sm:$0xf0] }
 0x1b5   : > { %19921 = vst [vmem:[#allocation38_spill] sm:$0xff] %v17598_v52  ;;  %v17608_v33 = vadd.f32 %v1561_v13, %v1533_v22  ;;  %v15272_v22 = vld [vmem:[%s16842_s11 + $0x2f4] sm:$0xf0]  ;;  %v15204_v13 = vld [vmem:[%s16842_s11 + $0xdc] sm:$0xf] }
 0x1b6   : > { %2697 = vmatpush.bf16.msrb.mxu1 %v11351_v24  ;;  %2723 = vmatpush.bf16.msrb.mxu3 %v11355_v31  ;;  %v17603_v19 = vpop.f32.mrf.mxu1  ;;  %v15212_v24 = vld [vmem:[%s16842_s11 + $0x11c] sm:$0xf]  ;;  %v11287_v31 = vor.u32 %v15280_v14, %v11286_v55  ;;  %v11255_v46 = vor.u32 %v15272_v22, %v11254_v59  ;;  %v15200_v14 = vld [vmem:[%s16842_s11 + $0xb4] sm:$0xf0] }
 0x1b7   : > { %19922 = vst [vmem:[#allocation39_spill] sm:$0xff] %v17603_v19  ;;  %v11035_v34 = vor.u32 %v15212_v24, %v11032_v26  ;;  %v11000_v19 = vld [vmem:[%s16842_s11 + $0xf8] sm:$0xf0]  ;;  %v11222_v24 = vld [vmem:[%s16842_s11 + $0x298] sm:$0xf] }
 0x1b8   : > { %19923 = vst [vmem:[#allocation40_spill] sm:$0xff] %v17608_v33  ;;  %2685 = vmatpush.bf16.msrb.mxu0 %v11063_v7  ;;  %2711 = vmatpush.bf16.msrb.mxu2 %v11067_v63  ;;  %v15268_v52 = vld [vmem:[%s16842_s11 + $0x2dc] sm:$0xf]  ;;  %v11003_v55 = vor.u32 %v15204_v13, %v11000_v19  ;;  %v10934_v13 = vld [vmem:[%s16842_s11 + $0x58] sm:$0xf] }
 0x1b9   : > { %v11259_v44 = vor.u32 %v15268_v52, %v11256_v15  ;;  %v15192_v15 = vld [vmem:[%s16842_s11 + $0x74] sm:$0xf0]  ;;  %v11616_v33 = vld [vmem:[%s16842_s11 + $0x1e0] sm:$0xf0] }
 0x1ba   : > { %2698 = vmatpush.bf16.msrb.mxu1 %v11319_v29  ;;  %2724 = vmatpush.bf16.msrb.mxu3 %v11323_v42  ;;  %v17620_v7 = vpop.f32.mrf.mxu2  ;;  %v10999_v29 = vor.u32 %v15208_v1, %v10998_v35  ;;  %v10966_v42 = vld [vmem:[%s16842_s11 + $0x98] sm:$0xf]  ;;  %v15260_v35 = vld [vmem:[%s16842_s11 + $0x29c] sm:$0xf] }
 0x1bb   : > { %19924 = vst [vmem:[#allocation41_spill] sm:$0xff] %v17620_v7  ;;  %v11224_v1 = vld [vmem:[%s16842_s11 + $0x2b8] sm:$0xf0]  ;;  %v10967_v59 = vor.u32 %v15200_v14, %v10966_v42  ;;  %v11190_v52 = vld [vmem:[%s16842_s11 + $0x258] sm:$0xf] }
 0x1bc   : > { %2686 = vmatpush.bf16.msrb.mxu0 %v11031_v11  ;;  %2712 = vmatpush.bf16.msrb.mxu2 %v11035_v34  ;;  %v17622_v63 = vpop.f32.mrf.mxu3  ;;  %v1479_v28 = vpop.f32.mrf.mxu0  ;;  %v15264_v11 = vld [vmem:[%s16842_s11 + $0x2b4] sm:$0xf0]  ;;  %v10968_v34 = vld [vmem:[%s16842_s11 + $0xb8] sm:$0xf0] }
 0x1bd   : > { %19925 = vst [vmem:[#allocation42_spill] sm:$0xff] %v17622_v63  ;;  %v1480_v26 = vadd.f32 %v1479_v28, %v17457_v61  ;;  %v11227_v28 = vor.u32 %v15260_v35, %v11224_v1  ;;  %v15256_v63 = vld [vmem:[%s16842_s11 + $0x274] sm:$0xf0]  ;;  %v15188_v7 = vld [vmem:[%s16842_s11 + $0x5c] sm:$0xf] }
 0x1be   : > { %2699 = vmatpush.bf16.msrb.mxu1 %v11287_v31  ;;  %2725 = vmatpush.bf16.msrb.mxu3 %v11291_v48  ;;  %v1508_v41 = vpop.f32.mrf.mxu1  ;;  %v15196_v31 = vld [vmem:[%s16842_s11 + $0x9c] sm:$0xf]  ;;  %v11223_v48 = vor.u32 %v15264_v11, %v11222_v24  ;;  %v11191_v24 = vor.u32 %v15256_v63, %v11190_v52  ;;  %v10902_v11 = vld [vmem:[%s16842_s11 + $0x18] sm:$0xf]  ;;  %v17659_v52 = vperm.slane %v17454_v57, 6 }
 0x1bf   : > { %v17633_v19 = vadd.f32 %v1508_v41, %v1480_v26  ;;  %v10971_v22 = vor.u32 %v15196_v31, %v10968_v34  ;;  %v15252_v26 = vld [vmem:[%s16842_s11 + $0x25c] sm:$0xf]  ;;  %v15184_v31 = vld [vmem:[%s16842_s11 + $0x34] sm:$0xf0] }
 0x1c0   : > { %2687 = vmatpush.bf16.msrb.mxu0 %v10999_v29  ;;  %2713 = vmatpush.bf16.msrb.mxu2 %v11003_v55  ;;  %v11192_v41 = vld [vmem:[%s16842_s11 + $0x278] sm:$0xf0]  ;;  %v11158_v34 = vld [vmem:[%s16842_s11 + $0x218] sm:$0xf] }
 0x1c1   : > { %19926 = vst [vmem:[#allocation43_spill] sm:$0xff] %v17633_v19  ;;  %v11195_v1 = vor.u32 %v15252_v26, %v11192_v41  ;;  %v10903_v19 = vor.u32 %v15184_v31, %v10902_v11 }
 0x1c2   : > { %2700 = vmatpush.bf16.msrb.mxu1 %v11255_v46  ;;  %2726 = vmatpush.bf16.msrb.mxu3 %v11259_v44  ;;  %v1537_v29 = vpop.f32.mrf.mxu2  ;;  %v10935_v46 = vor.u32 %v15192_v15, %v10934_v13  ;;  %v10939_v44 = vor.u32 %v15188_v7, %v10936_v25  ;;  %v15180_v13 = vld [vmem:[%s16842_s11 + $0x1c] sm:$0xf] }
 0x1c3   : > { %v1538_v55 = vadd.f32 %v1537_v29, %v17484_v49  ;;  %v15244_v15 = vld [vmem:[%s16842_s11 + $0x21c] sm:$0xf] }
 0x1c4   : > { %2688 = vmatpush.bf16.msrb.mxu0 %v10967_v59  ;;  %2714 = vmatpush.bf16.msrb.mxu2 %v10971_v22  ;;  %v1566_v42 = vpop.f32.mrf.mxu3  ;;  %v17644_v14 = vpop.f32.mrf.mxu0  ;;  %v15248_v59 = vld [vmem:[%s16842_s11 + $0x234] sm:$0xf0]  ;;  %v11160_v29 = vld [vmem:[%s16842_s11 + $0x238] sm:$0xf0] }
 0x1c5   : > { %19927 = vst [vmem:[#allocation44_spill] sm:$0xff] %v17644_v14  ;;  %v17654_v22 = vadd.f32 %v1566_v42, %v1538_v55  ;;  %v11159_v63 = vor.u32 %v15248_v59, %v11158_v34  ;;  %v11163_v7 = vor.u32 %v15244_v15, %v11160_v29 }
 0x1c6   : > { %2701 = vmatpush.bf16.msrb.mxu1 %v11223_v48  ;;  %2727 = vmatpush.bf16.msrb.mxu3 %v11227_v28  ;;  %v17649_v35 = vpop.f32.mrf.mxu1  ;;  %v10904_v48 = vld [vmem:[%s16842_s11 + $0x38] sm:$0xf0] }
 0x1c7   : > { %19928 = vst [vmem:[#allocation45_spill] sm:$0xff] %v17649_v35  ;;  %v10907_v25 = vor.u32 %v15180_v13, %v10904_v48 }
 0x1c8   : > { %19929 = vst [vmem:[#allocation46_spill] sm:$0xff] %v17654_v22  ;;  %2689 = vmatpush.bf16.msrb.mxu0 %v10935_v46  ;;  %2715 = vmatpush.bf16.msrb.mxu2 %v10939_v44 }
 0x1ca   : > { %2702 = vmatpush.bf16.msrb.mxu1 %v11191_v24  ;;  %2728 = vmatpush.bf16.msrb.mxu3 %v11195_v1  ;;  %v17661_v28 = vpop.f32.mrf.mxu2 }
 0x1cb   : > { %19930 = vst [vmem:[#allocation47_spill] sm:$0xff] %v17661_v28 }
 0x1cc   : > { %2690 = vmatpush.bf16.msrb.mxu0 %v10903_v19  ;;  %2716 = vmatpush.bf16.msrb.mxu2 %v10907_v25  ;;  %v17663_v26 = vpop.f32.mrf.mxu3  ;;  %v1580_v41 = vpop.f32.mrf.mxu0  ;;  %v17673_v19 = vperm.slane %v17454_v57, 7 }
 0x1cd   : > { %19931 = vst [vmem:[#allocation48_spill] sm:$0xff] %v17663_v26  ;;  %v1581_v46 = vadd.f32 %v1580_v41, %v17659_v52 }
 0x1ce   : > { %2703 = vmatpush.bf16.msrb.mxu1 %v11159_v63  ;;  %2729 = vmatpush.bf16.msrb.mxu3 %v11163_v7  ;;  %v1609_v55 = vpop.f32.mrf.mxu1 }
 0x1cf   : > { %2691 = vmatmul.bf16.vlgmr.msrb.gmra.mxu0 %v19919_v2  ;;  %2717 = vmatmul.bf16.vlgmr.msrb.gmra.mxu2 %v19919_v2  ;;  %v17669_v42 = vadd.f32 %v1609_v55, %v1581_v46 }
 0x1d1   : > { %2704 = vmatmul.bf16.vlgmr.msrb.gmra.mxu1 %v19919_v2  ;;  %2730 = vmatmul.bf16.vlgmr.msrb.gmra.mxu3 %v19919_v2 }
 0x1d2   : > { %v1638_v24 = vpop.f32.mrf.mxu2 }
 0x1d3   : > { %v1639_v44 = vadd.f32 %v1638_v24, %v17673_v19 }
 0x1d4   : > { %v1667_v11 = vpop.f32.mrf.mxu3  ;;  %v17676_v31 = vpop.f32.mrf.mxu0 }
 0x1d5   : > { %v17680_v1 = vadd.f32 %v1667_v11, %v1639_v44 }
 0x1d6   : > { %v17678_v34 = vpop.f32.mrf.mxu1 }
 0x1da   : > { %v17682_v59 = vpop.f32.mrf.mxu2 }
 0x1dc   : > { %v17684_v13 = vpop.f32.mrf.mxu3  ;;  %v1585_v48 = vpop.f32.mrf.mxu0 }
 0x1dd   : > { %v1586_v2 = vadd.f32 %v1585_v48, %v17659_v52 }
 0x1de   : > { %v1614_v15 = vpop.f32.mrf.mxu1 }
 0x1df   : > { %v17687_v57 = vadd.f32 %v1614_v15, %v1586_v2 }
 0x1e2   : > { %v1643_v29 = vpop.f32.mrf.mxu2 }
 0x1e3   : > { %v1644_v63 = vadd.f32 %v1643_v29, %v17673_v19 }
 0x1e4   : > { %v1672_v25 = vpop.f32.mrf.mxu3  ;;  %v17690_v7 = vpop.f32.mrf.mxu0 }
 0x1e5   : > { %v17694_v46 = vadd.f32 %v1672_v25, %v1644_v63 }
 0x1e6   : > { %v17692_v41 = vpop.f32.mrf.mxu1 }
 0x1e7   : > { %19932 = vst [vmem:[#allocation49_spill] sm:$0xff] %v17692_v41  ;;  %v11606_v41 = vld [vmem:[%s16842_s11 + $0x198] sm:$0xf] }
 0x1ea   : > { %v17696_v55 = vpop.f32.mrf.mxu2 }
 0x1eb   : > { %19933 = vst [vmem:[#allocation50_spill] sm:$0xff] %v17696_v55 }
 0x1ec   : > { %v17698_v24 = vpop.f32.mrf.mxu3  ;;  %v1590_v44 = vpop.f32.mrf.mxu0 }
 0x1ed   : > { %19934 = vst [vmem:[#allocation51_spill] sm:$0xff] %v17698_v24  ;;  %v1591_v11 = vadd.f32 %v1590_v44, %v17659_v52 }
 0x1ee   : > { %v1619_v48 = vpop.f32.mrf.mxu1 }
 0x1ef   : > { %v17701_v2 = vadd.f32 %v1619_v48, %v1591_v11 }
 0x1f1   : > { %19935 = vst [vmem:[#allocation52_spill] sm:$0xff] %v17701_v2  ;;  %v15429_v2 = vld [vmem:[%s16842_s11 + $0x3dc] sm:$0xf0] }
 0x1f2   : > { %v1648_v15 = vpop.f32.mrf.mxu2 }
 0x1f3   : > { %v1649_v29 = vadd.f32 %v1648_v15, %v17673_v19 }
 0x1f4   : > { %v1677_v26 = vpop.f32.mrf.mxu3  ;;  %v17704_v28 = vpop.f32.mrf.mxu0 }
 0x1f5   : > { %19936 = vst [vmem:[#allocation53_spill] sm:$0xff] %v17704_v28  ;;  %v17708_v63 = vadd.f32 %v1677_v26, %v1649_v29 }
 0x1f6   : > { %v17706_v35 = vpop.f32.mrf.mxu1 }
 0x1f7   : > { %19937 = vst [vmem:[#allocation54_spill] sm:$0xff] %v17706_v35 }
 0x1f8   : > { %19938 = vst [vmem:[#allocation55_spill] sm:$0xff] %v17708_v63  ;;  %v11870_v63 = vld [vmem:[%s16842_s11 + $0x3c0] sm:$0xf] }
 0x1fa   : > { %v17710_v25 = vpop.f32.mrf.mxu2 }
 0x1fb   : > { %19939 = vst [vmem:[#allocation56_spill] sm:$0xff] %v17710_v25 }
 0x1fc   : > { %v17712_v14 = vpop.f32.mrf.mxu3  ;;  %v1595_v44 = vpop.f32.mrf.mxu0 }
 0x1fd   : > { %19940 = vst [vmem:[#allocation57_spill] sm:$0xff] %v17712_v14  ;;  %v1596_v11 = vadd.f32 %v1595_v44, %v17659_v52 }
 0x1fe   : > { %v1624_v48 = vpop.f32.mrf.mxu1 }
 0x1ff   : > { %v17715_v15 = vadd.f32 %v1624_v48, %v1596_v11 }
 0x201   : > { %19941 = vst [vmem:[#allocation58_spill] sm:$0xff] %v17715_v15  ;;  %v11614_v15 = vld [vmem:[%s16842_s11 + $0x1c0] sm:$0xf] }
 0x202   : > { %v1653_v22 = vpop.f32.mrf.mxu2 }
 0x203   : > { %v1654_v26 = vadd.f32 %v1653_v22, %v17673_v19  ;;  %v11615_v22 = vor.u32 %v15365_v17, %v11614_v15  ;;  %v11582_v15 = vld [vmem:[%s16842_s11 + $0x180] sm:$0xf] }
 0x204   : > { %v1682_v29 = vpop.f32.mrf.mxu3  ;;  %v17718_v35 = vpop.f32.mrf.mxu0 }
 0x205   : > { %19942 = vst [vmem:[#allocation59_spill] sm:$0xff] %v17718_v35  ;;  %v17722_v14 = vadd.f32 %v1682_v29, %v1654_v26  ;;  %v15361_v35 = vld [vmem:[%s16842_s11 + $0x1c4] sm:$0xf]  ;;  %3564 = vmatpush.bf16.msra.mxu0 %v11615_v22 }
 0x206   : > { %v17720_v25 = vpop.f32.mrf.mxu1  ;;  %v11619_v51 = vor.u32 %v15361_v35, %v11616_v33  ;;  %v15425_v26 = vld [vmem:[%s16842_s11 + $0x3c4] sm:$0xf]  ;;  %v11838_v33 = vld [vmem:[%s16842_s11 + $0x380] sm:$0xf] }
 0x207   : > { %19943 = vst [vmem:[#allocation60_spill] sm:$0xff] %v17720_v25  ;;  %v11871_v25 = vor.u32 %v15429_v2, %v11870_v63  ;;  %v11872_v29 = vld [vmem:[%s16842_s11 + $0x3e0] sm:$0xf0]  ;;  %v11583_v2 = vor.u32 %v15357_v9, %v11582_v15  ;;  %v15421_v63 = vld [vmem:[%s16842_s11 + $0x39c] sm:$0xf0] }
 0x208   : > { %19944 = vst [vmem:[#allocation61_spill] sm:$0xff] %v17722_v14  ;;  %3590 = vmatpush.bf16.msra.mxu2 %v11619_v51  ;;  %v15353_v22 = vld [vmem:[%s16842_s11 + $0x184] sm:$0xf]  ;;  %v15413_v15 = vld [vmem:[%s16842_s11 + $0x35c] sm:$0xf0] }
 0x209   : > { %3577 = vmatpush.bf16.msra.mxu1 %v11871_v25  ;;  %v15417_v25 = vld [vmem:[%s16842_s11 + $0x384] sm:$0xf]  ;;  %3565 = vmatpush.bf16.msra.mxu0 %v11583_v2 }
 0x20a   : > { %v17724_v28 = vpop.f32.mrf.mxu2  ;;  %v11840_v51 = vld [vmem:[%s16842_s11 + $0x3a0] sm:$0xf0] }
 0x20b   : > { %19945 = vst [vmem:[#allocation62_spill] sm:$0xff] %v17724_v28  ;;  %v11875_v28 = vor.u32 %v15425_v26, %v11872_v29  ;;  %v11584_v26 = vld [vmem:[%s16842_s11 + $0x1a0] sm:$0xf0]  ;;  %v11839_v29 = vor.u32 %v15421_v63, %v11838_v33 }
 0x20c   : > { %v17726_v44 = vpop.f32.mrf.mxu3  ;;  %v2536_v11 = vpop.f32.mrf.mxu0  ;;  %v11587_v32 = vor.u32 %v15353_v22, %v11584_v26  ;;  %v15345_v33 = vld [vmem:[%s16842_s11 + $0x144] sm:$0xf] }
 0x20d   : > { %19946 = vst [vmem:[#allocation63_spill] sm:$0xff] %v17726_v44  ;;  %3603 = vmatpush.bf16.msra.mxu3 %v11875_v28  ;;  %3578 = vmatpush.bf16.msra.mxu1 %v11839_v29  ;;  %v11806_v28 = vld [vmem:[%s16842_s11 + $0x340] sm:$0xf]  ;;  %v11552_v22 = vld [vmem:[%s16842_s11 + $0x160] sm:$0xf0] }
 0x20e   : > { %v2549_v48 = vpop.f32.mrf.mxu1  ;;  %3591 = vmatpush.bf16.msra.mxu2 %v11587_v32  ;;  %v11807_v63 = vor.u32 %v15413_v15, %v11806_v28  ;;  %v15409_v26 = vld [vmem:[%s16842_s11 + $0x344] sm:$0xf]  ;;  %v11555_v2 = vor.u32 %v15345_v33, %v11552_v22 }
 0x20f   : > { %v11811_v32 = vor.u32 %v15409_v26, %v11808_v56  ;;  %v2550_v29 = vadd.f32 %v2549_v48, %v2536_v11  ;;  %v15337_v15 = vld [vmem:[%s16842_s11 + $0x104] sm:$0xf] }
 0x210   : > { %v11520_v11 = vld [vmem:[%s16842_s11 + $0x120] sm:$0xf0] }
 0x211   : > { %3579 = vmatpush.bf16.msra.mxu1 %v11807_v63  ;;  %v15401_v48 = vld [vmem:[%s16842_s11 + $0x304] sm:$0xf]  ;;  %v11523_v22 = vor.u32 %v15337_v15, %v11520_v11 }
 0x212   : > { %v17736_v44 = vpop.f32.mrf.mxu2  ;;  %3592 = vmatpush.bf16.msra.mxu2 %v11555_v2  ;;  %v11776_v63 = vld [vmem:[%s16842_s11 + $0x320] sm:$0xf0]  ;;  %v2735_v2 = vadd.f32 %v2550_v29, %v17130_v20 }
 0x213   : > { %v11779_v26 = vor.u32 %v15401_v48, %v11776_v63  ;;  %v15393_v11 = vld [vmem:[%s16842_s11 + $0x2c4] sm:$0xf] }
 0x214   : > { %v17738_v14 = vpop.f32.mrf.mxu3  ;;  %v2538_v17 = vpop.f32.mrf.mxu0  ;;  %v11744_v48 = vld [vmem:[%s16842_s11 + $0x2e0] sm:$0xf0]  ;;  %v2743_v29 = vmul.f32 0.5, %v2735_v2 }
 0x215   : > { %v11843_v17 = vor.u32 %v15417_v25, %v11840_v51  ;;  %v11518_v51 = vld [vmem:[%s16842_s11 + $0x100] sm:$0xf]  ;;  %v15321_v2 = vld [vmem:[%s16842_s11 + $0x84] sm:$0xf] }
 0x216   : > { %v2551_v35 = vpop.f32.mrf.mxu1  ;;  %3593 = vmatpush.bf16.msra.mxu2 %v11523_v22  ;;  %v11454_v22 = vld [vmem:[%s16842_s11 + $0x80] sm:$0xf] }
 0x217   : > { %v11550_v35 = vld [vmem:[%s16842_s11 + $0x140] sm:$0xf]  ;;  %3604 = vmatpush.bf16.msra.mxu3 %v11843_v17 }
 0x218   : > { %v11551_v9 = vor.u32 %v15349_v0, %v11550_v35  ;;  %v15341_v17 = vld [vmem:[%s16842_s11 + $0x11c] sm:$0xf0] }
 0x219   : > { %v11774_v35 = vld [vmem:[%s16842_s11 + $0x300] sm:$0xf] }
 0x21a   : > { %v2564_v24 = vpop.f32.mrf.mxu2  ;;  %3566 = vmatpush.bf16.msra.mxu0 %v11551_v9  ;;  %v15405_v9 = vld [vmem:[%s16842_s11 + $0x31c] sm:$0xf0] }
 0x21b   : > { %3605 = vmatpush.bf16.msra.mxu3 %v11811_v32  ;;  %v11519_v24 = vor.u32 %v15341_v17, %v11518_v51  ;;  %v11775_v33 = vor.u32 %v15405_v9, %v11774_v35  ;;  %v15333_v51 = vld [vmem:[%s16842_s11 + $0xdc] sm:$0xf0] }
 0x21c   : > { %v2577_v25 = vpop.f32.mrf.mxu3  ;;  %v2588_v0 = vpop.f32.mrf.mxu0  ;;  %v15397_v35 = vld [vmem:[%s16842_s11 + $0x2dc] sm:$0xf0] }
 0x21d   : > { %3580 = vmatpush.bf16.msra.mxu1 %v11775_v33  ;;  %v11486_v25 = vld [vmem:[%s16842_s11 + $0xc0] sm:$0xf] }
 0x21e   : > { %v2601_v28 = vpop.f32.mrf.mxu1  ;;  %3567 = vmatpush.bf16.msra.mxu0 %v11519_v24  ;;  %v11487_v17 = vor.u32 %v15333_v51, %v11486_v25  ;;  %v11488_v24 = vld [vmem:[%s16842_s11 + $0xe0] sm:$0xf0] }
 0x21f   : > { %v2602_v56 = vadd.f32 %v2601_v28, %v2588_v0  ;;  %v11742_v0 = vld [vmem:[%s16842_s11 + $0x2c0] sm:$0xf]  ;;  %3606 = vmatpush.bf16.msra.mxu3 %v11779_v26  ;;  %v15329_v28 = vld [vmem:[%s16842_s11 + $0xc4] sm:$0xf] }
 0x220   : > { %v11743_v9 = vor.u32 %v15397_v35, %v11742_v0  ;;  %v11491_v15 = vor.u32 %v15329_v28, %v11488_v24  ;;  %v15325_v26 = vld [vmem:[%s16842_s11 + $0x9c] sm:$0xf0]  ;;  %v11456_v28 = vld [vmem:[%s16842_s11 + $0xa0] sm:$0xf0] }
 0x221   : > { %v2737_v32 = vadd.f32 %v2602_v56, %v17317_v40  ;;  %v11747_v40 = vor.u32 %v15393_v11, %v11744_v48  ;;  %v11455_v0 = vor.u32 %v15325_v26, %v11454_v22  ;;  %v15389_v35 = vld [vmem:[%s16842_s11 + $0x29c] sm:$0xf0]  ;;  %v15385_v24 = vld [vmem:[%s16842_s11 + $0x284] sm:$0xf]  ;;  %v2576_v11 = vadd.f32 %v17738_v14, %v17736_v44 }
 0x222   : > { %v2614_v20 = vpop.f32.mrf.mxu2  ;;  %3568 = vmatpush.bf16.msra.mxu0 %v11487_v17  ;;  %3581 = vmatpush.bf16.msra.mxu1 %v11743_v9  ;;  %v11710_v17 = vld [vmem:[%s16842_s11 + $0x280] sm:$0xf]  ;;  %v11712_v9 = vld [vmem:[%s16842_s11 + $0x2a0] sm:$0xf0] }
 0x223   : > { %v2751_v56 = vmul.f32 0.5, %v2737_v32  ;;  %3594 = vmatpush.bf16.msra.mxu2 %v11491_v15  ;;  %3607 = vmatpush.bf16.msra.mxu3 %v11747_v40  ;;  %v11711_v32 = vor.u32 %v15389_v35, %v11710_v17  ;;  %v11459_v15 = vor.u32 %v15321_v2, %v11456_v28  ;;  %v11422_v40 = vld [vmem:[%s16842_s11 + $0x40] sm:$0xf]  ;;  %v11424_v17 = vld [vmem:[%s16842_s11 + $0x60] sm:$0xf0]  ;;  %v2736_v35 = vadd.f32 %v2576_v11, %v17154_v58 }
 0x224   : > { %v2627_v33 = vpop.f32.mrf.mxu3  ;;  %v2590_v63 = vpop.f32.mrf.mxu0  ;;  %v15381_v26 = vld [vmem:[%s16842_s11 + $0x25c] sm:$0xf0]  ;;  %v15377_v44 = vld [vmem:[%s16842_s11 + $0x244] sm:$0xf] }
 0x225   : > { %v2628_v25 = vadd.f32 %v2627_v33, %v2614_v20  ;;  %v11715_v20 = vor.u32 %v15385_v24, %v11712_v9  ;;  %v15317_v33 = vld [vmem:[%s16842_s11 + $0x5c] sm:$0xf0]  ;;  %16292 = vtanh.f32 %v2751_v56  ;;  %v11392_v11 = vld [vmem:[%s16842_s11 + $0x20] sm:$0xf0] }
 0x226   : > { %v2603_v51 = vpop.f32.mrf.mxu1  ;;  %3569 = vmatpush.bf16.msra.mxu0 %v11455_v0  ;;  %v11678_v63 = vld [vmem:[%s16842_s11 + $0x240] sm:$0xf]  ;;  %3582 = vmatpush.bf16.msra.mxu1 %v11711_v32  ;;  %v11423_v22 = vor.u32 %v15317_v33, %v11422_v40  ;;  %16294 = vtanh.f32 %v2743_v29  ;;  %v15305_v29 = vld [vmem:[%s16842_s11 + $0x4] sm:$0xf] }
 0x227   : > { %v2738_v48 = vadd.f32 %v2628_v25, %v17346_v27  ;;  %v15313_v51 = vld [vmem:[%s16842_s11 + $0x44] sm:$0xf]  ;;  %3595 = vmatpush.bf16.msra.mxu2 %v11459_v15  ;;  %3608 = vmatpush.bf16.msra.mxu3 %v11715_v20  ;;  %v11679_v27 = vor.u32 %v15381_v26, %v11678_v63  ;;  %v11390_v28 = vld [vmem:[%s16842_s11] sm:$0xf] }
 0x228   : > { %v11427_v14 = vor.u32 %v15313_v51, %v11424_v17  ;;  %v11680_v25 = vld [vmem:[%s16842_s11 + $0x260] sm:$0xf0]  ;;  %v15309_v24 = vld [vmem:[%s16842_s11 + $0x1c] sm:$0xf0]  ;;  %v11395_v51 = vor.u32 %v15305_v29, %v11392_v11  ;;  %v15358_v11 = vld [vmem:[%s16842_s11 + $0x1a4] sm:$0xf0] }
 0x229   : > { %v11683_v0 = vor.u32 %v15377_v44, %v11680_v25  ;;  %v2752_v2 = vmul.f32 0.5, %v2738_v48  ;;  %v11646_v9 = vld [vmem:[%s16842_s11 + $0x200] sm:$0xf]  ;;  %v11391_v15 = vor.u32 %v15309_v24, %v11390_v28  ;;  %v15369_v48 = vld [vmem:[%s16842_s11 + $0x204] sm:$0xf] }
 0x22a   : > { %v2616_v32 = vpop.f32.mrf.mxu2  ;;  %3570 = vmatpush.bf16.msra.mxu0 %v11423_v22  ;;  %3583 = vmatpush.bf16.msra.mxu1 %v11679_v27  ;;  %v15373_v20 = vld [vmem:[%s16842_s11 + $0x21c] sm:$0xf0]  ;;  %v11648_v33 = vld [vmem:[%s16842_s11 + $0x220] sm:$0xf0]  ;;  %v2744_v22 = vmul.f32 0.5, %v2736_v35 }
 0x22b   : > { %3596 = vmatpush.bf16.msra.mxu2 %v11427_v14  ;;  %3609 = vmatpush.bf16.msra.mxu3 %v11683_v0  ;;  %v11647_v58 = vor.u32 %v15373_v20, %v11646_v9  ;;  %v16293_v63 = vpop.eup %16292  ;;  %16296 = vtanh.f32 %v2752_v2  ;;  %v11651_v17 = vor.u32 %v15369_v48, %v11648_v33  ;;  %v11622_v27 = vld [vmem:[%s16842_s11 + $0x1c8] sm:$0xf]  ;;  %v11624_v2 = vld [vmem:[%s16842_s11 + $0x1e8] sm:$0xf0] }
 0x22c   : > { %v2629_v56 = vpop.f32.mrf.mxu3  ;;  %v2640_v40 = vpop.f32.mrf.mxu0  ;;  %v15366_v14 = vld [vmem:[%s16842_s11 + $0x1e4] sm:$0xf0]  ;;  %v15426_v24 = vld [vmem:[%s16842_s11 + $0x3cc] sm:$0xf]  ;;  %16298 = vtanh.f32 %v2744_v22 }
 0x22d   : > { %v11623_v25 = vor.u32 %v15366_v14, %v11622_v27  ;;  %v11878_v0 = vld [vmem:[%s16842_s11 + $0x3c8] sm:$0xf]  ;;  %v15362_v56 = vld [vmem:[%s16842_s11 + $0x1cc] sm:$0xf]  ;;  %v16295_v28 = vpop.eup %16294 }
 0x22e   : > { %v2653_v26 = vpop.f32.mrf.mxu1  ;;  %3571 = vmatpush.bf16.msra.mxu0 %v11391_v15  ;;  %3584 = vmatpush.bf16.msra.mxu1 %v11647_v58  ;;  %v15430_v32 = vld [vmem:[%s16842_s11 + $0x3e4] sm:$0xf0]  ;;  %v11880_v9 = vld [vmem:[%s16842_s11 + $0x3e8] sm:$0xf0]  ;;  %v2755_v15 = vmul.f32 0.5, %v16293_v63  ;;  %v11627_v29 = vor.u32 %v15362_v56, %v11624_v2 }
 0x22f   : > { %v2654_v44 = vadd.f32 %v2653_v26, %v2640_v40  ;;  %3597 = vmatpush.bf16.msra.mxu2 %v11395_v51  ;;  %3610 = vmatpush.bf16.msra.mxu3 %v11651_v17  ;;  %v11879_v35 = vor.u32 %v15430_v32, %v11878_v0  ;;  %v11883_v40 = vor.u32 %v15426_v24, %v11880_v9  ;;  %v11590_v58 = vld [vmem:[%s16842_s11 + $0x188] sm:$0xf]  ;;  %v15354_v51 = vld [vmem:[%s16842_s11 + $0x18c] sm:$0xf]  ;;  %v2747_v17 = vmul.f32 0.5, %v16295_v28 }
 0x230   : > { %v11591_v48 = vor.u32 %v15358_v11, %v11590_v58  ;;  %v11846_v33 = vld [vmem:[%s16842_s11 + $0x388] sm:$0xf]  ;;  %v11592_v63 = vld [vmem:[%s16842_s11 + $0x1a8] sm:$0xf0]  ;;  %v2757_v56 = vadd.f32 0.5, %v2755_v15 }
 0x231   : > { %v2739_v20 = vadd.f32 %v2654_v44, %v17475_v39  ;;  %v15422_v26 = vld [vmem:[%s16842_s11 + $0x3a4] sm:$0xf0]  ;;  %v15418_v27 = vld [vmem:[%s16842_s11 + $0x38c] sm:$0xf]  ;;  %v16297_v14 = vpop.eup %16296  ;;  %v11595_v22 = vor.u32 %v15354_v51, %v11592_v63  ;;  %v2749_v15 = vadd.f32 0.5, %v2747_v17 }
 0x232   : > { %3616 = vmatpush.bf16.msrb.mxu0 %v11623_v25  ;;  %3629 = vmatpush.bf16.msrb.mxu1 %v11879_v35  ;;  %v11847_v39 = vor.u32 %v15422_v26, %v11846_v33  ;;  %v2666_v44 = vpop.f32.mrf.mxu2  ;;  %v11848_v25 = vld [vmem:[%s16842_s11 + $0x3a8] sm:$0xf0]  ;;  %v11558_v0 = vld [vmem:[%s16842_s11 + $0x148] sm:$0xf]  ;;  %v2756_v51 = vmul.f32 0.5, %v16297_v14 }
 0x233   : > { %16300 = vtanh.f32 %v2739_v20  ;;  %3642 = vmatpush.bf16.msrb.mxu2 %v11627_v29  ;;  %3655 = vmatpush.bf16.msrb.mxu3 %v11883_v40  ;;  %v15350_v32 = vld [vmem:[%s16842_s11 + $0x164] sm:$0xf0]  ;;  %v11851_v2 = vor.u32 %v15418_v27, %v11848_v25  ;;  %v15346_v11 = vld [vmem:[%s16842_s11 + $0x14c] sm:$0xf]  ;;  %v16299_v27 = vpop.eup %16298 }
 0x234   : > { %v2679_v35 = vpop.f32.mrf.mxu3  ;;  %v2642_v28 = vpop.f32.mrf.mxu0  ;;  %v11559_v24 = vor.u32 %v15350_v32, %v11558_v0  ;;  %v11814_v9 = vld [vmem:[%s16842_s11 + $0x348] sm:$0xf]  ;;  %v11560_v33 = vld [vmem:[%s16842_s11 + $0x168] sm:$0xf0] }
 0x235   : > { %v15414_v20 = vld [vmem:[%s16842_s11 + $0x364] sm:$0xf0]  ;;  %v2680_v29 = vadd.f32 %v2679_v35, %v2666_v44  ;;  %v15410_v26 = vld [vmem:[%s16842_s11 + $0x34c] sm:$0xf] }
 0x236   : > { %3617 = vmatpush.bf16.msrb.mxu0 %v11591_v48  ;;  %v2655_v40 = vpop.f32.mrf.mxu1  ;;  %3630 = vmatpush.bf16.msrb.mxu1 %v11847_v39  ;;  %v11815_v58 = vor.u32 %v15414_v20, %v11814_v9  ;;  %v11563_v48 = vor.u32 %v15346_v11, %v11560_v33  ;;  %v11816_v63 = vld [vmem:[%s16842_s11 + $0x368] sm:$0xf0]  ;;  %v11526_v39 = vld [vmem:[%s16842_s11 + $0x108] sm:$0xf]  ;;  %v2758_v11 = vadd.f32 0.5, %v2756_v51 }
 0x237   : > { %3643 = vmatpush.bf16.msrb.mxu2 %v11595_v22  ;;  %3656 = vmatpush.bf16.msrb.mxu3 %v11851_v2  ;;  %v2740_v44 = vadd.f32 %v2680_v29, %v17502_v47  ;;  %v11819_v25 = vor.u32 %v15410_v26, %v11816_v63  ;;  %v15342_v0 = vld [vmem:[%s16842_s11 + $0x124] sm:$0xf0]  ;;  %v15338_v9 = vld [vmem:[%s16842_s11 + $0x10c] sm:$0xf]  ;;  %v2769_v22 = vmul.f32 0.0, %v2757_v56  ;;  %v2748_v40 = vmul.f32 0.5, %v16299_v27 }
 0x238   : > { %v11782_v32 = vld [vmem:[%s16842_s11 + $0x308] sm:$0xf]  ;;  %v11527_v28 = vor.u32 %v15342_v0, %v11526_v39  ;;  %v11528_v14 = vld [vmem:[%s16842_s11 + $0x128] sm:$0xf0] }
 0x239   : > { %v16301_v35 = vpop.eup %16300  ;;  %v15406_v17 = vld [vmem:[%s16842_s11 + $0x324] sm:$0xf0]  ;;  %16302 = vtanh.f32 %v2740_v44  ;;  %v15402_v20 = vld [vmem:[%s16842_s11 + $0x30c] sm:$0xf] }
 0x23a   : > { %3618 = vmatpush.bf16.msrb.mxu0 %v11559_v24  ;;  %v2771_v2 = vmul.f32 %v16301_v35, %v2749_v15  ;;  %3631 = vmatpush.bf16.msrb.mxu1 %v11815_v58  ;;  %v11783_v47 = vor.u32 %v15406_v17, %v11782_v32  ;;  %v11784_v29 = vld [vmem:[%s16842_s11 + $0x328] sm:$0xf0]  ;;  %v11531_v24 = vor.u32 %v15338_v9, %v11528_v14  ;;  %v2668_v26 = vpop.f32.mrf.mxu2  ;;  %v11494_v15 = vld [vmem:[%s16842_s11 + $0xc8] sm:$0xf]  ;;  %v2750_v35 = vadd.f32 0.5, %v2748_v40 }
 0x23b   : > { %3644 = vmatpush.bf16.msrb.mxu2 %v11563_v48  ;;  %3657 = vmatpush.bf16.msrb.mxu3 %v11819_v25  ;;  %v11787_v33 = vor.u32 %v15402_v20, %v11784_v29  ;;  %v15334_v63 = vld [vmem:[%s16842_s11 + $0xe4] sm:$0xf0]  ;;  %v15330_v51 = vld [vmem:[%s16842_s11 + $0xcc] sm:$0xf]  ;;  %v2770_v17 = vmul.f32 0.0, %v2758_v11 }
 0x23c   : > { %v17836_v56 = vadd.f32 %v2771_v2, %v2769_v22  ;;  %v11750_v58 = vld [vmem:[%s16842_s11 + $0x2c8] sm:$0xf]  ;;  %v2681_v44 = vpop.f32.mrf.mxu3  ;;  %v11495_v39 = vor.u32 %v15334_v63, %v11494_v15  ;;  %v11496_v48 = vld [vmem:[%s16842_s11 + $0xe8] sm:$0xf0] }
 0x23d   : > { %v15398_v27 = vld [vmem:[%s16842_s11 + $0x2e4] sm:$0xf0]  ;;  %v15394_v0 = vld [vmem:[%s16842_s11 + $0x2cc] sm:$0xf] }
 0x23e   : > { %3619 = vmatpush.bf16.msrb.mxu0 %v11527_v28  ;;  %3632 = vmatpush.bf16.msrb.mxu1 %v11783_v47  ;;  %v11751_v25 = vor.u32 %v15398_v27, %v11750_v58  ;;  %v11752_v32 = vld [vmem:[%s16842_s11 + $0x2e8] sm:$0xf0]  ;;  %v11499_v28 = vor.u32 %v15330_v51, %v11496_v48  ;;  %v11462_v22 = vld [vmem:[%s16842_s11 + $0x88] sm:$0xf] }
 0x23f   : > { %3645 = vmatpush.bf16.msrb.mxu2 %v11531_v24  ;;  %3658 = vmatpush.bf16.msrb.mxu3 %v11787_v33  ;;  %v11755_v9 = vor.u32 %v15394_v0, %v11752_v32  ;;  %v16303_v14 = vpop.eup %16302  ;;  %v15326_v2 = vld [vmem:[%s16842_s11 + $0xa4] sm:$0xf0]  ;;  %v15322_v15 = vld [vmem:[%s16842_s11 + $0x8c] sm:$0xf] }
 0x240   : > { %v11718_v20 = vld [vmem:[%s16842_s11 + $0x288] sm:$0xf]  ;;  %v2772_v47 = vmul.f32 %v16303_v14, %v2750_v35  ;;  %v11463_v29 = vor.u32 %v15326_v2, %v11462_v22  ;;  %v11464_v40 = vld [vmem:[%s16842_s11 + $0xa8] sm:$0xf0] }
 0x241   : > { %v15390_v26 = vld [vmem:[%s16842_s11 + $0x2a4] sm:$0xf0]  ;;  %v15386_v24 = vld [vmem:[%s16842_s11 + $0x28c] sm:$0xf]  ;;  %v11467_v58 = vor.u32 %v15322_v15, %v11464_v40 }
 0x242   : > { %3620 = vmatpush.bf16.msrb.mxu0 %v11495_v39  ;;  %3633 = vmatpush.bf16.msrb.mxu1 %v11751_v25  ;;  %v11719_v11 = vor.u32 %v15390_v26, %v11718_v20  ;;  %v11720_v33 = vld [vmem:[%s16842_s11 + $0x2a8] sm:$0xf0]  ;;  %v17854_v63 = vadd.f32 %v2772_v47, %v2770_v17  ;;  %v11430_v39 = vld [vmem:[%s16842_s11 + $0x48] sm:$0xf] }
 0x243   : > { %3646 = vmatpush.bf16.msrb.mxu2 %v11499_v28  ;;  %3659 = vmatpush.bf16.msrb.mxu3 %v11755_v9  ;;  %v11723_v44 = vor.u32 %v15386_v24, %v11720_v33  ;;  %v15318_v27 = vld [vmem:[%s16842_s11 + $0x64] sm:$0xf0]  ;;  %v15314_v0 = vld [vmem:[%s16842_s11 + $0x4c] sm:$0xf] }
 0x244   : > { %v11686_v51 = vld [vmem:[%s16842_s11 + $0x248] sm:$0xf]  ;;  %v11431_v48 = vor.u32 %v15318_v27, %v11430_v39  ;;  %v11432_v32 = vld [vmem:[%s16842_s11 + $0x68] sm:$0xf0] }
 0x245   : > { %v15382_v25 = vld [vmem:[%s16842_s11 + $0x264] sm:$0xf0]  ;;  %v15378_v17 = vld [vmem:[%s16842_s11 + $0x24c] sm:$0xf]  ;;  %v11435_v9 = vor.u32 %v15314_v0, %v11432_v32 }
 0x246   : > { %3621 = vmatpush.bf16.msrb.mxu0 %v11463_v29  ;;  %3634 = vmatpush.bf16.msrb.mxu1 %v11719_v11  ;;  %v11687_v35 = vor.u32 %v15382_v25, %v11686_v51  ;;  %v11688_v28 = vld [vmem:[%s16842_s11 + $0x268] sm:$0xf0]  ;;  %v11398_v22 = vld [vmem:[%s16842_s11 + $0x8] sm:$0xf] }
 0x247   : > { %3647 = vmatpush.bf16.msrb.mxu2 %v11467_v58  ;;  %3660 = vmatpush.bf16.msrb.mxu3 %v11723_v44  ;;  %v11691_v14 = vor.u32 %v15378_v17, %v11688_v28  ;;  %v15310_v2 = vld [vmem:[%s16842_s11 + $0x24] sm:$0xf0]  ;;  %v15306_v26 = vld [vmem:[%s16842_s11 + $0xc] sm:$0xf] }
 0x248   : > { %v11654_v20 = vld [vmem:[%s16842_s11 + $0x208] sm:$0xf]  ;;  %v11399_v47 = vor.u32 %v15310_v2, %v11398_v22  ;;  %v11400_v15 = vld [vmem:[%s16842_s11 + $0x28] sm:$0xf0] }
 0x249   : > { %v15374_v29 = vld [vmem:[%s16842_s11 + $0x224] sm:$0xf0]  ;;  %v15370_v24 = vld [vmem:[%s16842_s11 + $0x20c] sm:$0xf]  ;;  %v11403_v58 = vor.u32 %v15306_v26, %v11400_v15 }
 0x24a   : > { %3622 = vmatpush.bf16.msrb.mxu0 %v11431_v48  ;;  %3635 = vmatpush.bf16.msrb.mxu1 %v11687_v35  ;;  %v11655_v11 = vor.u32 %v15374_v29, %v11654_v20  ;;  %v11656_v33 = vld [vmem:[%s16842_s11 + $0x228] sm:$0xf0] }
 0x24b   : > { %3648 = vmatpush.bf16.msrb.mxu2 %v11435_v9  ;;  %3661 = vmatpush.bf16.msrb.mxu3 %v11691_v14  ;;  %v11659_v44 = vor.u32 %v15370_v24, %v11656_v33  ;;  %v11630_v33 = vld [vmem:[%s16842_s11 + $0x1d0] sm:$0xf] }
 0x24c   : > { %v2692_v40 = vpop.f32.mrf.mxu0 }
 0x24e   : > { %v2705_v39 = vpop.f32.mrf.mxu1  ;;  %3623 = vmatpush.bf16.msrb.mxu0 %v11399_v47  ;;  %3636 = vmatpush.bf16.msrb.mxu1 %v11655_v11 }
 0x24f   : > { %v2706_v27 = vadd.f32 %v2705_v39, %v2692_v40  ;;  %3649 = vmatpush.bf16.msrb.mxu2 %v11403_v58  ;;  %3662 = vmatpush.bf16.msrb.mxu3 %v11659_v44  ;;  %v15367_v39 = vld [vmem:[%s16842_s11 + $0x1ec] sm:$0xf0] }
 0x250   : > { %v11886_v58 = vld [vmem:[%s16842_s11 + $0x3d0] sm:$0xf] }
 0x251   : > { %v2741_v51 = vadd.f32 %v2706_v27, %v17669_v42  ;;  %v15431_v44 = vld [vmem:[%s16842_s11 + $0x3ec] sm:$0xf0]  ;;  %v15363_v27 = vld [vmem:[%s16842_s11 + $0x1d4] sm:$0xf] }
 0x252   : > { %v2718_v25 = vpop.f32.mrf.mxu2 }
 0x253   : > { %v2761_v48 = vmul.f32 0.5, %v2741_v51  ;;  %v11632_v51 = vld [vmem:[%s16842_s11 + $0x1f0] sm:$0xf0] }
 0x254   : > { %v2731_v0 = vpop.f32.mrf.mxu3  ;;  %v2694_v32 = vpop.f32.mrf.mxu0 }
 0x255   : > { %16304 = vtanh.f32 %v2761_v48  ;;  %v2732_v35 = vadd.f32 %v2731_v0, %v2718_v25  ;;  %v15427_v0 = vld [vmem:[%s16842_s11 + $0x3d4] sm:$0xf] }
 0x256   : > { %v2707_v17 = vpop.f32.mrf.mxu1  ;;  %v11888_v32 = vld [vmem:[%s16842_s11 + $0x3f0] sm:$0xf0] }
 0x257   : > { %v2742_v28 = vadd.f32 %v2732_v35, %v17680_v1 }
 0x259   : > { %v2762_v9 = vmul.f32 0.5, %v2742_v28  ;;  %v11631_v28 = vor.u32 %v15367_v39, %v11630_v33  ;;  %v15351_v33 = vld [vmem:[%s16842_s11 + $0x16c] sm:$0xf0] }
 0x25a   : > { %v2720_v22 = vpop.f32.mrf.mxu2 }
 0x25b   : > { %v16305_v14 = vpop.eup %16304  ;;  %16306 = vtanh.f32 %v2762_v9  ;;  %v11887_v9 = vor.u32 %v15431_v44, %v11886_v58  ;;  %v15359_v22 = vld [vmem:[%s16842_s11 + $0x1ac] sm:$0xf0] }
 0x25c   : > { %v2733_v42 = vpop.f32.mrf.mxu3  ;;  %16308 = vtanh.f32 %v17836_v56  ;;  %v2765_v2 = vmul.f32 0.5, %v16305_v14  ;;  %v11598_v14 = vld [vmem:[%s16842_s11 + $0x190] sm:$0xf] }
 0x25d   : > { %16310 = vtanh.f32 %v17854_v63  ;;  %v11635_v42 = vor.u32 %v15363_v27, %v11632_v51  ;;  %v11822_v44 = vld [vmem:[%s16842_s11 + $0x350] sm:$0xf]  ;;  %v15347_v51 = vld [vmem:[%s16842_s11 + $0x154] sm:$0xf] }
 0x25e   : > { %v2767_v47 = vadd.f32 0.5, %v2765_v2  ;;  %v11891_v2 = vor.u32 %v15427_v0, %v11888_v32  ;;  %v15415_v27 = vld [vmem:[%s16842_s11 + $0x36c] sm:$0xf0]  ;;  %v11824_v0 = vld [vmem:[%s16842_s11 + $0x370] sm:$0xf0] }
 0x261   : > { %v16307_v20 = vpop.eup %16306 }
 0x262   : > { %v2766_v29 = vmul.f32 0.5, %v16307_v20  ;;  %v16309_v1 = vpop.eup %16308  ;;  %v11854_v20 = vld [vmem:[%s16842_s11 + $0x390] sm:$0xf] }
 0x263   : > { %v16311_v15 = vpop.eup %16310  ;;  %v2777_v40 = vmul.f32 %v16309_v1, %v2767_v47  ;;  %v15423_v47 = vld [vmem:[%s16842_s11 + $0x3ac] sm:$0xf0]  ;;  %v11600_v1 = vld [vmem:[%s16842_s11 + $0x1b0] sm:$0xf0] }
 0x264   : > { %v2768_v26 = vadd.f32 0.5, %v2766_v29  ;;  %v15355_v29 = vld [vmem:[%s16842_s11 + $0x194] sm:$0xf] }
 0x265   : > { %v11603_v39 = vor.u32 %v15355_v29, %v11600_v1  ;;  %v11536_v29 = vld [vmem:[%s16842_s11 + $0x130] sm:$0xf0] }
 0x266   : > { %v2778_v11 = vmul.f32 %v16311_v15, %v2768_v26  ;;  %v15419_v26 = vld [vmem:[%s16842_s11 + $0x394] sm:$0xf] }
 0x267   : > { %v11856_v15 = vld [vmem:[%s16842_s11 + $0x3b0] sm:$0xf0] }
 0x268   : > { %v2779_v24 = vpack.c.bf16 %v2778_v11, %v2777_v40  ;;  %v11599_v40 = vor.u32 %v15359_v22, %v11598_v14  ;;  %v11855_v11 = vor.u32 %v15423_v47, %v11854_v20  ;;  %v11859_v58 = vor.u32 %v15419_v26, %v11856_v15  ;;  %v15343_v14 = vld [vmem:[%s16842_s11 + $0x12c] sm:$0xf0]  ;;  %v15339_v47 = vld [vmem:[%s16842_s11 + $0x114] sm:$0xf] }
 0x269   : > { %v15407_v20 = vld [vmem:[%s16842_s11 + $0x32c] sm:$0xf0]  ;;  %v15403_v1 = vld [vmem:[%s16842_s11 + $0x314] sm:$0xf] }
 0x26a   : > { %2780 = vst [vmem:[#allocation3] sm:$0xff] %v2779_v24  ;;  %v2918_v48 = vunpack.c.l.b16 %v2779_v24  ;;  %v2919_v25 = vunpack.c.h.b16 %v2779_v24  ;;  %v11566_v24 = vld [vmem:[%s16842_s11 + $0x150] sm:$0xf]  ;;  %v11792_v26 = vld [vmem:[%s16842_s11 + $0x330] sm:$0xf0] }
 0x26b   : > { %v11567_v32 = vor.u32 %v15351_v33, %v11566_v24  ;;  %v15335_v24 = vld [vmem:[%s16842_s11 + $0xec] sm:$0xf0]  ;;  %v11539_v33 = vor.u32 %v15339_v47, %v11536_v29  ;;  %v11472_v47 = vld [vmem:[%s16842_s11 + $0xb0] sm:$0xf0] }
 0x26c   : > { %v17884_v35 = vpack.c.b16 %v2918_v48, %v2918_v48  ;;  %v17886_v17 = vpack.c.b16 %v2919_v25, %v2919_v25  ;;  %v11568_v48 = vld [vmem:[%s16842_s11 + $0x170] sm:$0xf0] }
 0x26d   : > { %v15411_v25 = vld [vmem:[%s16842_s11 + $0x354] sm:$0xf]  ;;  %v11571_v22 = vor.u32 %v15347_v51, %v11568_v48 }
 0x26e   : > { %3572 = vmatmul.bf16.vlgmr.msra.gmra.mxu0 %v17884_v35  ;;  %3585 = vmatmul.bf16.vlgmr.msra.gmra.mxu1 %v17886_v17  ;;  %v11504_v51 = vld [vmem:[%s16842_s11 + $0xf0] sm:$0xf0] }
 0x26f   : > { %3598 = vmatmul.bf16.vlgmr.msra.gmra.mxu2 %v17884_v35  ;;  %3611 = vmatmul.bf16.vlgmr.msra.gmra.mxu3 %v17886_v17  ;;  %v15395_v48 = vld [vmem:[%s16842_s11 + $0x2d4] sm:$0xf] }
 0x270   : > { %3668 = vmatpush.bf16.msra.mxu0 %v11631_v28  ;;  %3681 = vmatpush.bf16.msra.mxu1 %v11887_v9  ;;  %v11823_v28 = vor.u32 %v15415_v27, %v11822_v44  ;;  %v11534_v9 = vld [vmem:[%s16842_s11 + $0x110] sm:$0xf]  ;;  %v15331_v27 = vld [vmem:[%s16842_s11 + $0xd4] sm:$0xf] }
 0x271   : > { %3694 = vmatpush.bf16.msra.mxu2 %v11635_v42  ;;  %3707 = vmatpush.bf16.msra.mxu3 %v11891_v2  ;;  %v11827_v42 = vor.u32 %v15411_v25, %v11824_v0  ;;  %v11790_v2 = vld [vmem:[%s16842_s11 + $0x310] sm:$0xf]  ;;  %v11535_v15 = vor.u32 %v15343_v14, %v11534_v9  ;;  %v11760_v25 = vld [vmem:[%s16842_s11 + $0x2f0] sm:$0xf0]  ;;  %v11507_v14 = vor.u32 %v15331_v27, %v11504_v51 }
 0x272   : > { %v15399_v44 = vld [vmem:[%s16842_s11 + $0x2ec] sm:$0xf0]  ;;  %v15387_v29 = vld [vmem:[%s16842_s11 + $0x294] sm:$0xf] }
 0x273   : > { %v15327_v9 = vld [vmem:[%s16842_s11 + $0xac] sm:$0xf0]  ;;  %v11440_v27 = vld [vmem:[%s16842_s11 + $0x70] sm:$0xf0] }
 0x274   : > { %3669 = vmatpush.bf16.msra.mxu0 %v11599_v40  ;;  %3682 = vmatpush.bf16.msra.mxu1 %v11855_v11  ;;  %v11791_v40 = vor.u32 %v15407_v20, %v11790_v2  ;;  %v11502_v11 = vld [vmem:[%s16842_s11 + $0xd0] sm:$0xf]  ;;  %v15323_v20 = vld [vmem:[%s16842_s11 + $0x94] sm:$0xf] }
 0x275   : > { %3695 = vmatpush.bf16.msra.mxu2 %v11603_v39  ;;  %3708 = vmatpush.bf16.msra.mxu3 %v11859_v58  ;;  %v11795_v39 = vor.u32 %v15403_v1, %v11792_v26  ;;  %v11758_v58 = vld [vmem:[%s16842_s11 + $0x2d0] sm:$0xf]  ;;  %v11503_v0 = vor.u32 %v15335_v24, %v11502_v11  ;;  %v11728_v1 = vld [vmem:[%s16842_s11 + $0x2b0] sm:$0xf0]  ;;  %v11475_v24 = vor.u32 %v15323_v20, %v11472_v47 }
 0x276   : > { %v15391_v2 = vld [vmem:[%s16842_s11 + $0x2ac] sm:$0xf0]  ;;  %v15379_v51 = vld [vmem:[%s16842_s11 + $0x254] sm:$0xf] }
 0x277   : > { %v15319_v11 = vld [vmem:[%s16842_s11 + $0x6c] sm:$0xf0]  ;;  %v11408_v20 = vld [vmem:[%s16842_s11 + $0x30] sm:$0xf0] }
 0x278   : > { %3670 = vmatpush.bf16.msra.mxu0 %v11567_v32  ;;  %3683 = vmatpush.bf16.msra.mxu1 %v11823_v28  ;;  %v11759_v32 = vor.u32 %v15399_v44, %v11758_v58  ;;  %v11470_v28 = vld [vmem:[%s16842_s11 + $0x90] sm:$0xf]  ;;  %v15315_v44 = vld [vmem:[%s16842_s11 + $0x54] sm:$0xf] }
 0x279   : > { %3696 = vmatpush.bf16.msra.mxu2 %v11571_v22  ;;  %3709 = vmatpush.bf16.msra.mxu3 %v11827_v42  ;;  %v11763_v22 = vor.u32 %v15395_v48, %v11760_v25  ;;  %v11726_v42 = vld [vmem:[%s16842_s11 + $0x290] sm:$0xf]  ;;  %v11471_v26 = vor.u32 %v15327_v9, %v11470_v28  ;;  %v11696_v48 = vld [vmem:[%s16842_s11 + $0x270] sm:$0xf0] }
 0x27a   : > { %v15383_v58 = vld [vmem:[%s16842_s11 + $0x26c] sm:$0xf0]  ;;  %v15371_v47 = vld [vmem:[%s16842_s11 + $0x214] sm:$0xf] }
 0x27b   : > { %v11406_v25 = vld [vmem:[%s16842_s11 + $0x10] sm:$0xf] }
 0x27c   : > { %3671 = vmatpush.bf16.msra.mxu0 %v11535_v15  ;;  %3684 = vmatpush.bf16.msra.mxu1 %v11791_v40  ;;  %v11727_v15 = vor.u32 %v15391_v2, %v11726_v42  ;;  %v11438_v40 = vld [vmem:[%s16842_s11 + $0x50] sm:$0xf]  ;;  %v11699_v42 = vor.u32 %v15379_v51, %v11696_v48  ;;  %v15307_v2 = vld [vmem:[%s16842_s11 + $0x14] sm:$0xf] }
 0x27d   : > { %3697 = vmatpush.bf16.msra.mxu2 %v11539_v33  ;;  %3710 = vmatpush.bf16.msra.mxu3 %v11795_v39  ;;  %v11731_v33 = vor.u32 %v15387_v29, %v11728_v1  ;;  %v11694_v39 = vld [vmem:[%s16842_s11 + $0x250] sm:$0xf]  ;;  %v11664_v29 = vld [vmem:[%s16842_s11 + $0x230] sm:$0xf0]  ;;  %v11638_v1 = vld [vmem:[%s16842_s11 + $0x1d8] sm:$0xf] }
 0x27e   : > { %3624 = vmatmul.bf16.vlgmr.msrb.gmra.mxu0 %v17884_v35  ;;  %3637 = vmatmul.bf16.vlgmr.msrb.gmra.mxu1 %v17886_v17  ;;  %v15311_v28 = vld [vmem:[%s16842_s11 + $0x2c] sm:$0xf0]  ;;  %v11667_v51 = vor.u32 %v15371_v47, %v11664_v29  ;;  %v11574_v29 = vld [vmem:[%s16842_s11 + $0x158] sm:$0xf] }
 0x27f   : > { %3650 = vmatmul.bf16.vlgmr.msrb.gmra.mxu2 %v17884_v35  ;;  %3663 = vmatmul.bf16.vlgmr.msrb.gmra.mxu3 %v17886_v17  ;;  %v11662_v9 = vld [vmem:[%s16842_s11 + $0x210] sm:$0xf] }
 0x280   : > { %3672 = vmatpush.bf16.msra.mxu0 %v11503_v0  ;;  %3685 = vmatpush.bf16.msra.mxu1 %v11759_v32  ;;  %v11439_v0 = vor.u32 %v15319_v11, %v11438_v40  ;;  %v11695_v32 = vor.u32 %v15383_v58, %v11694_v39  ;;  %v15432_v40 = vld [vmem:[%s16842_s11 + $0x3f4] sm:$0xf0]  ;;  %v15364_v11 = vld [vmem:[%s16842_s11 + $0x1dc] sm:$0xf] }
 0x281   : > { %3698 = vmatpush.bf16.msra.mxu2 %v11507_v14  ;;  %3711 = vmatpush.bf16.msra.mxu3 %v11763_v22  ;;  %v15375_v14 = vld [vmem:[%s16842_s11 + $0x22c] sm:$0xf0]  ;;  %v11443_v22 = vor.u32 %v15315_v44, %v11440_v27  ;;  %v11640_v39 = vld [vmem:[%s16842_s11 + $0x1f8] sm:$0xf0]  ;;  %v11411_v27 = vor.u32 %v15307_v2, %v11408_v20 }
 0x282   : > { %v15428_v58 = vld [vmem:[%s16842_s11 + $0x3dc] sm:$0xf] }
 0x283   : > { %v11896_v44 = vld [vmem:[%s16842_s11 + $0x3f8] sm:$0xf0] }
 0x284   : > { %3673 = vmatpush.bf16.msra.mxu0 %v11471_v26  ;;  %3686 = vmatpush.bf16.msra.mxu1 %v11727_v15  ;;  %v15368_v26 = vld [vmem:[%s16842_s11 + $0x1f4] sm:$0xf0]  ;;  %v11864_v2 = vld [vmem:[%s16842_s11 + $0x3b8] sm:$0xf0] }
 0x285   : > { %3699 = vmatpush.bf16.msra.mxu2 %v11475_v24  ;;  %3712 = vmatpush.bf16.msra.mxu3 %v11731_v33  ;;  %v11894_v15 = vld [vmem:[%s16842_s11 + $0x3d8] sm:$0xf]  ;;  %v11407_v24 = vor.u32 %v15311_v28, %v11406_v25  ;;  %v11663_v33 = vor.u32 %v15375_v14, %v11662_v9  ;;  %v11639_v48 = vor.u32 %v15368_v26, %v11638_v1  ;;  %v15356_v14 = vld [vmem:[%s16842_s11 + $0x19c] sm:$0xf] }
 0x286   : > { %v11895_v55 = vor.u32 %v15432_v40, %v11894_v15  ;;  %v11899_v25 = vor.u32 %v15428_v58, %v11896_v44  ;;  %v11862_v28 = vld [vmem:[%s16842_s11 + $0x398] sm:$0xf] }
 0x287   : > { %v15424_v9 = vld [vmem:[%s16842_s11 + $0x3b4] sm:$0xf0] }
 0x288   : > { %3674 = vmatpush.bf16.msra.mxu0 %v11439_v0  ;;  %3687 = vmatpush.bf16.msra.mxu1 %v11695_v32  ;;  %v15360_v0 = vld [vmem:[%s16842_s11 + $0x1b4] sm:$0xf0]  ;;  %v11643_v32 = vor.u32 %v15364_v11, %v11640_v39  ;;  %v11863_v47 = vor.u32 %v15424_v9, %v11862_v28  ;;  %v11544_v28 = vld [vmem:[%s16842_s11 + $0x138] sm:$0xf0] }
 0x289   : > { %3700 = vmatpush.bf16.msra.mxu2 %v11443_v22  ;;  %3713 = vmatpush.bf16.msra.mxu3 %v11699_v42  ;;  %v11608_v22 = vld [vmem:[%s16842_s11 + $0x1b8] sm:$0xf0]  ;;  %v11607_v20 = vor.u32 %v15360_v0, %v11606_v41  ;;  %v15352_v1 = vld [vmem:[%s16842_s11 + $0x174] sm:$0xf0] }
 0x28a   : > { %v15420_v42 = vld [vmem:[%s16842_s11 + $0x39c] sm:$0xf]  ;;  %v11611_v26 = vor.u32 %v15356_v14, %v11608_v22  ;;  %v11830_v40 = vld [vmem:[%s16842_s11 + $0x358] sm:$0xf]  ;;  %v11575_v39 = vor.u32 %v15352_v1, %v11574_v29 }
 0x28b   : > { %v11867_v15 = vor.u32 %v15420_v42, %v11864_v2  ;;  %v15416_v11 = vld [vmem:[%s16842_s11 + $0x374] sm:$0xf0]  ;;  %v15412_v41 = vld [vmem:[%s16842_s11 + $0x35c] sm:$0xf] }
 0x28c   : > { %3675 = vmatpush.bf16.msra.mxu0 %v11407_v24  ;;  %3688 = vmatpush.bf16.msra.mxu1 %v11663_v33  ;;  %v15348_v24 = vld [vmem:[%s16842_s11 + $0x15c] sm:$0xf]  ;;  %v11831_v58 = vor.u32 %v15416_v11, %v11830_v40  ;;  %v11542_v44 = vld [vmem:[%s16842_s11 + $0x118] sm:$0xf] }
 0x28d   : > { %3701 = vmatpush.bf16.msra.mxu2 %v11411_v27  ;;  %3714 = vmatpush.bf16.msra.mxu3 %v11667_v51  ;;  %v11832_v33 = vld [vmem:[%s16842_s11 + $0x378] sm:$0xf0]  ;;  %v15344_v27 = vld [vmem:[%s16842_s11 + $0x134] sm:$0xf0] }
 0x28e   : > { %v11798_v0 = vld [vmem:[%s16842_s11 + $0x318] sm:$0xf]  ;;  %v15404_v9 = vld [vmem:[%s16842_s11 + $0x31c] sm:$0xf]  ;;  %v11543_v22 = vor.u32 %v15344_v27, %v11542_v44 }
 0x28f   : > { %3676 = vmatmul.bf16.vlgmr.msra.gmra.mxu0 %v17884_v35  ;;  %3689 = vmatmul.bf16.vlgmr.msra.gmra.mxu1 %v17886_v17  ;;  %v11800_v14 = vld [vmem:[%s16842_s11 + $0x338] sm:$0xf0]  ;;  %v11510_v2 = vld [vmem:[%s16842_s11 + $0xd8] sm:$0xf] }
 0x290   : > { %3720 = vmatpush.bf16.msrb.mxu0 %v11639_v48  ;;  %3733 = vmatpush.bf16.msrb.mxu1 %v11895_v55  ;;  %v11576_v55 = vld [vmem:[%s16842_s11 + $0x178] sm:$0xf0]  ;;  %v11835_v48 = vor.u32 %v15412_v41, %v11832_v33  ;;  %v11803_v29 = vor.u32 %v15404_v9, %v11800_v14  ;;  %v11766_v1 = vld [vmem:[%s16842_s11 + $0x2d8] sm:$0xf] }
 0x291   : > { %3746 = vmatpush.bf16.msrb.mxu2 %v11643_v32  ;;  %3759 = vmatpush.bf16.msrb.mxu3 %v11899_v25  ;;  %v11579_v51 = vor.u32 %v15348_v24, %v11576_v55  ;;  %v15408_v32 = vld [vmem:[%s16842_s11 + $0x334] sm:$0xf0]  ;;  %v15340_v25 = vld [vmem:[%s16842_s11 + $0x11c] sm:$0xf] }
 0x292   : > { %3702 = vmatmul.bf16.vlgmr.msra.gmra.mxu2 %v17884_v35  ;;  %3715 = vmatmul.bf16.vlgmr.msra.gmra.mxu3 %v17886_v17  ;;  %v11799_v42 = vor.u32 %v15408_v32, %v11798_v0  ;;  %v11512_v40 = vld [vmem:[%s16842_s11 + $0xf8] sm:$0xf0]  ;;  %v11478_v33 = vld [vmem:[%s16842_s11 + $0x98] sm:$0xf] }
 0x293   : > { %v15396_v11 = vld [vmem:[%s16842_s11 + $0x2dc] sm:$0xf]  ;;  %v11734_v27 = vld [vmem:[%s16842_s11 + $0x298] sm:$0xf] }
 0x294   : > { %3721 = vmatpush.bf16.msrb.mxu0 %v11607_v20  ;;  %3734 = vmatpush.bf16.msrb.mxu1 %v11863_v47  ;;  %v15336_v20 = vld [vmem:[%s16842_s11 + $0xf4] sm:$0xf0]  ;;  %v11547_v47 = vor.u32 %v15340_v25, %v11544_v28  ;;  %v11768_v24 = vld [vmem:[%s16842_s11 + $0x2f8] sm:$0xf0] }
 0x295   : > { %3747 = vmatpush.bf16.msrb.mxu2 %v11611_v26  ;;  %3760 = vmatpush.bf16.msrb.mxu3 %v11867_v15  ;;  %v15400_v26 = vld [vmem:[%s16842_s11 + $0x2f4] sm:$0xf0]  ;;  %v15332_v15 = vld [vmem:[%s16842_s11 + $0xdc] sm:$0xf]  ;;  %v11511_v55 = vor.u32 %v15336_v20, %v11510_v2  ;;  %v11771_v44 = vor.u32 %v15396_v11, %v11768_v24 }
 0x296   : > { %v11767_v41 = vor.u32 %v15400_v26, %v11766_v1  ;;  %v11480_v0 = vld [vmem:[%s16842_s11 + $0xb8] sm:$0xf0]  ;;  %v11446_v14 = vld [vmem:[%s16842_s11 + $0x58] sm:$0xf] }
 0x297   : > { %v15388_v32 = vld [vmem:[%s16842_s11 + $0x29c] sm:$0xf]  ;;  %v11702_v20 = vld [vmem:[%s16842_s11 + $0x258] sm:$0xf] }
 0x298   : > { %3722 = vmatpush.bf16.msrb.mxu0 %v11575_v39  ;;  %3735 = vmatpush.bf16.msrb.mxu1 %v11831_v58  ;;  %v15328_v39 = vld [vmem:[%s16842_s11 + $0xb4] sm:$0xf0]  ;;  %v11515_v58 = vor.u32 %v15332_v15, %v11512_v40  ;;  %v11736_v25 = vld [vmem:[%s16842_s11 + $0x2b8] sm:$0xf0] }
 0x299   : > { %3748 = vmatpush.bf16.msrb.mxu2 %v11579_v51  ;;  %3761 = vmatpush.bf16.msrb.mxu3 %v11835_v48  ;;  %v15392_v51 = vld [vmem:[%s16842_s11 + $0x2b4] sm:$0xf0]  ;;  %v15324_v48 = vld [vmem:[%s16842_s11 + $0x9c] sm:$0xf]  ;;  %v11479_v28 = vor.u32 %v15328_v39, %v11478_v33  ;;  %v11739_v2 = vor.u32 %v15388_v32, %v11736_v25 }
 0x29a   : > { %v11735_v9 = vor.u32 %v15392_v51, %v11734_v27  ;;  %v11448_v1 = vld [vmem:[%s16842_s11 + $0x78] sm:$0xf0]  ;;  %v11414_v24 = vld [vmem:[%s16842_s11 + $0x18] sm:$0xf] }
 0x29b   : > { %v15380_v26 = vld [vmem:[%s16842_s11 + $0x25c] sm:$0xf]  ;;  %v11670_v39 = vld [vmem:[%s16842_s11 + $0x218] sm:$0xf] }
 0x29c   : > { %3723 = vmatpush.bf16.msrb.mxu0 %v11543_v22  ;;  %3736 = vmatpush.bf16.msrb.mxu1 %v11799_v42  ;;  %v15320_v22 = vld [vmem:[%s16842_s11 + $0x74] sm:$0xf0]  ;;  %v11483_v42 = vor.u32 %v15324_v48, %v11480_v0  ;;  %v11704_v15 = vld [vmem:[%s16842_s11 + $0x278] sm:$0xf0] }
 0x29d   : > { %3749 = vmatpush.bf16.msrb.mxu2 %v11547_v47  ;;  %3762 = vmatpush.bf16.msrb.mxu3 %v11803_v29  ;;  %v15384_v47 = vld [vmem:[%s16842_s11 + $0x274] sm:$0xf0]  ;;  %v15316_v29 = vld [vmem:[%s16842_s11 + $0x5c] sm:$0xf]  ;;  %v11447_v40 = vor.u32 %v15320_v22, %v11446_v14  ;;  %v11707_v33 = vor.u32 %v15380_v26, %v11704_v15  ;;  %v12126_v22 = vld [vmem:[%s16842_s11 + $0x1c0] sm:$0xf] }
 0x29e   : > { %v11703_v11 = vor.u32 %v15384_v47, %v11702_v20  ;;  %v11416_v27 = vld [vmem:[%s16842_s11 + $0x38] sm:$0xf0]  ;;  %v15557_v47 = vld [vmem:[%s16842_s11 + $0x3dc] sm:$0xf0] }
 0x29f   : > { %v15372_v51 = vld [vmem:[%s16842_s11 + $0x21c] sm:$0xf] }
 0x2a0   : > { %3724 = vmatpush.bf16.msrb.mxu0 %v11511_v55  ;;  %3737 = vmatpush.bf16.msrb.mxu1 %v11767_v41  ;;  %v15312_v55 = vld [vmem:[%s16842_s11 + $0x34] sm:$0xf0]  ;;  %v11451_v41 = vor.u32 %v15316_v29, %v11448_v1  ;;  %v11672_v48 = vld [vmem:[%s16842_s11 + $0x238] sm:$0xf0]  ;;  %v15489_v29 = vld [vmem:[%s16842_s11 + $0x1c4] sm:$0xf] }
 0x2a1   : > { %3750 = vmatpush.bf16.msrb.mxu2 %v11515_v58  ;;  %3763 = vmatpush.bf16.msrb.mxu3 %v11771_v44  ;;  %v15376_v58 = vld [vmem:[%s16842_s11 + $0x234] sm:$0xf0]  ;;  %v15308_v44 = vld [vmem:[%s16842_s11 + $0x1c] sm:$0xf]  ;;  %v11415_v0 = vor.u32 %v15312_v55, %v11414_v24  ;;  %v12128_v1 = vld [vmem:[%s16842_s11 + $0x1e0] sm:$0xf0] }
 0x2a2   : > { %v11671_v32 = vor.u32 %v15376_v58, %v11670_v39  ;;  %v11419_v25 = vor.u32 %v15308_v44, %v11416_v27  ;;  %v12131_v15 = vor.u32 %v15489_v29, %v12128_v1  ;;  %v12094_v55 = vld [vmem:[%s16842_s11 + $0x180] sm:$0xf]  ;;  %v15473_v1 = vld [vmem:[%s16842_s11 + $0x144] sm:$0xf] }
 0x2a3   : > { %v15549_v27 = vld [vmem:[%s16842_s11 + $0x39c] sm:$0xf0] }
 0x2a4   : > { %3725 = vmatpush.bf16.msrb.mxu0 %v11479_v28  ;;  %3738 = vmatpush.bf16.msrb.mxu1 %v11735_v9  ;;  %v11675_v28 = vor.u32 %v15372_v51, %v11672_v48  ;;  %v15481_v51 = vld [vmem:[%s16842_s11 + $0x184] sm:$0xf]  ;;  %v15541_v29 = vld [vmem:[%s16842_s11 + $0x35c] sm:$0xf0] }
 0x2a5   : > { %3751 = vmatpush.bf16.msrb.mxu2 %v11483_v42  ;;  %3764 = vmatpush.bf16.msrb.mxu3 %v11739_v2  ;;  %v15493_v42 = vld [vmem:[%s16842_s11 + $0x1dc] sm:$0xf0]  ;;  %v12096_v48 = vld [vmem:[%s16842_s11 + $0x1a0] sm:$0xf0] }
 0x2a6   : > { %v12382_v2 = vld [vmem:[%s16842_s11 + $0x3c0] sm:$0xf]  ;;  %v12127_v20 = vor.u32 %v15493_v42, %v12126_v22 }
 0x2a7   : > { %v12383_v26 = vor.u32 %v15557_v47, %v12382_v2  ;;  %v12062_v42 = vld [vmem:[%s16842_s11 + $0x140] sm:$0xf] }
 0x2a8   : > { %3726 = vmatpush.bf16.msrb.mxu0 %v11447_v40  ;;  %3739 = vmatpush.bf16.msrb.mxu1 %v11703_v11  ;;  %v15553_v40 = vld [vmem:[%s16842_s11 + $0x3c4] sm:$0xf]  ;;  %v15477_v2 = vld [vmem:[%s16842_s11 + $0x15c] sm:$0xf0] }
 0x2a9   : > { %3752 = vmatpush.bf16.msrb.mxu2 %v11451_v41  ;;  %3765 = vmatpush.bf16.msrb.mxu3 %v11707_v33  ;;  %v15485_v41 = vld [vmem:[%s16842_s11 + $0x19c] sm:$0xf0]  ;;  %v12063_v47 = vor.u32 %v15477_v2, %v12062_v42  ;;  %v12288_v42 = vld [vmem:[%s16842_s11 + $0x320] sm:$0xf0] }
 0x2aa   : > { %v12350_v33 = vld [vmem:[%s16842_s11 + $0x380] sm:$0xf]  ;;  %v12095_v44 = vor.u32 %v15485_v41, %v12094_v55 }
 0x2ac   : > { %3727 = vmatpush.bf16.msrb.mxu0 %v11415_v0  ;;  %3740 = vmatpush.bf16.msrb.mxu1 %v11671_v32  ;;  %v12351_v0 = vor.u32 %v15549_v27, %v12350_v33  ;;  %v12099_v32 = vor.u32 %v15481_v51, %v12096_v48  ;;  %v12286_v27 = vld [vmem:[%s16842_s11 + $0x300] sm:$0xf] }
 0x2ad   : > { %3753 = vmatpush.bf16.msrb.mxu2 %v11419_v25  ;;  %3766 = vmatpush.bf16.msrb.mxu3 %v11675_v28  ;;  %v15545_v25 = vld [vmem:[%s16842_s11 + $0x384] sm:$0xf] }
 0x2ae   : > { %v12352_v28 = vld [vmem:[%s16842_s11 + $0x3a0] sm:$0xf0] }
 0x2af   : > { %3728 = vmatmul.bf16.vlgmr.msrb.gmra.mxu0 %v17884_v35  ;;  %3741 = vmatmul.bf16.vlgmr.msrb.gmra.mxu1 %v17886_v17  ;;  %v12355_v22 = vor.u32 %v15545_v25, %v12352_v28  ;;  %v15465_v25 = vld [vmem:[%s16842_s11 + $0x104] sm:$0xf] }
 0x2b0   : > { %3754 = vmatmul.bf16.vlgmr.msrb.gmra.mxu2 %v17884_v35  ;;  %3767 = vmatmul.bf16.vlgmr.msrb.gmra.mxu3 %v17886_v17  ;;  %v12384_v35 = vld [vmem:[%s16842_s11 + $0x3e0] sm:$0xf0] }
 0x2b1   : > { %4601 = vmatpush.bf16.msra.mxu0 %v12127_v20  ;;  %v12387_v17 = vor.u32 %v15553_v40, %v12384_v35  ;;  %4614 = vmatpush.bf16.msra.mxu1 %v12383_v26  ;;  %v12318_v20 = vld [vmem:[%s16842_s11 + $0x340] sm:$0xf]  ;;  %v15537_v40 = vld [vmem:[%s16842_s11 + $0x344] sm:$0xf] }
 0x2b2   : > { %4627 = vmatpush.bf16.msra.mxu2 %v12131_v15  ;;  %v12319_v26 = vor.u32 %v15541_v29, %v12318_v20  ;;  %v12064_v15 = vld [vmem:[%s16842_s11 + $0x160] sm:$0xf0] }
 0x2b3   : > { %4640 = vmatpush.bf16.msra.mxu3 %v12387_v17  ;;  %v12320_v35 = vld [vmem:[%s16842_s11 + $0x360] sm:$0xf0]  ;;  %v12067_v17 = vor.u32 %v15473_v1, %v12064_v15  ;;  %v11998_v1 = vld [vmem:[%s16842_s11 + $0xc0] sm:$0xf] }
 0x2b4   : > { %v12323_v55 = vor.u32 %v15537_v40, %v12320_v35  ;;  %v12032_v28 = vld [vmem:[%s16842_s11 + $0x120] sm:$0xf0]  ;;  %v12254_v15 = vld [vmem:[%s16842_s11 + $0x2c0] sm:$0xf] }
 0x2b5   : > { %4602 = vmatpush.bf16.msra.mxu0 %v12095_v44  ;;  %4615 = vmatpush.bf16.msra.mxu1 %v12351_v0  ;;  %v15469_v44 = vld [vmem:[%s16842_s11 + $0x11c] sm:$0xf0]  ;;  %v12035_v2 = vor.u32 %v15465_v25, %v12032_v28 }
 0x2b6   : > { %4628 = vmatpush.bf16.msra.mxu2 %v12099_v32  ;;  %v15533_v32 = vld [vmem:[%s16842_s11 + $0x31c] sm:$0xf0] }
 0x2b7   : > { %4641 = vmatpush.bf16.msra.mxu3 %v12355_v22  ;;  %v15529_v22 = vld [vmem:[%s16842_s11 + $0x304] sm:$0xf]  ;;  %v15525_v35 = vld [vmem:[%s16842_s11 + $0x2dc] sm:$0xf0] }
 0x2b8   : > { %v12291_v20 = vor.u32 %v15529_v22, %v12288_v42  ;;  %v12222_v22 = vld [vmem:[%s16842_s11 + $0x280] sm:$0xf] }
 0x2b9   : > { %4603 = vmatpush.bf16.msra.mxu0 %v12063_v47  ;;  %4616 = vmatpush.bf16.msra.mxu1 %v12319_v26  ;;  %v15461_v26 = vld [vmem:[%s16842_s11 + $0xdc] sm:$0xf0] }
 0x2ba   : > { %4629 = vmatpush.bf16.msra.mxu2 %v12067_v17  ;;  %v11999_v40 = vor.u32 %v15461_v26, %v11998_v1  ;;  %v15457_v17 = vld [vmem:[%s16842_s11 + $0xc4] sm:$0xf]  ;;  %v15517_v42 = vld [vmem:[%s16842_s11 + $0x29c] sm:$0xf0] }
 0x2bb   : > { %4642 = vmatpush.bf16.msra.mxu3 %v12323_v55  ;;  %v12000_v55 = vld [vmem:[%s16842_s11 + $0xe0] sm:$0xf0] }
 0x2bc   : > { %v12224_v1 = vld [vmem:[%s16842_s11 + $0x2a0] sm:$0xf0] }
 0x2be   : > { %4630 = vmatpush.bf16.msra.mxu2 %v12035_v2  ;;  %v15449_v2 = vld [vmem:[%s16842_s11 + $0x84] sm:$0xf] }
 0x2bf   : > { %4643 = vmatpush.bf16.msra.mxu3 %v12291_v20  ;;  %v12223_v20 = vor.u32 %v15517_v42, %v12222_v22  ;;  %v15501_v42 = vld [vmem:[%s16842_s11 + $0x21c] sm:$0xf0] }
 0x2eb   : > { %v3573_v9 = vpop.f32.mrf.mxu0  ;;  %v3586_v14 = vpop.f32.mrf.mxu1 }
 0x2ec   : > { %v3587_v41 = vadd.f32 %v3586_v14, %v3573_v9  ;;  %v12287_v14 = vor.u32 %v15533_v32, %v12286_v27 }
 0x2ee   : > { %v3772_v47 = vadd.f32 %v3587_v41, %v17156_v60  ;;  %4617 = vmatpush.bf16.msra.mxu1 %v12287_v14  ;;  %v12256_v60 = vld [vmem:[%s16842_s11 + $0x2e0] sm:$0xf0] }
 0x2f0   : > { %v3780_v41 = vmul.f32 0.5, %v3772_v47  ;;  %v11968_v47 = vld [vmem:[%s16842_s11 + $0xa0] sm:$0xf0] }
 0x2f2   : > { %v18032_v11 = vpop.f32.mrf.mxu2  ;;  %v18034_v24 = vpop.f32.mrf.mxu3 }
 0x2f3   : > { %v3575_v39 = vpop.f32.mrf.mxu0  ;;  %v3588_v58 = vpop.f32.mrf.mxu1  ;;  %v3613_v32 = vadd.f32 %v18034_v24, %v18032_v11  ;;  %v11971_v24 = vor.u32 %v15449_v2, %v11968_v47  ;;  %v15433_v2 = vld [vmem:[%s16842_s11 + $0x4] sm:$0xf] }
 0x2f4   : > { %v12030_v58 = vld [vmem:[%s16842_s11 + $0x100] sm:$0xf]  ;;  %v15497_v47 = vld [vmem:[%s16842_s11 + $0x204] sm:$0xf] }
 0x2f5   : > { %v12031_v0 = vor.u32 %v15469_v44, %v12030_v58  ;;  %v12003_v58 = vor.u32 %v15457_v17, %v12000_v55  ;;  %v15521_v44 = vld [vmem:[%s16842_s11 + $0x2c4] sm:$0xf]  ;;  %v15509_v55 = vld [vmem:[%s16842_s11 + $0x25c] sm:$0xf0] }
 0x2f7   : > { %4604 = vmatpush.bf16.msra.mxu0 %v12031_v0  ;;  %v15453_v0 = vld [vmem:[%s16842_s11 + $0x9c] sm:$0xf0]  ;;  %4631 = vmatpush.bf16.msra.mxu2 %v12003_v58  ;;  %v3773_v58 = vadd.f32 %v3613_v32, %v17176_v36 }
 0x2f8   : > { %v11902_v32 = vld [vmem:[%s16842_s11] sm:$0xf] }
 0x2fa   : > { %v3601_v33 = vpop.f32.mrf.mxu2  ;;  %v3614_v39 = vpop.f32.mrf.mxu3 }
 0x2fb   : > { %v3625_v51 = vpop.f32.mrf.mxu0  ;;  %v3638_v48 = vpop.f32.mrf.mxu1  ;;  %v12255_v39 = vor.u32 %v15525_v35, %v12254_v15  ;;  %4605 = vmatpush.bf16.msra.mxu0 %v11999_v40  ;;  %v11934_v15 = vld [vmem:[%s16842_s11 + $0x40] sm:$0xf]  ;;  %4632 = vmatpush.bf16.msra.mxu2 %v11971_v24 }
 0x2fc   : > { %v3639_v9 = vadd.f32 %v3638_v48, %v3625_v51  ;;  %v11966_v48 = vld [vmem:[%s16842_s11 + $0x80] sm:$0xf] }
 0x2fd   : > { %4618 = vmatpush.bf16.msra.mxu1 %v12255_v39  ;;  %v11967_v28 = vor.u32 %v15453_v0, %v11966_v48  ;;  %v15445_v40 = vld [vmem:[%s16842_s11 + $0x5c] sm:$0xf0]  ;;  %v11936_v39 = vld [vmem:[%s16842_s11 + $0x60] sm:$0xf0] }
 0x2fe   : > { %v3774_v29 = vadd.f32 %v3639_v9, %v17351_v37  ;;  %v12259_v37 = vor.u32 %v15521_v44, %v12256_v60  ;;  %v12190_v35 = vld [vmem:[%s16842_s11 + $0x240] sm:$0xf]  ;;  %v11935_v17 = vor.u32 %v15445_v40, %v11934_v15  ;;  %v15505_v60 = vld [vmem:[%s16842_s11 + $0x244] sm:$0xf]  ;;  %v12134_v40 = vld [vmem:[%s16842_s11 + $0x1c8] sm:$0xf] }
 0x2ff   : > { %4606 = vmatpush.bf16.msra.mxu0 %v11967_v28 }
 0x300   : > { %v3788_v33 = vmul.f32 0.5, %v3774_v29  ;;  %4644 = vmatpush.bf16.msra.mxu3 %v12259_v37  ;;  %v15513_v29 = vld [vmem:[%s16842_s11 + $0x284] sm:$0xf] }
 0x301   : > { %v12227_v26 = vor.u32 %v15513_v29, %v12224_v1  ;;  %4619 = vmatpush.bf16.msra.mxu1 %v12223_v20  ;;  %v12192_v37 = vld [vmem:[%s16842_s11 + $0x260] sm:$0xf0] }
 0x302   : > { %16312 = vtanh.f32 %v3788_v33  ;;  %v3651_v27 = vpop.f32.mrf.mxu2  ;;  %v3664_v51 = vpop.f32.mrf.mxu3  ;;  %v15441_v33 = vld [vmem:[%s16842_s11 + $0x44] sm:$0xf] }
 0x303   : > { %v3665_v25 = vadd.f32 %v3664_v51, %v3651_v27  ;;  %v3627_v9 = vpop.f32.mrf.mxu0  ;;  %v3640_v14 = vpop.f32.mrf.mxu1  ;;  %16314 = vtanh.f32 %v3780_v41  ;;  %v11939_v44 = vor.u32 %v15441_v33, %v11936_v39  ;;  %v12195_v51 = vor.u32 %v15505_v60, %v12192_v37  ;;  %4607 = vmatpush.bf16.msra.mxu0 %v11935_v17  ;;  %v12160_v29 = vld [vmem:[%s16842_s11 + $0x220] sm:$0xf0]  ;;  %v12390_v17 = vld [vmem:[%s16842_s11 + $0x3c8] sm:$0xf] }
 0x304   : > { %4645 = vmatpush.bf16.msra.mxu3 %v12227_v26  ;;  %v1467_v41 = vadd.f32 %v17496_v30, %v17457_v61  ;;  %v12158_v9 = vld [vmem:[%s16842_s11 + $0x200] sm:$0xf]  ;;  %v3781_v14 = vmul.f32 0.5, %v3773_v58  ;;  %v11904_v30 = vld [vmem:[%s16842_s11 + $0x20] sm:$0xf0]  ;;  %v12163_v15 = vor.u32 %v15497_v47, %v12160_v29 }
 0x305   : > { %v3775_v11 = vadd.f32 %v3665_v25, %v17366_v6  ;;  %v12191_v6 = vor.u32 %v15509_v55, %v12190_v35  ;;  %v15437_v25 = vld [vmem:[%s16842_s11 + $0x1c] sm:$0xf0]  ;;  %4633 = vmatpush.bf16.msra.mxu2 %v11939_v44  ;;  %v12159_v20 = vor.u32 %v15501_v42, %v12158_v9  ;;  %v11907_v26 = vor.u32 %v15433_v2, %v11904_v30  ;;  %v15494_v35 = vld [vmem:[%s16842_s11 + $0x1e4] sm:$0xf0]  ;;  %v12136_v44 = vld [vmem:[%s16842_s11 + $0x1e8] sm:$0xf0] }
 0x306   : > { %v11903_v22 = vor.u32 %v15437_v25, %v11902_v32  ;;  %v1496_v55 = vadd.f32 %v17500_v21, %v1467_v41  ;;  %v12135_v39 = vor.u32 %v15494_v35, %v12134_v40  ;;  %v15558_v58 = vld [vmem:[%s16842_s11 + $0x3e4] sm:$0xf0]  ;;  %v1525_v21 = vadd.f32 %v17515_v23, %v17484_v49  ;;  %v15482_v42 = vld [vmem:[%s16842_s11 + $0x18c] sm:$0xf] }
 0x307   : > { %v3789_v48 = vmul.f32 0.5, %v3775_v11  ;;  %4620 = vmatpush.bf16.msra.mxu1 %v12191_v6  ;;  %v15490_v6 = vld [vmem:[%s16842_s11 + $0x1cc] sm:$0xf]  ;;  %v12391_v60 = vor.u32 %v15558_v58, %v12390_v17  ;;  %v15486_v32 = vld [vmem:[%s16842_s11 + $0x1a4] sm:$0xf0] }
 0x308   : > { %v16313_v27 = vpop.eup %16312  ;;  %4646 = vmatpush.bf16.msra.mxu3 %v12195_v51  ;;  %4608 = vmatpush.bf16.msra.mxu0 %v11903_v22  ;;  %v12139_v37 = vor.u32 %v15490_v6, %v12136_v44  ;;  %v12392_v51 = vld [vmem:[%s16842_s11 + $0x3e8] sm:$0xf0]  ;;  %v12358_v25 = vld [vmem:[%s16842_s11 + $0x388] sm:$0xf] }
 0x309   : > { %v3792_v28 = vmul.f32 0.5, %v16313_v27  ;;  %v16315_v1 = vpop.eup %16314  ;;  %16316 = vtanh.f32 %v3789_v48  ;;  %4634 = vmatpush.bf16.msra.mxu2 %v11907_v26  ;;  %v15554_v27 = vld [vmem:[%s16842_s11 + $0x3cc] sm:$0xf]  ;;  %v12102_v48 = vld [vmem:[%s16842_s11 + $0x188] sm:$0xf] }
 0x30a   : > { %v3653_v36 = vpop.f32.mrf.mxu2  ;;  %v3666_v0 = vpop.f32.mrf.mxu3  ;;  %v3784_v41 = vmul.f32 0.5, %v16315_v1  ;;  %16318 = vtanh.f32 %v3781_v14  ;;  %v12103_v9 = vor.u32 %v15486_v32, %v12102_v48  ;;  %v15550_v22 = vld [vmem:[%s16842_s11 + $0x3a4] sm:$0xf0]  ;;  %v12104_v2 = vld [vmem:[%s16842_s11 + $0x1a8] sm:$0xf0] }
 0x30b   : > { %4621 = vmatpush.bf16.msra.mxu1 %v12159_v20  ;;  %v12395_v0 = vor.u32 %v15554_v27, %v12392_v51  ;;  %v3794_v20 = vadd.f32 0.5, %v3792_v28  ;;  %v12359_v23 = vor.u32 %v15550_v22, %v12358_v25  ;;  %v12107_v30 = vor.u32 %v15482_v42, %v12104_v2  ;;  %v15546_v47 = vld [vmem:[%s16842_s11 + $0x38c] sm:$0xf]  ;;  %v12326_v26 = vld [vmem:[%s16842_s11 + $0x348] sm:$0xf] }
 0x30c   : > { %v3677_v11 = vpop.f32.mrf.mxu0  ;;  %v3690_v24 = vpop.f32.mrf.mxu1  ;;  %4647 = vmatpush.bf16.msra.mxu3 %v12163_v15  ;;  %4653 = vmatpush.bf16.msrb.mxu0 %v12135_v39  ;;  %v12360_v29 = vld [vmem:[%s16842_s11 + $0x3a8] sm:$0xf0]  ;;  %v1554_v15 = vadd.f32 %v17520_v43, %v1525_v21  ;;  %v15542_v17 = vld [vmem:[%s16842_s11 + $0x364] sm:$0xf0]  ;;  %v3786_v27 = vadd.f32 0.5, %v3784_v41 }
 0x30d   : > { %v3691_v33 = vadd.f32 %v3690_v24, %v3677_v11  ;;  %4679 = vmatpush.bf16.msrb.mxu2 %v12139_v37  ;;  %v12363_v1 = vor.u32 %v15546_v47, %v12360_v29  ;;  %v12070_v11 = vld [vmem:[%s16842_s11 + $0x148] sm:$0xf]  ;;  %v12327_v44 = vor.u32 %v15542_v17, %v12326_v26  ;;  %v15538_v43 = vld [vmem:[%s16842_s11 + $0x34c] sm:$0xf]  ;;  %v3806_v22 = vmul.f32 %v3794_v20, %v17836_v56 }
 0x30e   : > { %v15478_v24 = vld [vmem:[%s16842_s11 + $0x164] sm:$0xf0]  ;;  %v12328_v37 = vld [vmem:[%s16842_s11 + $0x368] sm:$0xf0] }
 0x30f   : > { %v3776_v36 = vadd.f32 %v3691_v33, %v1496_v55  ;;  %4666 = vmatpush.bf16.msrb.mxu1 %v12391_v60  ;;  %v16317_v14 = vpop.eup %16316  ;;  %v12071_v35 = vor.u32 %v15478_v24, %v12070_v11  ;;  %v15474_v55 = vld [vmem:[%s16842_s11 + $0x14c] sm:$0xf]  ;;  %v12331_v48 = vor.u32 %v15538_v43, %v12328_v37  ;;  %v15470_v32 = vld [vmem:[%s16842_s11 + $0x124] sm:$0xf0] }
 0x310   : > { %4692 = vmatpush.bf16.msrb.mxu3 %v12395_v0  ;;  %4654 = vmatpush.bf16.msrb.mxu0 %v12103_v9  ;;  %v12072_v33 = vld [vmem:[%s16842_s11 + $0x168] sm:$0xf0]  ;;  %v3793_v51 = vmul.f32 0.5, %v16317_v14  ;;  %v16319_v21 = vpop.eup %16318  ;;  %v12038_v0 = vld [vmem:[%s16842_s11 + $0x108] sm:$0xf] }
 0x311   : > { %16320 = vtanh.f32 %v3776_v36  ;;  %4680 = vmatpush.bf16.msrb.mxu2 %v12107_v30  ;;  %v12075_v60 = vor.u32 %v15474_v55, %v12072_v33  ;;  %v12294_v25 = vld [vmem:[%s16842_s11 + $0x308] sm:$0xf]  ;;  %v12039_v42 = vor.u32 %v15470_v32, %v12038_v0  ;;  %v12040_v41 = vld [vmem:[%s16842_s11 + $0x128] sm:$0xf0]  ;;  %v3785_v56 = vmul.f32 0.5, %v16319_v21 }
 0x312   : > { %v15534_v2 = vld [vmem:[%s16842_s11 + $0x324] sm:$0xf0]  ;;  %v15530_v14 = vld [vmem:[%s16842_s11 + $0x30c] sm:$0xf]  ;;  %v3795_v20 = vadd.f32 0.5, %v3793_v51 }
 0x313   : > { %4667 = vmatpush.bf16.msrb.mxu1 %v12359_v23  ;;  %v15466_v23 = vld [vmem:[%s16842_s11 + $0x10c] sm:$0xf]  ;;  %v12295_v47 = vor.u32 %v15534_v2, %v12294_v25  ;;  %v12006_v26 = vld [vmem:[%s16842_s11 + $0xc8] sm:$0xf]  ;;  %v3787_v43 = vadd.f32 0.5, %v3785_v56 }
 0x314   : > { %v3679_v58 = vpop.f32.mrf.mxu0  ;;  %v3692_v6 = vpop.f32.mrf.mxu1  ;;  %4693 = vmatpush.bf16.msrb.mxu3 %v12363_v1  ;;  %4655 = vmatpush.bf16.msrb.mxu0 %v12071_v35  ;;  %v12043_v29 = vor.u32 %v15466_v23, %v12040_v41  ;;  %v12296_v1 = vld [vmem:[%s16842_s11 + $0x328] sm:$0xf0]  ;;  %v15526_v55 = vld [vmem:[%s16842_s11 + $0x2e4] sm:$0xf0] }
 0x315   : > { %v3703_v40 = vpop.f32.mrf.mxu2  ;;  %v3716_v28 = vpop.f32.mrf.mxu3  ;;  %4681 = vmatpush.bf16.msrb.mxu2 %v12075_v60  ;;  %v12299_v11 = vor.u32 %v15530_v14, %v12296_v1  ;;  %v15458_v33 = vld [vmem:[%s16842_s11 + $0xcc] sm:$0xf]  ;;  %v11974_v51 = vld [vmem:[%s16842_s11 + $0x88] sm:$0xf] }
 0x316   : > { %v3717_v39 = vadd.f32 %v3716_v28, %v3703_v40  ;;  %v12262_v40 = vld [vmem:[%s16842_s11 + $0x2c8] sm:$0xf]  ;;  %v12264_v60 = vld [vmem:[%s16842_s11 + $0x2e8] sm:$0xf0] }
 0x317   : > { %v16321_v9 = vpop.eup %16320  ;;  %4668 = vmatpush.bf16.msrb.mxu1 %v12327_v44  ;;  %v12263_v58 = vor.u32 %v15526_v55, %v12262_v40  ;;  %v15522_v44 = vld [vmem:[%s16842_s11 + $0x2cc] sm:$0xf]  ;;  %v12230_v21 = vld [vmem:[%s16842_s11 + $0x288] sm:$0xf] }
 0x318   : > { %v3777_v36 = vadd.f32 %v3717_v39, %v1554_v15  ;;  %v3808_v30 = vmul.f32 %v16321_v9, %v3786_v27  ;;  %4694 = vmatpush.bf16.msrb.mxu3 %v12331_v48  ;;  %v15462_v15 = vld [vmem:[%s16842_s11 + $0xe4] sm:$0xf0]  ;;  %4656 = vmatpush.bf16.msrb.mxu0 %v12039_v42  ;;  %v12008_v39 = vld [vmem:[%s16842_s11 + $0xe8] sm:$0xf0]  ;;  %v12267_v37 = vor.u32 %v15522_v44, %v12264_v60 }
 0x319   : > { %v12007_v17 = vor.u32 %v15462_v15, %v12006_v26  ;;  %4682 = vmatpush.bf16.msrb.mxu2 %v12043_v29  ;;  %v12011_v6 = vor.u32 %v15458_v33, %v12008_v39  ;;  %v15454_v48 = vld [vmem:[%s16842_s11 + $0xa4] sm:$0xf0]  ;;  %v15450_v9 = vld [vmem:[%s16842_s11 + $0x8c] sm:$0xf] }
 0x31a   : > { %16322 = vtanh.f32 %v3777_v36  ;;  %v18137_v24 = vadd.f32 %v3808_v30, %v3806_v22  ;;  %v3807_v36 = vmul.f32 %v3795_v20, %v17854_v63  ;;  %v11975_v32 = vor.u32 %v15454_v48, %v11974_v51  ;;  %v15518_v25 = vld [vmem:[%s16842_s11 + $0x2a4] sm:$0xf0]  ;;  %v11976_v22 = vld [vmem:[%s16842_s11 + $0xa8] sm:$0xf0] }
 0x31b   : > { %4669 = vmatpush.bf16.msrb.mxu1 %v12295_v47  ;;  %v12231_v42 = vor.u32 %v15518_v25, %v12230_v21  ;;  %v11979_v2 = vor.u32 %v15450_v9, %v11976_v22  ;;  %v15514_v23 = vld [vmem:[%s16842_s11 + $0x28c] sm:$0xf]  ;;  %v11942_v47 = vld [vmem:[%s16842_s11 + $0x48] sm:$0xf]  ;;  %v1641_v25 = vadd.f32 %v17682_v59, %v17673_v19 }
 0x31c   : > { %4695 = vmatpush.bf16.msrb.mxu3 %v12299_v11  ;;  %4657 = vmatpush.bf16.msrb.mxu0 %v12007_v17  ;;  %v12232_v41 = vld [vmem:[%s16842_s11 + $0x2a8] sm:$0xf0]  ;;  %v15446_v29 = vld [vmem:[%s16842_s11 + $0x64] sm:$0xf0]  ;;  %v1583_v17 = vadd.f32 %v17676_v31, %v17659_v52 }
 0x31d   : > { %v3705_v28 = vpop.f32.mrf.mxu2  ;;  %v3718_v35 = vpop.f32.mrf.mxu3  ;;  %4683 = vmatpush.bf16.msrb.mxu2 %v12011_v6  ;;  %v12235_v30 = vor.u32 %v15514_v23, %v12232_v41  ;;  %v12198_v14 = vld [vmem:[%s16842_s11 + $0x248] sm:$0xf]  ;;  %v11943_v1 = vor.u32 %v15446_v29, %v11942_v47  ;;  %v15442_v20 = vld [vmem:[%s16842_s11 + $0x4c] sm:$0xf] }
 0x31e   : > { %v15510_v56 = vld [vmem:[%s16842_s11 + $0x264] sm:$0xf0]  ;;  %v11944_v11 = vld [vmem:[%s16842_s11 + $0x68] sm:$0xf0]  ;;  %v1612_v31 = vadd.f32 %v17678_v34, %v1583_v17  ;;  %v12142_v17 = vld [vmem:[%s16842_s11 + $0x1d0] sm:$0xf] }
 0x31f   : > { %4670 = vmatpush.bf16.msrb.mxu1 %v12263_v58  ;;  %v12199_v26 = vor.u32 %v15510_v56, %v12198_v14  ;;  %v11947_v15 = vor.u32 %v15442_v20, %v11944_v11  ;;  %v15506_v40 = vld [vmem:[%s16842_s11 + $0x24c] sm:$0xf]  ;;  %v11910_v55 = vld [vmem:[%s16842_s11 + $0x8] sm:$0xf] }
 0x320   : > { %v16323_v27 = vpop.eup %16322  ;;  %4696 = vmatpush.bf16.msrb.mxu3 %v12267_v37  ;;  %4658 = vmatpush.bf16.msrb.mxu0 %v11975_v32  ;;  %v12200_v28 = vld [vmem:[%s16842_s11 + $0x268] sm:$0xf0]  ;;  %v15438_v33 = vld [vmem:[%s16842_s11 + $0x24] sm:$0xf0] }
 0x321   : > { %v3809_v0 = vmul.f32 %v16323_v27, %v3787_v43  ;;  %4684 = vmatpush.bf16.msrb.mxu2 %v11979_v2  ;;  %v12203_v35 = vor.u32 %v15506_v40, %v12200_v28  ;;  %v12166_v39 = vld [vmem:[%s16842_s11 + $0x208] sm:$0xf]  ;;  %v11911_v58 = vor.u32 %v15438_v33, %v11910_v55  ;;  %v15434_v44 = vld [vmem:[%s16842_s11 + $0xc] sm:$0xf]  ;;  %v1670_v2 = vadd.f32 %v17684_v13, %v1641_v25  ;;  %v15495_v55 = vld [vmem:[%s16842_s11 + $0x1ec] sm:$0xf0] }
 0x322   : > { %v15502_v6 = vld [vmem:[%s16842_s11 + $0x224] sm:$0xf0]  ;;  %v11912_v60 = vld [vmem:[%s16842_s11 + $0x28] sm:$0xf0]  ;;  %v12398_v33 = vld [vmem:[%s16842_s11 + $0x3d0] sm:$0xf] }
 0x323   : > { %v18156_v63 = vadd.f32 %v3809_v0, %v3807_v36  ;;  %4671 = vmatpush.bf16.msrb.mxu1 %v12231_v42  ;;  %v12167_v43 = vor.u32 %v15502_v6, %v12166_v39  ;;  %v11915_v37 = vor.u32 %v15434_v44, %v11912_v60  ;;  %v15498_v27 = vld [vmem:[%s16842_s11 + $0x20c] sm:$0xf]  ;;  %v15559_v39 = vld [vmem:[%s16842_s11 + $0x3ec] sm:$0xf0]  ;;  %v12144_v6 = vld [vmem:[%s16842_s11 + $0x1f0] sm:$0xf0] }
 0x324   : > { %4697 = vmatpush.bf16.msrb.mxu3 %v12235_v30  ;;  %4659 = vmatpush.bf16.msrb.mxu0 %v11943_v1  ;;  %v12168_v51 = vld [vmem:[%s16842_s11 + $0x228] sm:$0xf0]  ;;  %v12366_v25 = vld [vmem:[%s16842_s11 + $0x390] sm:$0xf] }
 0x325   : > { %4685 = vmatpush.bf16.msrb.mxu2 %v11947_v15  ;;  %v12171_v36 = vor.u32 %v15498_v27, %v12168_v51 }
 0x327   : > { %4672 = vmatpush.bf16.msrb.mxu1 %v12199_v26 }
 0x328   : > { %4698 = vmatpush.bf16.msrb.mxu3 %v12203_v35  ;;  %4660 = vmatpush.bf16.msrb.mxu0 %v11911_v58  ;;  %v15491_v58 = vld [vmem:[%s16842_s11 + $0x1d4] sm:$0xf] }
 0x329   : > { %4686 = vmatpush.bf16.msrb.mxu2 %v11915_v37  ;;  %v12400_v37 = vld [vmem:[%s16842_s11 + $0x3f0] sm:$0xf0] }
 0x32b   : > { %4673 = vmatpush.bf16.msrb.mxu1 %v12167_v43  ;;  %v15555_v43 = vld [vmem:[%s16842_s11 + $0x3d4] sm:$0xf] }
 0x32c   : > { %v3729_v48 = vpop.f32.mrf.mxu0  ;;  %v3742_v21 = vpop.f32.mrf.mxu1  ;;  %4699 = vmatpush.bf16.msrb.mxu3 %v12171_v36  ;;  %v12110_v36 = vld [vmem:[%s16842_s11 + $0x190] sm:$0xf] }
 0x32d   : > { %v3743_v0 = vadd.f32 %v3742_v21, %v3729_v48  ;;  %v12143_v48 = vor.u32 %v15495_v55, %v12142_v17  ;;  %v12399_v21 = vor.u32 %v15559_v39, %v12398_v33  ;;  %v12302_v55 = vld [vmem:[%s16842_s11 + $0x310] sm:$0xf]  ;;  %v15467_v39 = vld [vmem:[%s16842_s11 + $0x114] sm:$0xf] }
 0x32e   : > { %v15535_v33 = vld [vmem:[%s16842_s11 + $0x32c] sm:$0xf0] }
 0x32f   : > { %v3778_v32 = vadd.f32 %v3743_v0, %v1612_v31  ;;  %v15487_v31 = vld [vmem:[%s16842_s11 + $0x1ac] sm:$0xf0]  ;;  %v12147_v0 = vor.u32 %v15491_v58, %v12144_v6  ;;  %v12048_v58 = vld [vmem:[%s16842_s11 + $0x130] sm:$0xf0] }
 0x330   : > { %v15531_v6 = vld [vmem:[%s16842_s11 + $0x314] sm:$0xf] }
 0x331   : > { %v3798_v9 = vmul.f32 0.5, %v3778_v32  ;;  %v12403_v32 = vor.u32 %v15555_v43, %v12400_v37  ;;  %v12303_v43 = vor.u32 %v15535_v33, %v12302_v55  ;;  %v12014_v37 = vld [vmem:[%s16842_s11 + $0xd0] sm:$0xf]  ;;  %v11952_v55 = vld [vmem:[%s16842_s11 + $0x70] sm:$0xf0] }
 0x332   : > { %v15507_v33 = vld [vmem:[%s16842_s11 + $0x254] sm:$0xf] }
 0x333   : > { %v3755_v22 = vpop.f32.mrf.mxu2  ;;  %v3768_v42 = vpop.f32.mrf.mxu3  ;;  %16324 = vtanh.f32 %v3798_v9  ;;  %v15551_v9 = vld [vmem:[%s16842_s11 + $0x3ac] sm:$0xf0] }
 0x334   : > { %v3769_v23 = vadd.f32 %v3768_v42, %v3755_v22  ;;  %v3731_v41 = vpop.f32.mrf.mxu0  ;;  %v3744_v30 = vpop.f32.mrf.mxu1  ;;  %v15483_v22 = vld [vmem:[%s16842_s11 + $0x194] sm:$0xf] }
 0x335   : > { %v12112_v42 = vld [vmem:[%s16842_s11 + $0x1b0] sm:$0xf0]  ;;  %v12111_v41 = vor.u32 %v15487_v31, %v12110_v36  ;;  %v12367_v30 = vor.u32 %v15551_v9, %v12366_v25  ;;  %v12270_v31 = vld [vmem:[%s16842_s11 + $0x2d0] sm:$0xf] }
 0x336   : > { %v3779_v47 = vadd.f32 %v3769_v23, %v1670_v2  ;;  %v15547_v2 = vld [vmem:[%s16842_s11 + $0x394] sm:$0xf] }
 0x337   : > { %v12368_v23 = vld [vmem:[%s16842_s11 + $0x3b0] sm:$0xf0] }
 0x338   : > { %v3799_v34 = vmul.f32 0.5, %v3779_v47  ;;  %v12078_v47 = vld [vmem:[%s16842_s11 + $0x150] sm:$0xf]  ;;  %v12016_v25 = vld [vmem:[%s16842_s11 + $0xf0] sm:$0xf0] }
 0x339   : > { %v16325_v29 = vpop.eup %16324  ;;  %v15523_v9 = vld [vmem:[%s16842_s11 + $0x2d4] sm:$0xf] }
 0x33a   : > { %16326 = vtanh.f32 %v3799_v34  ;;  %v3802_v59 = vmul.f32 0.5, %v16325_v29  ;;  %v15479_v34 = vld [vmem:[%s16842_s11 + $0x16c] sm:$0xf0]  ;;  %v12115_v29 = vor.u32 %v15483_v22, %v12112_v42  ;;  %v12272_v22 = vld [vmem:[%s16842_s11 + $0x2f0] sm:$0xf0] }
 0x33b   : > { %v3757_v14 = vpop.f32.mrf.mxu2  ;;  %v3770_v1 = vpop.f32.mrf.mxu3  ;;  %16328 = vtanh.f32 %v18137_v24 }
 0x33c   : > { %16330 = vtanh.f32 %v18156_v63  ;;  %v3804_v56 = vadd.f32 0.5, %v3802_v59  ;;  %v12371_v14 = vor.u32 %v15547_v2, %v12368_v23  ;;  %v12334_v1 = vld [vmem:[%s16842_s11 + $0x350] sm:$0xf] }
 0x33d   : > { %v15543_v59 = vld [vmem:[%s16842_s11 + $0x36c] sm:$0xf0] }
 0x33e   : > { %v11982_v23 = vld [vmem:[%s16842_s11 + $0x90] sm:$0xf] }
 0x340   : > { %v16327_v13 = vpop.eup %16326 }
 0x341   : > { %v3803_v20 = vmul.f32 0.5, %v16327_v13  ;;  %v16329_v11 = vpop.eup %16328  ;;  %v15475_v13 = vld [vmem:[%s16842_s11 + $0x154] sm:$0xf] }
 0x342   : > { %v16331_v15 = vpop.eup %16330  ;;  %v3814_v40 = vmul.f32 %v16329_v11, %v3804_v56  ;;  %v12080_v56 = vld [vmem:[%s16842_s11 + $0x170] sm:$0xf0] }
 0x343   : > { %v3805_v26 = vadd.f32 0.5, %v3803_v20  ;;  %v15539_v20 = vld [vmem:[%s16842_s11 + $0x354] sm:$0xf] }
 0x344   : > { %v12336_v11 = vld [vmem:[%s16842_s11 + $0x370] sm:$0xf0] }
 0x345   : > { %v3815_v28 = vmul.f32 %v16331_v15, %v3805_v26  ;;  %v12079_v26 = vor.u32 %v15479_v34, %v12078_v47  ;;  %v12335_v15 = vor.u32 %v15543_v59, %v12334_v1  ;;  %v12339_v17 = vor.u32 %v15539_v20, %v12336_v11  ;;  %v12238_v34 = vld [vmem:[%s16842_s11 + $0x290] sm:$0xf]  ;;  %v11984_v1 = vld [vmem:[%s16842_s11 + $0xb0] sm:$0xf0] }
 0x346   : > { %v12275_v47 = vor.u32 %v15523_v9, %v12272_v22  ;;  %v15515_v59 = vld [vmem:[%s16842_s11 + $0x294] sm:$0xf]  ;;  %v11950_v11 = vld [vmem:[%s16842_s11 + $0x50] sm:$0xf]  ;;  %v15496_v9 = vld [vmem:[%s16842_s11 + $0x1f4] sm:$0xf0] }
 0x347   : > { %v3816_v35 = vpack.c.bf16 %v3815_v28, %v3814_v40  ;;  %v12046_v40 = vld [vmem:[%s16842_s11 + $0x110] sm:$0xf]  ;;  %v12406_v22 = vld [vmem:[%s16842_s11 + $0x3d8] sm:$0xf] }
 0x348   : > { %v15471_v28 = vld [vmem:[%s16842_s11 + $0x12c] sm:$0xf0] }
 0x349   : > { %3817 = vst [vmem:[#allocation3 + $0x8] sm:$0xff] %v3816_v35  ;;  %v3955_v44 = vunpack.c.l.b16 %v3816_v35  ;;  %v3956_v60 = vunpack.c.h.b16 %v3816_v35  ;;  %v12083_v35 = vor.u32 %v15475_v13, %v12080_v56  ;;  %v12240_v13 = vld [vmem:[%s16842_s11 + $0x2b0] sm:$0xf0] }
 0x34b   : > { %v18190_v27 = vpack.c.b16 %v3955_v44, %v3955_v44  ;;  %v18192_v51 = vpack.c.b16 %v3956_v60, %v3956_v60  ;;  %v12304_v44 = vld [vmem:[%s16842_s11 + $0x330] sm:$0xf0]  ;;  %v12047_v60 = vor.u32 %v15471_v28, %v12046_v40  ;;  %v12243_v40 = vor.u32 %v15515_v59, %v12240_v13  ;;  %v12206_v28 = vld [vmem:[%s16842_s11 + $0x250] sm:$0xf]  ;;  %v12118_v13 = vld [vmem:[%s16842_s11 + $0x198] sm:$0xf] }
 0x34c   : > { %v12307_v36 = vor.u32 %v15531_v6, %v12304_v44 }
 0x34d   : > { %4609 = vmatmul.bf16.vlgmr.msra.gmra.mxu0 %v18190_v27  ;;  %4622 = vmatmul.bf16.vlgmr.msra.gmra.mxu1 %v18192_v51 }
 0x34e   : > { %4635 = vmatmul.bf16.vlgmr.msra.gmra.mxu2 %v18190_v27  ;;  %4648 = vmatmul.bf16.vlgmr.msra.gmra.mxu3 %v18192_v51 }
 0x34f   : > { %4705 = vmatpush.bf16.msra.mxu0 %v12143_v48  ;;  %4718 = vmatpush.bf16.msra.mxu1 %v12399_v21  ;;  %v15463_v48 = vld [vmem:[%s16842_s11 + $0xec] sm:$0xf0]  ;;  %v12051_v21 = vor.u32 %v15467_v39, %v12048_v58  ;;  %v12208_v39 = vld [vmem:[%s16842_s11 + $0x270] sm:$0xf0] }
 0x350   : > { %4731 = vmatpush.bf16.msra.mxu2 %v12147_v0  ;;  %4744 = vmatpush.bf16.msra.mxu3 %v12403_v32  ;;  %v15527_v0 = vld [vmem:[%s16842_s11 + $0x2ec] sm:$0xf0]  ;;  %v15459_v32 = vld [vmem:[%s16842_s11 + $0xd4] sm:$0xf]  ;;  %v12015_v42 = vor.u32 %v15463_v48, %v12014_v37 }
 0x351   : > { %v12271_v2 = vor.u32 %v15527_v0, %v12270_v31  ;;  %v11918_v58 = vld [vmem:[%s16842_s11 + $0x10] sm:$0xf]  ;;  %v11920_v31 = vld [vmem:[%s16842_s11 + $0x30] sm:$0xf0] }
 0x352   : > { %v15503_v37 = vld [vmem:[%s16842_s11 + $0x22c] sm:$0xf0]  ;;  %v15499_v0 = vld [vmem:[%s16842_s11 + $0x214] sm:$0xf] }
 0x353   : > { %4706 = vmatpush.bf16.msra.mxu0 %v12111_v41  ;;  %4719 = vmatpush.bf16.msra.mxu1 %v12367_v30  ;;  %v15455_v41 = vld [vmem:[%s16842_s11 + $0xac] sm:$0xf0]  ;;  %v12019_v30 = vor.u32 %v15459_v32, %v12016_v25  ;;  %v12176_v32 = vld [vmem:[%s16842_s11 + $0x230] sm:$0xf0]  ;;  %v12150_v25 = vld [vmem:[%s16842_s11 + $0x1d8] sm:$0xf] }
 0x354   : > { %4732 = vmatpush.bf16.msra.mxu2 %v12115_v29  ;;  %4745 = vmatpush.bf16.msra.mxu3 %v12371_v14  ;;  %v15519_v29 = vld [vmem:[%s16842_s11 + $0x2ac] sm:$0xf0]  ;;  %v15451_v14 = vld [vmem:[%s16842_s11 + $0x94] sm:$0xf]  ;;  %v11983_v56 = vor.u32 %v15455_v41, %v11982_v23 }
 0x355   : > { %v12239_v20 = vor.u32 %v15519_v29, %v12238_v34  ;;  %v12408_v34 = vld [vmem:[%s16842_s11 + $0x3f8] sm:$0xf0] }
 0x357   : > { %4707 = vmatpush.bf16.msra.mxu0 %v12079_v26  ;;  %4720 = vmatpush.bf16.msra.mxu1 %v12335_v15  ;;  %v15447_v26 = vld [vmem:[%s16842_s11 + $0x6c] sm:$0xf0]  ;;  %v11987_v15 = vor.u32 %v15451_v14, %v11984_v1  ;;  %v12179_v14 = vor.u32 %v15499_v0, %v12176_v32  ;;  %v12151_v1 = vor.u32 %v15496_v9, %v12150_v25  ;;  %v12054_v32 = vld [vmem:[%s16842_s11 + $0x118] sm:$0xf] }
 0x358   : > { %4733 = vmatpush.bf16.msra.mxu2 %v12083_v35  ;;  %4746 = vmatpush.bf16.msra.mxu3 %v12339_v17  ;;  %v15511_v35 = vld [vmem:[%s16842_s11 + $0x26c] sm:$0xf0]  ;;  %v15443_v17 = vld [vmem:[%s16842_s11 + $0x54] sm:$0xf]  ;;  %v11951_v6 = vor.u32 %v15447_v26, %v11950_v11  ;;  %v12374_v26 = vld [vmem:[%s16842_s11 + $0x398] sm:$0xf] }
 0x359   : > { %v12207_v44 = vor.u32 %v15511_v35, %v12206_v28  ;;  %v11955_v48 = vor.u32 %v15443_v17, %v11952_v55  ;;  %v12120_v28 = vld [vmem:[%s16842_s11 + $0x1b8] sm:$0xf0]  ;;  %v15472_v25 = vld [vmem:[%s16842_s11 + $0x134] sm:$0xf0] }
 0x35a   : > { %v15548_v35 = vld [vmem:[%s16842_s11 + $0x39c] sm:$0xf] }
 0x35b   : > { %4708 = vmatpush.bf16.msra.mxu0 %v12047_v60  ;;  %4721 = vmatpush.bf16.msra.mxu1 %v12303_v43  ;;  %v15439_v60 = vld [vmem:[%s16842_s11 + $0x2c] sm:$0xf0]  ;;  %v12376_v17 = vld [vmem:[%s16842_s11 + $0x3b8] sm:$0xf0] }
 0x35c   : > { %4734 = vmatpush.bf16.msra.mxu2 %v12051_v21  ;;  %4747 = vmatpush.bf16.msra.mxu3 %v12307_v36  ;;  %v12174_v43 = vld [vmem:[%s16842_s11 + $0x210] sm:$0xf]  ;;  %v12211_v21 = vor.u32 %v15507_v33, %v12208_v39  ;;  %v15435_v36 = vld [vmem:[%s16842_s11 + $0x14] sm:$0xf]  ;;  %v11919_v23 = vor.u32 %v15439_v60, %v11918_v58  ;;  %v12086_v39 = vld [vmem:[%s16842_s11 + $0x158] sm:$0xf] }
 0x35d   : > { %4661 = vmatmul.bf16.vlgmr.msrb.gmra.mxu0 %v18190_v27  ;;  %4674 = vmatmul.bf16.vlgmr.msrb.gmra.mxu1 %v18192_v51  ;;  %v12175_v41 = vor.u32 %v15503_v37, %v12174_v43  ;;  %v11923_v29 = vor.u32 %v15435_v36, %v11920_v31  ;;  %v15480_v58 = vld [vmem:[%s16842_s11 + $0x174] sm:$0xf0]  ;;  %v15476_v37 = vld [vmem:[%s16842_s11 + $0x15c] sm:$0xf] }
 0x35e   : > { %4687 = vmatmul.bf16.vlgmr.msrb.gmra.mxu2 %v18190_v27  ;;  %4700 = vmatmul.bf16.vlgmr.msrb.gmra.mxu3 %v18192_v51  ;;  %v12342_v60 = vld [vmem:[%s16842_s11 + $0x358] sm:$0xf]  ;;  %v12344_v36 = vld [vmem:[%s16842_s11 + $0x378] sm:$0xf0]  ;;  %v12087_v31 = vor.u32 %v15480_v58, %v12086_v39 }
 0x35f   : > { %4709 = vmatpush.bf16.msra.mxu0 %v12015_v42  ;;  %4722 = vmatpush.bf16.msra.mxu1 %v12271_v2  ;;  %v15560_v42 = vld [vmem:[%s16842_s11 + $0x3f4] sm:$0xf0]  ;;  %v15492_v2 = vld [vmem:[%s16842_s11 + $0x1dc] sm:$0xf] }
 0x360   : > { %4735 = vmatpush.bf16.msra.mxu2 %v12019_v30  ;;  %4748 = vmatpush.bf16.msra.mxu3 %v12275_v47  ;;  %v12152_v30 = vld [vmem:[%s16842_s11 + $0x1f8] sm:$0xf0]  ;;  %v12407_v59 = vor.u32 %v15560_v42, %v12406_v22  ;;  %v15544_v43 = vld [vmem:[%s16842_s11 + $0x374] sm:$0xf0] }
 0x361   : > { %v15556_v47 = vld [vmem:[%s16842_s11 + $0x3dc] sm:$0xf]  ;;  %v12343_v0 = vor.u32 %v15544_v43, %v12342_v60  ;;  %v12310_v42 = vld [vmem:[%s16842_s11 + $0x318] sm:$0xf] }
 0x362   : > { %v12411_v11 = vor.u32 %v15556_v47, %v12408_v34  ;;  %v12312_v47 = vld [vmem:[%s16842_s11 + $0x338] sm:$0xf0]  ;;  %v12055_v34 = vor.u32 %v15472_v25, %v12054_v32  ;;  %v12246_v58 = vld [vmem:[%s16842_s11 + $0x298] sm:$0xf] }
 0x363   : > { %4710 = vmatpush.bf16.msra.mxu0 %v11983_v56  ;;  %4723 = vmatpush.bf16.msra.mxu1 %v12239_v20  ;;  %v15488_v56 = vld [vmem:[%s16842_s11 + $0x1b4] sm:$0xf0]  ;;  %v12155_v20 = vor.u32 %v15492_v2, %v12152_v30  ;;  %v15532_v30 = vld [vmem:[%s16842_s11 + $0x31c] sm:$0xf] }
 0x364   : > { %4736 = vmatpush.bf16.msra.mxu2 %v11987_v15  ;;  %4749 = vmatpush.bf16.msra.mxu3 %v12243_v40  ;;  %v15552_v15 = vld [vmem:[%s16842_s11 + $0x3b4] sm:$0xf0]  ;;  %v15484_v40 = vld [vmem:[%s16842_s11 + $0x19c] sm:$0xf]  ;;  %v12119_v55 = vor.u32 %v15488_v56, %v12118_v13  ;;  %v12315_v13 = vor.u32 %v15532_v30, %v12312_v47 }
 0x365   : > { %v12375_v33 = vor.u32 %v15552_v15, %v12374_v26  ;;  %v15536_v2 = vld [vmem:[%s16842_s11 + $0x334] sm:$0xf0]  ;;  %v12024_v26 = vld [vmem:[%s16842_s11 + $0xf8] sm:$0xf0] }
 0x366   : > { %v12278_v56 = vld [vmem:[%s16842_s11 + $0x2d8] sm:$0xf]  ;;  %v15524_v15 = vld [vmem:[%s16842_s11 + $0x2dc] sm:$0xf] }
 0x367   : > { %4711 = vmatpush.bf16.msra.mxu0 %v11951_v6  ;;  %4724 = vmatpush.bf16.msra.mxu1 %v12207_v44  ;;  %v12123_v6 = vor.u32 %v15484_v40, %v12120_v28  ;;  %v12379_v44 = vor.u32 %v15548_v35, %v12376_v17  ;;  %v12280_v40 = vld [vmem:[%s16842_s11 + $0x2f8] sm:$0xf0]  ;;  %v11990_v17 = vld [vmem:[%s16842_s11 + $0x98] sm:$0xf] }
 0x368   : > { %4737 = vmatpush.bf16.msra.mxu2 %v11955_v48  ;;  %4750 = vmatpush.bf16.msra.mxu3 %v12211_v21  ;;  %v12088_v48 = vld [vmem:[%s16842_s11 + $0x178] sm:$0xf0]  ;;  %v12283_v39 = vor.u32 %v15524_v15, %v12280_v40  ;;  %v12214_v25 = vld [vmem:[%s16842_s11 + $0x258] sm:$0xf] }
 0x369   : > { %v15540_v21 = vld [vmem:[%s16842_s11 + $0x35c] sm:$0xf]  ;;  %v12091_v9 = vor.u32 %v15476_v37, %v12088_v48  ;;  %v11926_v47 = vld [vmem:[%s16842_s11 + $0x18] sm:$0xf] }
 0x36a   : > { %v12347_v22 = vor.u32 %v15540_v21, %v12344_v36  ;;  %v11992_v60 = vld [vmem:[%s16842_s11 + $0xb8] sm:$0xf0]  ;;  %v11958_v36 = vld [vmem:[%s16842_s11 + $0x58] sm:$0xf] }
 0x36b   : > { %4712 = vmatpush.bf16.msra.mxu0 %v11919_v23  ;;  %4725 = vmatpush.bf16.msra.mxu1 %v12175_v41  ;;  %v15468_v23 = vld [vmem:[%s16842_s11 + $0x11c] sm:$0xf] }
 0x36c   : > { %4738 = vmatpush.bf16.msra.mxu2 %v11923_v29  ;;  %4751 = vmatpush.bf16.msra.mxu3 %v12179_v14  ;;  %v12056_v41 = vld [vmem:[%s16842_s11 + $0x138] sm:$0xf0]  ;;  %v12311_v29 = vor.u32 %v15536_v2, %v12310_v42  ;;  %v12022_v14 = vld [vmem:[%s16842_s11 + $0xd8] sm:$0xf] }
 0x36d   : > { %v15516_v43 = vld [vmem:[%s16842_s11 + $0x29c] sm:$0xf] }
 0x36e   : > { %4713 = vmatmul.bf16.vlgmr.msra.gmra.mxu0 %v18190_v27  ;;  %4726 = vmatmul.bf16.vlgmr.msra.gmra.mxu1 %v18192_v51  ;;  %v12248_v37 = vld [vmem:[%s16842_s11 + $0x2b8] sm:$0xf0] }
 0x36f   : > { %4757 = vmatpush.bf16.msrb.mxu0 %v12151_v1  ;;  %4770 = vmatpush.bf16.msrb.mxu1 %v12407_v59  ;;  %v15464_v1 = vld [vmem:[%s16842_s11 + $0xf4] sm:$0xf0]  ;;  %v12059_v59 = vor.u32 %v15468_v23, %v12056_v41  ;;  %v12251_v32 = vor.u32 %v15516_v43, %v12248_v37  ;;  %v11960_v42 = vld [vmem:[%s16842_s11 + $0x78] sm:$0xf0] }
 0x370   : > { %4783 = vmatpush.bf16.msrb.mxu2 %v12155_v20  ;;  %4796 = vmatpush.bf16.msrb.mxu3 %v12411_v11  ;;  %v15528_v20 = vld [vmem:[%s16842_s11 + $0x2f4] sm:$0xf0]  ;;  %v15460_v11 = vld [vmem:[%s16842_s11 + $0xdc] sm:$0xf]  ;;  %v12023_v28 = vor.u32 %v15464_v1, %v12022_v14 }
 0x371   : > { %4739 = vmatmul.bf16.vlgmr.msra.gmra.mxu2 %v18190_v27  ;;  %4752 = vmatmul.bf16.vlgmr.msra.gmra.mxu3 %v18192_v51  ;;  %v12279_v35 = vor.u32 %v15528_v20, %v12278_v56  ;;  %v15508_v2 = vld [vmem:[%s16842_s11 + $0x25c] sm:$0xf]  ;;  %v12182_v1 = vld [vmem:[%s16842_s11 + $0x218] sm:$0xf] }
 0x372   : > { %v12216_v23 = vld [vmem:[%s16842_s11 + $0x278] sm:$0xf0] }
 0x373   : > { %4758 = vmatpush.bf16.msrb.mxu0 %v12119_v55  ;;  %4771 = vmatpush.bf16.msrb.mxu1 %v12375_v33  ;;  %v15456_v55 = vld [vmem:[%s16842_s11 + $0xb4] sm:$0xf0]  ;;  %v12027_v33 = vor.u32 %v15460_v11, %v12024_v26  ;;  %v12219_v14 = vor.u32 %v15508_v2, %v12216_v23  ;;  %v11928_v56 = vld [vmem:[%s16842_s11 + $0x38] sm:$0xf0]  ;;  %v15609_v2 = vld [vmem:[%s16842_s11 + $0x184] sm:$0xf] }
 0x374   : > { %4784 = vmatpush.bf16.msrb.mxu2 %v12123_v6  ;;  %4797 = vmatpush.bf16.msrb.mxu3 %v12379_v44  ;;  %v15520_v6 = vld [vmem:[%s16842_s11 + $0x2b4] sm:$0xf0]  ;;  %v15452_v44 = vld [vmem:[%s16842_s11 + $0x9c] sm:$0xf]  ;;  %v11991_v48 = vor.u32 %v15456_v55, %v11990_v17  ;;  %v12638_v55 = vld [vmem:[%s16842_s11 + $0x1c0] sm:$0xf] }
 0x375   : > { %v12247_v21 = vor.u32 %v15520_v6, %v12246_v58  ;;  %v15500_v20 = vld [vmem:[%s16842_s11 + $0x21c] sm:$0xf]  ;;  %v15685_v6 = vld [vmem:[%s16842_s11 + $0x3dc] sm:$0xf0]  ;;  %v12608_v23 = vld [vmem:[%s16842_s11 + $0x1a0] sm:$0xf0] }
 0x376   : > { %v12184_v11 = vld [vmem:[%s16842_s11 + $0x238] sm:$0xf0] }
 0x377   : > { %4759 = vmatpush.bf16.msrb.mxu0 %v12087_v31  ;;  %4772 = vmatpush.bf16.msrb.mxu1 %v12343_v0  ;;  %v15448_v31 = vld [vmem:[%s16842_s11 + $0x74] sm:$0xf0]  ;;  %v11995_v0 = vor.u32 %v15452_v44, %v11992_v60  ;;  %v15617_v44 = vld [vmem:[%s16842_s11 + $0x1c4] sm:$0xf] }
 0x378   : > { %4785 = vmatpush.bf16.msrb.mxu2 %v12091_v9  ;;  %4798 = vmatpush.bf16.msrb.mxu3 %v12347_v22  ;;  %v15512_v9 = vld [vmem:[%s16842_s11 + $0x274] sm:$0xf0]  ;;  %v15444_v22 = vld [vmem:[%s16842_s11 + $0x5c] sm:$0xf]  ;;  %v11959_v41 = vor.u32 %v15448_v31, %v11958_v36  ;;  %v12640_v60 = vld [vmem:[%s16842_s11 + $0x1e0] sm:$0xf0] }
 0x379   : > { %v12215_v30 = vor.u32 %v15512_v9, %v12214_v25  ;;  %v12643_v37 = vor.u32 %v15617_v44, %v12640_v60  ;;  %v12606_v31 = vld [vmem:[%s16842_s11 + $0x180] sm:$0xf] }
 0x37a   : > { %v15597_v44 = vld [vmem:[%s16842_s11 + $0x11c] sm:$0xf0] }
 0x37b   : > { %4760 = vmatpush.bf16.msrb.mxu0 %v12055_v34  ;;  %4773 = vmatpush.bf16.msrb.mxu1 %v12311_v29  ;;  %v15440_v34 = vld [vmem:[%s16842_s11 + $0x34] sm:$0xf0]  ;;  %v11963_v29 = vor.u32 %v15444_v22, %v11960_v42  ;;  %v15677_v42 = vld [vmem:[%s16842_s11 + $0x39c] sm:$0xf0] }
 0x37c   : > { %4786 = vmatpush.bf16.msrb.mxu2 %v12059_v59  ;;  %4799 = vmatpush.bf16.msrb.mxu3 %v12315_v13  ;;  %v15504_v59 = vld [vmem:[%s16842_s11 + $0x234] sm:$0xf0]  ;;  %v15436_v13 = vld [vmem:[%s16842_s11 + $0x1c] sm:$0xf]  ;;  %v11927_v26 = vor.u32 %v15440_v34, %v11926_v47  ;;  %v15673_v47 = vld [vmem:[%s16842_s11 + $0x384] sm:$0xf] }
 0x37d   : > { %v12183_v15 = vor.u32 %v15504_v59, %v12182_v1  ;;  %v11931_v40 = vor.u32 %v15436_v13, %v11928_v56  ;;  %v12864_v34 = vld [vmem:[%s16842_s11 + $0x3a0] sm:$0xf0]  ;;  %v15605_v1 = vld [vmem:[%s16842_s11 + $0x15c] sm:$0xf0] }
 0x37e   : > { %v12830_v59 = vld [vmem:[%s16842_s11 + $0x340] sm:$0xf] }
 0x37f   : > { %4761 = vmatpush.bf16.msrb.mxu0 %v12023_v28  ;;  %4774 = vmatpush.bf16.msrb.mxu1 %v12279_v35  ;;  %v12187_v28 = vor.u32 %v15500_v20, %v12184_v11  ;;  %v15669_v56 = vld [vmem:[%s16842_s11 + $0x35c] sm:$0xf0]  ;;  %v15601_v20 = vld [vmem:[%s16842_s11 + $0x144] sm:$0xf] }
 0x380   : > { %4787 = vmatpush.bf16.msrb.mxu2 %v12027_v33  ;;  %4800 = vmatpush.bf16.msrb.mxu3 %v12283_v39  ;;  %v15621_v33 = vld [vmem:[%s16842_s11 + $0x1dc] sm:$0xf0]  ;;  %v12831_v11 = vor.u32 %v15669_v56, %v12830_v59 }
 0x381   : > { %v12894_v39 = vld [vmem:[%s16842_s11 + $0x3c0] sm:$0xf]  ;;  %v12639_v58 = vor.u32 %v15621_v33, %v12638_v55 }
 0x382   : > { %v12895_v43 = vor.u32 %v15685_v6, %v12894_v39  ;;  %v12542_v6 = vld [vmem:[%s16842_s11 + $0x100] sm:$0xf] }
 0x383   : > { %4762 = vmatpush.bf16.msrb.mxu0 %v11991_v48  ;;  %4775 = vmatpush.bf16.msrb.mxu1 %v12247_v21  ;;  %v15681_v48 = vld [vmem:[%s16842_s11 + $0x3c4] sm:$0xf]  ;;  %v12798_v60 = vld [vmem:[%s16842_s11 + $0x300] sm:$0xf] }
 0x384   : > { %4788 = vmatpush.bf16.msrb.mxu2 %v11995_v0  ;;  %4801 = vmatpush.bf16.msrb.mxu3 %v12251_v32  ;;  %v15613_v0 = vld [vmem:[%s16842_s11 + $0x19c] sm:$0xf0] }
 0x385   : > { %v12862_v32 = vld [vmem:[%s16842_s11 + $0x380] sm:$0xf]  ;;  %v12607_v22 = vor.u32 %v15613_v0, %v12606_v31  ;;  %v12544_v31 = vld [vmem:[%s16842_s11 + $0x120] sm:$0xf0] }
 0x386   : > { %v15657_v0 = vld [vmem:[%s16842_s11 + $0x304] sm:$0xf] }
 0x387   : > { %4763 = vmatpush.bf16.msrb.mxu0 %v11959_v41  ;;  %4776 = vmatpush.bf16.msrb.mxu1 %v12215_v30  ;;  %v12863_v41 = vor.u32 %v15677_v42, %v12862_v32  ;;  %v12611_v30 = vor.u32 %v15609_v2, %v12608_v23  ;;  %v12800_v32 = vld [vmem:[%s16842_s11 + $0x320] sm:$0xf0]  ;;  %v12510_v2 = vld [vmem:[%s16842_s11 + $0xc0] sm:$0xf] }
 0x388   : > { %4789 = vmatpush.bf16.msrb.mxu2 %v11963_v29  ;;  %4802 = vmatpush.bf16.msrb.mxu3 %v12219_v14  ;;  %v12867_v29 = vor.u32 %v15673_v47, %v12864_v34  ;;  %v12574_v14 = vld [vmem:[%s16842_s11 + $0x140] sm:$0xf]  ;;  %v15585_v34 = vld [vmem:[%s16842_s11 + $0xc4] sm:$0xf] }
 0x389   : > { %v12575_v13 = vor.u32 %v15605_v1, %v12574_v14  ;;  %v15589_v23 = vld [vmem:[%s16842_s11 + $0xdc] sm:$0xf0] }
 0x38a   : > { %v15653_v47 = vld [vmem:[%s16842_s11 + $0x2dc] sm:$0xf0] }
 0x38b   : > { %4764 = vmatpush.bf16.msrb.mxu0 %v11927_v26  ;;  %4777 = vmatpush.bf16.msrb.mxu1 %v12183_v15  ;;  %v12576_v26 = vld [vmem:[%s16842_s11 + $0x160] sm:$0xf0] }
 0x38c   : > { %4790 = vmatpush.bf16.msrb.mxu2 %v11931_v40  ;;  %4803 = vmatpush.bf16.msrb.mxu3 %v12187_v28  ;;  %v15665_v15 = vld [vmem:[%s16842_s11 + $0x344] sm:$0xf]  ;;  %v12579_v28 = vor.u32 %v15601_v20, %v12576_v26  ;;  %v12478_v26 = vld [vmem:[%s16842_s11 + $0x80] sm:$0xf] }
 0x38d   : > { %v12832_v40 = vld [vmem:[%s16842_s11 + $0x360] sm:$0xf0] }
 0x38e   : > { %4765 = vmatmul.bf16.vlgmr.msrb.gmra.mxu0 %v18190_v27  ;;  %4778 = vmatmul.bf16.vlgmr.msrb.gmra.mxu1 %v18192_v51  ;;  %v12835_v55 = vor.u32 %v15665_v15, %v12832_v40  ;;  %v15581_v15 = vld [vmem:[%s16842_s11 + $0x9c] sm:$0xf0] }
 0x38f   : > { %4791 = vmatmul.bf16.vlgmr.msrb.gmra.mxu2 %v18190_v27  ;;  %4804 = vmatmul.bf16.vlgmr.msrb.gmra.mxu3 %v18192_v51  ;;  %v12896_v27 = vld [vmem:[%s16842_s11 + $0x3e0] sm:$0xf0] }
 0x390   : > { %5638 = vmatpush.bf16.msra.mxu0 %v12639_v58  ;;  %v12899_v51 = vor.u32 %v15681_v48, %v12896_v27  ;;  %5651 = vmatpush.bf16.msra.mxu1 %v12895_v43  ;;  %v12543_v48 = vor.u32 %v15597_v44, %v12542_v6  ;;  %v15661_v27 = vld [vmem:[%s16842_s11 + $0x31c] sm:$0xf0]  ;;  %v15577_v44 = vld [vmem:[%s16842_s11 + $0x84] sm:$0xf] }
 0x391   : > { %5664 = vmatpush.bf16.msra.mxu2 %v12643_v37  ;;  %v15645_v6 = vld [vmem:[%s16842_s11 + $0x29c] sm:$0xf0] }
 0x392   : > { %5677 = vmatpush.bf16.msra.mxu3 %v12899_v51  ;;  %v15593_v51 = vld [vmem:[%s16842_s11 + $0x104] sm:$0xf] }
 0x394   : > { %5639 = vmatpush.bf16.msra.mxu0 %v12607_v22  ;;  %5652 = vmatpush.bf16.msra.mxu1 %v12863_v41  ;;  %v12766_v41 = vld [vmem:[%s16842_s11 + $0x2c0] sm:$0xf] }
 0x395   : > { %5665 = vmatpush.bf16.msra.mxu2 %v12611_v30  ;;  %v12511_v30 = vor.u32 %v15589_v23, %v12510_v2  ;;  %v12767_v1 = vor.u32 %v15653_v47, %v12766_v41  ;;  %v12704_v2 = vld [vmem:[%s16842_s11 + $0x260] sm:$0xf0] }
 0x396   : > { %5678 = vmatpush.bf16.msra.mxu3 %v12867_v29  ;;  %v12512_v29 = vld [vmem:[%s16842_s11 + $0xe0] sm:$0xf0] }
 0x397   : > { %v12515_v59 = vor.u32 %v15585_v34, %v12512_v29  ;;  %v15565_v29 = vld [vmem:[%s16842_s11 + $0x1c] sm:$0xf0] }
 0x398   : > { %5640 = vmatpush.bf16.msra.mxu0 %v12575_v13  ;;  %5653 = vmatpush.bf16.msra.mxu1 %v12831_v11  ;;  %v15649_v13 = vld [vmem:[%s16842_s11 + $0x2c4] sm:$0xf] }
 0x399   : > { %5666 = vmatpush.bf16.msra.mxu2 %v12579_v28 }
 0x39a   : > { %5679 = vmatpush.bf16.msra.mxu3 %v12835_v55 }
 0x39c   : > { %5641 = vmatpush.bf16.msra.mxu0 %v12543_v48  ;;  %v12736_v48 = vld [vmem:[%s16842_s11 + $0x2a0] sm:$0xf0] }
 0x3a0   : > { %5642 = vmatpush.bf16.msra.mxu0 %v12511_v30 }
 0x3ca   : > { %v4610_v35 = vpop.f32.mrf.mxu0  ;;  %v4623_v17 = vpop.f32.mrf.mxu1 }
 0x3cb   : > { %v4624_v33 = vadd.f32 %v4623_v17, %v4610_v35  ;;  %v12799_v17 = vor.u32 %v15661_v27, %v12798_v60 }
 0x3cd   : > { %v4809_v22 = vadd.f32 %v4624_v33, %v17178_v38  ;;  %5654 = vmatpush.bf16.msra.mxu1 %v12799_v17  ;;  %v12768_v38 = vld [vmem:[%s16842_s11 + $0x2e0] sm:$0xf0]  ;;  %v12702_v17 = vld [vmem:[%s16842_s11 + $0x240] sm:$0xf] }
 0x3cf   : > { %v4817_v56 = vmul.f32 0.5, %v4809_v22 }
 0x3d1   : > { %v18338_v21 = vpop.f32.mrf.mxu2  ;;  %v18340_v36 = vpop.f32.mrf.mxu3  ;;  %5655 = vmatpush.bf16.msra.mxu1 %v12767_v1 }
 0x3d2   : > { %v4612_v25 = vpop.f32.mrf.mxu0  ;;  %v4625_v9 = vpop.f32.mrf.mxu1  ;;  %v4650_v40 = vadd.f32 %v18340_v36, %v18338_v21 }
 0x3d3   : > { %v12547_v25 = vor.u32 %v15593_v51, %v12544_v31  ;;  %v12803_v9 = vor.u32 %v15657_v0, %v12800_v32  ;;  %v12446_v51 = vld [vmem:[%s16842_s11 + $0x40] sm:$0xf]  ;;  %v15569_v32 = vld [vmem:[%s16842_s11 + $0x44] sm:$0xf] }
 0x3d4   : > { %v15637_v0 = vld [vmem:[%s16842_s11 + $0x25c] sm:$0xf0] }
 0x3d5   : > { %5667 = vmatpush.bf16.msra.mxu2 %v12547_v25  ;;  %5680 = vmatpush.bf16.msra.mxu3 %v12803_v9  ;;  %v12448_v25 = vld [vmem:[%s16842_s11 + $0x60] sm:$0xf0]  ;;  %v4810_v9 = vadd.f32 %v4650_v40, %v17202_v8  ;;  %v12414_v8 = vld [vmem:[%s16842_s11] sm:$0xf] }
 0x3d6   : > { %v12451_v22 = vor.u32 %v15569_v32, %v12448_v25  ;;  %v15614_v32 = vld [vmem:[%s16842_s11 + $0x1a4] sm:$0xf0] }
 0x3d7   : > { %v4818_v1 = vmul.f32 0.5, %v4810_v9  ;;  %v12870_v25 = vld [vmem:[%s16842_s11 + $0x388] sm:$0xf] }
 0x3d9   : > { %v4638_v39 = vpop.f32.mrf.mxu2  ;;  %v4651_v58 = vpop.f32.mrf.mxu3  ;;  %5668 = vmatpush.bf16.msra.mxu2 %v12515_v59 }
 0x3da   : > { %v4662_v43 = vpop.f32.mrf.mxu0  ;;  %v4675_v37 = vpop.f32.mrf.mxu1  ;;  %v12479_v39 = vor.u32 %v15581_v15, %v12478_v26  ;;  %v12734_v58 = vld [vmem:[%s16842_s11 + $0x280] sm:$0xf]  ;;  %v12672_v26 = vld [vmem:[%s16842_s11 + $0x220] sm:$0xf0] }
 0x3db   : > { %v4676_v35 = vadd.f32 %v4675_v37, %v4662_v43  ;;  %v12735_v60 = vor.u32 %v15645_v6, %v12734_v58  ;;  %v12480_v43 = vld [vmem:[%s16842_s11 + $0xa0] sm:$0xf0]  ;;  %v15622_v58 = vld [vmem:[%s16842_s11 + $0x1e4] sm:$0xf0] }
 0x3dc   : > { %v15641_v37 = vld [vmem:[%s16842_s11 + $0x284] sm:$0xf]  ;;  %5643 = vmatpush.bf16.msra.mxu0 %v12479_v39  ;;  %v12483_v36 = vor.u32 %v15577_v44, %v12480_v43  ;;  %v12646_v39 = vld [vmem:[%s16842_s11 + $0x1c8] sm:$0xf] }
 0x3dd   : > { %v4811_v42 = vadd.f32 %v4676_v35, %v17371_v18  ;;  %v12771_v18 = vor.u32 %v15649_v13, %v12768_v38  ;;  %v12739_v27 = vor.u32 %v15641_v37, %v12736_v48  ;;  %v15573_v35 = vld [vmem:[%s16842_s11 + $0x5c] sm:$0xf0]  ;;  %5656 = vmatpush.bf16.msra.mxu1 %v12735_v60  ;;  %v12415_v13 = vor.u32 %v15565_v29, %v12414_v8  ;;  %v12902_v6 = vld [vmem:[%s16842_s11 + $0x3c8] sm:$0xf]  ;;  %v15618_v37 = vld [vmem:[%s16842_s11 + $0x1cc] sm:$0xf] }
 0x3de   : > { %v12447_v31 = vor.u32 %v15573_v35, %v12446_v51  ;;  %5669 = vmatpush.bf16.msra.mxu2 %v12483_v36  ;;  %v15629_v38 = vld [vmem:[%s16842_s11 + $0x21c] sm:$0xf0]  ;;  %v12647_v60 = vor.u32 %v15622_v58, %v12646_v39  ;;  %v15686_v43 = vld [vmem:[%s16842_s11 + $0x3e4] sm:$0xf0]  ;;  %v12648_v48 = vld [vmem:[%s16842_s11 + $0x1e8] sm:$0xf0] }
 0x3df   : > { %v4825_v14 = vmul.f32 0.5, %v4811_v42  ;;  %5681 = vmatpush.bf16.msra.mxu3 %v12771_v18  ;;  %v15633_v42 = vld [vmem:[%s16842_s11 + $0x244] sm:$0xf]  ;;  %v12651_v36 = vor.u32 %v15618_v37, %v12648_v48  ;;  %v12904_v51 = vld [vmem:[%s16842_s11 + $0x3e8] sm:$0xf0] }
 0x3e0   : > { %v12707_v41 = vor.u32 %v15633_v42, %v12704_v2  ;;  %5644 = vmatpush.bf16.msra.mxu0 %v12447_v31  ;;  %v15561_v18 = vld [vmem:[%s16842_s11 + $0x4] sm:$0xf]  ;;  %v12614_v35 = vld [vmem:[%s16842_s11 + $0x188] sm:$0xf]  ;;  %v12616_v42 = vld [vmem:[%s16842_s11 + $0x1a8] sm:$0xf0] }
 0x3e1   : > { %16332 = vtanh.f32 %v4825_v14  ;;  %v4688_v20 = vpop.f32.mrf.mxu2  ;;  %v4701_v11 = vpop.f32.mrf.mxu3  ;;  %v12670_v14 = vld [vmem:[%s16842_s11 + $0x200] sm:$0xf]  ;;  %v12615_v9 = vor.u32 %v15614_v32, %v12614_v35  ;;  %v12582_v8 = vld [vmem:[%s16842_s11 + $0x148] sm:$0xf]  ;;  %v12552_v35 = vld [vmem:[%s16842_s11 + $0x128] sm:$0xf0] }
 0x3e2   : > { %v4702_v28 = vadd.f32 %v4701_v11, %v4688_v20  ;;  %v4664_v55 = vpop.f32.mrf.mxu0  ;;  %v4677_v33 = vpop.f32.mrf.mxu1  ;;  %16334 = vtanh.f32 %v4817_v56  ;;  %5670 = vmatpush.bf16.msra.mxu2 %v12451_v22  ;;  %v12671_v56 = vor.u32 %v15629_v38, %v12670_v14  ;;  %v12416_v20 = vld [vmem:[%s16842_s11 + $0x20] sm:$0xf0]  ;;  %v15610_v22 = vld [vmem:[%s16842_s11 + $0x18c] sm:$0xf]  ;;  %v15606_v29 = vld [vmem:[%s16842_s11 + $0x164] sm:$0xf0] }
 0x3e3   : > { %5682 = vmatpush.bf16.msra.mxu3 %v12739_v27  ;;  %v15625_v11 = vld [vmem:[%s16842_s11 + $0x204] sm:$0xf]  ;;  %v12419_v55 = vor.u32 %v15561_v18, %v12416_v20  ;;  %v15682_v27 = vld [vmem:[%s16842_s11 + $0x3cc] sm:$0xf]  ;;  %v12838_v14 = vld [vmem:[%s16842_s11 + $0x348] sm:$0xf] }
 0x3e4   : > { %v4812_v21 = vadd.f32 %v4702_v28, %v17392_v45  ;;  %v12703_v45 = vor.u32 %v15637_v0, %v12702_v17  ;;  %5645 = vmatpush.bf16.msra.mxu0 %v12415_v13  ;;  %v12675_v33 = vor.u32 %v15625_v11, %v12672_v26  ;;  %v12907_v0 = vor.u32 %v15682_v27, %v12904_v51  ;;  %v15670_v38 = vld [vmem:[%s16842_s11 + $0x364] sm:$0xf0]  ;;  %v15602_v18 = vld [vmem:[%s16842_s11 + $0x14c] sm:$0xf] }
 0x3e5   : > { %v12806_v37 = vld [vmem:[%s16842_s11 + $0x308] sm:$0xf]  ;;  %v15594_v51 = vld [vmem:[%s16842_s11 + $0x10c] sm:$0xf] }
 0x3e6   : > { %v4826_v30 = vmul.f32 0.5, %v4812_v21  ;;  %5657 = vmatpush.bf16.msra.mxu1 %v12703_v45  ;;  %5671 = vmatpush.bf16.msra.mxu2 %v12419_v55  ;;  %v12903_v21 = vor.u32 %v15686_v43, %v12902_v6  ;;  %v15678_v45 = vld [vmem:[%s16842_s11 + $0x3a4] sm:$0xf0]  ;;  %v12840_v55 = vld [vmem:[%s16842_s11 + $0x368] sm:$0xf0] }
 0x3e7   : > { %v16333_v23 = vpop.eup %16332  ;;  %5683 = vmatpush.bf16.msra.mxu3 %v12707_v41  ;;  %v15674_v41 = vld [vmem:[%s16842_s11 + $0x38c] sm:$0xf]  ;;  %v15598_v43 = vld [vmem:[%s16842_s11 + $0x124] sm:$0xf0] }
 0x3e8   : > { %v4829_v59 = vmul.f32 0.5, %v16333_v23  ;;  %v16335_v15 = vpop.eup %16334  ;;  %16336 = vtanh.f32 %v4826_v30  ;;  %5690 = vmatpush.bf16.msrb.mxu0 %v12647_v60  ;;  %v12619_v23 = vor.u32 %v15610_v22, %v12616_v42  ;;  %v12872_v30 = vld [vmem:[%s16842_s11 + $0x3a8] sm:$0xf0]  ;;  %v12550_v60 = vld [vmem:[%s16842_s11 + $0x108] sm:$0xf] }
 0x3e9   : > { %v4690_v47 = vpop.f32.mrf.mxu2  ;;  %v4703_v34 = vpop.f32.mrf.mxu3  ;;  %v4821_v17 = vmul.f32 0.5, %v16335_v15  ;;  %16338 = vtanh.f32 %v4818_v1  ;;  %v12839_v15 = vor.u32 %v15670_v38, %v12838_v14  ;;  %v15662_v27 = vld [vmem:[%s16842_s11 + $0x324] sm:$0xf0]  ;;  %v12808_v32 = vld [vmem:[%s16842_s11 + $0x328] sm:$0xf0] }
 0x3ea   : > { %5658 = vmatpush.bf16.msra.mxu1 %v12671_v56  ;;  %5716 = vmatpush.bf16.msrb.mxu2 %v12651_v36  ;;  %v4831_v2 = vadd.f32 0.5, %v4829_v59  ;;  %v12875_v34 = vor.u32 %v15674_v41, %v12872_v30  ;;  %v12583_v59 = vor.u32 %v15606_v29, %v12582_v8  ;;  %v12584_v56 = vld [vmem:[%s16842_s11 + $0x168] sm:$0xf0]  ;;  %v12551_v36 = vor.u32 %v15598_v43, %v12550_v60  ;;  %v12518_v22 = vld [vmem:[%s16842_s11 + $0xc8] sm:$0xf] }
 0x3eb   : > { %v4714_v40 = vpop.f32.mrf.mxu0  ;;  %v4727_v28 = vpop.f32.mrf.mxu1  ;;  %5684 = vmatpush.bf16.msra.mxu3 %v12675_v33  ;;  %v4823_v33 = vadd.f32 0.5, %v4821_v17  ;;  %v15590_v42 = vld [vmem:[%s16842_s11 + $0xe4] sm:$0xf0]  ;;  %v15650_v14 = vld [vmem:[%s16842_s11 + $0x2cc] sm:$0xf] }
 0x3ec   : > { %v4728_v44 = vadd.f32 %v4727_v28, %v4714_v40  ;;  %5691 = vmatpush.bf16.msrb.mxu0 %v12615_v9  ;;  %v12587_v40 = vor.u32 %v15602_v18, %v12584_v56  ;;  %v15666_v28 = vld [vmem:[%s16842_s11 + $0x34c] sm:$0xf]  ;;  %v12519_v41 = vor.u32 %v15590_v42, %v12518_v22  ;;  %v15654_v30 = vld [vmem:[%s16842_s11 + $0x2e4] sm:$0xf0] }
 0x3ed   : > { %v12843_v58 = vor.u32 %v15666_v28, %v12840_v55  ;;  %v12486_v18 = vld [vmem:[%s16842_s11 + $0x88] sm:$0xf]  ;;  %v15578_v28 = vld [vmem:[%s16842_s11 + $0x8c] sm:$0xf] }
 0x3ee   : > { %v4813_v31 = vadd.f32 %v4728_v44, %v17528_v50  ;;  %5703 = vmatpush.bf16.msrb.mxu1 %v12903_v21  ;;  %v12871_v50 = vor.u32 %v15678_v45, %v12870_v25  ;;  %v16337_v47 = vpop.eup %16336  ;;  %5717 = vmatpush.bf16.msrb.mxu2 %v12619_v23  ;;  %v4843_v21 = vmul.f32 %v4831_v2, %v18137_v24  ;;  %v12774_v2 = vld [vmem:[%s16842_s11 + $0x2c8] sm:$0xf]  ;;  %v12488_v55 = vld [vmem:[%s16842_s11 + $0xa8] sm:$0xf0] }
 0x3ef   : > { %5729 = vmatpush.bf16.msrb.mxu3 %v12907_v0  ;;  %v4830_v39 = vmul.f32 0.5, %v16337_v47  ;;  %v16339_v6 = vpop.eup %16338  ;;  %v15658_v0 = vld [vmem:[%s16842_s11 + $0x30c] sm:$0xf]  ;;  %v12775_v8 = vor.u32 %v15654_v30, %v12774_v2  ;;  %v15582_v56 = vld [vmem:[%s16842_s11 + $0xa4] sm:$0xf0] }
 0x3f0   : > { %16340 = vtanh.f32 %v4813_v31  ;;  %5692 = vmatpush.bf16.msrb.mxu0 %v12583_v59  ;;  %v12555_v31 = vor.u32 %v15594_v51, %v12552_v35  ;;  %v4822_v24 = vmul.f32 0.5, %v16339_v6  ;;  %v12811_v9 = vor.u32 %v15658_v0, %v12808_v32  ;;  %v15586_v47 = vld [vmem:[%s16842_s11 + $0xcc] sm:$0xf]  ;;  %v12454_v60 = vld [vmem:[%s16842_s11 + $0x48] sm:$0xf] }
 0x3f1   : > { %v4832_v25 = vadd.f32 0.5, %v4830_v39  ;;  %v12491_v39 = vor.u32 %v15578_v28, %v12488_v55  ;;  %v12744_v6 = vld [vmem:[%s16842_s11 + $0x2a8] sm:$0xf0]  ;;  %v15574_v43 = vld [vmem:[%s16842_s11 + $0x64] sm:$0xf0] }
 0x3f2   : > { %5704 = vmatpush.bf16.msrb.mxu1 %v12871_v50  ;;  %5718 = vmatpush.bf16.msrb.mxu2 %v12587_v40  ;;  %v15646_v40 = vld [vmem:[%s16842_s11 + $0x2a4] sm:$0xf0]  ;;  %v15562_v22 = vld [vmem:[%s16842_s11 + $0xc] sm:$0xf] }
 0x3f3   : > { %v4716_v11 = vpop.f32.mrf.mxu0  ;;  %v4729_v26 = vpop.f32.mrf.mxu1  ;;  %5730 = vmatpush.bf16.msrb.mxu3 %v12875_v34  ;;  %v12520_v34 = vld [vmem:[%s16842_s11 + $0xe8] sm:$0xf0]  ;;  %v12422_v0 = vld [vmem:[%s16842_s11 + $0x8] sm:$0xf] }
 0x3f4   : > { %v4740_v1 = vpop.f32.mrf.mxu2  ;;  %v4753_v13 = vpop.f32.mrf.mxu3  ;;  %5693 = vmatpush.bf16.msrb.mxu0 %v12551_v36  ;;  %v12523_v29 = vor.u32 %v15586_v47, %v12520_v34  ;;  %v4844_v11 = vmul.f32 %v4832_v25, %v18156_v63  ;;  %v15570_v36 = vld [vmem:[%s16842_s11 + $0x4c] sm:$0xf]  ;;  %v15566_v32 = vld [vmem:[%s16842_s11 + $0x24] sm:$0xf0] }
 0x3f5   : > { %v4754_v20 = vadd.f32 %v4753_v13, %v4740_v1  ;;  %v12776_v1 = vld [vmem:[%s16842_s11 + $0x2e8] sm:$0xf0]  ;;  %v4824_v13 = vadd.f32 0.5, %v4822_v24  ;;  %v12678_v24 = vld [vmem:[%s16842_s11 + $0x208] sm:$0xf]  ;;  %v12423_v25 = vor.u32 %v15566_v32, %v12422_v0 }
 0x3f6   : > { %v16341_v48 = vpop.eup %16340  ;;  %5705 = vmatpush.bf16.msrb.mxu1 %v12839_v15  ;;  %5719 = vmatpush.bf16.msrb.mxu2 %v12555_v31  ;;  %v12779_v59 = vor.u32 %v15650_v14, %v12776_v1  ;;  %v12487_v15 = vor.u32 %v15582_v56, %v12486_v18  ;;  %v12424_v42 = vld [vmem:[%s16842_s11 + $0x28] sm:$0xf0] }
 0x3f7   : > { %v4814_v44 = vadd.f32 %v4754_v20, %v17554_v62  ;;  %v4845_v17 = vmul.f32 %v16341_v48, %v4823_v33  ;;  %v12807_v62 = vor.u32 %v15662_v27, %v12806_v37  ;;  %5731 = vmatpush.bf16.msrb.mxu3 %v12843_v58  ;;  %v12742_v20 = vld [vmem:[%s16842_s11 + $0x288] sm:$0xf]  ;;  %v15642_v58 = vld [vmem:[%s16842_s11 + $0x28c] sm:$0xf]  ;;  %v12455_v48 = vor.u32 %v15574_v43, %v12454_v60  ;;  %v12654_v60 = vld [vmem:[%s16842_s11 + $0x1d0] sm:$0xf] }
 0x3f8   : > { %5694 = vmatpush.bf16.msrb.mxu0 %v12519_v41  ;;  %v12743_v33 = vor.u32 %v15646_v40, %v12742_v20  ;;  %v12710_v37 = vld [vmem:[%s16842_s11 + $0x248] sm:$0xf]  ;;  %v12456_v27 = vld [vmem:[%s16842_s11 + $0x68] sm:$0xf0]  ;;  %v15623_v43 = vld [vmem:[%s16842_s11 + $0x1ec] sm:$0xf0] }
 0x3f9   : > { %16342 = vtanh.f32 %v4814_v44  ;;  %v18439_v45 = vadd.f32 %v4845_v17, %v4843_v21  ;;  %v12747_v44 = vor.u32 %v15642_v58, %v12744_v6  ;;  %v15638_v21 = vld [vmem:[%s16842_s11 + $0x264] sm:$0xf0]  ;;  %v12459_v35 = vor.u32 %v15570_v36, %v12456_v27  ;;  %v15634_v17 = vld [vmem:[%s16842_s11 + $0x24c] sm:$0xf]  ;;  %v12656_v36 = vld [vmem:[%s16842_s11 + $0x1f0] sm:$0xf0] }
 0x3fa   : > { %5706 = vmatpush.bf16.msrb.mxu1 %v12807_v62  ;;  %5720 = vmatpush.bf16.msrb.mxu2 %v12523_v29  ;;  %v12711_v51 = vor.u32 %v15638_v21, %v12710_v37  ;;  %v12712_v62 = vld [vmem:[%s16842_s11 + $0x268] sm:$0xf0]  ;;  %v12910_v37 = vld [vmem:[%s16842_s11 + $0x3d0] sm:$0xf]  ;;  %v15619_v21 = vld [vmem:[%s16842_s11 + $0x1d4] sm:$0xf]  ;;  %v12655_v0 = vor.u32 %v15623_v43, %v12654_v60 }
 0x3fb   : > { %5732 = vmatpush.bf16.msrb.mxu3 %v12811_v9  ;;  %v12715_v31 = vor.u32 %v15634_v17, %v12712_v62  ;;  %v15630_v9 = vld [vmem:[%s16842_s11 + $0x224] sm:$0xf0]  ;;  %v12680_v41 = vld [vmem:[%s16842_s11 + $0x228] sm:$0xf0]  ;;  %v12912_v17 = vld [vmem:[%s16842_s11 + $0x3f0] sm:$0xf0] }
 0x3fc   : > { %v4742_v50 = vpop.f32.mrf.mxu2  ;;  %v4755_v23 = vpop.f32.mrf.mxu3  ;;  %5695 = vmatpush.bf16.msrb.mxu0 %v12487_v15  ;;  %v12679_v2 = vor.u32 %v15630_v9, %v12678_v24  ;;  %v12622_v24 = vld [vmem:[%s16842_s11 + $0x190] sm:$0xf]  ;;  %v12659_v9 = vor.u32 %v15619_v21, %v12656_v36 }
 0x3fd   : > { %v12427_v50 = vor.u32 %v15562_v22, %v12424_v42  ;;  %v15626_v23 = vld [vmem:[%s16842_s11 + $0x20c] sm:$0xf]  ;;  %v12878_v42 = vld [vmem:[%s16842_s11 + $0x390] sm:$0xf] }
 0x3fe   : > { %5707 = vmatpush.bf16.msrb.mxu1 %v12775_v8  ;;  %5721 = vmatpush.bf16.msrb.mxu2 %v12491_v39  ;;  %v12683_v34 = vor.u32 %v15626_v23, %v12680_v41  ;;  %v12624_v23 = vld [vmem:[%s16842_s11 + $0x1b0] sm:$0xf0]  ;;  %v12526_v43 = vld [vmem:[%s16842_s11 + $0xd0] sm:$0xf] }
 0x3ff   : > { %v16343_v38 = vpop.eup %16342  ;;  %5733 = vmatpush.bf16.msrb.mxu3 %v12779_v59  ;;  %v15675_v41 = vld [vmem:[%s16842_s11 + $0x394] sm:$0xf]  ;;  %v12782_v36 = vld [vmem:[%s16842_s11 + $0x2d0] sm:$0xf] }
 0x400   : > { %v4846_v26 = vmul.f32 %v16343_v38, %v4824_v13  ;;  %5696 = vmatpush.bf16.msrb.mxu0 %v12455_v48  ;;  %v15687_v48 = vld [vmem:[%s16842_s11 + $0x3ec] sm:$0xf0] }
 0x401   : > { %v12911_v32 = vor.u32 %v15687_v48, %v12910_v37  ;;  %v15591_v37 = vld [vmem:[%s16842_s11 + $0xec] sm:$0xf0] }
 0x402   : > { %v18458_v63 = vadd.f32 %v4846_v26, %v4844_v11  ;;  %5708 = vmatpush.bf16.msrb.mxu1 %v12743_v33  ;;  %5722 = vmatpush.bf16.msrb.mxu2 %v12459_v35  ;;  %v15683_v35 = vld [vmem:[%s16842_s11 + $0x3d4] sm:$0xf] }
 0x403   : > { %5734 = vmatpush.bf16.msrb.mxu3 %v12747_v44  ;;  %v12915_v22 = vor.u32 %v15683_v35, %v12912_v17  ;;  %v12528_v35 = vld [vmem:[%s16842_s11 + $0xf0] sm:$0xf0] }
 0x404   : > { %5697 = vmatpush.bf16.msrb.mxu0 %v12423_v25  ;;  %v15615_v25 = vld [vmem:[%s16842_s11 + $0x1ac] sm:$0xf0]  ;;  %v15651_v17 = vld [vmem:[%s16842_s11 + $0x2d4] sm:$0xf] }
 0x406   : > { %5709 = vmatpush.bf16.msrb.mxu1 %v12711_v51  ;;  %5723 = vmatpush.bf16.msrb.mxu2 %v12427_v50  ;;  %v15611_v50 = vld [vmem:[%s16842_s11 + $0x194] sm:$0xf] }
 0x407   : > { %5735 = vmatpush.bf16.msrb.mxu3 %v12715_v31 }
 0x40a   : > { %5710 = vmatpush.bf16.msrb.mxu1 %v12679_v2  ;;  %v15679_v2 = vld [vmem:[%s16842_s11 + $0x3ac] sm:$0xf0] }
 0x40b   : > { %v4766_v30 = vpop.f32.mrf.mxu0  ;;  %v4779_v47 = vpop.f32.mrf.mxu1  ;;  %5736 = vmatpush.bf16.msrb.mxu3 %v12683_v34  ;;  %v12879_v34 = vor.u32 %v15679_v2, %v12878_v42  ;;  %v12750_v2 = vld [vmem:[%s16842_s11 + $0x290] sm:$0xf] }
 0x40c   : > { %v4780_v8 = vadd.f32 %v4779_v47, %v4766_v30  ;;  %v12880_v30 = vld [vmem:[%s16842_s11 + $0x3b0] sm:$0xf0]  ;;  %v12623_v47 = vor.u32 %v15615_v25, %v12622_v24  ;;  %v12494_v25 = vld [vmem:[%s16842_s11 + $0x90] sm:$0xf] }
 0x40e   : > { %v4815_v29 = vadd.f32 %v4780_v8, %v17687_v57  ;;  %v12590_v8 = vld [vmem:[%s16842_s11 + $0x150] sm:$0xf] }
 0x410   : > { %v4835_v14 = vmul.f32 0.5, %v4815_v29  ;;  %v15607_v29 = vld [vmem:[%s16842_s11 + $0x16c] sm:$0xf0] }
 0x412   : > { %v4792_v1 = vpop.f32.mrf.mxu2  ;;  %v4805_v13 = vpop.f32.mrf.mxu3  ;;  %16344 = vtanh.f32 %v4835_v14  ;;  %v12627_v14 = vor.u32 %v15611_v50, %v12624_v23  ;;  %v15647_v50 = vld [vmem:[%s16842_s11 + $0x2ac] sm:$0xf0]  ;;  %v15579_v23 = vld [vmem:[%s16842_s11 + $0x94] sm:$0xf] }
 0x413   : > { %v4806_v59 = vadd.f32 %v4805_v13, %v4792_v1  ;;  %v4768_v38 = vpop.f32.mrf.mxu0  ;;  %v4781_v18 = vpop.f32.mrf.mxu1  ;;  %v12883_v1 = vor.u32 %v15675_v41, %v12880_v30  ;;  %v12846_v13 = vld [vmem:[%s16842_s11 + $0x350] sm:$0xf]  ;;  %v12496_v41 = vld [vmem:[%s16842_s11 + $0xb0] sm:$0xf0] }
 0x414   : > { %v15603_v38 = vld [vmem:[%s16842_s11 + $0x154] sm:$0xf] }
 0x415   : > { %v4816_v56 = vadd.f32 %v4806_v59, %v17694_v46  ;;  %v15671_v59 = vld [vmem:[%s16842_s11 + $0x36c] sm:$0xf0]  ;;  %v12592_v18 = vld [vmem:[%s16842_s11 + $0x170] sm:$0xf0] }
 0x416   : > { %v15643_v30 = vld [vmem:[%s16842_s11 + $0x294] sm:$0xf] }
 0x417   : > { %v4836_v20 = vmul.f32 0.5, %v4816_v56  ;;  %v15667_v56 = vld [vmem:[%s16842_s11 + $0x354] sm:$0xf] }
 0x418   : > { %v16345_v11 = vpop.eup %16344 }
 0x419   : > { %16346 = vtanh.f32 %v4836_v20  ;;  %v4839_v15 = vmul.f32 0.5, %v16345_v11  ;;  %v12848_v20 = vld [vmem:[%s16842_s11 + $0x370] sm:$0xf0]  ;;  %v12591_v11 = vor.u32 %v15607_v29, %v12590_v8  ;;  %v12751_v8 = vor.u32 %v15647_v50, %v12750_v2  ;;  %v12462_v29 = vld [vmem:[%s16842_s11 + $0x50] sm:$0xf] }
 0x41a   : > { %v4794_v26 = vpop.f32.mrf.mxu2  ;;  %v4807_v57 = vpop.f32.mrf.mxu3  ;;  %16348 = vtanh.f32 %v18439_v45  ;;  %v12886_v50 = vld [vmem:[%s16842_s11 + $0x398] sm:$0xf] }
 0x41b   : > { %16350 = vtanh.f32 %v18458_v63  ;;  %v4841_v28 = vadd.f32 0.5, %v4839_v15  ;;  %v12847_v26 = vor.u32 %v15671_v59, %v12846_v13  ;;  %v12558_v57 = vld [vmem:[%s16842_s11 + $0x110] sm:$0xf] }
 0x41c   : > { %v15599_v15 = vld [vmem:[%s16842_s11 + $0x12c] sm:$0xf0] }
 0x41d   : > { %v12718_v59 = vld [vmem:[%s16842_s11 + $0x250] sm:$0xf] }
 0x41f   : > { %v16347_v40 = vpop.eup %16346 }
 0x420   : > { %v4840_v55 = vmul.f32 0.5, %v16347_v40  ;;  %v16349_v46 = vpop.eup %16348  ;;  %v12595_v40 = vor.u32 %v15603_v38, %v12592_v18  ;;  %v15639_v38 = vld [vmem:[%s16842_s11 + $0x26c] sm:$0xf0]  ;;  %v15571_v18 = vld [vmem:[%s16842_s11 + $0x54] sm:$0xf] }
 0x421   : > { %v16351_v39 = vpop.eup %16350  ;;  %v4851_v58 = vmul.f32 %v16349_v46, %v4841_v28  ;;  %v12851_v28 = vor.u32 %v15667_v56, %v12848_v20  ;;  %v15663_v46 = vld [vmem:[%s16842_s11 + $0x32c] sm:$0xf0]  ;;  %v12464_v56 = vld [vmem:[%s16842_s11 + $0x70] sm:$0xf0] }
 0x422   : > { %v4842_v33 = vadd.f32 0.5, %v4840_v55  ;;  %v12814_v55 = vld [vmem:[%s16842_s11 + $0x310] sm:$0xf]  ;;  %v15635_v20 = vld [vmem:[%s16842_s11 + $0x254] sm:$0xf] }
 0x423   : > { %v12815_v60 = vor.u32 %v15663_v46, %v12814_v55  ;;  %v15631_v55 = vld [vmem:[%s16842_s11 + $0x22c] sm:$0xf0]  ;;  %v12467_v46 = vor.u32 %v15571_v18, %v12464_v56  ;;  %v15672_v18 = vld [vmem:[%s16842_s11 + $0x374] sm:$0xf0]  ;;  %v15604_v56 = vld [vmem:[%s16842_s11 + $0x15c] sm:$0xf] }
 0x424   : > { %v4852_v6 = vmul.f32 %v16351_v39, %v4842_v33  ;;  %v15595_v33 = vld [vmem:[%s16842_s11 + $0x114] sm:$0xf] }
 0x425   : > { %v12560_v39 = vld [vmem:[%s16842_s11 + $0x130] sm:$0xf0] }
 0x426   : > { %v4853_v44 = vpack.c.bf16 %v4852_v6, %v4851_v58  ;;  %v15659_v58 = vld [vmem:[%s16842_s11 + $0x314] sm:$0xf]  ;;  %v12563_v48 = vor.u32 %v15595_v33, %v12560_v39 }
 0x427   : > { %v12816_v6 = vld [vmem:[%s16842_s11 + $0x330] sm:$0xf0] }
 0x428   : > { %4854 = vst [vmem:[#allocation3 + $0x10] sm:$0xff] %v4853_v44  ;;  %v4992_v27 = vunpack.c.l.b16 %v4853_v44  ;;  %v4993_v51 = vunpack.c.h.b16 %v4853_v44  ;;  %v12559_v44 = vor.u32 %v15599_v15, %v12558_v57  ;;  %v12819_v21 = vor.u32 %v15659_v58, %v12816_v6  ;;  %v15563_v39 = vld [vmem:[%s16842_s11 + $0x14] sm:$0xf] }
 0x429   : > { %v12719_v15 = vor.u32 %v15639_v38, %v12718_v59  ;;  %v12432_v58 = vld [vmem:[%s16842_s11 + $0x30] sm:$0xf0]  ;;  %v12854_v38 = vld [vmem:[%s16842_s11 + $0x358] sm:$0xf] }
 0x42a   : > { %v18488_v62 = vpack.c.b16 %v4992_v27, %v4992_v27  ;;  %v18490_v31 = vpack.c.b16 %v4993_v51, %v4993_v51  ;;  %v15655_v27 = vld [vmem:[%s16842_s11 + $0x2ec] sm:$0xf0]  ;;  %v15587_v51 = vld [vmem:[%s16842_s11 + $0xd4] sm:$0xf] }
 0x42b   : > { %v12783_v24 = vor.u32 %v15655_v27, %v12782_v36  ;;  %v15627_v6 = vld [vmem:[%s16842_s11 + $0x214] sm:$0xf] }
 0x42c   : > { %5646 = vmatmul.bf16.vlgmr.msra.gmra.mxu0 %v18488_v62  ;;  %5659 = vmatmul.bf16.vlgmr.msra.gmra.mxu1 %v18490_v31 }
 0x42d   : > { %5672 = vmatmul.bf16.vlgmr.msra.gmra.mxu2 %v18488_v62  ;;  %5685 = vmatmul.bf16.vlgmr.msra.gmra.mxu3 %v18490_v31 }
 0x42e   : > { %5742 = vmatpush.bf16.msra.mxu0 %v12655_v0  ;;  %5755 = vmatpush.bf16.msra.mxu1 %v12911_v32  ;;  %v12784_v0 = vld [vmem:[%s16842_s11 + $0x2f0] sm:$0xf0]  ;;  %v12527_v32 = vor.u32 %v15591_v37, %v12526_v43  ;;  %v15624_v43 = vld [vmem:[%s16842_s11 + $0x1f4] sm:$0xf0] }
 0x42f   : > { %5768 = vmatpush.bf16.msra.mxu2 %v12659_v9  ;;  %5781 = vmatpush.bf16.msra.mxu3 %v12915_v22  ;;  %v15583_v9 = vld [vmem:[%s16842_s11 + $0xac] sm:$0xf0]  ;;  %v12531_v22 = vor.u32 %v15587_v51, %v12528_v35  ;;  %v12787_v42 = vor.u32 %v15651_v17, %v12784_v0  ;;  %v12918_v37 = vld [vmem:[%s16842_s11 + $0x3d8] sm:$0xf]  ;;  %v12664_v51 = vld [vmem:[%s16842_s11 + $0x1f8] sm:$0xf0]  ;;  %v12435_v0 = vor.u32 %v15563_v39, %v12432_v58 }
 0x430   : > { %v15684_v35 = vld [vmem:[%s16842_s11 + $0x3dc] sm:$0xf]  ;;  %v15664_v39 = vld [vmem:[%s16842_s11 + $0x334] sm:$0xf0] }
 0x431   : > { %v12920_v17 = vld [vmem:[%s16842_s11 + $0x3f8] sm:$0xf0] }
 0x432   : > { %5743 = vmatpush.bf16.msra.mxu0 %v12623_v47  ;;  %5756 = vmatpush.bf16.msra.mxu1 %v12879_v34  ;;  %v12752_v47 = vld [vmem:[%s16842_s11 + $0x2b0] sm:$0xf0]  ;;  %v12495_v34 = vor.u32 %v15583_v9, %v12494_v25  ;;  %v12630_v9 = vld [vmem:[%s16842_s11 + $0x198] sm:$0xf]  ;;  %v12923_v2 = vor.u32 %v15684_v35, %v12920_v17  ;;  %v15596_v58 = vld [vmem:[%s16842_s11 + $0x11c] sm:$0xf] }
 0x433   : > { %5769 = vmatpush.bf16.msra.mxu2 %v12627_v14  ;;  %5782 = vmatpush.bf16.msra.mxu3 %v12883_v1  ;;  %v15575_v14 = vld [vmem:[%s16842_s11 + $0x6c] sm:$0xf0]  ;;  %v12499_v1 = vor.u32 %v15579_v23, %v12496_v41  ;;  %v12755_v13 = vor.u32 %v15643_v30, %v12752_v47  ;;  %v15680_v23 = vld [vmem:[%s16842_s11 + $0x3b4] sm:$0xf0]  ;;  %v15612_v41 = vld [vmem:[%s16842_s11 + $0x19c] sm:$0xf] }
 0x434   : > { %v12463_v57 = vor.u32 %v15575_v14, %v12462_v29  ;;  %v12632_v30 = vld [vmem:[%s16842_s11 + $0x1b8] sm:$0xf0]  ;;  %v12887_v29 = vor.u32 %v15680_v23, %v12886_v50  ;;  %v12598_v14 = vld [vmem:[%s16842_s11 + $0x158] sm:$0xf] }
 0x435   : > { %v15676_v47 = vld [vmem:[%s16842_s11 + $0x39c] sm:$0xf]  ;;  %v15656_v35 = vld [vmem:[%s16842_s11 + $0x2f4] sm:$0xf0] }
 0x436   : > { %5744 = vmatpush.bf16.msra.mxu0 %v12591_v11  ;;  %5757 = vmatpush.bf16.msra.mxu1 %v12847_v26  ;;  %v12720_v11 = vld [vmem:[%s16842_s11 + $0x270] sm:$0xf0]  ;;  %v12430_v26 = vld [vmem:[%s16842_s11 + $0x10] sm:$0xf]  ;;  %v15588_v17 = vld [vmem:[%s16842_s11 + $0xdc] sm:$0xf] }
 0x437   : > { %5770 = vmatpush.bf16.msra.mxu2 %v12595_v40  ;;  %5783 = vmatpush.bf16.msra.mxu3 %v12851_v28  ;;  %v15567_v40 = vld [vmem:[%s16842_s11 + $0x2c] sm:$0xf0]  ;;  %v12723_v33 = vor.u32 %v15635_v20, %v12720_v11  ;;  %v12600_v20 = vld [vmem:[%s16842_s11 + $0x178] sm:$0xf0]  ;;  %v12758_v23 = vld [vmem:[%s16842_s11 + $0x298] sm:$0xf] }
 0x438   : > { %v12686_v28 = vld [vmem:[%s16842_s11 + $0x210] sm:$0xf]  ;;  %v12431_v36 = vor.u32 %v15567_v40, %v12430_v26  ;;  %v15668_v11 = vld [vmem:[%s16842_s11 + $0x35c] sm:$0xf]  ;;  %v12566_v40 = vld [vmem:[%s16842_s11 + $0x118] sm:$0xf] }
 0x439   : > { %v12687_v27 = vor.u32 %v15631_v55, %v12686_v28  ;;  %v12856_v26 = vld [vmem:[%s16842_s11 + $0x378] sm:$0xf0]  ;;  %v15600_v28 = vld [vmem:[%s16842_s11 + $0x134] sm:$0xf0]  ;;  %v12603_v55 = vor.u32 %v15604_v56, %v12600_v20 }
 0x43a   : > { %5745 = vmatpush.bf16.msra.mxu0 %v12559_v44  ;;  %5758 = vmatpush.bf16.msra.mxu1 %v12815_v60  ;;  %v12688_v44 = vld [vmem:[%s16842_s11 + $0x230] sm:$0xf0]  ;;  %v12662_v60 = vld [vmem:[%s16842_s11 + $0x1d8] sm:$0xf]  ;;  %v15572_v20 = vld [vmem:[%s16842_s11 + $0x5c] sm:$0xf] }
 0x43b   : > { %5771 = vmatpush.bf16.msra.mxu2 %v12563_v48  ;;  %5784 = vmatpush.bf16.msra.mxu3 %v12819_v21  ;;  %v15688_v48 = vld [vmem:[%s16842_s11 + $0x3f4] sm:$0xf0]  ;;  %v15620_v21 = vld [vmem:[%s16842_s11 + $0x1dc] sm:$0xf] }
 0x43c   : > { %5698 = vmatmul.bf16.vlgmr.msrb.gmra.mxu0 %v18488_v62  ;;  %5711 = vmatmul.bf16.vlgmr.msrb.gmra.mxu1 %v18490_v31  ;;  %v12919_v25 = vor.u32 %v15688_v48, %v12918_v37  ;;  %v12534_v48 = vld [vmem:[%s16842_s11 + $0xd8] sm:$0xf] }
 0x43d   : > { %5724 = vmatmul.bf16.vlgmr.msrb.gmra.mxu2 %v18488_v62  ;;  %5737 = vmatmul.bf16.vlgmr.msrb.gmra.mxu3 %v18490_v31  ;;  %v15640_v56 = vld [vmem:[%s16842_s11 + $0x274] sm:$0xf0] }
 0x43e   : > { %5746 = vmatpush.bf16.msra.mxu0 %v12527_v32  ;;  %5759 = vmatpush.bf16.msra.mxu1 %v12783_v24  ;;  %v12691_v32 = vor.u32 %v15627_v6, %v12688_v44  ;;  %v12663_v24 = vor.u32 %v15624_v43, %v12662_v60  ;;  %v12568_v6 = vld [vmem:[%s16842_s11 + $0x138] sm:$0xf0]  ;;  %v12567_v43 = vor.u32 %v15600_v28, %v12566_v40  ;;  %v12438_v28 = vld [vmem:[%s16842_s11 + $0x18] sm:$0xf] }
 0x43f   : > { %5772 = vmatpush.bf16.msra.mxu2 %v12531_v22  ;;  %5785 = vmatpush.bf16.msra.mxu3 %v12787_v42  ;;  %v15616_v22 = vld [vmem:[%s16842_s11 + $0x1b4] sm:$0xf0]  ;;  %v12667_v42 = vor.u32 %v15620_v21, %v12664_v51  ;;  %v15660_v44 = vld [vmem:[%s16842_s11 + $0x31c] sm:$0xf] }
 0x440   : > { %v12824_v60 = vld [vmem:[%s16842_s11 + $0x338] sm:$0xf0]  ;;  %v15592_v21 = vld [vmem:[%s16842_s11 + $0xf4] sm:$0xf0] }
 0x441   : > { %v12790_v51 = vld [vmem:[%s16842_s11 + $0x2d8] sm:$0xf] }
 0x442   : > { %5747 = vmatpush.bf16.msra.mxu0 %v12495_v34  ;;  %5760 = vmatpush.bf16.msra.mxu1 %v12751_v8  ;;  %v12888_v34 = vld [vmem:[%s16842_s11 + $0x3b8] sm:$0xf0]  ;;  %v12631_v8 = vor.u32 %v15616_v22, %v12630_v9  ;;  %v12791_v9 = vor.u32 %v15656_v35, %v12790_v51  ;;  %v12502_v22 = vld [vmem:[%s16842_s11 + $0x98] sm:$0xf]  ;;  %v13150_v35 = vld [vmem:[%s16842_s11 + $0x1c0] sm:$0xf] }
 0x443   : > { %5773 = vmatpush.bf16.msra.mxu2 %v12499_v1  ;;  %5786 = vmatpush.bf16.msra.mxu3 %v12755_v13  ;;  %v15608_v1 = vld [vmem:[%s16842_s11 + $0x174] sm:$0xf0]  ;;  %v12635_v13 = vor.u32 %v15612_v41, %v12632_v30  ;;  %v12891_v59 = vor.u32 %v15676_v47, %v12888_v34  ;;  %v15580_v30 = vld [vmem:[%s16842_s11 + $0x9c] sm:$0xf] }
 0x444   : > { %v15648_v41 = vld [vmem:[%s16842_s11 + $0x2b4] sm:$0xf0]  ;;  %v12504_v47 = vld [vmem:[%s16842_s11 + $0xb8] sm:$0xf0] }
 0x445   : > { %v15644_v34 = vld [vmem:[%s16842_s11 + $0x29c] sm:$0xf] }
 0x446   : > { %5748 = vmatpush.bf16.msra.mxu0 %v12463_v57  ;;  %5761 = vmatpush.bf16.msra.mxu1 %v12719_v15  ;;  %v12599_v57 = vor.u32 %v15608_v1, %v12598_v14  ;;  %v12855_v15 = vor.u32 %v15672_v18, %v12854_v38  ;;  %v12759_v14 = vor.u32 %v15648_v41, %v12758_v23  ;;  %v12470_v1 = vld [vmem:[%s16842_s11 + $0x58] sm:$0xf]  ;;  %v13118_v41 = vld [vmem:[%s16842_s11 + $0x180] sm:$0xf] }
 0x447   : > { %5774 = vmatpush.bf16.msra.mxu2 %v12467_v46  ;;  %5787 = vmatpush.bf16.msra.mxu3 %v12723_v33  ;;  %v12859_v46 = vor.u32 %v15668_v11, %v12856_v26  ;;  %v12822_v33 = vld [vmem:[%s16842_s11 + $0x318] sm:$0xf]  ;;  %v12472_v11 = vld [vmem:[%s16842_s11 + $0x78] sm:$0xf0] }
 0x448   : > { %v12823_v37 = vor.u32 %v15664_v39, %v12822_v33  ;;  %v12726_v18 = vld [vmem:[%s16842_s11 + $0x258] sm:$0xf]  ;;  %v15636_v26 = vld [vmem:[%s16842_s11 + $0x25c] sm:$0xf] }
 0x449   : > { %v12727_v40 = vor.u32 %v15640_v56, %v12726_v18  ;;  %v12694_v39 = vld [vmem:[%s16842_s11 + $0x218] sm:$0xf]  ;;  %v15801_v18 = vld [vmem:[%s16842_s11 + $0x384] sm:$0xf] }
 0x44a   : > { %5749 = vmatpush.bf16.msra.mxu0 %v12431_v36  ;;  %5762 = vmatpush.bf16.msra.mxu1 %v12687_v27  ;;  %v12571_v36 = vor.u32 %v15596_v58, %v12568_v6  ;;  %v12827_v27 = vor.u32 %v15660_v44, %v12824_v60  ;;  %v15632_v58 = vld [vmem:[%s16842_s11 + $0x234] sm:$0xf0]  ;;  %v15564_v6 = vld [vmem:[%s16842_s11 + $0x1c] sm:$0xf]  ;;  %v13376_v56 = vld [vmem:[%s16842_s11 + $0x3a0] sm:$0xf0] }
 0x44b   : > { %5775 = vmatpush.bf16.msra.mxu2 %v12435_v0  ;;  %5788 = vmatpush.bf16.msra.mxu3 %v12691_v32  ;;  %v12536_v0 = vld [vmem:[%s16842_s11 + $0xf8] sm:$0xf0] }
 0x44c   : > { %v15652_v32 = vld [vmem:[%s16842_s11 + $0x2dc] sm:$0xf] }
 0x44d   : > { %5750 = vmatmul.bf16.vlgmr.msra.gmra.mxu0 %v18488_v62  ;;  %5763 = vmatmul.bf16.vlgmr.msra.gmra.mxu1 %v18490_v31  ;;  %v12440_v44 = vld [vmem:[%s16842_s11 + $0x38] sm:$0xf0] }
 0x44e   : > { %5794 = vmatpush.bf16.msrb.mxu0 %v12663_v24  ;;  %5807 = vmatpush.bf16.msrb.mxu1 %v12919_v25  ;;  %v12792_v24 = vld [vmem:[%s16842_s11 + $0x2f8] sm:$0xf0]  ;;  %v12535_v25 = vor.u32 %v15592_v21, %v12534_v48  ;;  %v12695_v48 = vor.u32 %v15632_v58, %v12694_v39  ;;  %v12443_v21 = vor.u32 %v15564_v6, %v12440_v44  ;;  %v13344_v39 = vld [vmem:[%s16842_s11 + $0x360] sm:$0xf0] }
 0x44f   : > { %5820 = vmatpush.bf16.msrb.mxu2 %v12667_v42  ;;  %5833 = vmatpush.bf16.msrb.mxu3 %v12923_v2  ;;  %v15584_v42 = vld [vmem:[%s16842_s11 + $0xb4] sm:$0xf0]  ;;  %v12539_v2 = vor.u32 %v15588_v17, %v12536_v0  ;;  %v12795_v50 = vor.u32 %v15652_v32, %v12792_v24  ;;  %v15628_v60 = vld [vmem:[%s16842_s11 + $0x21c] sm:$0xf]  ;;  %v15749_v17 = vld [vmem:[%s16842_s11 + $0x1dc] sm:$0xf0] }
 0x450   : > { %5776 = vmatmul.bf16.vlgmr.msra.gmra.mxu2 %v18488_v62  ;;  %5789 = vmatmul.bf16.vlgmr.msra.gmra.mxu3 %v18490_v31  ;;  %v13406_v0 = vld [vmem:[%s16842_s11 + $0x3c0] sm:$0xf]  ;;  %v13151_v32 = vor.u32 %v15749_v17, %v13150_v35 }
 0x451   : > { %v15813_v24 = vld [vmem:[%s16842_s11 + $0x3dc] sm:$0xf0] }
 0x452   : > { %5795 = vmatpush.bf16.msrb.mxu0 %v12631_v8  ;;  %5808 = vmatpush.bf16.msrb.mxu1 %v12887_v29  ;;  %v12760_v8 = vld [vmem:[%s16842_s11 + $0x2b8] sm:$0xf0]  ;;  %v12503_v29 = vor.u32 %v15584_v42, %v12502_v22  ;;  %v13407_v22 = vor.u32 %v15813_v24, %v13406_v0  ;;  %v15789_v0 = vld [vmem:[%s16842_s11 + $0x31c] sm:$0xf0]  ;;  %v13056_v24 = vld [vmem:[%s16842_s11 + $0x120] sm:$0xf0] }
 0x453   : > { %5821 = vmatpush.bf16.msrb.mxu2 %v12635_v13  ;;  %5834 = vmatpush.bf16.msrb.mxu3 %v12891_v59  ;;  %v15576_v13 = vld [vmem:[%s16842_s11 + $0x74] sm:$0xf0]  ;;  %v12507_v59 = vor.u32 %v15580_v30, %v12504_v47  ;;  %v12763_v38 = vor.u32 %v15644_v34, %v12760_v8  ;;  %v15741_v30 = vld [vmem:[%s16842_s11 + $0x19c] sm:$0xf0] }
 0x454   : > { %v13374_v47 = vld [vmem:[%s16842_s11 + $0x380] sm:$0xf] }
 0x456   : > { %5796 = vmatpush.bf16.msrb.mxu0 %v12599_v57  ;;  %5809 = vmatpush.bf16.msrb.mxu1 %v12855_v15  ;;  %v12728_v57 = vld [vmem:[%s16842_s11 + $0x278] sm:$0xf0]  ;;  %v12471_v15 = vor.u32 %v15576_v13, %v12470_v1  ;;  %v15737_v1 = vld [vmem:[%s16842_s11 + $0x184] sm:$0xf] }
 0x457   : > { %5822 = vmatpush.bf16.msrb.mxu2 %v12603_v55  ;;  %5835 = vmatpush.bf16.msrb.mxu3 %v12859_v46  ;;  %v15568_v55 = vld [vmem:[%s16842_s11 + $0x34] sm:$0xf0]  ;;  %v12475_v46 = vor.u32 %v15572_v20, %v12472_v11  ;;  %v12731_v33 = vor.u32 %v15636_v26, %v12728_v57  ;;  %v13120_v13 = vld [vmem:[%s16842_s11 + $0x1a0] sm:$0xf0]  ;;  %v13379_v20 = vor.u32 %v15801_v18, %v13376_v56  ;;  %v13086_v11 = vld [vmem:[%s16842_s11 + $0x140] sm:$0xf] }
 0x458   : > { %v15733_v26 = vld [vmem:[%s16842_s11 + $0x15c] sm:$0xf0] }
 0x459   : > { %v13342_v57 = vld [vmem:[%s16842_s11 + $0x340] sm:$0xf] }
 0x45a   : > { %5797 = vmatpush.bf16.msrb.mxu0 %v12567_v43  ;;  %5810 = vmatpush.bf16.msrb.mxu1 %v12823_v37  ;;  %v12696_v43 = vld [vmem:[%s16842_s11 + $0x238] sm:$0xf0]  ;;  %v12439_v37 = vor.u32 %v15568_v55, %v12438_v28  ;;  %v15729_v28 = vld [vmem:[%s16842_s11 + $0x144] sm:$0xf] }
 0x45b   : > { %5823 = vmatpush.bf16.msrb.mxu2 %v12571_v36  ;;  %5836 = vmatpush.bf16.msrb.mxu3 %v12827_v27  ;;  %v12699_v36 = vor.u32 %v15628_v60, %v12696_v43 }
 0x45e   : > { %5798 = vmatpush.bf16.msrb.mxu0 %v12535_v25  ;;  %5811 = vmatpush.bf16.msrb.mxu1 %v12791_v9  ;;  %v15745_v25 = vld [vmem:[%s16842_s11 + $0x1c4] sm:$0xf] }
 0x45f   : > { %5824 = vmatpush.bf16.msrb.mxu2 %v12539_v2  ;;  %5837 = vmatpush.bf16.msrb.mxu3 %v12795_v50  ;;  %v13152_v9 = vld [vmem:[%s16842_s11 + $0x1e0] sm:$0xf0] }
 0x460   : > { %v13155_v42 = vor.u32 %v15745_v25, %v13152_v9  ;;  %v15809_v2 = vld [vmem:[%s16842_s11 + $0x3c4] sm:$0xf] }
 0x461   : > { %v15785_v25 = vld [vmem:[%s16842_s11 + $0x304] sm:$0xf] }
 0x462   : > { %5799 = vmatpush.bf16.msrb.mxu0 %v12503_v29  ;;  %5812 = vmatpush.bf16.msrb.mxu1 %v12759_v14  ;;  %v13119_v29 = vor.u32 %v15741_v30, %v13118_v41  ;;  %v15805_v14 = vld [vmem:[%s16842_s11 + $0x39c] sm:$0xf0]  ;;  %v13312_v9 = vld [vmem:[%s16842_s11 + $0x320] sm:$0xf0] }
 0x463   : > { %5825 = vmatpush.bf16.msrb.mxu2 %v12507_v59  ;;  %5838 = vmatpush.bf16.msrb.mxu3 %v12763_v38  ;;  %v13375_v59 = vor.u32 %v15805_v14, %v13374_v47  ;;  %v13123_v38 = vor.u32 %v15737_v1, %v13120_v13  ;;  %v15717_v41 = vld [vmem:[%s16842_s11 + $0xdc] sm:$0xf0] }
 0x464   : > { %v13278_v30 = vld [vmem:[%s16842_s11 + $0x2c0] sm:$0xf] }
 0x466   : > { %5800 = vmatpush.bf16.msrb.mxu0 %v12471_v15  ;;  %5813 = vmatpush.bf16.msrb.mxu1 %v12727_v40  ;;  %v13087_v15 = vor.u32 %v15733_v26, %v13086_v11  ;;  %v15797_v40 = vld [vmem:[%s16842_s11 + $0x35c] sm:$0xf0] }
 0x467   : > { %5826 = vmatpush.bf16.msrb.mxu2 %v12475_v46  ;;  %5839 = vmatpush.bf16.msrb.mxu3 %v12731_v33  ;;  %v13343_v55 = vor.u32 %v15797_v40, %v13342_v57  ;;  %v13088_v46 = vld [vmem:[%s16842_s11 + $0x160] sm:$0xf0]  ;;  %v15709_v11 = vld [vmem:[%s16842_s11 + $0x9c] sm:$0xf0] }
 0x468   : > { %v15793_v33 = vld [vmem:[%s16842_s11 + $0x344] sm:$0xf]  ;;  %v13091_v58 = vor.u32 %v15729_v28, %v13088_v46  ;;  %v15773_v46 = vld [vmem:[%s16842_s11 + $0x29c] sm:$0xf0] }
 0x469   : > { %v13347_v6 = vor.u32 %v15793_v33, %v13344_v39  ;;  %v15705_v33 = vld [vmem:[%s16842_s11 + $0x84] sm:$0xf] }
 0x46a   : > { %5801 = vmatpush.bf16.msrb.mxu0 %v12439_v37  ;;  %5814 = vmatpush.bf16.msrb.mxu1 %v12695_v48  ;;  %v13054_v37 = vld [vmem:[%s16842_s11 + $0x100] sm:$0xf] }
 0x46b   : > { %5827 = vmatpush.bf16.msrb.mxu2 %v12443_v21  ;;  %5840 = vmatpush.bf16.msrb.mxu3 %v12699_v36  ;;  %v15725_v48 = vld [vmem:[%s16842_s11 + $0x11c] sm:$0xf0] }
 0x46c   : > { %v13310_v21 = vld [vmem:[%s16842_s11 + $0x300] sm:$0xf]  ;;  %v13055_v17 = vor.u32 %v15725_v48, %v13054_v37 }
 0x46d   : > { %5802 = vmatmul.bf16.vlgmr.msrb.gmra.mxu0 %v18488_v62  ;;  %5815 = vmatmul.bf16.vlgmr.msrb.gmra.mxu1 %v18490_v31  ;;  %v15701_v37 = vld [vmem:[%s16842_s11 + $0x5c] sm:$0xf0] }
 0x46e   : > { %5828 = vmatmul.bf16.vlgmr.msrb.gmra.mxu2 %v18488_v62  ;;  %5841 = vmatmul.bf16.vlgmr.msrb.gmra.mxu3 %v18490_v31  ;;  %v13408_v62 = vld [vmem:[%s16842_s11 + $0x3e0] sm:$0xf0]  ;;  %v13214_v48 = vld [vmem:[%s16842_s11 + $0x240] sm:$0xf] }
 0x46f   : > { %6675 = vmatpush.bf16.msra.mxu0 %v13151_v32  ;;  %v13411_v31 = vor.u32 %v15809_v2, %v13408_v62  ;;  %6688 = vmatpush.bf16.msra.mxu1 %v13407_v22  ;;  %v15721_v32 = vld [vmem:[%s16842_s11 + $0x104] sm:$0xf] }
 0x470   : > { %6701 = vmatpush.bf16.msra.mxu2 %v13155_v42  ;;  %v13059_v22 = vor.u32 %v15721_v32, %v13056_v24  ;;  %v13315_v42 = vor.u32 %v15785_v25, %v13312_v9 }
 0x471   : > { %6714 = vmatpush.bf16.msra.mxu3 %v13411_v31  ;;  %v13022_v31 = vld [vmem:[%s16842_s11 + $0xc0] sm:$0xf] }
 0x472   : > { %v13023_v47 = vor.u32 %v15717_v41, %v13022_v31  ;;  %v13182_v31 = vld [vmem:[%s16842_s11 + $0x200] sm:$0xf] }
 0x473   : > { %6676 = vmatpush.bf16.msra.mxu0 %v13119_v29  ;;  %6689 = vmatpush.bf16.msra.mxu1 %v13375_v59  ;;  %v13024_v29 = vld [vmem:[%s16842_s11 + $0xe0] sm:$0xf0] }
 0x474   : > { %6702 = vmatpush.bf16.msra.mxu2 %v13123_v38  ;;  %v15777_v59 = vld [vmem:[%s16842_s11 + $0x2c4] sm:$0xf] }
 0x475   : > { %6715 = vmatpush.bf16.msra.mxu3 %v13379_v20  ;;  %v12990_v20 = vld [vmem:[%s16842_s11 + $0x80] sm:$0xf] }
 0x476   : > { %v12991_v28 = vor.u32 %v15709_v11, %v12990_v20  ;;  %v13414_v20 = vld [vmem:[%s16842_s11 + $0x3c8] sm:$0xf] }
 0x477   : > { %6677 = vmatpush.bf16.msra.mxu0 %v13087_v15  ;;  %6690 = vmatpush.bf16.msra.mxu1 %v13343_v55  ;;  %v13246_v55 = vld [vmem:[%s16842_s11 + $0x280] sm:$0xf] }
 0x478   : > { %6703 = vmatpush.bf16.msra.mxu2 %v13091_v58  ;;  %v13247_v39 = vor.u32 %v15773_v46, %v13246_v55  ;;  %v12992_v58 = vld [vmem:[%s16842_s11 + $0xa0] sm:$0xf0] }
 0x479   : > { %6716 = vmatpush.bf16.msra.mxu3 %v13347_v6  ;;  %v15769_v6 = vld [vmem:[%s16842_s11 + $0x284] sm:$0xf] }
 0x47b   : > { %6678 = vmatpush.bf16.msra.mxu0 %v13055_v17  ;;  %v12960_v17 = vld [vmem:[%s16842_s11 + $0x60] sm:$0xf0] }
 0x47c   : > { %6704 = vmatpush.bf16.msra.mxu2 %v13059_v22  ;;  %v1472_v22 = vadd.f32 %v17546_v12, %v17457_v61  ;;  %v12928_v12 = vld [vmem:[%s16842_s11 + $0x20] sm:$0xf0] }
 0x47d   : > { %6717 = vmatpush.bf16.msra.mxu3 %v13315_v42 }
 0x47e   : > { %v1501_v11 = vadd.f32 %v17550_v4, %v1472_v22  ;;  %v1530_v4 = vadd.f32 %v17570_v3, %v17484_v49 }
 0x47f   : > { %6679 = vmatpush.bf16.msra.mxu0 %v13023_v47 }
 0x483   : > { %6680 = vmatpush.bf16.msra.mxu0 %v12991_v28  ;;  %v13160_v28 = vld [vmem:[%s16842_s11 + $0x1e8] sm:$0xf0] }
 0x4a9   : > { %v5647_v27 = vpop.f32.mrf.mxu0  ;;  %v5660_v51 = vpop.f32.mrf.mxu1 }
 0x4aa   : > { %v5661_v44 = vadd.f32 %v5660_v51, %v5647_v27  ;;  %v13311_v51 = vor.u32 %v15789_v0, %v13310_v21 }
 0x4ac   : > { %v5846_v2 = vadd.f32 %v5661_v44, %v17204_v10  ;;  %6691 = vmatpush.bf16.msra.mxu1 %v13311_v51  ;;  %v13280_v10 = vld [vmem:[%s16842_s11 + $0x2e0] sm:$0xf0] }
 0x4ad   : > { %v13248_v44 = vld [vmem:[%s16842_s11 + $0x2a0] sm:$0xf0] }
 0x4ae   : > { %v5854_v38 = vmul.f32 0.5, %v5846_v2  ;;  %v13216_v51 = vld [vmem:[%s16842_s11 + $0x260] sm:$0xf0]  ;;  %v12926_v2 = vld [vmem:[%s16842_s11] sm:$0xf] }
 0x4b0   : > { %v18636_v50 = vpop.f32.mrf.mxu2  ;;  %v18638_v23 = vpop.f32.mrf.mxu3 }
 0x4b1   : > { %v5649_v34 = vpop.f32.mrf.mxu0  ;;  %v5662_v8 = vpop.f32.mrf.mxu1  ;;  %v5687_v26 = vadd.f32 %v18638_v23, %v18636_v50  ;;  %v12995_v23 = vor.u32 %v15705_v33, %v12992_v58  ;;  %v15810_v33 = vld [vmem:[%s16842_s11 + $0x3cc] sm:$0xf]  ;;  %v13126_v58 = vld [vmem:[%s16842_s11 + $0x188] sm:$0xf] }
 0x4b2   : > { %v15781_v34 = vld [vmem:[%s16842_s11 + $0x2dc] sm:$0xf0]  ;;  %v15713_v8 = vld [vmem:[%s16842_s11 + $0xc4] sm:$0xf] }
 0x4b3   : > { %v13279_v1 = vor.u32 %v15781_v34, %v13278_v30  ;;  %v13027_v13 = vor.u32 %v15713_v8, %v13024_v29  ;;  %v5847_v0 = vadd.f32 %v5687_v26, %v17224_v54  ;;  %v15757_v34 = vld [vmem:[%s16842_s11 + $0x21c] sm:$0xf0]  ;;  %v15689_v8 = vld [vmem:[%s16842_s11 + $0x4] sm:$0xf] }
 0x4b4   : > { %v13183_v29 = vor.u32 %v15757_v34, %v13182_v31 }
 0x4b5   : > { %6692 = vmatpush.bf16.msra.mxu1 %v13279_v1  ;;  %6705 = vmatpush.bf16.msra.mxu2 %v13027_v13  ;;  %v5855_v41 = vmul.f32 0.5, %v5847_v0  ;;  %v13184_v1 = vld [vmem:[%s16842_s11 + $0x220] sm:$0xf0]  ;;  %v13384_v0 = vld [vmem:[%s16842_s11 + $0x3a8] sm:$0xf0] }
 0x4b8   : > { %v5675_v60 = vpop.f32.mrf.mxu2  ;;  %v5688_v43 = vpop.f32.mrf.mxu3 }
 0x4b9   : > { %v5699_v36 = vpop.f32.mrf.mxu0  ;;  %v5712_v35 = vpop.f32.mrf.mxu1  ;;  %v13251_v60 = vor.u32 %v15769_v6, %v13248_v44  ;;  %v12958_v43 = vld [vmem:[%s16842_s11 + $0x40] sm:$0xf]  ;;  %6693 = vmatpush.bf16.msra.mxu1 %v13247_v39  ;;  %6706 = vmatpush.bf16.msra.mxu2 %v12995_v23  ;;  %v13416_v39 = vld [vmem:[%s16842_s11 + $0x3e8] sm:$0xf0]  ;;  %v15742_v23 = vld [vmem:[%s16842_s11 + $0x1a4] sm:$0xf0] }
 0x4ba   : > { %v5713_v27 = vadd.f32 %v5712_v35, %v5699_v36  ;;  %v12959_v21 = vor.u32 %v15701_v37, %v12958_v43  ;;  %v15765_v36 = vld [vmem:[%s16842_s11 + $0x25c] sm:$0xf0]  ;;  %v15697_v35 = vld [vmem:[%s16842_s11 + $0x44] sm:$0xf]  ;;  %v13127_v43 = vor.u32 %v15742_v23, %v13126_v58  ;;  %v15806_v37 = vld [vmem:[%s16842_s11 + $0x3a4] sm:$0xf0] }
 0x4bb   : > { %v12963_v32 = vor.u32 %v15697_v35, %v12960_v17  ;;  %v15802_v17 = vld [vmem:[%s16842_s11 + $0x38c] sm:$0xf]  ;;  %v13030_v58 = vld [vmem:[%s16842_s11 + $0xc8] sm:$0xf] }
 0x4bc   : > { %v5848_v62 = vadd.f32 %v5713_v27, %v17397_v5  ;;  %v13283_v5 = vor.u32 %v15777_v59, %v13280_v10  ;;  %v15761_v27 = vld [vmem:[%s16842_s11 + $0x244] sm:$0xf]  ;;  %6681 = vmatpush.bf16.msra.mxu0 %v12959_v21  ;;  %v13128_v21 = vld [vmem:[%s16842_s11 + $0x1a8] sm:$0xf0] }
 0x4bd   : > { %v13219_v25 = vor.u32 %v15761_v27, %v13216_v51  ;;  %6707 = vmatpush.bf16.msra.mxu2 %v12963_v32  ;;  %v13387_v32 = vor.u32 %v15802_v17, %v13384_v0  ;;  %v13094_v27 = vld [vmem:[%s16842_s11 + $0x148] sm:$0xf] }
 0x4be   : > { %v5862_v14 = vmul.f32 0.5, %v5848_v62  ;;  %6718 = vmatpush.bf16.msra.mxu3 %v13283_v5  ;;  %v15693_v62 = vld [vmem:[%s16842_s11 + $0x1c] sm:$0xf0]  ;;  %v12931_v5 = vor.u32 %v15689_v8, %v12928_v12  ;;  %v15734_v51 = vld [vmem:[%s16842_s11 + $0x164] sm:$0xf0] }
 0x4bf   : > { %v12927_v47 = vor.u32 %v15693_v62, %v12926_v2  ;;  %v15730_v2 = vld [vmem:[%s16842_s11 + $0x14c] sm:$0xf] }
 0x4c0   : > { %16352 = vtanh.f32 %v5862_v14  ;;  %v5725_v18 = vpop.f32.mrf.mxu2  ;;  %v5738_v56 = vpop.f32.mrf.mxu3  ;;  %v15753_v14 = vld [vmem:[%s16842_s11 + $0x204] sm:$0xf]  ;;  %v13096_v62 = vld [vmem:[%s16842_s11 + $0x168] sm:$0xf0] }
 0x4c1   : > { %v5739_v57 = vadd.f32 %v5738_v56, %v5725_v18  ;;  %v5701_v15 = vpop.f32.mrf.mxu0  ;;  %v5714_v40 = vpop.f32.mrf.mxu1  ;;  %16354 = vtanh.f32 %v5854_v38  ;;  %6682 = vmatpush.bf16.msra.mxu0 %v12927_v47  ;;  %v13187_v38 = vor.u32 %v15753_v14, %v13184_v1  ;;  %v13158_v18 = vld [vmem:[%s16842_s11 + $0x1c8] sm:$0xf]  ;;  %6708 = vmatpush.bf16.msra.mxu2 %v12931_v5  ;;  %v13099_v34 = vor.u32 %v15730_v2, %v13096_v62  ;;  %v13352_v8 = vld [vmem:[%s16842_s11 + $0x368] sm:$0xf0] }
 0x4c2   : > { %6719 = vmatpush.bf16.msra.mxu3 %v13251_v60  ;;  %v15750_v56 = vld [vmem:[%s16842_s11 + $0x1e4] sm:$0xf0]  ;;  %v15746_v40 = vld [vmem:[%s16842_s11 + $0x1cc] sm:$0xf] }
 0x4c3   : > { %v5849_v50 = vadd.f32 %v5739_v57, %v17414_v53  ;;  %v13215_v53 = vor.u32 %v15765_v36, %v13214_v48  ;;  %v13159_v57 = vor.u32 %v15750_v56, %v13158_v18  ;;  %v15814_v15 = vld [vmem:[%s16842_s11 + $0x3e4] sm:$0xf0]  ;;  %v13163_v46 = vor.u32 %v15746_v40, %v13160_v28  ;;  %v15738_v48 = vld [vmem:[%s16842_s11 + $0x18c] sm:$0xf] }
 0x4c4   : > { %v13415_v55 = vor.u32 %v15814_v15, %v13414_v20  ;;  %v13382_v60 = vld [vmem:[%s16842_s11 + $0x388] sm:$0xf]  ;;  %v13131_v35 = vor.u32 %v15738_v48, %v13128_v21  ;;  %v15786_v28 = vld [vmem:[%s16842_s11 + $0x30c] sm:$0xf] }
 0x4c5   : > { %v5863_v9 = vmul.f32 0.5, %v5849_v50  ;;  %6694 = vmatpush.bf16.msra.mxu1 %v13215_v53  ;;  %6727 = vmatpush.bf16.msrb.mxu0 %v13159_v57  ;;  %v13419_v50 = vor.u32 %v15810_v33, %v13416_v39  ;;  %v13383_v3 = vor.u32 %v15806_v37, %v13382_v60  ;;  %v13318_v5 = vld [vmem:[%s16842_s11 + $0x308] sm:$0xf]  ;;  %v13032_v37 = vld [vmem:[%s16842_s11 + $0xe8] sm:$0xf0] }
 0x4c6   : > { %v16353_v24 = vpop.eup %16352  ;;  %6720 = vmatpush.bf16.msra.mxu3 %v13219_v25  ;;  %6753 = vmatpush.bf16.msrb.mxu2 %v13163_v46  ;;  %v1559_v25 = vadd.f32 %v17572_v16, %v1530_v4  ;;  %v15794_v16 = vld [vmem:[%s16842_s11 + $0x34c] sm:$0xf]  ;;  %v15790_v20 = vld [vmem:[%s16842_s11 + $0x324] sm:$0xf0] }
 0x4c7   : > { %v5866_v30 = vmul.f32 0.5, %v16353_v24  ;;  %v16355_v13 = vpop.eup %16354  ;;  %16356 = vtanh.f32 %v5863_v9  ;;  %v13350_v24 = vld [vmem:[%s16842_s11 + $0x348] sm:$0xf]  ;;  %v13355_v14 = vor.u32 %v15794_v16, %v13352_v8  ;;  %v13319_v15 = vor.u32 %v15790_v20, %v13318_v5  ;;  %v15770_v62 = vld [vmem:[%s16842_s11 + $0x28c] sm:$0xf] }
 0x4c8   : > { %v5727_v54 = vpop.f32.mrf.mxu2  ;;  %v5740_v42 = vpop.f32.mrf.mxu3  ;;  %v5858_v6 = vmul.f32 0.5, %v16355_v13  ;;  %16358 = vtanh.f32 %v5855_v41  ;;  %v15718_v4 = vld [vmem:[%s16842_s11 + $0xe4] sm:$0xf0]  ;;  %v1588_v5 = vadd.f32 %v17690_v7, %v17659_v52 }
 0x4c9   : > { %6695 = vmatpush.bf16.msra.mxu1 %v13183_v29  ;;  %v5868_v36 = vadd.f32 0.5, %v5866_v30  ;;  %6728 = vmatpush.bf16.msrb.mxu0 %v13127_v43  ;;  %v13095_v54 = vor.u32 %v15734_v51, %v13094_v27  ;;  %v15798_v42 = vld [vmem:[%s16842_s11 + $0x364] sm:$0xf0]  ;;  %v13031_v23 = vor.u32 %v15718_v4, %v13030_v58  ;;  %v15714_v43 = vld [vmem:[%s16842_s11 + $0xcc] sm:$0xf]  ;;  %v19947_v58 = vld [vmem:[#allocation49_spill] sm:$0xff] }
 0x4ca   : > { %v5751_v59 = vpop.f32.mrf.mxu0  ;;  %v5764_v10 = vpop.f32.mrf.mxu1  ;;  %6721 = vmatpush.bf16.msra.mxu3 %v13187_v38  ;;  %6754 = vmatpush.bf16.msrb.mxu2 %v13131_v35  ;;  %v13351_v47 = vor.u32 %v15798_v42, %v13350_v24  ;;  %v5860_v29 = vadd.f32 0.5, %v5858_v6  ;;  %v13286_v6 = vld [vmem:[%s16842_s11 + $0x2c8] sm:$0xf]  ;;  %v13035_v21 = vor.u32 %v15714_v43, %v13032_v37  ;;  %v1617_v7 = vadd.f32 %v19947_v58, %v1588_v5  ;;  %v13134_v5 = vld [vmem:[%s16842_s11 + $0x190] sm:$0xf] }
 0x4cb   : > { %v5765_v26 = vadd.f32 %v5764_v10, %v5751_v59  ;;  %v13062_v59 = vld [vmem:[%s16842_s11 + $0x108] sm:$0xf]  ;;  %v5880_v18 = vmul.f32 %v5868_v36, %v18439_v45  ;;  %v15778_v36 = vld [vmem:[%s16842_s11 + $0x2cc] sm:$0xf] }
 0x4cc   : > { %v15726_v10 = vld [vmem:[%s16842_s11 + $0x124] sm:$0xf0] }
 0x4cd   : > { %v5850_v44 = vadd.f32 %v5765_v26, %v1501_v11  ;;  %6740 = vmatpush.bf16.msrb.mxu1 %v13415_v55  ;;  %v16357_v53 = vpop.eup %16356  ;;  %6729 = vmatpush.bf16.msrb.mxu0 %v13095_v54  ;;  %v13063_v56 = vor.u32 %v15726_v10, %v13062_v59  ;;  %v15722_v11 = vld [vmem:[%s16842_s11 + $0x10c] sm:$0xf]  ;;  %v15782_v60 = vld [vmem:[%s16842_s11 + $0x2e4] sm:$0xf0] }
 0x4ce   : > { %6766 = vmatpush.bf16.msrb.mxu3 %v13419_v50  ;;  %v5867_v12 = vmul.f32 0.5, %v16357_v53  ;;  %v16359_v1 = vpop.eup %16358  ;;  %v13064_v26 = vld [vmem:[%s16842_s11 + $0x128] sm:$0xf0]  ;;  %6755 = vmatpush.bf16.msrb.mxu2 %v13099_v34  ;;  %v13287_v48 = vor.u32 %v15782_v60, %v13286_v6  ;;  %v12998_v53 = vld [vmem:[%s16842_s11 + $0x88] sm:$0xf] }
 0x4cf   : > { %16360 = vtanh.f32 %v5850_v44  ;;  %v13067_v40 = vor.u32 %v15722_v11, %v13064_v26  ;;  %v13320_v55 = vld [vmem:[%s16842_s11 + $0x328] sm:$0xf0]  ;;  %v5859_v45 = vmul.f32 0.5, %v16359_v1  ;;  %v13254_v27 = vld [vmem:[%s16842_s11 + $0x288] sm:$0xf] }
 0x4d0   : > { %v5869_v46 = vadd.f32 0.5, %v5867_v12  ;;  %v13323_v33 = vor.u32 %v15786_v28, %v13320_v55  ;;  %v13000_v54 = vld [vmem:[%s16842_s11 + $0xa8] sm:$0xf0]  ;;  %v13222_v34 = vld [vmem:[%s16842_s11 + $0x248] sm:$0xf] }
 0x4d1   : > { %6741 = vmatpush.bf16.msrb.mxu1 %v13383_v3  ;;  %6730 = vmatpush.bf16.msrb.mxu0 %v13063_v56  ;;  %v13288_v3 = vld [vmem:[%s16842_s11 + $0x2e8] sm:$0xf0]  ;;  %v5861_v35 = vadd.f32 0.5, %v5859_v45  ;;  %v15766_v8 = vld [vmem:[%s16842_s11 + $0x264] sm:$0xf0] }
 0x4d2   : > { %v5753_v41 = vpop.f32.mrf.mxu0  ;;  %v5766_v30 = vpop.f32.mrf.mxu1  ;;  %6767 = vmatpush.bf16.msrb.mxu3 %v13387_v32  ;;  %6756 = vmatpush.bf16.msrb.mxu2 %v13067_v40  ;;  %v13291_v17 = vor.u32 %v15778_v36, %v13288_v3  ;;  %v15710_v32 = vld [vmem:[%s16842_s11 + $0xa4] sm:$0xf0]  ;;  %v5881_v51 = vmul.f32 %v5869_v46, %v18458_v63  ;;  %v12968_v12 = vld [vmem:[%s16842_s11 + $0x68] sm:$0xf0] }
 0x4d3   : > { %v5777_v9 = vpop.f32.mrf.mxu2  ;;  %v5790_v22 = vpop.f32.mrf.mxu3  ;;  %v12966_v30 = vld [vmem:[%s16842_s11 + $0x48] sm:$0xf]  ;;  %v13224_v59 = vld [vmem:[%s16842_s11 + $0x268] sm:$0xf0] }
 0x4d4   : > { %v5791_v31 = vadd.f32 %v5790_v22, %v5777_v9  ;;  %v15774_v9 = vld [vmem:[%s16842_s11 + $0x2a4] sm:$0xf0]  ;;  %v15706_v22 = vld [vmem:[%s16842_s11 + $0x8c] sm:$0xf] }
 0x4d5   : > { %v16361_v38 = vpop.eup %16360  ;;  %6742 = vmatpush.bf16.msrb.mxu1 %v13351_v47  ;;  %6731 = vmatpush.bf16.msrb.mxu0 %v13031_v23  ;;  %v13255_v42 = vor.u32 %v15774_v9, %v13254_v27  ;;  %v13003_v2 = vor.u32 %v15706_v22, %v13000_v54  ;;  %v15702_v47 = vld [vmem:[%s16842_s11 + $0x64] sm:$0xf0]  ;;  %v15690_v26 = vld [vmem:[%s16842_s11 + $0xc] sm:$0xf] }
 0x4d6   : > { %v5851_v13 = vadd.f32 %v5791_v31, %v1559_v25  ;;  %v5882_v57 = vmul.f32 %v16361_v38, %v5860_v29  ;;  %6768 = vmatpush.bf16.msrb.mxu3 %v13355_v14  ;;  %v12999_v25 = vor.u32 %v15710_v32, %v12998_v53  ;;  %6757 = vmatpush.bf16.msrb.mxu2 %v13035_v21  ;;  %v13256_v31 = vld [vmem:[%s16842_s11 + $0x2a8] sm:$0xf0]  ;;  %v12934_v38 = vld [vmem:[%s16842_s11 + $0x8] sm:$0xf] }
 0x4d7   : > { %v13259_v41 = vor.u32 %v15770_v62, %v13256_v31  ;;  %v12967_v16 = vor.u32 %v15702_v47, %v12966_v30  ;;  %v15698_v29 = vld [vmem:[%s16842_s11 + $0x4c] sm:$0xf]  ;;  %v13223_v14 = vor.u32 %v15766_v8, %v13222_v34  ;;  %v13190_v56 = vld [vmem:[%s16842_s11 + $0x208] sm:$0xf]  ;;  %v13166_v31 = vld [vmem:[%s16842_s11 + $0x1d0] sm:$0xf] }
 0x4d8   : > { %16362 = vtanh.f32 %v5851_v13  ;;  %v18741_v39 = vadd.f32 %v5882_v57, %v5880_v18  ;;  %v12971_v1 = vor.u32 %v15698_v29, %v12968_v12  ;;  %v15762_v13 = vld [vmem:[%s16842_s11 + $0x24c] sm:$0xf]  ;;  %v15694_v18 = vld [vmem:[%s16842_s11 + $0x24] sm:$0xf0]  ;;  %v13422_v30 = vld [vmem:[%s16842_s11 + $0x3d0] sm:$0xf] }
 0x4d9   : > { %6743 = vmatpush.bf16.msrb.mxu1 %v13319_v15  ;;  %6732 = vmatpush.bf16.msrb.mxu0 %v12999_v25  ;;  %v13227_v10 = vor.u32 %v15762_v13, %v13224_v59  ;;  %v12935_v20 = vor.u32 %v15694_v18, %v12934_v38  ;;  %v15758_v11 = vld [vmem:[%s16842_s11 + $0x224] sm:$0xf0]  ;;  %v12936_v57 = vld [vmem:[%s16842_s11 + $0x28] sm:$0xf0]  ;;  %v15815_v47 = vld [vmem:[%s16842_s11 + $0x3ec] sm:$0xf0] }
 0x4da   : > { %6769 = vmatpush.bf16.msrb.mxu3 %v13323_v33  ;;  %6758 = vmatpush.bf16.msrb.mxu2 %v13003_v2  ;;  %v13191_v15 = vor.u32 %v15758_v11, %v13190_v56  ;;  %v12939_v40 = vor.u32 %v15690_v26, %v12936_v57  ;;  %v15754_v28 = vld [vmem:[%s16842_s11 + $0x20c] sm:$0xf]  ;;  %v19949_v37 = vld [vmem:[#allocation51_spill] sm:$0xff]  ;;  %v15747_v34 = vld [vmem:[%s16842_s11 + $0x1d4] sm:$0xf] }
 0x4db   : > { %v5779_v44 = vpop.f32.mrf.mxu2  ;;  %v5792_v50 = vpop.f32.mrf.mxu3  ;;  %v13192_v55 = vld [vmem:[%s16842_s11 + $0x228] sm:$0xf0]  ;;  %v15811_v12 = vld [vmem:[%s16842_s11 + $0x3d4] sm:$0xf]  ;;  %v15743_v38 = vld [vmem:[%s16842_s11 + $0x1ac] sm:$0xf0] }
 0x4dc   : > { %v13195_v33 = vor.u32 %v15754_v28, %v13192_v55  ;;  %v19948_v44 = vld [vmem:[#allocation50_spill] sm:$0xff]  ;;  %v15807_v11 = vld [vmem:[%s16842_s11 + $0x3ac] sm:$0xf0]  ;;  %v15739_v26 = vld [vmem:[%s16842_s11 + $0x194] sm:$0xf]  ;;  %v13135_v28 = vor.u32 %v15743_v38, %v13134_v5 }
 0x4dd   : > { %6744 = vmatpush.bf16.msrb.mxu1 %v13287_v48  ;;  %6733 = vmatpush.bf16.msrb.mxu0 %v12967_v16  ;;  %v1646_v50 = vadd.f32 %v19948_v44, %v17673_v19  ;;  %v13168_v16 = vld [vmem:[%s16842_s11 + $0x1f0] sm:$0xf0] }
 0x4de   : > { %v16363_v0 = vpop.eup %16362  ;;  %6770 = vmatpush.bf16.msrb.mxu3 %v13291_v17  ;;  %6759 = vmatpush.bf16.msrb.mxu2 %v12971_v1  ;;  %v13171_v18 = vor.u32 %v15747_v34, %v13168_v16  ;;  %v13136_v57 = vld [vmem:[%s16842_s11 + $0x1b0] sm:$0xf0]  ;;  %v13006_v34 = vld [vmem:[%s16842_s11 + $0x90] sm:$0xf] }
 0x4df   : > { %v5883_v24 = vmul.f32 %v16363_v0, %v5861_v35  ;;  %v1675_v48 = vadd.f32 %v19949_v37, %v1646_v50  ;;  %v13104_v44 = vld [vmem:[%s16842_s11 + $0x170] sm:$0xf0]  ;;  %v13070_v37 = vld [vmem:[%s16842_s11 + $0x110] sm:$0xf] }
 0x4e0   : > { %v15795_v50 = vld [vmem:[%s16842_s11 + $0x354] sm:$0xf]  ;;  %v15711_v16 = vld [vmem:[%s16842_s11 + $0xac] sm:$0xf0] }
 0x4e1   : > { %v18760_v63 = vadd.f32 %v5883_v24, %v5881_v51  ;;  %6745 = vmatpush.bf16.msrb.mxu1 %v13255_v42  ;;  %6734 = vmatpush.bf16.msrb.mxu0 %v12935_v20  ;;  %v13390_v20 = vld [vmem:[%s16842_s11 + $0x390] sm:$0xf]  ;;  %v15771_v5 = vld [vmem:[%s16842_s11 + $0x294] sm:$0xf] }
 0x4e2   : > { %6771 = vmatpush.bf16.msrb.mxu3 %v13259_v41  ;;  %6760 = vmatpush.bf16.msrb.mxu2 %v12939_v40  ;;  %v15751_v41 = vld [vmem:[%s16842_s11 + $0x1ec] sm:$0xf0]  ;;  %v13392_v40 = vld [vmem:[%s16842_s11 + $0x3b0] sm:$0xf0]  ;;  %v13391_v55 = vor.u32 %v15807_v11, %v13390_v20 }
 0x4e3   : > { %v13167_v59 = vor.u32 %v15751_v41, %v13166_v31  ;;  %v15779_v31 = vld [vmem:[%s16842_s11 + $0x2d4] sm:$0xf]  ;;  %v12974_v20 = vld [vmem:[%s16842_s11 + $0x50] sm:$0xf] }
 0x4e4   : > { %v13296_v41 = vld [vmem:[%s16842_s11 + $0x2f0] sm:$0xf0]  ;;  %v15703_v11 = vld [vmem:[%s16842_s11 + $0x6c] sm:$0xf0] }
 0x4e5   : > { %6746 = vmatpush.bf16.msrb.mxu1 %v13223_v14  ;;  %v13424_v14 = vld [vmem:[%s16842_s11 + $0x3f0] sm:$0xf0] }
 0x4e6   : > { %6772 = vmatpush.bf16.msrb.mxu3 %v13227_v10  ;;  %v13423_v10 = vor.u32 %v15815_v47, %v13422_v30  ;;  %v13427_v56 = vor.u32 %v15811_v12, %v13424_v14  ;;  %v13262_v12 = vld [vmem:[%s16842_s11 + $0x290] sm:$0xf]  ;;  %v13264_v38 = vld [vmem:[%s16842_s11 + $0x2b0] sm:$0xf0] }
 0x4e7   : > { %v15775_v14 = vld [vmem:[%s16842_s11 + $0x2ac] sm:$0xf0] }
 0x4e9   : > { %6747 = vmatpush.bf16.msrb.mxu1 %v13191_v15  ;;  %v15803_v15 = vld [vmem:[%s16842_s11 + $0x394] sm:$0xf] }
 0x4ea   : > { %v5803_v45 = vpop.f32.mrf.mxu0  ;;  %v5816_v46 = vpop.f32.mrf.mxu1  ;;  %6773 = vmatpush.bf16.msrb.mxu3 %v13195_v33  ;;  %v13139_v33 = vor.u32 %v15739_v26, %v13136_v57  ;;  %v13395_v58 = vor.u32 %v15803_v15, %v13392_v40  ;;  %v13267_v57 = vor.u32 %v15771_v5, %v13264_v38  ;;  %v13230_v15 = vld [vmem:[%s16842_s11 + $0x250] sm:$0xf]  ;;  %v13366_v5 = vld [vmem:[%s16842_s11 + $0x358] sm:$0xf] }
 0x4eb   : > { %v5817_v4 = vadd.f32 %v5816_v46, %v5803_v45  ;;  %v13102_v45 = vld [vmem:[%s16842_s11 + $0x150] sm:$0xf]  ;;  %v15800_v38 = vld [vmem:[%s16842_s11 + $0x374] sm:$0xf0] }
 0x4ec   : > { %v15735_v46 = vld [vmem:[%s16842_s11 + $0x16c] sm:$0xf0] }
 0x4ed   : > { %v5852_v6 = vadd.f32 %v5817_v4, %v1617_v7  ;;  %v13358_v7 = vld [vmem:[%s16842_s11 + $0x350] sm:$0xf] }
 0x4ee   : > { %v15799_v4 = vld [vmem:[%s16842_s11 + $0x36c] sm:$0xf0] }
 0x4ef   : > { %v5872_v23 = vmul.f32 0.5, %v5852_v6  ;;  %v15731_v6 = vld [vmem:[%s16842_s11 + $0x154] sm:$0xf]  ;;  %v15767_v40 = vld [vmem:[%s16842_s11 + $0x26c] sm:$0xf0] }
 0x4f1   : > { %v5829_v60 = vpop.f32.mrf.mxu2  ;;  %v5842_v43 = vpop.f32.mrf.mxu3  ;;  %16364 = vtanh.f32 %v5872_v23  ;;  %v13360_v23 = vld [vmem:[%s16842_s11 + $0x370] sm:$0xf0] }
 0x4f2   : > { %v5843_v21 = vadd.f32 %v5842_v43, %v5829_v60  ;;  %v5805_v36 = vpop.f32.mrf.mxu0  ;;  %v5818_v3 = vpop.f32.mrf.mxu1  ;;  %v13103_v60 = vor.u32 %v15735_v46, %v13102_v45  ;;  %v13359_v43 = vor.u32 %v15799_v4, %v13358_v7  ;;  %v15763_v45 = vld [vmem:[%s16842_s11 + $0x254] sm:$0xf]  ;;  %v13231_v7 = vor.u32 %v15767_v40, %v13230_v15  ;;  %v15695_v4 = vld [vmem:[%s16842_s11 + $0x2c] sm:$0xf0]  ;;  %v13078_v15 = vld [vmem:[%s16842_s11 + $0x118] sm:$0xf] }
 0x4f3   : > { %v13363_v36 = vor.u32 %v15795_v50, %v13360_v23  ;;  %v13326_v3 = vld [vmem:[%s16842_s11 + $0x310] sm:$0xf]  ;;  %v13232_v46 = vld [vmem:[%s16842_s11 + $0x270] sm:$0xf0]  ;;  %v15728_v40 = vld [vmem:[%s16842_s11 + $0x134] sm:$0xf0] }
 0x4f4   : > { %v5853_v35 = vadd.f32 %v5843_v21, %v1675_v48  ;;  %v15727_v48 = vld [vmem:[%s16842_s11 + $0x12c] sm:$0xf0]  ;;  %v13107_v21 = vor.u32 %v15731_v6, %v13104_v44  ;;  %v13235_v23 = vor.u32 %v15763_v45, %v13232_v46  ;;  %v13334_v45 = vld [vmem:[%s16842_s11 + $0x318] sm:$0xf] }
 0x4f5   : > { %v13198_v6 = vld [vmem:[%s16842_s11 + $0x210] sm:$0xf]  ;;  %v15792_v46 = vld [vmem:[%s16842_s11 + $0x334] sm:$0xf0] }
 0x4f6   : > { %v5873_v17 = vmul.f32 0.5, %v5853_v35  ;;  %v15791_v35 = vld [vmem:[%s16842_s11 + $0x32c] sm:$0xf0] }
 0x4f7   : > { %v16365_v0 = vpop.eup %16364  ;;  %v15759_v44 = vld [vmem:[%s16842_s11 + $0x22c] sm:$0xf0] }
 0x4f8   : > { %16366 = vtanh.f32 %v5873_v17  ;;  %v5876_v27 = vmul.f32 0.5, %v16365_v0  ;;  %v15723_v17 = vld [vmem:[%s16842_s11 + $0x114] sm:$0xf] }
 0x4f9   : > { %v5831_v53 = vpop.f32.mrf.mxu2  ;;  %v5844_v32 = vpop.f32.mrf.mxu3  ;;  %16368 = vtanh.f32 %v18741_v39  ;;  %v13072_v0 = vld [vmem:[%s16842_s11 + $0x130] sm:$0xf0] }
 0x4fa   : > { %16370 = vtanh.f32 %v18760_v63  ;;  %v5878_v24 = vadd.f32 0.5, %v5876_v27  ;;  %v15787_v53 = vld [vmem:[%s16842_s11 + $0x314] sm:$0xf]  ;;  %v13071_v27 = vor.u32 %v15727_v48, %v13070_v37 }
 0x4fb   : > { %v13328_v32 = vld [vmem:[%s16842_s11 + $0x330] sm:$0xf0] }
 0x4fc   : > { %v15755_v37 = vld [vmem:[%s16842_s11 + $0x214] sm:$0xf] }
 0x4fd   : > { %v13200_v48 = vld [vmem:[%s16842_s11 + $0x230] sm:$0xf0] }
 0x4fe   : > { %v16367_v51 = vpop.eup %16366 }
 0x4ff   : > { %v5877_v25 = vmul.f32 0.5, %v16367_v51  ;;  %v16369_v9 = vpop.eup %16368  ;;  %v13327_v51 = vor.u32 %v15791_v35, %v13326_v3  ;;  %v13430_v3 = vld [vmem:[%s16842_s11 + $0x3d8] sm:$0xf] }
 0x500   : > { %v16371_v54 = vpop.eup %16370  ;;  %v5888_v42 = vmul.f32 %v16369_v9, %v5878_v24  ;;  %v13038_v24 = vld [vmem:[%s16842_s11 + $0xd0] sm:$0xf]  ;;  %v13075_v9 = vor.u32 %v15723_v17, %v13072_v0  ;;  %v15816_v35 = vld [vmem:[%s16842_s11 + $0x3f4] sm:$0xf0]  ;;  %v15748_v17 = vld [vmem:[%s16842_s11 + $0x1dc] sm:$0xf] }
 0x501   : > { %v5879_v22 = vadd.f32 0.5, %v5877_v25  ;;  %v15719_v25 = vld [vmem:[%s16842_s11 + $0xec] sm:$0xf0] }
 0x502   : > { %v13039_v30 = vor.u32 %v15719_v25, %v13038_v24  ;;  %v13203_v25 = vor.u32 %v15755_v37, %v13200_v48  ;;  %v13302_v37 = vld [vmem:[%s16842_s11 + $0x2d8] sm:$0xf] }
 0x503   : > { %v5889_v2 = vmul.f32 %v16371_v54, %v5879_v22  ;;  %v13331_v22 = vor.u32 %v15787_v53, %v13328_v32  ;;  %v13294_v54 = vld [vmem:[%s16842_s11 + $0x2d0] sm:$0xf]  ;;  %v13199_v53 = vor.u32 %v15759_v44, %v13198_v6  ;;  %v13176_v32 = vld [vmem:[%s16842_s11 + $0x1f8] sm:$0xf0]  ;;  %v13079_v6 = vor.u32 %v15728_v40, %v13078_v15  ;;  %v15784_v48 = vld [vmem:[%s16842_s11 + $0x2f4] sm:$0xf0] }
 0x504   : > { %v13335_v44 = vor.u32 %v15792_v46, %v13334_v45  ;;  %v15756_v15 = vld [vmem:[%s16842_s11 + $0x21c] sm:$0xf] }
 0x505   : > { %v5890_v62 = vpack.c.bf16 %v5889_v2, %v5888_v42  ;;  %v15783_v42 = vld [vmem:[%s16842_s11 + $0x2ec] sm:$0xf0]  ;;  %v15715_v2 = vld [vmem:[%s16842_s11 + $0xd4] sm:$0xf]  ;;  %v13208_v40 = vld [vmem:[%s16842_s11 + $0x238] sm:$0xf0] }
 0x506   : > { %v13295_v47 = vor.u32 %v15783_v42, %v13294_v54  ;;  %v13142_v54 = vld [vmem:[%s16842_s11 + $0x198] sm:$0xf]  ;;  %v13211_v46 = vor.u32 %v15756_v15, %v13208_v40  ;;  %v15849_v15 = vld [vmem:[%s16842_s11 + $0x104] sm:$0xf] }
 0x507   : > { %5891 = vst [vmem:[#allocation3 + $0x18] sm:$0xff] %v5890_v62  ;;  %v6029_v8 = vunpack.c.l.b16 %v5890_v62  ;;  %v6030_v29 = vunpack.c.h.b16 %v5890_v62  ;;  %v13040_v62 = vld [vmem:[%s16842_s11 + $0xf0] sm:$0xf0]  ;;  %v15744_v42 = vld [vmem:[%s16842_s11 + $0x1b4] sm:$0xf0] }
 0x509   : > { %v18794_v1 = vpack.c.b16 %v6029_v8, %v6029_v8  ;;  %v18796_v13 = vpack.c.b16 %v6030_v29, %v6030_v29  ;;  %v13043_v8 = vor.u32 %v15715_v2, %v13040_v62  ;;  %v13299_v29 = vor.u32 %v15779_v31, %v13296_v41  ;;  %v13398_v31 = vld [vmem:[%s16842_s11 + $0x398] sm:$0xf] }
 0x50a   : > { %v13179_v2 = vor.u32 %v15748_v17, %v13176_v32  ;;  %v15808_v41 = vld [vmem:[%s16842_s11 + $0x3b4] sm:$0xf0] }
 0x50b   : > { %6683 = vmatmul.bf16.vlgmr.msra.gmra.mxu0 %v18794_v1  ;;  %6696 = vmatmul.bf16.vlgmr.msra.gmra.mxu1 %v18796_v13  ;;  %v15712_v32 = vld [vmem:[%s16842_s11 + $0xb4] sm:$0xf0] }
 0x50c   : > { %6709 = vmatmul.bf16.vlgmr.msra.gmra.mxu2 %v18794_v1  ;;  %6722 = vmatmul.bf16.vlgmr.msra.gmra.mxu3 %v18796_v13 }
 0x50d   : > { %6779 = vmatpush.bf16.msra.mxu0 %v13167_v59  ;;  %6792 = vmatpush.bf16.msra.mxu1 %v13423_v10  ;;  %v15707_v59 = vld [vmem:[%s16842_s11 + $0x94] sm:$0xf] }
 0x50e   : > { %6805 = vmatpush.bf16.msra.mxu2 %v13171_v18  ;;  %6818 = vmatpush.bf16.msra.mxu3 %v13427_v56  ;;  %v13008_v10 = vld [vmem:[%s16842_s11 + $0xb0] sm:$0xf0]  ;;  %v13007_v18 = vor.u32 %v15711_v16, %v13006_v34  ;;  %v13263_v56 = vor.u32 %v15775_v14, %v13262_v12  ;;  %v15804_v34 = vld [vmem:[%s16842_s11 + $0x39c] sm:$0xf]  ;;  %v13110_v12 = vld [vmem:[%s16842_s11 + $0x158] sm:$0xf] }
 0x50f   : > { %v13011_v26 = vor.u32 %v15707_v59, %v13008_v10  ;;  %v13400_v16 = vld [vmem:[%s16842_s11 + $0x3b8] sm:$0xf0]  ;;  %v15736_v14 = vld [vmem:[%s16842_s11 + $0x174] sm:$0xf0] }
 0x510   : > { %v13403_v10 = vor.u32 %v15804_v34, %v13400_v16  ;;  %v13238_v34 = vld [vmem:[%s16842_s11 + $0x258] sm:$0xf] }
 0x511   : > { %6780 = vmatpush.bf16.msra.mxu0 %v13135_v28  ;;  %6793 = vmatpush.bf16.msra.mxu1 %v13391_v55  ;;  %v15699_v28 = vld [vmem:[%s16842_s11 + $0x54] sm:$0xf]  ;;  %v15768_v16 = vld [vmem:[%s16842_s11 + $0x274] sm:$0xf0] }
 0x512   : > { %6806 = vmatpush.bf16.msra.mxu2 %v13139_v33  ;;  %6819 = vmatpush.bf16.msra.mxu3 %v13395_v58  ;;  %v12976_v55 = vld [vmem:[%s16842_s11 + $0x70] sm:$0xf0]  ;;  %v12942_v33 = vld [vmem:[%s16842_s11 + $0x10] sm:$0xf]  ;;  %v12975_v58 = vor.u32 %v15703_v11, %v12974_v20  ;;  %v15796_v20 = vld [vmem:[%s16842_s11 + $0x35c] sm:$0xf] }
 0x513   : > { %v12979_v50 = vor.u32 %v15699_v28, %v12976_v55  ;;  %v12943_v0 = vor.u32 %v15695_v4, %v12942_v33  ;;  %v13368_v11 = vld [vmem:[%s16842_s11 + $0x378] sm:$0xf0] }
 0x514   : > { %v13371_v55 = vor.u32 %v15796_v20, %v13368_v11  ;;  %v15724_v33 = vld [vmem:[%s16842_s11 + $0x11c] sm:$0xf]  ;;  %v13206_v20 = vld [vmem:[%s16842_s11 + $0x218] sm:$0xf] }
 0x515   : > { %6781 = vmatpush.bf16.msra.mxu0 %v13103_v60  ;;  %6794 = vmatpush.bf16.msra.mxu1 %v13359_v43  ;;  %v15691_v60 = vld [vmem:[%s16842_s11 + $0x14] sm:$0xf]  ;;  %v13336_v4 = vld [vmem:[%s16842_s11 + $0x338] sm:$0xf0]  ;;  %v15760_v11 = vld [vmem:[%s16842_s11 + $0x234] sm:$0xf0] }
 0x516   : > { %6807 = vmatpush.bf16.msra.mxu2 %v13107_v21  ;;  %6820 = vmatpush.bf16.msra.mxu3 %v13363_v36  ;;  %v12944_v43 = vld [vmem:[%s16842_s11 + $0x30] sm:$0xf0]  ;;  %v13174_v21 = vld [vmem:[%s16842_s11 + $0x1d8] sm:$0xf] }
 0x517   : > { %v15752_v36 = vld [vmem:[%s16842_s11 + $0x1f4] sm:$0xf0]  ;;  %v12947_v24 = vor.u32 %v15691_v60, %v12944_v43 }
 0x519   : > { %6782 = vmatpush.bf16.msra.mxu0 %v13071_v27  ;;  %6795 = vmatpush.bf16.msra.mxu1 %v13327_v51  ;;  %v15812_v27 = vld [vmem:[%s16842_s11 + $0x3dc] sm:$0xf] }
 0x51a   : > { %6808 = vmatpush.bf16.msra.mxu2 %v13075_v9  ;;  %6821 = vmatpush.bf16.msra.mxu3 %v13331_v22  ;;  %v13432_v51 = vld [vmem:[%s16842_s11 + $0x3f8] sm:$0xf0]  ;;  %v13175_v9 = vor.u32 %v15752_v36, %v13174_v21  ;;  %v13431_v22 = vor.u32 %v15816_v35, %v13430_v3 }
 0x51b   : > { %6735 = vmatmul.bf16.vlgmr.msrb.gmra.mxu0 %v18794_v1  ;;  %6748 = vmatmul.bf16.vlgmr.msrb.gmra.mxu1 %v18796_v13  ;;  %v13435_v62 = vor.u32 %v15812_v27, %v13432_v51  ;;  %v15716_v21 = vld [vmem:[%s16842_s11 + $0xdc] sm:$0xf] }
 0x51c   : > { %6761 = vmatmul.bf16.vlgmr.msrb.gmra.mxu2 %v18794_v1  ;;  %6774 = vmatmul.bf16.vlgmr.msrb.gmra.mxu3 %v18796_v13  ;;  %v13048_v36 = vld [vmem:[%s16842_s11 + $0xf8] sm:$0xf0] }
 0x51d   : > { %6783 = vmatpush.bf16.msra.mxu0 %v13039_v30  ;;  %6796 = vmatpush.bf16.msra.mxu1 %v13295_v47  ;;  %v15740_v30 = vld [vmem:[%s16842_s11 + $0x19c] sm:$0xf]  ;;  %v13051_v27 = vor.u32 %v15716_v21, %v13048_v36 }
 0x51e   : > { %6809 = vmatpush.bf16.msra.mxu2 %v13043_v8  ;;  %6822 = vmatpush.bf16.msra.mxu3 %v13299_v29  ;;  %v13144_v47 = vld [vmem:[%s16842_s11 + $0x1b8] sm:$0xf0]  ;;  %v13143_v8 = vor.u32 %v15744_v42, %v13142_v54  ;;  %v13399_v29 = vor.u32 %v15808_v41, %v13398_v31  ;;  %v12982_v31 = vld [vmem:[%s16842_s11 + $0x58] sm:$0xf] }
 0x51f   : > { %v13147_v59 = vor.u32 %v15740_v30, %v13144_v47  ;;  %v15780_v3 = vld [vmem:[%s16842_s11 + $0x2dc] sm:$0xf]  ;;  %v15704_v41 = vld [vmem:[%s16842_s11 + $0x74] sm:$0xf0] }
 0x520   : > { %v13304_v35 = vld [vmem:[%s16842_s11 + $0x2f8] sm:$0xf0] }
 0x521   : > { %6784 = vmatpush.bf16.msra.mxu0 %v13007_v18  ;;  %6797 = vmatpush.bf16.msra.mxu1 %v13263_v56  ;;  %v15732_v18 = vld [vmem:[%s16842_s11 + $0x15c] sm:$0xf]  ;;  %v13307_v51 = vor.u32 %v15780_v3, %v13304_v35  ;;  %v13630_v3 = vld [vmem:[%s16842_s11 + $0x180] sm:$0xf] }
 0x522   : > { %6810 = vmatpush.bf16.msra.mxu2 %v13011_v26  ;;  %6823 = vmatpush.bf16.msra.mxu3 %v13267_v57  ;;  %v13112_v56 = vld [vmem:[%s16842_s11 + $0x178] sm:$0xf0]  ;;  %v13111_v26 = vor.u32 %v15736_v14, %v13110_v12  ;;  %v13367_v57 = vor.u32 %v15800_v38, %v13366_v5  ;;  %v12950_v5 = vld [vmem:[%s16842_s11 + $0x18] sm:$0xf]  ;;  %v15869_v35 = vld [vmem:[%s16842_s11 + $0x19c] sm:$0xf0] }
 0x523   : > { %v13115_v28 = vor.u32 %v15732_v18, %v13112_v56  ;;  %v15772_v54 = vld [vmem:[%s16842_s11 + $0x29c] sm:$0xf]  ;;  %v15696_v38 = vld [vmem:[%s16842_s11 + $0x34] sm:$0xf0] }
 0x524   : > { %v13272_v42 = vld [vmem:[%s16842_s11 + $0x2b8] sm:$0xf0] }
 0x525   : > { %6785 = vmatpush.bf16.msra.mxu0 %v12975_v58  ;;  %6798 = vmatpush.bf16.msra.mxu1 %v13231_v7  ;;  %v13080_v58 = vld [vmem:[%s16842_s11 + $0x138] sm:$0xf0]  ;;  %v13275_v47 = vor.u32 %v15772_v54, %v13272_v42  ;;  %v13888_v54 = vld [vmem:[%s16842_s11 + $0x3a0] sm:$0xf0] }
 0x526   : > { %6811 = vmatpush.bf16.msra.mxu2 %v12979_v50  ;;  %6824 = vmatpush.bf16.msra.mxu3 %v13235_v23  ;;  %v15788_v7 = vld [vmem:[%s16842_s11 + $0x31c] sm:$0xf]  ;;  %v13046_v50 = vld [vmem:[%s16842_s11 + $0xd8] sm:$0xf]  ;;  %v13083_v60 = vor.u32 %v15724_v33, %v13080_v58 }
 0x527   : > { %v15720_v23 = vld [vmem:[%s16842_s11 + $0xf4] sm:$0xf0]  ;;  %v13339_v43 = vor.u32 %v15788_v7, %v13336_v4  ;;  %v15764_v12 = vld [vmem:[%s16842_s11 + $0x25c] sm:$0xf]  ;;  %v13662_v7 = vld [vmem:[%s16842_s11 + $0x1c0] sm:$0xf] }
 0x528   : > { %v13047_v17 = vor.u32 %v15720_v23, %v13046_v50  ;;  %v13240_v14 = vld [vmem:[%s16842_s11 + $0x278] sm:$0xf0]  ;;  %v15877_v4 = vld [vmem:[%s16842_s11 + $0x1dc] sm:$0xf0]  ;;  %v15873_v23 = vld [vmem:[%s16842_s11 + $0x1c4] sm:$0xf] }
 0x529   : > { %6786 = vmatpush.bf16.msra.mxu0 %v12943_v0  ;;  %6799 = vmatpush.bf16.msra.mxu1 %v13199_v53  ;;  %v13303_v0 = vor.u32 %v15784_v48, %v13302_v37  ;;  %v13014_v53 = vld [vmem:[%s16842_s11 + $0x98] sm:$0xf]  ;;  %v13243_v56 = vor.u32 %v15764_v12, %v13240_v14  ;;  %v15941_v50 = vld [vmem:[%s16842_s11 + $0x3dc] sm:$0xf0]  ;;  %v15937_v48 = vld [vmem:[%s16842_s11 + $0x3c4] sm:$0xf] }
 0x52a   : > { %6812 = vmatpush.bf16.msra.mxu2 %v12947_v24  ;;  %6825 = vmatpush.bf16.msra.mxu3 %v13203_v25  ;;  %v13270_v24 = vld [vmem:[%s16842_s11 + $0x298] sm:$0xf] }
 0x52b   : > { %v15776_v25 = vld [vmem:[%s16842_s11 + $0x2b4] sm:$0xf0] }
 0x52c   : > { %6787 = vmatmul.bf16.vlgmr.msra.gmra.mxu0 %v18794_v1  ;;  %6800 = vmatmul.bf16.vlgmr.msra.gmra.mxu1 %v18796_v13 }
 0x52d   : > { %6831 = vmatpush.bf16.msrb.mxu0 %v13175_v9  ;;  %6844 = vmatpush.bf16.msrb.mxu1 %v13431_v22  ;;  %v15708_v9 = vld [vmem:[%s16842_s11 + $0x9c] sm:$0xf] }
 0x52e   : > { %6857 = vmatpush.bf16.msrb.mxu2 %v13179_v2  ;;  %6870 = vmatpush.bf16.msrb.mxu3 %v13435_v62  ;;  %v13016_v22 = vld [vmem:[%s16842_s11 + $0xb8] sm:$0xf0]  ;;  %v13015_v2 = vor.u32 %v15712_v32, %v13014_v53  ;;  %v13271_v62 = vor.u32 %v15776_v25, %v13270_v24  ;;  %v13631_v32 = vor.u32 %v15869_v35, %v13630_v3  ;;  %v13632_v24 = vld [vmem:[%s16842_s11 + $0x1a0] sm:$0xf0] }
 0x52f   : > { %6813 = vmatmul.bf16.vlgmr.msra.gmra.mxu2 %v18794_v1  ;;  %6826 = vmatmul.bf16.vlgmr.msra.gmra.mxu3 %v18796_v13  ;;  %v13019_v30 = vor.u32 %v15708_v9, %v13016_v22  ;;  %v15929_v22 = vld [vmem:[%s16842_s11 + $0x384] sm:$0xf] }
 0x530   : > { %v13891_v42 = vor.u32 %v15929_v22, %v13888_v54 }
 0x531   : > { %6832 = vmatpush.bf16.msrb.mxu0 %v13143_v8  ;;  %6845 = vmatpush.bf16.msrb.mxu1 %v13399_v29  ;;  %v15700_v8 = vld [vmem:[%s16842_s11 + $0x5c] sm:$0xf] }
 0x532   : > { %6858 = vmatpush.bf16.msrb.mxu2 %v13147_v59  ;;  %6871 = vmatpush.bf16.msrb.mxu3 %v13403_v10  ;;  %v12984_v29 = vld [vmem:[%s16842_s11 + $0x78] sm:$0xf0]  ;;  %v12983_v59 = vor.u32 %v15704_v41, %v12982_v31  ;;  %v13239_v10 = vor.u32 %v15768_v16, %v13238_v34  ;;  %v13854_v31 = vld [vmem:[%s16842_s11 + $0x340] sm:$0xf]  ;;  %v13600_v16 = vld [vmem:[%s16842_s11 + $0x160] sm:$0xf0] }
 0x533   : > { %v12987_v18 = vor.u32 %v15700_v8, %v12984_v29  ;;  %v15921_v8 = vld [vmem:[%s16842_s11 + $0x344] sm:$0xf] }
 0x534   : > { %v13856_v29 = vld [vmem:[%s16842_s11 + $0x360] sm:$0xf0] }
 0x535   : > { %6833 = vmatpush.bf16.msrb.mxu0 %v13111_v26  ;;  %6846 = vmatpush.bf16.msrb.mxu1 %v13367_v57  ;;  %v15692_v26 = vld [vmem:[%s16842_s11 + $0x1c] sm:$0xf]  ;;  %v13859_v14 = vor.u32 %v15921_v8, %v13856_v29 }
 0x536   : > { %6859 = vmatpush.bf16.msrb.mxu2 %v13115_v28  ;;  %6872 = vmatpush.bf16.msrb.mxu3 %v13371_v55  ;;  %v12952_v57 = vld [vmem:[%s16842_s11 + $0x38] sm:$0xf0]  ;;  %v12951_v28 = vor.u32 %v15696_v38, %v12950_v5  ;;  %v13207_v55 = vor.u32 %v15760_v11, %v13206_v20  ;;  %v13566_v38 = vld [vmem:[%s16842_s11 + $0x100] sm:$0xf] }
 0x537   : > { %v12955_v45 = vor.u32 %v15692_v26, %v12952_v57  ;;  %v15917_v57 = vld [vmem:[%s16842_s11 + $0x31c] sm:$0xf0] }
 0x539   : > { %6834 = vmatpush.bf16.msrb.mxu0 %v13079_v6  ;;  %6847 = vmatpush.bf16.msrb.mxu1 %v13335_v44  ;;  %v13918_v6 = vld [vmem:[%s16842_s11 + $0x3c0] sm:$0xf]  ;;  %v13663_v44 = vor.u32 %v15877_v4, %v13662_v7  ;;  %v19950_v7 = vld [vmem:[#allocation17_spill] sm:$0xff] }
 0x53a   : > { %6860 = vmatpush.bf16.msrb.mxu2 %v13083_v60  ;;  %6873 = vmatpush.bf16.msrb.mxu3 %v13339_v43  ;;  %v13664_v60 = vld [vmem:[%s16842_s11 + $0x1e0] sm:$0xf0]  ;;  %v13919_v43 = vor.u32 %v15941_v50, %v13918_v6  ;;  %v13534_v50 = vld [vmem:[%s16842_s11 + $0xc0] sm:$0xf] }
 0x53b   : > { %v13667_v37 = vor.u32 %v15873_v23, %v13664_v60  ;;  %v19951_v6 = vld [vmem:[#allocation27_spill] sm:$0xff] }
 0x53c   : > { %v15845_v23 = vld [vmem:[%s16842_s11 + $0xdc] sm:$0xf0] }
 0x53d   : > { %6835 = vmatpush.bf16.msrb.mxu0 %v13047_v17  ;;  %6848 = vmatpush.bf16.msrb.mxu1 %v13303_v0  ;;  %v13886_v17 = vld [vmem:[%s16842_s11 + $0x380] sm:$0xf] }
 0x53e   : > { %6861 = vmatpush.bf16.msrb.mxu2 %v13051_v27  ;;  %6874 = vmatpush.bf16.msrb.mxu3 %v13307_v51  ;;  %v15933_v27 = vld [vmem:[%s16842_s11 + $0x39c] sm:$0xf0]  ;;  %v15865_v51 = vld [vmem:[%s16842_s11 + $0x184] sm:$0xf] }
 0x53f   : > { %v13887_v25 = vor.u32 %v15933_v27, %v13886_v17  ;;  %v13635_v9 = vor.u32 %v15865_v51, %v13632_v24  ;;  %v13790_v60 = vld [vmem:[%s16842_s11 + $0x2c0] sm:$0xf]  ;;  %v15905_v17 = vld [vmem:[%s16842_s11 + $0x2c4] sm:$0xf] }
 0x540   : > { %v13502_v24 = vld [vmem:[%s16842_s11 + $0x80] sm:$0xf] }
 0x541   : > { %6836 = vmatpush.bf16.msrb.mxu0 %v13015_v2  ;;  %6849 = vmatpush.bf16.msrb.mxu1 %v13271_v62  ;;  %v13598_v2 = vld [vmem:[%s16842_s11 + $0x140] sm:$0xf] }
 0x542   : > { %6862 = vmatpush.bf16.msrb.mxu2 %v13019_v30  ;;  %6875 = vmatpush.bf16.msrb.mxu3 %v13275_v47  ;;  %v15861_v62 = vld [vmem:[%s16842_s11 + $0x15c] sm:$0xf0]  ;;  %v15857_v47 = vld [vmem:[%s16842_s11 + $0x144] sm:$0xf] }
 0x543   : > { %v13599_v41 = vor.u32 %v15861_v62, %v13598_v2  ;;  %v15925_v30 = vld [vmem:[%s16842_s11 + $0x35c] sm:$0xf0]  ;;  %v13603_v12 = vor.u32 %v15857_v47, %v13600_v16  ;;  %v13504_v47 = vld [vmem:[%s16842_s11 + $0xa0] sm:$0xf0] }
 0x544   : > { %v13855_v34 = vor.u32 %v15925_v30, %v13854_v31  ;;  %v13758_v62 = vld [vmem:[%s16842_s11 + $0x280] sm:$0xf]  ;;  %v13760_v16 = vld [vmem:[%s16842_s11 + $0x2a0] sm:$0xf0] }
 0x545   : > { %6837 = vmatpush.bf16.msrb.mxu0 %v12983_v59  ;;  %6850 = vmatpush.bf16.msrb.mxu1 %v13239_v10  ;;  %v15901_v31 = vld [vmem:[%s16842_s11 + $0x29c] sm:$0xf0] }
 0x546   : > { %6863 = vmatpush.bf16.msrb.mxu2 %v12987_v18  ;;  %6876 = vmatpush.bf16.msrb.mxu3 %v13243_v56  ;;  %v15853_v18 = vld [vmem:[%s16842_s11 + $0x11c] sm:$0xf0]  ;;  %v13759_v30 = vor.u32 %v15901_v31, %v13758_v62  ;;  %v13638_v62 = vld [vmem:[%s16842_s11 + $0x188] sm:$0xf] }
 0x547   : > { %v13822_v56 = vld [vmem:[%s16842_s11 + $0x300] sm:$0xf]  ;;  %v13567_v26 = vor.u32 %v15853_v18, %v13566_v38  ;;  %v15825_v38 = vld [vmem:[%s16842_s11 + $0x44] sm:$0xf] }
 0x548   : > { %v13472_v18 = vld [vmem:[%s16842_s11 + $0x60] sm:$0xf0] }
 0x549   : > { %6838 = vmatpush.bf16.msrb.mxu0 %v12951_v28  ;;  %6851 = vmatpush.bf16.msrb.mxu1 %v13207_v55  ;;  %v13823_v28 = vor.u32 %v15917_v57, %v13822_v56  ;;  %v13568_v55 = vld [vmem:[%s16842_s11 + $0x120] sm:$0xf0]  ;;  %v19953_v56 = vld [vmem:[#allocation18_spill] sm:$0xff] }
 0x54a   : > { %6864 = vmatpush.bf16.msrb.mxu2 %v12955_v45  ;;  %6877 = vmatpush.bf16.msrb.mxu3 %v13211_v46  ;;  %v15913_v45 = vld [vmem:[%s16842_s11 + $0x304] sm:$0xf] }
 0x54b   : > { %v13824_v46 = vld [vmem:[%s16842_s11 + $0x320] sm:$0xf0] }
 0x54c   : > { %6839 = vmatmul.bf16.vlgmr.msrb.gmra.mxu0 %v18794_v1  ;;  %6852 = vmatmul.bf16.vlgmr.msrb.gmra.mxu1 %v18796_v13  ;;  %v15889_v57 = vld [vmem:[%s16842_s11 + $0x244] sm:$0xf] }
 0x54d   : > { %6865 = vmatmul.bf16.vlgmr.msrb.gmra.mxu2 %v18794_v1  ;;  %6878 = vmatmul.bf16.vlgmr.msrb.gmra.mxu3 %v18796_v13  ;;  %v13920_v1 = vld [vmem:[%s16842_s11 + $0x3e0] sm:$0xf0] }
 0x54e   : > { %7712 = vmatpush.bf16.msra.mxu0 %v13663_v44  ;;  %v13923_v13 = vor.u32 %v15937_v48, %v13920_v1  ;;  %7725 = vmatpush.bf16.msra.mxu1 %v13919_v43  ;;  %v13535_v43 = vor.u32 %v15845_v23, %v13534_v50  ;;  %v15841_v48 = vld [vmem:[%s16842_s11 + $0xc4] sm:$0xf]  ;;  %v15885_v50 = vld [vmem:[%s16842_s11 + $0x21c] sm:$0xf0] }
 0x54f   : > { %7738 = vmatpush.bf16.msra.mxu2 %v13667_v37  ;;  %v15909_v37 = vld [vmem:[%s16842_s11 + $0x2dc] sm:$0xf0]  ;;  %v13536_v1 = vld [vmem:[%s16842_s11 + $0xe0] sm:$0xf0] }
 0x550   : > { %7751 = vmatpush.bf16.msra.mxu3 %v13923_v13  ;;  %v13791_v3 = vor.u32 %v15909_v37, %v13790_v60  ;;  %v13539_v35 = vor.u32 %v15841_v48, %v13536_v1  ;;  %v15817_v23 = vld [vmem:[%s16842_s11 + $0x4] sm:$0xf] }
 0x551   : > { %v15881_v37 = vld [vmem:[%s16842_s11 + $0x204] sm:$0xf] }
 0x552   : > { %7713 = vmatpush.bf16.msra.mxu0 %v13631_v32  ;;  %7726 = vmatpush.bf16.msra.mxu1 %v13887_v25  ;;  %v15837_v25 = vld [vmem:[%s16842_s11 + $0x9c] sm:$0xf0]  ;;  %v13696_v48 = vld [vmem:[%s16842_s11 + $0x220] sm:$0xf0] }
 0x553   : > { %7739 = vmatpush.bf16.msra.mxu2 %v13635_v9  ;;  %v13503_v2 = vor.u32 %v15837_v25, %v13502_v24  ;;  %v15942_v24 = vld [vmem:[%s16842_s11 + $0x3e4] sm:$0xf0]  ;;  %v15874_v25 = vld [vmem:[%s16842_s11 + $0x1cc] sm:$0xf] }
 0x554   : > { %7752 = vmatpush.bf16.msra.mxu3 %v13891_v42 }
 0x556   : > { %7714 = vmatpush.bf16.msra.mxu0 %v13599_v41  ;;  %7727 = vmatpush.bf16.msra.mxu1 %v13855_v34  ;;  %v15833_v41 = vld [vmem:[%s16842_s11 + $0x84] sm:$0xf] }
 0x557   : > { %7740 = vmatpush.bf16.msra.mxu2 %v13603_v12  ;;  %v15897_v34 = vld [vmem:[%s16842_s11 + $0x284] sm:$0xf]  ;;  %v13507_v8 = vor.u32 %v15833_v41, %v13504_v47  ;;  %v13470_v12 = vld [vmem:[%s16842_s11 + $0x40] sm:$0xf]  ;;  %v19954_v41 = vld [vmem:[#allocation37_spill] sm:$0xff] }
 0x558   : > { %7753 = vmatpush.bf16.msra.mxu3 %v13859_v14  ;;  %v13763_v29 = vor.u32 %v15897_v34, %v13760_v16  ;;  %v15829_v14 = vld [vmem:[%s16842_s11 + $0x5c] sm:$0xf0]  ;;  %v15870_v34 = vld [vmem:[%s16842_s11 + $0x1a4] sm:$0xf0] }
 0x559   : > { %v13894_v16 = vld [vmem:[%s16842_s11 + $0x388] sm:$0xf] }
 0x55a   : > { %7715 = vmatpush.bf16.msra.mxu0 %v13567_v26  ;;  %7728 = vmatpush.bf16.msra.mxu1 %v13823_v28  ;;  %v13475_v26 = vor.u32 %v15825_v38, %v13472_v18 }
 0x55e   : > { %7716 = vmatpush.bf16.msra.mxu0 %v13535_v43  ;;  %7729 = vmatpush.bf16.msra.mxu1 %v13791_v3  ;;  %v13440_v43 = vld [vmem:[%s16842_s11 + $0x20] sm:$0xf0] }
 0x562   : > { %7717 = vmatpush.bf16.msra.mxu0 %v13503_v2  ;;  %7730 = vmatpush.bf16.msra.mxu1 %v13759_v30  ;;  %v13928_v2 = vld [vmem:[%s16842_s11 + $0x3e8] sm:$0xf0] }
 0x588   : > { %v6684_v33 = vpop.f32.mrf.mxu0  ;;  %v6697_v58 = vpop.f32.mrf.mxu1 }
 0x589   : > { %v6698_v59 = vadd.f32 %v6697_v58, %v6684_v33  ;;  %v13571_v33 = vor.u32 %v15849_v15, %v13568_v55  ;;  %v13827_v58 = vor.u32 %v15913_v45, %v13824_v46  ;;  %v13728_v15 = vld [vmem:[%s16842_s11 + $0x260] sm:$0xf0] }
 0x58a   : > { %v13731_v28 = vor.u32 %v15889_v57, %v13728_v15 }
 0x58b   : > { %v6883_v4 = vadd.f32 %v6698_v59, %v19950_v7  ;;  %7741 = vmatpush.bf16.msra.mxu2 %v13571_v33  ;;  %7754 = vmatpush.bf16.msra.mxu3 %v13827_v58  ;;  %v13726_v59 = vld [vmem:[%s16842_s11 + $0x240] sm:$0xf] }
 0x58c   : > { %v13438_v33 = vld [vmem:[%s16842_s11] sm:$0xf] }
 0x58d   : > { %v6891_v32 = vmul.f32 0.5, %v6883_v4  ;;  %v15821_v58 = vld [vmem:[%s16842_s11 + $0x1c] sm:$0xf0] }
 0x58e   : > { %v13694_v7 = vld [vmem:[%s16842_s11 + $0x200] sm:$0xf] }
 0x58f   : > { %v18942_v21 = vpop.f32.mrf.mxu2  ;;  %v18944_v36 = vpop.f32.mrf.mxu3  ;;  %7742 = vmatpush.bf16.msra.mxu2 %v13539_v35  ;;  %v13695_v60 = vor.u32 %v15885_v50, %v13694_v7  ;;  %v13443_v35 = vor.u32 %v15817_v23, %v13440_v43  ;;  %v19955_v43 = vld [vmem:[#allocation40_spill] sm:$0xff] }
 0x590   : > { %v6686_v0 = vpop.f32.mrf.mxu0  ;;  %v6699_v53 = vpop.f32.mrf.mxu1  ;;  %v6724_v9 = vadd.f32 %v18944_v36, %v18942_v21  ;;  %v19952_v21 = vld [vmem:[#allocation28_spill] sm:$0xff] }
 0x591   : > { %v13792_v0 = vld [vmem:[%s16842_s11 + $0x2e0] sm:$0xf0] }
 0x592   : > { %v13795_v53 = vor.u32 %v15905_v17, %v13792_v0  ;;  %v13699_v17 = vor.u32 %v15881_v37, %v13696_v48  ;;  %v13670_v0 = vld [vmem:[%s16842_s11 + $0x1c8] sm:$0xf] }
 0x593   : > { %7743 = vmatpush.bf16.msra.mxu2 %v13507_v8  ;;  %v15866_v8 = vld [vmem:[%s16842_s11 + $0x18c] sm:$0xf]  ;;  %v13574_v48 = vld [vmem:[%s16842_s11 + $0x108] sm:$0xf] }
 0x594   : > { %7755 = vmatpush.bf16.msra.mxu3 %v13795_v53  ;;  %v15878_v53 = vld [vmem:[%s16842_s11 + $0x1e4] sm:$0xf0] }
 0x597   : > { %v6712_v10 = vpop.f32.mrf.mxu2  ;;  %v6725_v5 = vpop.f32.mrf.mxu3  ;;  %7744 = vmatpush.bf16.msra.mxu2 %v13475_v26 }
 0x598   : > { %v6736_v20 = vpop.f32.mrf.mxu0  ;;  %v6749_v11 = vpop.f32.mrf.mxu1  ;;  %v13471_v10 = vor.u32 %v15829_v14, %v13470_v12  ;;  %v15893_v5 = vld [vmem:[%s16842_s11 + $0x25c] sm:$0xf0]  ;;  %7756 = vmatpush.bf16.msra.mxu3 %v13763_v29  ;;  %v13640_v29 = vld [vmem:[%s16842_s11 + $0x1a8] sm:$0xf0] }
 0x599   : > { %v6750_v40 = vadd.f32 %v6749_v11, %v6736_v20  ;;  %v6884_v20 = vadd.f32 %v6724_v9, %v19953_v56  ;;  %v13727_v11 = vor.u32 %v15893_v5, %v13726_v59  ;;  %v13672_v9 = vld [vmem:[%s16842_s11 + $0x1e8] sm:$0xf0]  ;;  %v13643_v59 = vor.u32 %v15866_v8, %v13640_v29  ;;  %v13606_v56 = vld [vmem:[%s16842_s11 + $0x148] sm:$0xf] }
 0x59a   : > { %7718 = vmatpush.bf16.msra.mxu0 %v13471_v10  ;;  %v15930_v10 = vld [vmem:[%s16842_s11 + $0x38c] sm:$0xf] }
 0x59b   : > { %v6885_v44 = vadd.f32 %v6750_v40, %v19951_v6  ;;  %7731 = vmatpush.bf16.msra.mxu1 %v13727_v11  ;;  %v6892_v4 = vmul.f32 0.5, %v6884_v20  ;;  %7745 = vmatpush.bf16.msra.mxu2 %v13443_v35  ;;  %v13896_v5 = vld [vmem:[%s16842_s11 + $0x3a8] sm:$0xf0]  ;;  %v15862_v20 = vld [vmem:[%s16842_s11 + $0x164] sm:$0xf0] }
 0x59c   : > { %7757 = vmatpush.bf16.msra.mxu3 %v13731_v28  ;;  %v13899_v18 = vor.u32 %v15930_v10, %v13896_v5  ;;  %v13862_v11 = vld [vmem:[%s16842_s11 + $0x348] sm:$0xf]  ;;  %v13607_v15 = vor.u32 %v15862_v20, %v13606_v56  ;;  %v15858_v28 = vld [vmem:[%s16842_s11 + $0x14c] sm:$0xf] }
 0x59d   : > { %v6899_v13 = vmul.f32 0.5, %v6885_v44  ;;  %v13439_v44 = vor.u32 %v15821_v58, %v13438_v33  ;;  %v15906_v29 = vld [vmem:[%s16842_s11 + $0x2cc] sm:$0xf]  ;;  %v13510_v5 = vld [vmem:[%s16842_s11 + $0x88] sm:$0xf] }
 0x59f   : > { %16372 = vtanh.f32 %v6899_v13  ;;  %v6762_v27 = vpop.f32.mrf.mxu2  ;;  %v6775_v51 = vpop.f32.mrf.mxu3  ;;  %7719 = vmatpush.bf16.msra.mxu0 %v13439_v44  ;;  %7732 = vmatpush.bf16.msra.mxu1 %v13695_v60 }
 0x5a0   : > { %v6776_v22 = vadd.f32 %v6775_v51, %v6762_v27  ;;  %v6738_v54 = vpop.f32.mrf.mxu0  ;;  %v6751_v42 = vpop.f32.mrf.mxu1  ;;  %16374 = vtanh.f32 %v6891_v32  ;;  %v13926_v32 = vld [vmem:[%s16842_s11 + $0x3c8] sm:$0xf]  ;;  %v13671_v51 = vor.u32 %v15878_v53, %v13670_v0  ;;  %7758 = vmatpush.bf16.msra.mxu3 %v13699_v17  ;;  %v15850_v53 = vld [vmem:[%s16842_s11 + $0x10c] sm:$0xf] }
 0x5a1   : > { %v13675_v54 = vor.u32 %v15874_v25, %v13672_v9  ;;  %v15938_v42 = vld [vmem:[%s16842_s11 + $0x3cc] sm:$0xf]  ;;  %v15918_v0 = vld [vmem:[%s16842_s11 + $0x324] sm:$0xf0] }
 0x5a2   : > { %v6886_v36 = vadd.f32 %v6776_v22, %v19952_v21  ;;  %v13927_v22 = vor.u32 %v15942_v24, %v13926_v32  ;;  %v13931_v47 = vor.u32 %v15938_v42, %v13928_v2  ;;  %v13639_v21 = vor.u32 %v15870_v34, %v13638_v62  ;;  %v13576_v32 = vld [vmem:[%s16842_s11 + $0x128] sm:$0xf0]  ;;  %v13542_v2 = vld [vmem:[%s16842_s11 + $0xc8] sm:$0xf] }
 0x5a3   : > { %7764 = vmatpush.bf16.msrb.mxu0 %v13671_v51  ;;  %7790 = vmatpush.bf16.msrb.mxu2 %v13675_v54  ;;  %v13579_v24 = vor.u32 %v15850_v53, %v13576_v32  ;;  %v15914_v25 = vld [vmem:[%s16842_s11 + $0x30c] sm:$0xf]  ;;  %v15846_v62 = vld [vmem:[%s16842_s11 + $0xe4] sm:$0xf0] }
 0x5a4   : > { %v6900_v55 = vmul.f32 0.5, %v6886_v36  ;;  %7777 = vmatpush.bf16.msrb.mxu1 %v13927_v22  ;;  %v15934_v36 = vld [vmem:[%s16842_s11 + $0x3a4] sm:$0xf0]  ;;  %7803 = vmatpush.bf16.msrb.mxu3 %v13931_v47  ;;  %v13832_v9 = vld [vmem:[%s16842_s11 + $0x328] sm:$0xf0]  ;;  %v13543_v47 = vor.u32 %v15846_v62, %v13542_v2 }
 0x5a5   : > { %v16373_v40 = vpop.eup %16372  ;;  %v13895_v14 = vor.u32 %v15934_v36, %v13894_v16  ;;  %v13835_v54 = vor.u32 %v15914_v25, %v13832_v9  ;;  %v15910_v34 = vld [vmem:[%s16842_s11 + $0x2e4] sm:$0xf0]  ;;  %v15842_v16 = vld [vmem:[%s16842_s11 + $0xcc] sm:$0xf] }
 0x5a6   : > { %v6903_v6 = vmul.f32 0.5, %v16373_v40  ;;  %v16375_v1 = vpop.eup %16374  ;;  %16376 = vtanh.f32 %v6900_v55  ;;  %v15926_v40 = vld [vmem:[%s16842_s11 + $0x364] sm:$0xf0]  ;;  %v13608_v55 = vld [vmem:[%s16842_s11 + $0x168] sm:$0xf0] }
 0x5a7   : > { %v6764_v45 = vpop.f32.mrf.mxu2  ;;  %v6777_v46 = vpop.f32.mrf.mxu3  ;;  %v6895_v31 = vmul.f32 0.5, %v16375_v1  ;;  %16378 = vtanh.f32 %v6892_v4  ;;  %7765 = vmatpush.bf16.msrb.mxu0 %v13639_v21  ;;  %7791 = vmatpush.bf16.msrb.mxu2 %v13643_v59  ;;  %v13863_v58 = vor.u32 %v15926_v40, %v13862_v11  ;;  %v13611_v7 = vor.u32 %v15858_v28, %v13608_v55  ;;  %v15922_v4 = vld [vmem:[%s16842_s11 + $0x34c] sm:$0xf]  ;;  %v15854_v1 = vld [vmem:[%s16842_s11 + $0x124] sm:$0xf0] }
 0x5a8   : > { %v6905_v12 = vadd.f32 0.5, %v6903_v6  ;;  %7778 = vmatpush.bf16.msrb.mxu1 %v13895_v14  ;;  %v13864_v6 = vld [vmem:[%s16842_s11 + $0x368] sm:$0xf0]  ;;  %7804 = vmatpush.bf16.msrb.mxu3 %v13899_v18  ;;  %v13575_v17 = vor.u32 %v15854_v1, %v13574_v48  ;;  %v13766_v18 = vld [vmem:[%s16842_s11 + $0x288] sm:$0xf] }
 0x5a9   : > { %v6788_v13 = vpop.f32.mrf.mxu0  ;;  %v6801_v3 = vpop.f32.mrf.mxu1  ;;  %v6897_v44 = vadd.f32 0.5, %v6895_v31  ;;  %v13867_v23 = vor.u32 %v15922_v4, %v13864_v6  ;;  %v13798_v31 = vld [vmem:[%s16842_s11 + $0x2c8] sm:$0xf]  ;;  %v13544_v21 = vld [vmem:[%s16842_s11 + $0xe8] sm:$0xf0] }
 0x5aa   : > { %v6802_v27 = vadd.f32 %v6801_v3, %v6788_v13  ;;  %v13830_v13 = vld [vmem:[%s16842_s11 + $0x308] sm:$0xf]  ;;  %v6917_v35 = vmul.f32 %v6905_v12, %v18741_v39  ;;  %v13799_v36 = vor.u32 %v15910_v34, %v13798_v31  ;;  %v13547_v8 = vor.u32 %v15842_v16, %v13544_v21  ;;  %v13800_v12 = vld [vmem:[%s16842_s11 + $0x2e8] sm:$0xf0] }
 0x5ab   : > { %7766 = vmatpush.bf16.msrb.mxu0 %v13607_v15  ;;  %7792 = vmatpush.bf16.msrb.mxu2 %v13611_v7  ;;  %v13831_v51 = vor.u32 %v15918_v0, %v13830_v13  ;;  %v13803_v59 = vor.u32 %v15906_v29, %v13800_v12  ;;  %v13512_v15 = vld [vmem:[%s16842_s11 + $0xa8] sm:$0xf0]  ;;  %v13734_v7 = vld [vmem:[%s16842_s11 + $0x248] sm:$0xf] }
 0x5ac   : > { %v6887_v30 = vadd.f32 %v6802_v27, %v19954_v41  ;;  %v16377_v38 = vpop.eup %16376  ;;  %7779 = vmatpush.bf16.msrb.mxu1 %v13863_v58  ;;  %7805 = vmatpush.bf16.msrb.mxu3 %v13867_v23  ;;  %v15898_v55 = vld [vmem:[%s16842_s11 + $0x28c] sm:$0xf]  ;;  %v15830_v58 = vld [vmem:[%s16842_s11 + $0x64] sm:$0xf0] }
 0x5ad   : > { %v6904_v50 = vmul.f32 0.5, %v16377_v38  ;;  %v16379_v60 = vpop.eup %16378  ;;  %v15838_v38 = vld [vmem:[%s16842_s11 + $0xa4] sm:$0xf0]  ;;  %v15818_v0 = vld [vmem:[%s16842_s11 + $0xc] sm:$0xf] }
 0x5ae   : > { %16380 = vtanh.f32 %v6887_v30  ;;  %v6896_v39 = vmul.f32 0.5, %v16379_v60  ;;  %v13511_v11 = vor.u32 %v15838_v38, %v13510_v5  ;;  %v15894_v6 = vld [vmem:[%s16842_s11 + $0x264] sm:$0xf0]  ;;  %v13448_v53 = vld [vmem:[%s16842_s11 + $0x28] sm:$0xf0] }
 0x5af   : > { %v6906_v22 = vadd.f32 0.5, %v6904_v50  ;;  %7767 = vmatpush.bf16.msrb.mxu0 %v13575_v17  ;;  %7793 = vmatpush.bf16.msrb.mxu2 %v13579_v24  ;;  %v13480_v50 = vld [vmem:[%s16842_s11 + $0x68] sm:$0xf0]  ;;  %v13735_v23 = vor.u32 %v15894_v6, %v13734_v7  ;;  %v13446_v1 = vld [vmem:[%s16842_s11 + $0x8] sm:$0xf] }
 0x5b0   : > { %7780 = vmatpush.bf16.msrb.mxu1 %v13831_v51  ;;  %v6898_v14 = vadd.f32 0.5, %v6896_v39  ;;  %7806 = vmatpush.bf16.msrb.mxu3 %v13835_v54  ;;  %v15822_v13 = vld [vmem:[%s16842_s11 + $0x24] sm:$0xf0]  ;;  %v15882_v51 = vld [vmem:[%s16842_s11 + $0x20c] sm:$0xf] }
 0x5b1   : > { %v6790_v46 = vpop.f32.mrf.mxu0  ;;  %v6803_v33 = vpop.f32.mrf.mxu1  ;;  %v6918_v56 = vmul.f32 %v6906_v22, %v18760_v63  ;;  %v15886_v17 = vld [vmem:[%s16842_s11 + $0x224] sm:$0xf0]  ;;  %v13704_v24 = vld [vmem:[%s16842_s11 + $0x228] sm:$0xf0]  ;;  %v13936_v7 = vld [vmem:[%s16842_s11 + $0x3f0] sm:$0xf0] }
 0x5b2   : > { %v6814_v26 = vpop.f32.mrf.mxu2  ;;  %v6827_v57 = vpop.f32.mrf.mxu3  ;;  %v13478_v33 = vld [vmem:[%s16842_s11 + $0x48] sm:$0xf]  ;;  %v13707_v39 = vor.u32 %v15882_v51, %v13704_v24 }
 0x5b3   : > { %v6828_v45 = vadd.f32 %v6827_v57, %v6814_v26  ;;  %7768 = vmatpush.bf16.msrb.mxu0 %v13543_v47  ;;  %v15902_v26 = vld [vmem:[%s16842_s11 + $0x2a4] sm:$0xf0]  ;;  %v15834_v57 = vld [vmem:[%s16842_s11 + $0x8c] sm:$0xf]  ;;  %7794 = vmatpush.bf16.msrb.mxu2 %v13547_v8  ;;  %v13479_v4 = vor.u32 %v15830_v58, %v13478_v33  ;;  %v15939_v58 = vld [vmem:[%s16842_s11 + $0x3d4] sm:$0xf] }
 0x5b4   : > { %v16381_v3 = vpop.eup %16380  ;;  %7781 = vmatpush.bf16.msrb.mxu1 %v13799_v36  ;;  %v13767_v40 = vor.u32 %v15902_v26, %v13766_v18  ;;  %v13515_v28 = vor.u32 %v15834_v57, %v13512_v15  ;;  %7807 = vmatpush.bf16.msrb.mxu3 %v13803_v59  ;;  %v19956_v54 = vld [vmem:[#allocation52_spill] sm:$0xff]  ;;  %v19957_v16 = vld [vmem:[#allocation55_spill] sm:$0xff] }
 0x5b5   : > { %v6888_v37 = vadd.f32 %v6828_v45, %v19955_v43  ;;  %v6919_v27 = vmul.f32 %v16381_v3, %v6897_v44  ;;  %v13768_v45 = vld [vmem:[%s16842_s11 + $0x2a8] sm:$0xf0]  ;;  %v13702_v3 = vld [vmem:[%s16842_s11 + $0x208] sm:$0xf]  ;;  %v13678_v57 = vld [vmem:[%s16842_s11 + $0x1d0] sm:$0xf] }
 0x5b6   : > { %v13771_v46 = vor.u32 %v15898_v55, %v13768_v45  ;;  %v15826_v44 = vld [vmem:[%s16842_s11 + $0x4c] sm:$0xf]  ;;  %v13703_v32 = vor.u32 %v15886_v17, %v13702_v3  ;;  %v15879_v15 = vld [vmem:[%s16842_s11 + $0x1ec] sm:$0xf0]  ;;  %v15875_v55 = vld [vmem:[%s16842_s11 + $0x1d4] sm:$0xf] }
 0x5b7   : > { %16382 = vtanh.f32 %v6888_v37  ;;  %v19043_v42 = vadd.f32 %v6919_v27, %v6917_v35  ;;  %7769 = vmatpush.bf16.msrb.mxu0 %v13511_v11  ;;  %7795 = vmatpush.bf16.msrb.mxu2 %v13515_v28  ;;  %v13483_v60 = vor.u32 %v15826_v44, %v13480_v50  ;;  %v15890_v43 = vld [vmem:[%s16842_s11 + $0x24c] sm:$0xf]  ;;  %v13447_v35 = vor.u32 %v15822_v13, %v13446_v1  ;;  %v15943_v28 = vld [vmem:[%s16842_s11 + $0x3ec] sm:$0xf0]  ;;  %v13680_v45 = vld [vmem:[%s16842_s11 + $0x1f0] sm:$0xf0] }
 0x5b8   : > { %7782 = vmatpush.bf16.msrb.mxu1 %v13767_v40  ;;  %v13736_v37 = vld [vmem:[%s16842_s11 + $0x268] sm:$0xf0]  ;;  %7808 = vmatpush.bf16.msrb.mxu3 %v13771_v46  ;;  %v13451_v27 = vor.u32 %v15818_v0, %v13448_v53  ;;  %v13934_v40 = vld [vmem:[%s16842_s11 + $0x3d0] sm:$0xf]  ;;  %v13679_v44 = vor.u32 %v15879_v15, %v13678_v57  ;;  %v15867_v13 = vld [vmem:[%s16842_s11 + $0x194] sm:$0xf] }
 0x5b9   : > { %v13739_v48 = vor.u32 %v15890_v43, %v13736_v37  ;;  %v13935_v50 = vor.u32 %v15943_v28, %v13934_v40  ;;  %v13683_v43 = vor.u32 %v15875_v55, %v13680_v45  ;;  %v13939_v37 = vor.u32 %v15939_v58, %v13936_v7  ;;  %v15935_v1 = vld [vmem:[%s16842_s11 + $0x3ac] sm:$0xf0]  ;;  %v13648_v3 = vld [vmem:[%s16842_s11 + $0x1b0] sm:$0xf0] }
 0x5ba   : > { %v6816_v41 = vpop.f32.mrf.mxu2  ;;  %v6829_v30 = vpop.f32.mrf.mxu3  ;;  %v13904_v17 = vld [vmem:[%s16842_s11 + $0x3b0] sm:$0xf0]  ;;  %v13651_v51 = vor.u32 %v15867_v13, %v13648_v3  ;;  %v13518_v55 = vld [vmem:[%s16842_s11 + $0x90] sm:$0xf] }
 0x5bb   : > { %7770 = vmatpush.bf16.msrb.mxu0 %v13479_v4  ;;  %7796 = vmatpush.bf16.msrb.mxu2 %v13483_v60  ;;  %v15871_v60 = vld [vmem:[%s16842_s11 + $0x1ac] sm:$0xf0]  ;;  %v15907_v57 = vld [vmem:[%s16842_s11 + $0x2d4] sm:$0xf] }
 0x5bc   : > { %7783 = vmatpush.bf16.msrb.mxu1 %v13735_v23  ;;  %7809 = vmatpush.bf16.msrb.mxu3 %v13739_v48  ;;  %v13646_v23 = vld [vmem:[%s16842_s11 + $0x190] sm:$0xf]  ;;  %v13808_v15 = vld [vmem:[%s16842_s11 + $0x2f0] sm:$0xf0] }
 0x5bd   : > { %v16383_v10 = vpop.eup %16382  ;;  %v13902_v48 = vld [vmem:[%s16842_s11 + $0x390] sm:$0xf]  ;;  %v13647_v0 = vor.u32 %v15871_v60, %v13646_v23  ;;  %v15899_v23 = vld [vmem:[%s16842_s11 + $0x294] sm:$0xf] }
 0x5be   : > { %v6920_v20 = vmul.f32 %v16383_v10, %v6898_v14  ;;  %v13903_v53 = vor.u32 %v15935_v1, %v13902_v48  ;;  %v15839_v45 = vld [vmem:[%s16842_s11 + $0xac] sm:$0xf0]  ;;  %v13776_v60 = vld [vmem:[%s16842_s11 + $0x2b0] sm:$0xf0] }
 0x5bf   : > { %7771 = vmatpush.bf16.msrb.mxu0 %v13447_v35  ;;  %7797 = vmatpush.bf16.msrb.mxu2 %v13451_v27  ;;  %v15931_v35 = vld [vmem:[%s16842_s11 + $0x394] sm:$0xf]  ;;  %v15863_v27 = vld [vmem:[%s16842_s11 + $0x16c] sm:$0xf0]  ;;  %v13779_v3 = vor.u32 %v15899_v23, %v13776_v60  ;;  %v13878_v23 = vld [vmem:[%s16842_s11 + $0x358] sm:$0xf] }
 0x5c0   : > { %v19062_v63 = vadd.f32 %v6920_v20, %v6918_v56  ;;  %7784 = vmatpush.bf16.msrb.mxu1 %v13703_v32  ;;  %7810 = vmatpush.bf16.msrb.mxu3 %v13707_v39  ;;  %v13614_v32 = vld [vmem:[%s16842_s11 + $0x150] sm:$0xf]  ;;  %v13907_v24 = vor.u32 %v15931_v35, %v13904_v17  ;;  %v15859_v39 = vld [vmem:[%s16842_s11 + $0x154] sm:$0xf]  ;;  %v15928_v60 = vld [vmem:[%s16842_s11 + $0x374] sm:$0xf0] }
 0x5c1   : > { %v13774_v58 = vld [vmem:[%s16842_s11 + $0x290] sm:$0xf] }
 0x5c2   : > { %v15903_v7 = vld [vmem:[%s16842_s11 + $0x2ac] sm:$0xf0] }
 0x5c3   : > { %v13486_v48 = vld [vmem:[%s16842_s11 + $0x50] sm:$0xf] }
 0x5c4   : > { %v15831_v1 = vld [vmem:[%s16842_s11 + $0x6c] sm:$0xf0] }
 0x5c5   : > { %v13742_v35 = vld [vmem:[%s16842_s11 + $0x250] sm:$0xf] }
 0x5c6   : > { %v15895_v17 = vld [vmem:[%s16842_s11 + $0x26c] sm:$0xf0] }
 0x5c9   : > { %v6840_v25 = vpop.f32.mrf.mxu0  ;;  %v6853_v9 = vpop.f32.mrf.mxu1 }
 0x5ca   : > { %v6854_v22 = vadd.f32 %v6853_v9, %v6840_v25  ;;  %v13870_v25 = vld [vmem:[%s16842_s11 + $0x350] sm:$0xf] }
 0x5cb   : > { %v15927_v9 = vld [vmem:[%s16842_s11 + $0x36c] sm:$0xf0] }
 0x5cc   : > { %v6889_v2 = vadd.f32 %v6854_v22, %v19956_v54  ;;  %v13616_v22 = vld [vmem:[%s16842_s11 + $0x170] sm:$0xf0] }
 0x5cd   : > { %v15923_v54 = vld [vmem:[%s16842_s11 + $0x354] sm:$0xf] }
 0x5ce   : > { %v6909_v62 = vmul.f32 0.5, %v6889_v2  ;;  %v13872_v2 = vld [vmem:[%s16842_s11 + $0x370] sm:$0xf0] }
 0x5d0   : > { %v6866_v31 = vpop.f32.mrf.mxu2  ;;  %v6879_v41 = vpop.f32.mrf.mxu3  ;;  %16384 = vtanh.f32 %v6909_v62  ;;  %v13615_v62 = vor.u32 %v15863_v27, %v13614_v32  ;;  %v15891_v32 = vld [vmem:[%s16842_s11 + $0x254] sm:$0xf] }
 0x5d1   : > { %v6880_v30 = vadd.f32 %v6879_v41, %v6866_v31  ;;  %v6842_v47 = vpop.f32.mrf.mxu0  ;;  %v6855_v34 = vpop.f32.mrf.mxu1  ;;  %v13871_v31 = vor.u32 %v15927_v9, %v13870_v25  ;;  %v13582_v41 = vld [vmem:[%s16842_s11 + $0x110] sm:$0xf]  ;;  %v13744_v27 = vld [vmem:[%s16842_s11 + $0x270] sm:$0xf0]  ;;  %v13743_v25 = vor.u32 %v15895_v17, %v13742_v35  ;;  %v13590_v35 = vld [vmem:[%s16842_s11 + $0x118] sm:$0xf] }
 0x5d2   : > { %v13619_v47 = vor.u32 %v15859_v39, %v13616_v22  ;;  %v13875_v34 = vor.u32 %v15923_v54, %v13872_v2  ;;  %v15823_v9 = vld [vmem:[%s16842_s11 + $0x2c] sm:$0xf0]  ;;  %v13747_v2 = vor.u32 %v15891_v32, %v13744_v27  ;;  %v15856_v17 = vld [vmem:[%s16842_s11 + $0x134] sm:$0xf0] }
 0x5d3   : > { %v6890_v21 = vadd.f32 %v6880_v30, %v19957_v16  ;;  %v15855_v30 = vld [vmem:[%s16842_s11 + $0x12c] sm:$0xf0]  ;;  %v13846_v32 = vld [vmem:[%s16842_s11 + $0x318] sm:$0xf] }
 0x5d4   : > { %v13838_v16 = vld [vmem:[%s16842_s11 + $0x310] sm:$0xf]  ;;  %v15920_v27 = vld [vmem:[%s16842_s11 + $0x334] sm:$0xf0] }
 0x5d5   : > { %v6910_v36 = vmul.f32 0.5, %v6890_v21  ;;  %v15919_v21 = vld [vmem:[%s16842_s11 + $0x32c] sm:$0xf0] }
 0x5d6   : > { %v16385_v8 = vpop.eup %16384  ;;  %v13710_v39 = vld [vmem:[%s16842_s11 + $0x210] sm:$0xf] }
 0x5d7   : > { %16386 = vtanh.f32 %v6910_v36  ;;  %v6913_v14 = vmul.f32 0.5, %v16385_v8  ;;  %v15851_v36 = vld [vmem:[%s16842_s11 + $0x114] sm:$0xf]  ;;  %v15887_v22 = vld [vmem:[%s16842_s11 + $0x22c] sm:$0xf0] }
 0x5d8   : > { %v6868_v29 = vpop.f32.mrf.mxu2  ;;  %v6881_v12 = vpop.f32.mrf.mxu3  ;;  %16388 = vtanh.f32 %v19043_v42  ;;  %v13584_v8 = vld [vmem:[%s16842_s11 + $0x130] sm:$0xf0] }
 0x5d9   : > { %16390 = vtanh.f32 %v19062_v63  ;;  %v6915_v10 = vadd.f32 0.5, %v6913_v14  ;;  %v15915_v29 = vld [vmem:[%s16842_s11 + $0x314] sm:$0xf]  ;;  %v13583_v14 = vor.u32 %v15855_v30, %v13582_v41 }
 0x5da   : > { %v13840_v12 = vld [vmem:[%s16842_s11 + $0x330] sm:$0xf0] }
 0x5db   : > { %v15883_v41 = vld [vmem:[%s16842_s11 + $0x214] sm:$0xf] }
 0x5dc   : > { %v13712_v30 = vld [vmem:[%s16842_s11 + $0x230] sm:$0xf0] }
 0x5dd   : > { %v16387_v59 = vpop.eup %16386 }
 0x5de   : > { %v6914_v5 = vmul.f32 0.5, %v16387_v59  ;;  %v16389_v38 = vpop.eup %16388  ;;  %v13839_v59 = vor.u32 %v15919_v21, %v13838_v16  ;;  %v13942_v16 = vld [vmem:[%s16842_s11 + $0x3d8] sm:$0xf] }
 0x5df   : > { %v16391_v56 = vpop.eup %16390  ;;  %v6925_v20 = vmul.f32 %v16389_v38, %v6915_v10  ;;  %v13550_v10 = vld [vmem:[%s16842_s11 + $0xd0] sm:$0xf]  ;;  %v13587_v38 = vor.u32 %v15851_v36, %v13584_v8  ;;  %v15944_v21 = vld [vmem:[%s16842_s11 + $0x3f4] sm:$0xf0]  ;;  %v15876_v36 = vld [vmem:[%s16842_s11 + $0x1dc] sm:$0xf] }
 0x5e0   : > { %v6916_v18 = vadd.f32 0.5, %v6914_v5  ;;  %v15847_v5 = vld [vmem:[%s16842_s11 + $0xec] sm:$0xf0] }
 0x5e1   : > { %v13551_v40 = vor.u32 %v15847_v5, %v13550_v10  ;;  %v13715_v5 = vor.u32 %v15883_v41, %v13712_v30  ;;  %v13814_v41 = vld [vmem:[%s16842_s11 + $0x2d8] sm:$0xf] }
 0x5e2   : > { %v6926_v11 = vmul.f32 %v16391_v56, %v6916_v18  ;;  %v13843_v18 = vor.u32 %v15915_v29, %v13840_v12  ;;  %v13806_v56 = vld [vmem:[%s16842_s11 + $0x2d0] sm:$0xf]  ;;  %v13711_v29 = vor.u32 %v15887_v22, %v13710_v39  ;;  %v13688_v12 = vld [vmem:[%s16842_s11 + $0x1f8] sm:$0xf0]  ;;  %v13591_v39 = vor.u32 %v15856_v17, %v13590_v35  ;;  %v15912_v30 = vld [vmem:[%s16842_s11 + $0x2f4] sm:$0xf0] }
 0x5e3   : > { %v13847_v22 = vor.u32 %v15920_v27, %v13846_v32  ;;  %v15884_v35 = vld [vmem:[%s16842_s11 + $0x21c] sm:$0xf] }
 0x5e4   : > { %v6927_v26 = vpack.c.bf16 %v6926_v11, %v6925_v20  ;;  %v15911_v20 = vld [vmem:[%s16842_s11 + $0x2ec] sm:$0xf0]  ;;  %v15843_v11 = vld [vmem:[%s16842_s11 + $0xd4] sm:$0xf]  ;;  %v13720_v17 = vld [vmem:[%s16842_s11 + $0x238] sm:$0xf0] }
 0x5e5   : > { %v13807_v28 = vor.u32 %v15911_v20, %v13806_v56  ;;  %v13654_v56 = vld [vmem:[%s16842_s11 + $0x198] sm:$0xf]  ;;  %v13723_v27 = vor.u32 %v15884_v35, %v13720_v17  ;;  %v15977_v35 = vld [vmem:[%s16842_s11 + $0x104] sm:$0xf] }
 0x5e6   : > { %6928 = vst [vmem:[#allocation3 + $0x20] sm:$0xff] %v6927_v26  ;;  %v7066_v46 = vunpack.c.l.b16 %v6927_v26  ;;  %v7067_v33 = vunpack.c.h.b16 %v6927_v26  ;;  %v13552_v26 = vld [vmem:[%s16842_s11 + $0xf0] sm:$0xf0]  ;;  %v15872_v20 = vld [vmem:[%s16842_s11 + $0x1b4] sm:$0xf0] }
 0x5e8   : > { %v19092_v4 = vpack.c.b16 %v7066_v46, %v7066_v46  ;;  %v19094_v6 = vpack.c.b16 %v7067_v33, %v7067_v33  ;;  %v13555_v46 = vor.u32 %v15843_v11, %v13552_v26  ;;  %v13811_v33 = vor.u32 %v15907_v57, %v13808_v15  ;;  %v13910_v57 = vld [vmem:[%s16842_s11 + $0x398] sm:$0xf] }
 0x5e9   : > { %v13691_v11 = vor.u32 %v15876_v36, %v13688_v12  ;;  %v15936_v15 = vld [vmem:[%s16842_s11 + $0x3b4] sm:$0xf0] }
 0x5ea   : > { %7720 = vmatmul.bf16.vlgmr.msra.gmra.mxu0 %v19092_v4  ;;  %7733 = vmatmul.bf16.vlgmr.msra.gmra.mxu1 %v19094_v6  ;;  %v15840_v12 = vld [vmem:[%s16842_s11 + $0xb4] sm:$0xf0] }
 0x5eb   : > { %7746 = vmatmul.bf16.vlgmr.msra.gmra.mxu2 %v19092_v4  ;;  %7759 = vmatmul.bf16.vlgmr.msra.gmra.mxu3 %v19094_v6 }
 0x5ec   : > { %7816 = vmatpush.bf16.msra.mxu0 %v13679_v44  ;;  %7829 = vmatpush.bf16.msra.mxu1 %v13935_v50  ;;  %v15835_v44 = vld [vmem:[%s16842_s11 + $0x94] sm:$0xf] }
 0x5ed   : > { %7842 = vmatpush.bf16.msra.mxu2 %v13683_v43  ;;  %7855 = vmatpush.bf16.msra.mxu3 %v13939_v37  ;;  %v13520_v50 = vld [vmem:[%s16842_s11 + $0xb0] sm:$0xf0]  ;;  %v13519_v43 = vor.u32 %v15839_v45, %v13518_v55  ;;  %v13775_v37 = vor.u32 %v15903_v7, %v13774_v58  ;;  %v15932_v55 = vld [vmem:[%s16842_s11 + $0x39c] sm:$0xf]  ;;  %v13622_v58 = vld [vmem:[%s16842_s11 + $0x158] sm:$0xf] }
 0x5ee   : > { %v13523_v13 = vor.u32 %v15835_v44, %v13520_v50  ;;  %v13912_v45 = vld [vmem:[%s16842_s11 + $0x3b8] sm:$0xf0]  ;;  %v15864_v7 = vld [vmem:[%s16842_s11 + $0x174] sm:$0xf0] }
 0x5ef   : > { %v13915_v50 = vor.u32 %v15932_v55, %v13912_v45  ;;  %v13750_v55 = vld [vmem:[%s16842_s11 + $0x258] sm:$0xf] }
 0x5f0   : > { %7817 = vmatpush.bf16.msra.mxu0 %v13647_v0  ;;  %7830 = vmatpush.bf16.msra.mxu1 %v13903_v53  ;;  %v15827_v0 = vld [vmem:[%s16842_s11 + $0x54] sm:$0xf]  ;;  %v15896_v45 = vld [vmem:[%s16842_s11 + $0x274] sm:$0xf0] }
 0x5f1   : > { %7843 = vmatpush.bf16.msra.mxu2 %v13651_v51  ;;  %7856 = vmatpush.bf16.msra.mxu3 %v13907_v24  ;;  %v13488_v53 = vld [vmem:[%s16842_s11 + $0x70] sm:$0xf0]  ;;  %v13454_v51 = vld [vmem:[%s16842_s11 + $0x10] sm:$0xf]  ;;  %v13487_v24 = vor.u32 %v15831_v1, %v13486_v48  ;;  %v15924_v48 = vld [vmem:[%s16842_s11 + $0x35c] sm:$0xf] }
 0x5f2   : > { %v13491_v54 = vor.u32 %v15827_v0, %v13488_v53  ;;  %v13455_v8 = vor.u32 %v15823_v9, %v13454_v51  ;;  %v13880_v1 = vld [vmem:[%s16842_s11 + $0x378] sm:$0xf0] }
 0x5f3   : > { %v13883_v53 = vor.u32 %v15924_v48, %v13880_v1  ;;  %v15852_v51 = vld [vmem:[%s16842_s11 + $0x11c] sm:$0xf]  ;;  %v13718_v48 = vld [vmem:[%s16842_s11 + $0x218] sm:$0xf] }
 0x5f4   : > { %7818 = vmatpush.bf16.msra.mxu0 %v13615_v62  ;;  %7831 = vmatpush.bf16.msra.mxu1 %v13871_v31  ;;  %v15819_v62 = vld [vmem:[%s16842_s11 + $0x14] sm:$0xf]  ;;  %v13848_v9 = vld [vmem:[%s16842_s11 + $0x338] sm:$0xf0]  ;;  %v15888_v1 = vld [vmem:[%s16842_s11 + $0x234] sm:$0xf0] }
 0x5f5   : > { %7844 = vmatpush.bf16.msra.mxu2 %v13619_v47  ;;  %7857 = vmatpush.bf16.msra.mxu3 %v13875_v34  ;;  %v13456_v31 = vld [vmem:[%s16842_s11 + $0x30] sm:$0xf0]  ;;  %v13686_v47 = vld [vmem:[%s16842_s11 + $0x1d8] sm:$0xf] }
 0x5f6   : > { %v15880_v34 = vld [vmem:[%s16842_s11 + $0x1f4] sm:$0xf0]  ;;  %v13459_v10 = vor.u32 %v15819_v62, %v13456_v31 }
 0x5f8   : > { %7819 = vmatpush.bf16.msra.mxu0 %v13583_v14  ;;  %7832 = vmatpush.bf16.msra.mxu1 %v13839_v59  ;;  %v15940_v14 = vld [vmem:[%s16842_s11 + $0x3dc] sm:$0xf] }
 0x5f9   : > { %7845 = vmatpush.bf16.msra.mxu2 %v13587_v38  ;;  %7858 = vmatpush.bf16.msra.mxu3 %v13843_v18  ;;  %v13944_v59 = vld [vmem:[%s16842_s11 + $0x3f8] sm:$0xf0]  ;;  %v13687_v38 = vor.u32 %v15880_v34, %v13686_v47  ;;  %v13943_v18 = vor.u32 %v15944_v21, %v13942_v16 }
 0x5fa   : > { %7772 = vmatmul.bf16.vlgmr.msrb.gmra.mxu0 %v19092_v4  ;;  %7785 = vmatmul.bf16.vlgmr.msrb.gmra.mxu1 %v19094_v6  ;;  %v13947_v26 = vor.u32 %v15940_v14, %v13944_v59  ;;  %v15844_v47 = vld [vmem:[%s16842_s11 + $0xdc] sm:$0xf] }
 0x5fb   : > { %7798 = vmatmul.bf16.vlgmr.msrb.gmra.mxu2 %v19092_v4  ;;  %7811 = vmatmul.bf16.vlgmr.msrb.gmra.mxu3 %v19094_v6  ;;  %v13560_v34 = vld [vmem:[%s16842_s11 + $0xf8] sm:$0xf0] }
 0x5fc   : > { %7820 = vmatpush.bf16.msra.mxu0 %v13551_v40  ;;  %7833 = vmatpush.bf16.msra.mxu1 %v13807_v28  ;;  %v15868_v40 = vld [vmem:[%s16842_s11 + $0x19c] sm:$0xf]  ;;  %v13563_v14 = vor.u32 %v15844_v47, %v13560_v34 }
 0x5fd   : > { %7846 = vmatpush.bf16.msra.mxu2 %v13555_v46  ;;  %7859 = vmatpush.bf16.msra.mxu3 %v13811_v33  ;;  %v13656_v28 = vld [vmem:[%s16842_s11 + $0x1b8] sm:$0xf0]  ;;  %v13655_v46 = vor.u32 %v15872_v20, %v13654_v56  ;;  %v13911_v33 = vor.u32 %v15936_v15, %v13910_v57  ;;  %v13494_v57 = vld [vmem:[%s16842_s11 + $0x58] sm:$0xf] }
 0x5fe   : > { %v13659_v44 = vor.u32 %v15868_v40, %v13656_v28  ;;  %v15908_v16 = vld [vmem:[%s16842_s11 + $0x2dc] sm:$0xf]  ;;  %v15832_v15 = vld [vmem:[%s16842_s11 + $0x74] sm:$0xf0] }
 0x5ff   : > { %v13816_v21 = vld [vmem:[%s16842_s11 + $0x2f8] sm:$0xf0] }
 0x600   : > { %7821 = vmatpush.bf16.msra.mxu0 %v13519_v43  ;;  %7834 = vmatpush.bf16.msra.mxu1 %v13775_v37  ;;  %v15860_v43 = vld [vmem:[%s16842_s11 + $0x15c] sm:$0xf]  ;;  %v13819_v59 = vor.u32 %v15908_v16, %v13816_v21  ;;  %v14142_v16 = vld [vmem:[%s16842_s11 + $0x180] sm:$0xf] }
 0x601   : > { %7847 = vmatpush.bf16.msra.mxu2 %v13523_v13  ;;  %7860 = vmatpush.bf16.msra.mxu3 %v13779_v3  ;;  %v13624_v37 = vld [vmem:[%s16842_s11 + $0x178] sm:$0xf0]  ;;  %v13623_v13 = vor.u32 %v15864_v7, %v13622_v58  ;;  %v13879_v3 = vor.u32 %v15928_v60, %v13878_v23  ;;  %v13462_v23 = vld [vmem:[%s16842_s11 + $0x18] sm:$0xf]  ;;  %v15997_v21 = vld [vmem:[%s16842_s11 + $0x19c] sm:$0xf0] }
 0x602   : > { %v13627_v0 = vor.u32 %v15860_v43, %v13624_v37  ;;  %v15900_v56 = vld [vmem:[%s16842_s11 + $0x29c] sm:$0xf]  ;;  %v15824_v60 = vld [vmem:[%s16842_s11 + $0x34] sm:$0xf0] }
 0x603   : > { %v13784_v20 = vld [vmem:[%s16842_s11 + $0x2b8] sm:$0xf0] }
 0x604   : > { %7822 = vmatpush.bf16.msra.mxu0 %v13487_v24  ;;  %7835 = vmatpush.bf16.msra.mxu1 %v13743_v25  ;;  %v13592_v24 = vld [vmem:[%s16842_s11 + $0x138] sm:$0xf0]  ;;  %v13787_v28 = vor.u32 %v15900_v56, %v13784_v20  ;;  %v14400_v56 = vld [vmem:[%s16842_s11 + $0x3a0] sm:$0xf0] }
 0x605   : > { %7848 = vmatpush.bf16.msra.mxu2 %v13491_v54  ;;  %7861 = vmatpush.bf16.msra.mxu3 %v13747_v2  ;;  %v15916_v25 = vld [vmem:[%s16842_s11 + $0x31c] sm:$0xf]  ;;  %v13558_v54 = vld [vmem:[%s16842_s11 + $0xd8] sm:$0xf]  ;;  %v13595_v62 = vor.u32 %v15852_v51, %v13592_v24 }
 0x606   : > { %v15848_v2 = vld [vmem:[%s16842_s11 + $0xf4] sm:$0xf0]  ;;  %v13851_v31 = vor.u32 %v15916_v25, %v13848_v9  ;;  %v15892_v58 = vld [vmem:[%s16842_s11 + $0x25c] sm:$0xf]  ;;  %v14174_v25 = vld [vmem:[%s16842_s11 + $0x1c0] sm:$0xf] }
 0x607   : > { %v13559_v36 = vor.u32 %v15848_v2, %v13558_v54  ;;  %v13752_v7 = vld [vmem:[%s16842_s11 + $0x278] sm:$0xf0]  ;;  %v16005_v9 = vld [vmem:[%s16842_s11 + $0x1dc] sm:$0xf0]  ;;  %v16001_v2 = vld [vmem:[%s16842_s11 + $0x1c4] sm:$0xf] }
 0x608   : > { %7823 = vmatpush.bf16.msra.mxu0 %v13455_v8  ;;  %7836 = vmatpush.bf16.msra.mxu1 %v13711_v29  ;;  %v13815_v8 = vor.u32 %v15912_v30, %v13814_v41  ;;  %v13526_v29 = vld [vmem:[%s16842_s11 + $0x98] sm:$0xf]  ;;  %v13755_v37 = vor.u32 %v15892_v58, %v13752_v7  ;;  %v16069_v54 = vld [vmem:[%s16842_s11 + $0x3dc] sm:$0xf0]  ;;  %v16065_v30 = vld [vmem:[%s16842_s11 + $0x3c4] sm:$0xf] }
 0x609   : > { %7849 = vmatpush.bf16.msra.mxu2 %v13459_v10  ;;  %7862 = vmatpush.bf16.msra.mxu3 %v13715_v5  ;;  %v13782_v10 = vld [vmem:[%s16842_s11 + $0x298] sm:$0xf] }
 0x60a   : > { %v15904_v5 = vld [vmem:[%s16842_s11 + $0x2b4] sm:$0xf0] }
 0x60b   : > { %7824 = vmatmul.bf16.vlgmr.msra.gmra.mxu0 %v19092_v4  ;;  %7837 = vmatmul.bf16.vlgmr.msra.gmra.mxu1 %v19094_v6 }
 0x60c   : > { %7868 = vmatpush.bf16.msrb.mxu0 %v13687_v38  ;;  %7881 = vmatpush.bf16.msrb.mxu1 %v13943_v18  ;;  %v15836_v38 = vld [vmem:[%s16842_s11 + $0x9c] sm:$0xf] }
 0x60d   : > { %7894 = vmatpush.bf16.msrb.mxu2 %v13691_v11  ;;  %7907 = vmatpush.bf16.msrb.mxu3 %v13947_v26  ;;  %v13528_v18 = vld [vmem:[%s16842_s11 + $0xb8] sm:$0xf0]  ;;  %v13527_v11 = vor.u32 %v15840_v12, %v13526_v29  ;;  %v13783_v26 = vor.u32 %v15904_v5, %v13782_v10  ;;  %v14143_v12 = vor.u32 %v15997_v21, %v14142_v16  ;;  %v14144_v10 = vld [vmem:[%s16842_s11 + $0x1a0] sm:$0xf0] }
 0x60e   : > { %7850 = vmatmul.bf16.vlgmr.msra.gmra.mxu2 %v19092_v4  ;;  %7863 = vmatmul.bf16.vlgmr.msra.gmra.mxu3 %v19094_v6  ;;  %v13531_v40 = vor.u32 %v15836_v38, %v13528_v18  ;;  %v16057_v18 = vld [vmem:[%s16842_s11 + $0x384] sm:$0xf] }
 0x60f   : > { %v14403_v20 = vor.u32 %v16057_v18, %v14400_v56 }
 0x610   : > { %7869 = vmatpush.bf16.msrb.mxu0 %v13655_v46  ;;  %7882 = vmatpush.bf16.msrb.mxu1 %v13911_v33  ;;  %v15828_v46 = vld [vmem:[%s16842_s11 + $0x5c] sm:$0xf] }
 0x611   : > { %7895 = vmatpush.bf16.msrb.mxu2 %v13659_v44  ;;  %7908 = vmatpush.bf16.msrb.mxu3 %v13915_v50  ;;  %v13496_v33 = vld [vmem:[%s16842_s11 + $0x78] sm:$0xf0]  ;;  %v13495_v44 = vor.u32 %v15832_v15, %v13494_v57  ;;  %v13751_v50 = vor.u32 %v15896_v45, %v13750_v55  ;;  %v14366_v57 = vld [vmem:[%s16842_s11 + $0x340] sm:$0xf]  ;;  %v14112_v45 = vld [vmem:[%s16842_s11 + $0x160] sm:$0xf0] }
 0x612   : > { %v13499_v43 = vor.u32 %v15828_v46, %v13496_v33  ;;  %v16049_v46 = vld [vmem:[%s16842_s11 + $0x344] sm:$0xf] }
 0x613   : > { %v14368_v33 = vld [vmem:[%s16842_s11 + $0x360] sm:$0xf0] }
 0x614   : > { %7870 = vmatpush.bf16.msrb.mxu0 %v13623_v13  ;;  %7883 = vmatpush.bf16.msrb.mxu1 %v13879_v3  ;;  %v15820_v13 = vld [vmem:[%s16842_s11 + $0x1c] sm:$0xf]  ;;  %v14371_v7 = vor.u32 %v16049_v46, %v14368_v33 }
 0x615   : > { %7896 = vmatpush.bf16.msrb.mxu2 %v13627_v0  ;;  %7909 = vmatpush.bf16.msrb.mxu3 %v13883_v53  ;;  %v13464_v3 = vld [vmem:[%s16842_s11 + $0x38] sm:$0xf0]  ;;  %v13463_v0 = vor.u32 %v15824_v60, %v13462_v23  ;;  %v13719_v53 = vor.u32 %v15888_v1, %v13718_v48  ;;  %v14078_v60 = vld [vmem:[%s16842_s11 + $0x100] sm:$0xf] }
 0x616   : > { %v13467_v32 = vor.u32 %v15820_v13, %v13464_v3  ;;  %v16045_v3 = vld [vmem:[%s16842_s11 + $0x31c] sm:$0xf0] }
 0x618   : > { %7871 = vmatpush.bf16.msrb.mxu0 %v13591_v39  ;;  %7884 = vmatpush.bf16.msrb.mxu1 %v13847_v22  ;;  %v14430_v39 = vld [vmem:[%s16842_s11 + $0x3c0] sm:$0xf]  ;;  %v14175_v22 = vor.u32 %v16005_v9, %v14174_v25 }
 0x619   : > { %7897 = vmatpush.bf16.msrb.mxu2 %v13595_v62  ;;  %7910 = vmatpush.bf16.msrb.mxu3 %v13851_v31  ;;  %v14176_v62 = vld [vmem:[%s16842_s11 + $0x1e0] sm:$0xf0]  ;;  %v14431_v31 = vor.u32 %v16069_v54, %v14430_v39  ;;  %v19959_v39 = vld [vmem:[#allocation29_spill] sm:$0xff]  ;;  %v14046_v54 = vld [vmem:[%s16842_s11 + $0xc0] sm:$0xf] }
 0x61a   : > { %v14179_v41 = vor.u32 %v16001_v2, %v14176_v62  ;;  %v19958_v25 = vld [vmem:[#allocation19_spill] sm:$0xff] }
 0x61b   : > { %v15973_v2 = vld [vmem:[%s16842_s11 + $0xdc] sm:$0xf0] }
 0x61c   : > { %7872 = vmatpush.bf16.msrb.mxu0 %v13559_v36  ;;  %7885 = vmatpush.bf16.msrb.mxu1 %v13815_v8  ;;  %v14398_v36 = vld [vmem:[%s16842_s11 + $0x380] sm:$0xf] }
 0x61d   : > { %7898 = vmatpush.bf16.msrb.mxu2 %v13563_v14  ;;  %7911 = vmatpush.bf16.msrb.mxu3 %v13819_v59  ;;  %v16061_v14 = vld [vmem:[%s16842_s11 + $0x39c] sm:$0xf0]  ;;  %v15993_v59 = vld [vmem:[%s16842_s11 + $0x184] sm:$0xf] }
 0x61e   : > { %v14399_v5 = vor.u32 %v16061_v14, %v14398_v36  ;;  %v14147_v38 = vor.u32 %v15993_v59, %v14144_v10  ;;  %v14302_v62 = vld [vmem:[%s16842_s11 + $0x2c0] sm:$0xf]  ;;  %v16033_v36 = vld [vmem:[%s16842_s11 + $0x2c4] sm:$0xf] }
 0x61f   : > { %v14014_v10 = vld [vmem:[%s16842_s11 + $0x80] sm:$0xf] }
 0x620   : > { %7873 = vmatpush.bf16.msrb.mxu0 %v13527_v11  ;;  %7886 = vmatpush.bf16.msrb.mxu1 %v13783_v26  ;;  %v14110_v11 = vld [vmem:[%s16842_s11 + $0x140] sm:$0xf] }
 0x621   : > { %7899 = vmatpush.bf16.msrb.mxu2 %v13531_v40  ;;  %7912 = vmatpush.bf16.msrb.mxu3 %v13787_v28  ;;  %v15989_v26 = vld [vmem:[%s16842_s11 + $0x15c] sm:$0xf0]  ;;  %v15985_v28 = vld [vmem:[%s16842_s11 + $0x144] sm:$0xf] }
 0x622   : > { %v14111_v15 = vor.u32 %v15989_v26, %v14110_v11  ;;  %v16053_v40 = vld [vmem:[%s16842_s11 + $0x35c] sm:$0xf0]  ;;  %v14115_v58 = vor.u32 %v15985_v28, %v14112_v45  ;;  %v14016_v28 = vld [vmem:[%s16842_s11 + $0xa0] sm:$0xf0] }
 0x623   : > { %v14367_v55 = vor.u32 %v16053_v40, %v14366_v57  ;;  %v14270_v26 = vld [vmem:[%s16842_s11 + $0x280] sm:$0xf]  ;;  %v14272_v45 = vld [vmem:[%s16842_s11 + $0x2a0] sm:$0xf0] }
 0x624   : > { %7874 = vmatpush.bf16.msrb.mxu0 %v13495_v44  ;;  %7887 = vmatpush.bf16.msrb.mxu1 %v13751_v50  ;;  %v16029_v57 = vld [vmem:[%s16842_s11 + $0x29c] sm:$0xf0] }
 0x625   : > { %7900 = vmatpush.bf16.msrb.mxu2 %v13499_v43  ;;  %7913 = vmatpush.bf16.msrb.mxu3 %v13755_v37  ;;  %v15981_v43 = vld [vmem:[%s16842_s11 + $0x11c] sm:$0xf0]  ;;  %v14271_v40 = vor.u32 %v16029_v57, %v14270_v26 }
 0x626   : > { %v14334_v37 = vld [vmem:[%s16842_s11 + $0x300] sm:$0xf]  ;;  %v14079_v13 = vor.u32 %v15981_v43, %v14078_v60  ;;  %v15953_v60 = vld [vmem:[%s16842_s11 + $0x44] sm:$0xf] }
 0x627   : > { %v13984_v43 = vld [vmem:[%s16842_s11 + $0x60] sm:$0xf0] }
 0x628   : > { %7875 = vmatpush.bf16.msrb.mxu0 %v13463_v0  ;;  %7888 = vmatpush.bf16.msrb.mxu1 %v13719_v53  ;;  %v14335_v0 = vor.u32 %v16045_v3, %v14334_v37  ;;  %v14080_v53 = vld [vmem:[%s16842_s11 + $0x120] sm:$0xf0]  ;;  %v19961_v37 = vld [vmem:[#allocation20_spill] sm:$0xff] }
 0x629   : > { %7901 = vmatpush.bf16.msrb.mxu2 %v13467_v32  ;;  %7914 = vmatpush.bf16.msrb.mxu3 %v13723_v27  ;;  %v16041_v32 = vld [vmem:[%s16842_s11 + $0x304] sm:$0xf] }
 0x62a   : > { %v14336_v27 = vld [vmem:[%s16842_s11 + $0x320] sm:$0xf0] }
 0x62b   : > { %7876 = vmatmul.bf16.vlgmr.msrb.gmra.mxu0 %v19092_v4  ;;  %7889 = vmatmul.bf16.vlgmr.msrb.gmra.mxu1 %v19094_v6  ;;  %v16017_v3 = vld [vmem:[%s16842_s11 + $0x244] sm:$0xf] }
 0x62c   : > { %7902 = vmatmul.bf16.vlgmr.msrb.gmra.mxu2 %v19092_v4  ;;  %7915 = vmatmul.bf16.vlgmr.msrb.gmra.mxu3 %v19094_v6  ;;  %v14432_v4 = vld [vmem:[%s16842_s11 + $0x3e0] sm:$0xf0] }
 0x62d   : > { %8749 = vmatpush.bf16.msra.mxu0 %v14175_v22  ;;  %v14435_v6 = vor.u32 %v16065_v30, %v14432_v4  ;;  %8762 = vmatpush.bf16.msra.mxu1 %v14431_v31  ;;  %v14047_v31 = vor.u32 %v15973_v2, %v14046_v54  ;;  %v15969_v30 = vld [vmem:[%s16842_s11 + $0xc4] sm:$0xf] }
 0x62e   : > { %8775 = vmatpush.bf16.msra.mxu2 %v14179_v41  ;;  %v16037_v41 = vld [vmem:[%s16842_s11 + $0x2dc] sm:$0xf0]  ;;  %v14048_v4 = vld [vmem:[%s16842_s11 + $0xe0] sm:$0xf0] }
 0x62f   : > { %8788 = vmatpush.bf16.msra.mxu3 %v14435_v6  ;;  %v14303_v16 = vor.u32 %v16037_v41, %v14302_v62  ;;  %v14051_v21 = vor.u32 %v15969_v30, %v14048_v4  ;;  %v16013_v62 = vld [vmem:[%s16842_s11 + $0x21c] sm:$0xf0]  ;;  %v13952_v30 = vld [vmem:[%s16842_s11 + $0x20] sm:$0xf0] }
 0x630   : > { %v16009_v4 = vld [vmem:[%s16842_s11 + $0x204] sm:$0xf] }
 0x631   : > { %8750 = vmatpush.bf16.msra.mxu0 %v14143_v12  ;;  %8763 = vmatpush.bf16.msra.mxu1 %v14399_v5  ;;  %v15965_v5 = vld [vmem:[%s16842_s11 + $0x9c] sm:$0xf0] }
 0x632   : > { %8776 = vmatpush.bf16.msra.mxu2 %v14147_v38  ;;  %v14015_v11 = vor.u32 %v15965_v5, %v14014_v10  ;;  %v19963_v10 = vld [vmem:[#allocation39_spill] sm:$0xff] }
 0x633   : > { %8789 = vmatpush.bf16.msra.mxu3 %v14403_v20 }
 0x635   : > { %8751 = vmatpush.bf16.msra.mxu0 %v14111_v15  ;;  %8764 = vmatpush.bf16.msra.mxu1 %v14367_v55  ;;  %v15961_v15 = vld [vmem:[%s16842_s11 + $0x84] sm:$0xf] }
 0x636   : > { %8777 = vmatpush.bf16.msra.mxu2 %v14115_v58  ;;  %v16025_v55 = vld [vmem:[%s16842_s11 + $0x284] sm:$0xf]  ;;  %v14019_v46 = vor.u32 %v15961_v15, %v14016_v28  ;;  %v13982_v58 = vld [vmem:[%s16842_s11 + $0x40] sm:$0xf]  ;;  %v16066_v15 = vld [vmem:[%s16842_s11 + $0x3cc] sm:$0xf] }
 0x637   : > { %8790 = vmatpush.bf16.msra.mxu3 %v14371_v7  ;;  %v14275_v33 = vor.u32 %v16025_v55, %v14272_v45  ;;  %v15957_v7 = vld [vmem:[%s16842_s11 + $0x5c] sm:$0xf0]  ;;  %v14150_v28 = vld [vmem:[%s16842_s11 + $0x188] sm:$0xf]  ;;  %v19964_v55 = vld [vmem:[#allocation41_spill] sm:$0xff] }
 0x638   : > { %v1535_v45 = vadd.f32 %v19964_v55, %v17484_v49  ;;  %v14054_v55 = vld [vmem:[%s16842_s11 + $0xc8] sm:$0xf] }
 0x639   : > { %8752 = vmatpush.bf16.msra.mxu0 %v14079_v13  ;;  %8765 = vmatpush.bf16.msra.mxu1 %v14335_v0  ;;  %v13987_v13 = vor.u32 %v15953_v60, %v13984_v43 }
 0x63d   : > { %8753 = vmatpush.bf16.msra.mxu0 %v14047_v31  ;;  %8766 = vmatpush.bf16.msra.mxu1 %v14303_v16  ;;  %v15945_v31 = vld [vmem:[%s16842_s11 + $0x4] sm:$0xf] }
 0x641   : > { %8754 = vmatpush.bf16.msra.mxu0 %v14015_v11  ;;  %8767 = vmatpush.bf16.msra.mxu1 %v14271_v40  ;;  %v14184_v11 = vld [vmem:[%s16842_s11 + $0x1e8] sm:$0xf0] }
 0x642   : > { %v14440_v40 = vld [vmem:[%s16842_s11 + $0x3e8] sm:$0xf0] }
 0x667   : > { %v7721_v51 = vpop.f32.mrf.mxu0  ;;  %v7734_v24 = vpop.f32.mrf.mxu1 }
 0x668   : > { %v7735_v44 = vadd.f32 %v7734_v24, %v7721_v51  ;;  %v14083_v51 = vor.u32 %v15977_v35, %v14080_v53  ;;  %v14339_v24 = vor.u32 %v16041_v32, %v14336_v27  ;;  %v14240_v35 = vld [vmem:[%s16842_s11 + $0x260] sm:$0xf0]  ;;  %v19962_v32 = vld [vmem:[#allocation38_spill] sm:$0xff] }
 0x669   : > { %v14243_v0 = vor.u32 %v16017_v3, %v14240_v35  ;;  %v1477_v27 = vadd.f32 %v19962_v32, %v17457_v61  ;;  %v14118_v35 = vld [vmem:[%s16842_s11 + $0x148] sm:$0xf] }
 0x66a   : > { %v7920_v9 = vadd.f32 %v7735_v44, %v19958_v25  ;;  %8778 = vmatpush.bf16.msra.mxu2 %v14083_v51  ;;  %8791 = vmatpush.bf16.msra.mxu3 %v14339_v24  ;;  %v14238_v44 = vld [vmem:[%s16842_s11 + $0x240] sm:$0xf] }
 0x66b   : > { %v13950_v25 = vld [vmem:[%s16842_s11] sm:$0xf]  ;;  %v1506_v5 = vadd.f32 %v19963_v10, %v1477_v27 }
 0x66c   : > { %v7928_v12 = vmul.f32 0.5, %v7920_v9  ;;  %v15949_v9 = vld [vmem:[%s16842_s11 + $0x1c] sm:$0xf0] }
 0x66d   : > { %v13951_v2 = vor.u32 %v15949_v9, %v13950_v25  ;;  %v16054_v25 = vld [vmem:[%s16842_s11 + $0x364] sm:$0xf0]  ;;  %v15986_v9 = vld [vmem:[%s16842_s11 + $0x14c] sm:$0xf] }
 0x66e   : > { %v19240_v47 = vpop.f32.mrf.mxu2  ;;  %v19242_v34 = vpop.f32.mrf.mxu3  ;;  %8779 = vmatpush.bf16.msra.mxu2 %v14051_v21 }
 0x66f   : > { %v7723_v8 = vpop.f32.mrf.mxu0  ;;  %v7736_v29 = vpop.f32.mrf.mxu1  ;;  %v7761_v38 = vadd.f32 %v19242_v34, %v19240_v47  ;;  %v19960_v47 = vld [vmem:[#allocation30_spill] sm:$0xff] }
 0x670   : > { %v14304_v8 = vld [vmem:[%s16842_s11 + $0x2e0] sm:$0xf0] }
 0x671   : > { %v14307_v29 = vor.u32 %v16033_v36, %v14304_v8  ;;  %v13955_v8 = vor.u32 %v15945_v31, %v13952_v30  ;;  %v14376_v30 = vld [vmem:[%s16842_s11 + $0x368] sm:$0xf0] }
 0x672   : > { %8780 = vmatpush.bf16.msra.mxu2 %v14019_v46  ;;  %v14443_v46 = vor.u32 %v16066_v15, %v14440_v40 }
 0x673   : > { %8792 = vmatpush.bf16.msra.mxu3 %v14307_v29 }
 0x676   : > { %v7749_v50 = vpop.f32.mrf.mxu2  ;;  %v7762_v23 = vpop.f32.mrf.mxu3  ;;  %8781 = vmatpush.bf16.msra.mxu2 %v13987_v13 }
 0x677   : > { %v7773_v48 = vpop.f32.mrf.mxu0  ;;  %v7786_v1 = vpop.f32.mrf.mxu1  ;;  %v13983_v50 = vor.u32 %v15957_v7, %v13982_v58  ;;  %v16021_v23 = vld [vmem:[%s16842_s11 + $0x25c] sm:$0xf0]  ;;  %8793 = vmatpush.bf16.msra.mxu3 %v14275_v33  ;;  %v15998_v33 = vld [vmem:[%s16842_s11 + $0x1a4] sm:$0xf0] }
 0x678   : > { %v7787_v17 = vadd.f32 %v7786_v1, %v7773_v48  ;;  %v7921_v48 = vadd.f32 %v7761_v38, %v19961_v37  ;;  %v14239_v1 = vor.u32 %v16021_v23, %v14238_v44  ;;  %v14406_v58 = vld [vmem:[%s16842_s11 + $0x388] sm:$0xf]  ;;  %v14151_v7 = vor.u32 %v15998_v33, %v14150_v28  ;;  %v14152_v23 = vld [vmem:[%s16842_s11 + $0x1a8] sm:$0xf0] }
 0x679   : > { %8755 = vmatpush.bf16.msra.mxu0 %v13983_v50  ;;  %v16062_v44 = vld [vmem:[%s16842_s11 + $0x3a4] sm:$0xf0]  ;;  %v15994_v50 = vld [vmem:[%s16842_s11 + $0x18c] sm:$0xf] }
 0x67a   : > { %v7922_v22 = vadd.f32 %v7787_v17, %v19959_v39  ;;  %8768 = vmatpush.bf16.msra.mxu1 %v14239_v1  ;;  %v14206_v39 = vld [vmem:[%s16842_s11 + $0x200] sm:$0xf]  ;;  %8782 = vmatpush.bf16.msra.mxu2 %v13955_v8  ;;  %v14407_v43 = vor.u32 %v16062_v44, %v14406_v58  ;;  %v14155_v37 = vor.u32 %v15994_v50, %v14152_v23  ;;  %v14408_v1 = vld [vmem:[%s16842_s11 + $0x3a8] sm:$0xf0]  ;;  %v14086_v8 = vld [vmem:[%s16842_s11 + $0x108] sm:$0xf] }
 0x67b   : > { %8794 = vmatpush.bf16.msra.mxu3 %v14243_v0  ;;  %v14207_v41 = vor.u32 %v16013_v62, %v14206_v39  ;;  %v14374_v0 = vld [vmem:[%s16842_s11 + $0x348] sm:$0xf]  ;;  %v14120_v39 = vld [vmem:[%s16842_s11 + $0x168] sm:$0xf0] }
 0x67c   : > { %v7936_v6 = vmul.f32 0.5, %v7922_v22  ;;  %v7929_v22 = vmul.f32 0.5, %v7921_v48  ;;  %v16058_v48 = vld [vmem:[%s16842_s11 + $0x38c] sm:$0xf]  ;;  %v14375_v62 = vor.u32 %v16054_v25, %v14374_v0  ;;  %v14123_v31 = vor.u32 %v15986_v9, %v14120_v39  ;;  %v16038_v58 = vld [vmem:[%s16842_s11 + $0x2e4] sm:$0xf0] }
 0x67d   : > { %8756 = vmatpush.bf16.msra.mxu0 %v13951_v2  ;;  %v14411_v3 = vor.u32 %v16058_v48, %v14408_v1  ;;  %v14056_v44 = vld [vmem:[%s16842_s11 + $0xe8] sm:$0xf0] }
 0x67e   : > { %16392 = vtanh.f32 %v7936_v6  ;;  %v7799_v14 = vpop.f32.mrf.mxu2  ;;  %v7812_v59 = vpop.f32.mrf.mxu3  ;;  %v14208_v6 = vld [vmem:[%s16842_s11 + $0x220] sm:$0xf0]  ;;  %8769 = vmatpush.bf16.msra.mxu1 %v14207_v41  ;;  %v16050_v41 = vld [vmem:[%s16842_s11 + $0x34c] sm:$0xf] }
 0x67f   : > { %v7813_v18 = vadd.f32 %v7812_v59, %v7799_v14  ;;  %v7775_v56 = vpop.f32.mrf.mxu0  ;;  %v7788_v20 = vpop.f32.mrf.mxu1  ;;  %16394 = vtanh.f32 %v7928_v12  ;;  %v14211_v29 = vor.u32 %v16009_v4, %v14208_v6  ;;  %v14182_v12 = vld [vmem:[%s16842_s11 + $0x1c8] sm:$0xf]  ;;  %v16026_v9 = vld [vmem:[%s16842_s11 + $0x28c] sm:$0xf] }
 0x680   : > { %v16006_v14 = vld [vmem:[%s16842_s11 + $0x1e4] sm:$0xf0]  ;;  %v16002_v20 = vld [vmem:[%s16842_s11 + $0x1cc] sm:$0xf] }
 0x681   : > { %v7923_v34 = vadd.f32 %v7813_v18, %v19960_v47  ;;  %v14438_v59 = vld [vmem:[%s16842_s11 + $0x3c8] sm:$0xf]  ;;  %v14183_v18 = vor.u32 %v16006_v14, %v14182_v12  ;;  %8795 = vmatpush.bf16.msra.mxu3 %v14211_v29  ;;  %v14187_v57 = vor.u32 %v16002_v20, %v14184_v11  ;;  %v14280_v39 = vld [vmem:[%s16842_s11 + $0x2a8] sm:$0xf0] }
 0x682   : > { %v16070_v56 = vld [vmem:[%s16842_s11 + $0x3e4] sm:$0xf0] }
 0x683   : > { %v7937_v53 = vmul.f32 0.5, %v7923_v34  ;;  %v14439_v26 = vor.u32 %v16070_v56, %v14438_v59  ;;  %8801 = vmatpush.bf16.msrb.mxu0 %v14183_v18  ;;  %8827 = vmatpush.bf16.msrb.mxu2 %v14187_v57  ;;  %v15982_v29 = vld [vmem:[%s16842_s11 + $0x124] sm:$0xf0]  ;;  %v14088_v18 = vld [vmem:[%s16842_s11 + $0x128] sm:$0xf0] }
 0x684   : > { %v16393_v17 = vpop.eup %16392  ;;  %v14342_v12 = vld [vmem:[%s16842_s11 + $0x308] sm:$0xf]  ;;  %v14087_v10 = vor.u32 %v15982_v29, %v14086_v8  ;;  %v14344_v57 = vld [vmem:[%s16842_s11 + $0x328] sm:$0xf0]  ;;  %v19966_v29 = vld [vmem:[#allocation53_spill] sm:$0xff] }
 0x685   : > { %v7940_v54 = vmul.f32 0.5, %v16393_v17  ;;  %v16395_v16 = vpop.eup %16394  ;;  %16396 = vtanh.f32 %v7937_v53  ;;  %8814 = vmatpush.bf16.msrb.mxu1 %v14439_v26  ;;  %8840 = vmatpush.bf16.msrb.mxu3 %v14443_v46  ;;  %v15990_v17 = vld [vmem:[%s16842_s11 + $0x164] sm:$0xf0]  ;;  %v19965_v53 = vld [vmem:[#allocation42_spill] sm:$0xff]  ;;  %v16042_v26 = vld [vmem:[%s16842_s11 + $0x30c] sm:$0xf] }
 0x686   : > { %v7801_v51 = vpop.f32.mrf.mxu2  ;;  %v7814_v24 = vpop.f32.mrf.mxu3  ;;  %v7932_v47 = vmul.f32 0.5, %v16395_v16  ;;  %16398 = vtanh.f32 %v7929_v22  ;;  %v1564_v32 = vadd.f32 %v19965_v53, %v1535_v45  ;;  %v14379_v16 = vor.u32 %v16050_v41, %v14376_v30  ;;  %v15974_v45 = vld [vmem:[%s16842_s11 + $0xe4] sm:$0xf0]  ;;  %v15954_v30 = vld [vmem:[%s16842_s11 + $0x4c] sm:$0xf] }
 0x687   : > { %v7942_v60 = vadd.f32 0.5, %v7940_v54  ;;  %8802 = vmatpush.bf16.msrb.mxu0 %v14151_v7  ;;  %v14119_v24 = vor.u32 %v15990_v17, %v14118_v35  ;;  %8828 = vmatpush.bf16.msrb.mxu2 %v14155_v37  ;;  %v14347_v40 = vor.u32 %v16042_v26, %v14344_v57  ;;  %v14055_v33 = vor.u32 %v15974_v45, %v14054_v55  ;;  %v15970_v7 = vld [vmem:[%s16842_s11 + $0xcc] sm:$0xf]  ;;  %v14278_v35 = vld [vmem:[%s16842_s11 + $0x288] sm:$0xf]  ;;  %v19967_v55 = vld [vmem:[#allocation54_spill] sm:$0xff] }
 0x688   : > { %v7825_v21 = vpop.f32.mrf.mxu0  ;;  %v7838_v36 = vpop.f32.mrf.mxu1  ;;  %v7934_v4 = vadd.f32 0.5, %v7932_v47  ;;  %v14310_v47 = vld [vmem:[%s16842_s11 + $0x2c8] sm:$0xf]  ;;  %v14059_v23 = vor.u32 %v15970_v7, %v14056_v44  ;;  %v16010_v26 = vld [vmem:[%s16842_s11 + $0x20c] sm:$0xf] }
 0x689   : > { %v7839_v38 = vadd.f32 %v7838_v36, %v7825_v21  ;;  %8815 = vmatpush.bf16.msrb.mxu1 %v14407_v43  ;;  %8841 = vmatpush.bf16.msrb.mxu3 %v14411_v3  ;;  %v7954_v59 = vmul.f32 %v7942_v60, %v19043_v42  ;;  %v14311_v50 = vor.u32 %v16038_v58, %v14310_v47  ;;  %v16034_v60 = vld [vmem:[%s16842_s11 + $0x2cc] sm:$0xf]  ;;  %v15966_v3 = vld [vmem:[%s16842_s11 + $0xa4] sm:$0xf0] }
 0x68a   : > { %v14312_v43 = vld [vmem:[%s16842_s11 + $0x2e8] sm:$0xf0]  ;;  %v16022_v41 = vld [vmem:[%s16842_s11 + $0x264] sm:$0xf0] }
 0x68b   : > { %v7924_v34 = vadd.f32 %v7839_v38, %v1506_v5  ;;  %v16397_v13 = vpop.eup %16396  ;;  %8803 = vmatpush.bf16.msrb.mxu0 %v14119_v24  ;;  %v16046_v5 = vld [vmem:[%s16842_s11 + $0x324] sm:$0xf0]  ;;  %v15978_v38 = vld [vmem:[%s16842_s11 + $0x10c] sm:$0xf]  ;;  %8829 = vmatpush.bf16.msrb.mxu2 %v14123_v31  ;;  %v14315_v48 = vor.u32 %v16034_v60, %v14312_v43 }
 0x68c   : > { %v7941_v6 = vmul.f32 0.5, %v16397_v13  ;;  %v16399_v21 = vpop.eup %16398  ;;  %v14343_v20 = vor.u32 %v16046_v5, %v14342_v12  ;;  %v14091_v11 = vor.u32 %v15978_v38, %v14088_v18  ;;  %v14022_v13 = vld [vmem:[%s16842_s11 + $0x88] sm:$0xf]  ;;  %v1593_v12 = vadd.f32 %v19966_v29, %v17659_v52  ;;  %v15946_v18 = vld [vmem:[%s16842_s11 + $0xc] sm:$0xf] }
 0x68d   : > { %16400 = vtanh.f32 %v7924_v34  ;;  %8816 = vmatpush.bf16.msrb.mxu1 %v14375_v62  ;;  %v7933_v42 = vmul.f32 0.5, %v16399_v21  ;;  %8842 = vmatpush.bf16.msrb.mxu3 %v14379_v16  ;;  %v14023_v53 = vor.u32 %v15966_v3, %v14022_v13  ;;  %v14246_v62 = vld [vmem:[%s16842_s11 + $0x248] sm:$0xf]  ;;  %v16018_v21 = vld [vmem:[%s16842_s11 + $0x24c] sm:$0xf] }
 0x68e   : > { %v7943_v15 = vadd.f32 0.5, %v7941_v6  ;;  %v14247_v6 = vor.u32 %v16022_v41, %v14246_v62  ;;  %v16014_v38 = vld [vmem:[%s16842_s11 + $0x224] sm:$0xf0]  ;;  %v14216_v57 = vld [vmem:[%s16842_s11 + $0x228] sm:$0xf0]  ;;  %v1622_v45 = vadd.f32 %v19967_v55, %v1593_v12 }
 0x68f   : > { %8804 = vmatpush.bf16.msrb.mxu0 %v14087_v10  ;;  %8830 = vmatpush.bf16.msrb.mxu2 %v14091_v11  ;;  %v7935_v37 = vadd.f32 0.5, %v7933_v42  ;;  %v14214_v10 = vld [vmem:[%s16842_s11 + $0x208] sm:$0xf]  ;;  %v16071_v62 = vld [vmem:[%s16842_s11 + $0x3ec] sm:$0xf0] }
 0x690   : > { %v7827_v54 = vpop.f32.mrf.mxu0  ;;  %v7840_v2 = vpop.f32.mrf.mxu1  ;;  %v7955_v17 = vmul.f32 %v7943_v15, %v19062_v63  ;;  %v14192_v41 = vld [vmem:[%s16842_s11 + $0x1f0] sm:$0xf0]  ;;  %v14158_v12 = vld [vmem:[%s16842_s11 + $0x190] sm:$0xf] }
 0x691   : > { %v7851_v27 = vpop.f32.mrf.mxu2  ;;  %v7864_v51 = vpop.f32.mrf.mxu3  ;;  %8817 = vmatpush.bf16.msrb.mxu1 %v14343_v20  ;;  %8843 = vmatpush.bf16.msrb.mxu3 %v14347_v40  ;;  %v13990_v54 = vld [vmem:[%s16842_s11 + $0x48] sm:$0xf]  ;;  %v14215_v20 = vor.u32 %v16014_v38, %v14214_v10  ;;  %v14219_v40 = vor.u32 %v16010_v26, %v14216_v57  ;;  %v16063_v38 = vld [vmem:[%s16842_s11 + $0x3ac] sm:$0xf0] }
 0x692   : > { %v7865_v22 = vadd.f32 %v7864_v51, %v7851_v27  ;;  %v15962_v27 = vld [vmem:[%s16842_s11 + $0x8c] sm:$0xf]  ;;  %v15958_v2 = vld [vmem:[%s16842_s11 + $0x64] sm:$0xf0] }
 0x693   : > { %v16401_v14 = vpop.eup %16400  ;;  %8805 = vmatpush.bf16.msrb.mxu0 %v14055_v33  ;;  %v14024_v51 = vld [vmem:[%s16842_s11 + $0xa8] sm:$0xf0]  ;;  %8831 = vmatpush.bf16.msrb.mxu2 %v14059_v23  ;;  %v13991_v31 = vor.u32 %v15958_v2, %v13990_v54  ;;  %v16007_v54 = vld [vmem:[%s16842_s11 + $0x1ec] sm:$0xf0] }
 0x694   : > { %v7925_v36 = vadd.f32 %v7865_v22, %v1564_v32  ;;  %v7956_v56 = vmul.f32 %v16401_v14, %v7934_v4  ;;  %v16030_v32 = vld [vmem:[%s16842_s11 + $0x2a4] sm:$0xf0]  ;;  %v14027_v25 = vor.u32 %v15962_v27, %v14024_v51  ;;  %v14283_v22 = vor.u32 %v16026_v9, %v14280_v39  ;;  %v13992_v4 = vld [vmem:[%s16842_s11 + $0x68] sm:$0xf0]  ;;  %v14446_v2 = vld [vmem:[%s16842_s11 + $0x3d0] sm:$0xf] }
 0x695   : > { %8818 = vmatpush.bf16.msrb.mxu1 %v14311_v50  ;;  %v14279_v24 = vor.u32 %v16030_v32, %v14278_v35  ;;  %8844 = vmatpush.bf16.msrb.mxu3 %v14315_v48  ;;  %v13995_v16 = vor.u32 %v15954_v30, %v13992_v4  ;;  %v13958_v14 = vld [vmem:[%s16842_s11 + $0x8] sm:$0xf]  ;;  %v19969_v50 = vld [vmem:[#allocation57_spill] sm:$0xff]  ;;  %v14447_v29 = vor.u32 %v16071_v62, %v14446_v2 }
 0x696   : > { %16402 = vtanh.f32 %v7925_v36  ;;  %v19345_v28 = vadd.f32 %v7956_v56, %v7954_v59  ;;  %v14248_v36 = vld [vmem:[%s16842_s11 + $0x268] sm:$0xf0]  ;;  %v15950_v59 = vld [vmem:[%s16842_s11 + $0x24] sm:$0xf0] }
 0x697   : > { %8806 = vmatpush.bf16.msrb.mxu0 %v14023_v53  ;;  %8832 = vmatpush.bf16.msrb.mxu2 %v14027_v25  ;;  %v14251_v8 = vor.u32 %v16018_v21, %v14248_v36  ;;  %v13959_v5 = vor.u32 %v15950_v59, %v13958_v14  ;;  %v13960_v56 = vld [vmem:[%s16842_s11 + $0x28] sm:$0xf0]  ;;  %v15999_v14 = vld [vmem:[%s16842_s11 + $0x1ac] sm:$0xf0] }
 0x698   : > { %v13963_v11 = vor.u32 %v15946_v18, %v13960_v56  ;;  %v15995_v18 = vld [vmem:[%s16842_s11 + $0x194] sm:$0xf]  ;;  %v14159_v26 = vor.u32 %v15999_v14, %v14158_v12 }
 0x699   : > { %v7853_v34 = vpop.f32.mrf.mxu2  ;;  %v7866_v46 = vpop.f32.mrf.mxu3  ;;  %8819 = vmatpush.bf16.msrb.mxu1 %v14279_v24  ;;  %8845 = vmatpush.bf16.msrb.mxu3 %v14283_v22  ;;  %v14190_v22 = vld [vmem:[%s16842_s11 + $0x1d0] sm:$0xf]  ;;  %v14160_v56 = vld [vmem:[%s16842_s11 + $0x1b0] sm:$0xf0] }
 0x69a   : > { %v19968_v46 = vld [vmem:[#allocation56_spill] sm:$0xff]  ;;  %v16027_v12 = vld [vmem:[%s16842_s11 + $0x294] sm:$0xf] }
 0x69b   : > { %8807 = vmatpush.bf16.msrb.mxu0 %v13991_v31  ;;  %8833 = vmatpush.bf16.msrb.mxu2 %v13995_v16  ;;  %v1651_v33 = vadd.f32 %v19968_v46, %v17673_v19  ;;  %v16003_v31 = vld [vmem:[%s16842_s11 + $0x1d4] sm:$0xf] }
 0x69c   : > { %v16403_v1 = vpop.eup %16402  ;;  %v14448_v16 = vld [vmem:[%s16842_s11 + $0x3f0] sm:$0xf0]  ;;  %v14195_v59 = vor.u32 %v16003_v31, %v14192_v41  ;;  %v14030_v31 = vld [vmem:[%s16842_s11 + $0x90] sm:$0xf] }
 0x69d   : > { %v7957_v0 = vmul.f32 %v16403_v1, %v7935_v37  ;;  %8820 = vmatpush.bf16.msrb.mxu1 %v14247_v6  ;;  %8846 = vmatpush.bf16.msrb.mxu3 %v14251_v8  ;;  %v1680_v23 = vadd.f32 %v19969_v50, %v1651_v33  ;;  %v16067_v6 = vld [vmem:[%s16842_s11 + $0x3d4] sm:$0xf]  ;;  %v14191_v8 = vor.u32 %v16007_v54, %v14190_v22  ;;  %v14094_v50 = vld [vmem:[%s16842_s11 + $0x110] sm:$0xf] }
 0x69e   : > { %v14451_v10 = vor.u32 %v16067_v6, %v14448_v16  ;;  %v14128_v46 = vld [vmem:[%s16842_s11 + $0x170] sm:$0xf0]  ;;  %v15967_v41 = vld [vmem:[%s16842_s11 + $0xac] sm:$0xf0] }
 0x69f   : > { %v19364_v63 = vadd.f32 %v7957_v0, %v7955_v17  ;;  %8808 = vmatpush.bf16.msrb.mxu0 %v13959_v5  ;;  %8834 = vmatpush.bf16.msrb.mxu2 %v13963_v11  ;;  %v14414_v5 = vld [vmem:[%s16842_s11 + $0x390] sm:$0xf]  ;;  %v14416_v11 = vld [vmem:[%s16842_s11 + $0x3b0] sm:$0xf0] }
 0x6a0   : > { %v14415_v57 = vor.u32 %v16063_v38, %v14414_v5  ;;  %v16051_v33 = vld [vmem:[%s16842_s11 + $0x354] sm:$0xf]  ;;  %v14286_v6 = vld [vmem:[%s16842_s11 + $0x290] sm:$0xf] }
 0x6a1   : > { %8821 = vmatpush.bf16.msrb.mxu1 %v14215_v20  ;;  %8847 = vmatpush.bf16.msrb.mxu3 %v14219_v40  ;;  %v16059_v20 = vld [vmem:[%s16842_s11 + $0x394] sm:$0xf]  ;;  %v14163_v40 = vor.u32 %v15995_v18, %v14160_v56  ;;  %v16031_v16 = vld [vmem:[%s16842_s11 + $0x2ac] sm:$0xf0] }
 0x6a2   : > { %v14419_v55 = vor.u32 %v16059_v20, %v14416_v11  ;;  %v16035_v22 = vld [vmem:[%s16842_s11 + $0x2d4] sm:$0xf]  ;;  %v13998_v5 = vld [vmem:[%s16842_s11 + $0x50] sm:$0xf] }
 0x6a3   : > { %v14320_v54 = vld [vmem:[%s16842_s11 + $0x2f0] sm:$0xf0]  ;;  %v15959_v38 = vld [vmem:[%s16842_s11 + $0x6c] sm:$0xf0] }
 0x6a4   : > { %v14288_v14 = vld [vmem:[%s16842_s11 + $0x2b0] sm:$0xf0]  ;;  %v14254_v20 = vld [vmem:[%s16842_s11 + $0x250] sm:$0xf] }
 0x6a5   : > { %v14291_v56 = vor.u32 %v16027_v12, %v14288_v14  ;;  %v16023_v11 = vld [vmem:[%s16842_s11 + $0x26c] sm:$0xf0]  ;;  %v14390_v12 = vld [vmem:[%s16842_s11 + $0x358] sm:$0xf] }
 0x6a6   : > { %v16056_v14 = vld [vmem:[%s16842_s11 + $0x374] sm:$0xf0] }
 0x6a8   : > { %v7877_v42 = vpop.f32.mrf.mxu0  ;;  %v7890_v15 = vpop.f32.mrf.mxu1 }
 0x6a9   : > { %v7891_v47 = vadd.f32 %v7890_v15, %v7877_v42  ;;  %v14126_v42 = vld [vmem:[%s16842_s11 + $0x150] sm:$0xf] }
 0x6aa   : > { %v15991_v15 = vld [vmem:[%s16842_s11 + $0x16c] sm:$0xf0] }
 0x6ab   : > { %v7926_v34 = vadd.f32 %v7891_v47, %v1622_v45  ;;  %v14382_v45 = vld [vmem:[%s16842_s11 + $0x350] sm:$0xf] }
 0x6ac   : > { %v16055_v47 = vld [vmem:[%s16842_s11 + $0x36c] sm:$0xf0] }
 0x6ad   : > { %v7946_v58 = vmul.f32 0.5, %v7926_v34  ;;  %v15987_v34 = vld [vmem:[%s16842_s11 + $0x154] sm:$0xf] }
 0x6af   : > { %v7903_v7 = vpop.f32.mrf.mxu2  ;;  %v7916_v44 = vpop.f32.mrf.mxu3  ;;  %16404 = vtanh.f32 %v7946_v58  ;;  %v14384_v58 = vld [vmem:[%s16842_s11 + $0x370] sm:$0xf0] }
 0x6b0   : > { %v7917_v60 = vadd.f32 %v7916_v44, %v7903_v7  ;;  %v7879_v43 = vpop.f32.mrf.mxu0  ;;  %v7892_v37 = vpop.f32.mrf.mxu1  ;;  %v14127_v7 = vor.u32 %v15991_v15, %v14126_v42  ;;  %v14383_v44 = vor.u32 %v16055_v47, %v14382_v45  ;;  %v16019_v42 = vld [vmem:[%s16842_s11 + $0x254] sm:$0xf]  ;;  %v14255_v45 = vor.u32 %v16023_v11, %v14254_v20  ;;  %v15951_v47 = vld [vmem:[%s16842_s11 + $0x2c] sm:$0xf0]  ;;  %v14102_v20 = vld [vmem:[%s16842_s11 + $0x118] sm:$0xf] }
 0x6b1   : > { %v14387_v43 = vor.u32 %v16051_v33, %v14384_v58  ;;  %v14350_v37 = vld [vmem:[%s16842_s11 + $0x310] sm:$0xf]  ;;  %v14256_v15 = vld [vmem:[%s16842_s11 + $0x270] sm:$0xf0]  ;;  %v15984_v11 = vld [vmem:[%s16842_s11 + $0x134] sm:$0xf0] }
 0x6b2   : > { %v7927_v48 = vadd.f32 %v7917_v60, %v1680_v23  ;;  %v15983_v23 = vld [vmem:[%s16842_s11 + $0x12c] sm:$0xf0]  ;;  %v14131_v60 = vor.u32 %v15987_v34, %v14128_v46  ;;  %v14259_v58 = vor.u32 %v16019_v42, %v14256_v15  ;;  %v14358_v42 = vld [vmem:[%s16842_s11 + $0x318] sm:$0xf] }
 0x6b3   : > { %v14222_v34 = vld [vmem:[%s16842_s11 + $0x210] sm:$0xf]  ;;  %v16048_v15 = vld [vmem:[%s16842_s11 + $0x334] sm:$0xf0] }
 0x6b4   : > { %v7947_v1 = vmul.f32 0.5, %v7927_v48  ;;  %v16047_v48 = vld [vmem:[%s16842_s11 + $0x32c] sm:$0xf0] }
 0x6b5   : > { %v16405_v13 = vpop.eup %16404  ;;  %v16015_v46 = vld [vmem:[%s16842_s11 + $0x22c] sm:$0xf0] }
 0x6b6   : > { %16406 = vtanh.f32 %v7947_v1  ;;  %v7950_v17 = vmul.f32 0.5, %v16405_v13  ;;  %v15979_v1 = vld [vmem:[%s16842_s11 + $0x114] sm:$0xf] }
 0x6b7   : > { %v7905_v3 = vpop.f32.mrf.mxu2  ;;  %v7918_v35 = vpop.f32.mrf.mxu3  ;;  %16408 = vtanh.f32 %v19345_v28  ;;  %v14096_v13 = vld [vmem:[%s16842_s11 + $0x130] sm:$0xf0] }
 0x6b8   : > { %16410 = vtanh.f32 %v19364_v63  ;;  %v7952_v53 = vadd.f32 0.5, %v7950_v17  ;;  %v16043_v3 = vld [vmem:[%s16842_s11 + $0x314] sm:$0xf]  ;;  %v14095_v17 = vor.u32 %v15983_v23, %v14094_v50 }
 0x6b9   : > { %v14352_v35 = vld [vmem:[%s16842_s11 + $0x330] sm:$0xf0] }
 0x6ba   : > { %v16011_v50 = vld [vmem:[%s16842_s11 + $0x214] sm:$0xf] }
 0x6bb   : > { %v14224_v23 = vld [vmem:[%s16842_s11 + $0x230] sm:$0xf0] }
 0x6bc   : > { %v16407_v0 = vpop.eup %16406 }
 0x6bd   : > { %v7951_v32 = vmul.f32 0.5, %v16407_v0  ;;  %v16409_v27 = vpop.eup %16408  ;;  %v14351_v0 = vor.u32 %v16047_v48, %v14350_v37  ;;  %v14454_v37 = vld [vmem:[%s16842_s11 + $0x3d8] sm:$0xf] }
 0x6be   : > { %v16411_v24 = vpop.eup %16410  ;;  %v7962_v25 = vmul.f32 %v16409_v27, %v7952_v53  ;;  %v14062_v53 = vld [vmem:[%s16842_s11 + $0xd0] sm:$0xf]  ;;  %v14099_v27 = vor.u32 %v15979_v1, %v14096_v13  ;;  %v16072_v48 = vld [vmem:[%s16842_s11 + $0x3f4] sm:$0xf0]  ;;  %v16004_v1 = vld [vmem:[%s16842_s11 + $0x1dc] sm:$0xf] }
 0x6bf   : > { %v7953_v51 = vadd.f32 0.5, %v7951_v32  ;;  %v15975_v32 = vld [vmem:[%s16842_s11 + $0xec] sm:$0xf0] }
 0x6c0   : > { %v14063_v2 = vor.u32 %v15975_v32, %v14062_v53  ;;  %v14227_v32 = vor.u32 %v16011_v50, %v14224_v23  ;;  %v14326_v50 = vld [vmem:[%s16842_s11 + $0x2d8] sm:$0xf] }
 0x6c1   : > { %v7963_v9 = vmul.f32 %v16411_v24, %v7953_v51  ;;  %v14355_v51 = vor.u32 %v16043_v3, %v14352_v35  ;;  %v14318_v24 = vld [vmem:[%s16842_s11 + $0x2d0] sm:$0xf]  ;;  %v14223_v3 = vor.u32 %v16015_v46, %v14222_v34  ;;  %v14200_v35 = vld [vmem:[%s16842_s11 + $0x1f8] sm:$0xf0]  ;;  %v14103_v34 = vor.u32 %v15984_v11, %v14102_v20  ;;  %v16040_v23 = vld [vmem:[%s16842_s11 + $0x2f4] sm:$0xf0] }
 0x6c2   : > { %v14359_v46 = vor.u32 %v16048_v15, %v14358_v42  ;;  %v16012_v20 = vld [vmem:[%s16842_s11 + $0x21c] sm:$0xf] }
 0x6c3   : > { %v7964_v39 = vpack.c.bf16 %v7963_v9, %v7962_v25  ;;  %v16039_v25 = vld [vmem:[%s16842_s11 + $0x2ec] sm:$0xf0]  ;;  %v15971_v9 = vld [vmem:[%s16842_s11 + $0xd4] sm:$0xf]  ;;  %v14232_v11 = vld [vmem:[%s16842_s11 + $0x238] sm:$0xf0] }
 0x6c4   : > { %v14319_v62 = vor.u32 %v16039_v25, %v14318_v24  ;;  %v14166_v24 = vld [vmem:[%s16842_s11 + $0x198] sm:$0xf]  ;;  %v14235_v15 = vor.u32 %v16012_v20, %v14232_v11  ;;  %v16105_v20 = vld [vmem:[%s16842_s11 + $0x104] sm:$0xf] }
 0x6c5   : > { %7965 = vst [vmem:[#allocation3 + $0x28] sm:$0xff] %v7964_v39  ;;  %v8103_v30 = vunpack.c.l.b16 %v7964_v39  ;;  %v8104_v4 = vunpack.c.h.b16 %v7964_v39  ;;  %v14064_v39 = vld [vmem:[%s16842_s11 + $0xf0] sm:$0xf0]  ;;  %v16000_v25 = vld [vmem:[%s16842_s11 + $0x1b4] sm:$0xf0] }
 0x6c7   : > { %v19398_v21 = vpack.c.b16 %v8103_v30, %v8103_v30  ;;  %v19400_v36 = vpack.c.b16 %v8104_v4, %v8104_v4  ;;  %v14067_v30 = vor.u32 %v15971_v9, %v14064_v39  ;;  %v14323_v4 = vor.u32 %v16035_v22, %v14320_v54  ;;  %v14422_v22 = vld [vmem:[%s16842_s11 + $0x398] sm:$0xf] }
 0x6c8   : > { %v14203_v9 = vor.u32 %v16004_v1, %v14200_v35  ;;  %v16064_v54 = vld [vmem:[%s16842_s11 + $0x3b4] sm:$0xf0] }
 0x6c9   : > { %8757 = vmatmul.bf16.vlgmr.msra.gmra.mxu0 %v19398_v21  ;;  %8770 = vmatmul.bf16.vlgmr.msra.gmra.mxu1 %v19400_v36  ;;  %v15968_v35 = vld [vmem:[%s16842_s11 + $0xb4] sm:$0xf0] }
 0x6ca   : > { %8783 = vmatmul.bf16.vlgmr.msra.gmra.mxu2 %v19398_v21  ;;  %8796 = vmatmul.bf16.vlgmr.msra.gmra.mxu3 %v19400_v36 }
 0x6cb   : > { %8853 = vmatpush.bf16.msra.mxu0 %v14191_v8  ;;  %8866 = vmatpush.bf16.msra.mxu1 %v14447_v29  ;;  %v15963_v8 = vld [vmem:[%s16842_s11 + $0x94] sm:$0xf] }
 0x6cc   : > { %8879 = vmatpush.bf16.msra.mxu2 %v14195_v59  ;;  %8892 = vmatpush.bf16.msra.mxu3 %v14451_v10  ;;  %v14032_v29 = vld [vmem:[%s16842_s11 + $0xb0] sm:$0xf0]  ;;  %v14031_v59 = vor.u32 %v15967_v41, %v14030_v31  ;;  %v14287_v10 = vor.u32 %v16031_v16, %v14286_v6  ;;  %v16060_v31 = vld [vmem:[%s16842_s11 + $0x39c] sm:$0xf]  ;;  %v14134_v6 = vld [vmem:[%s16842_s11 + $0x158] sm:$0xf] }
 0x6cd   : > { %v14035_v18 = vor.u32 %v15963_v8, %v14032_v29  ;;  %v14424_v41 = vld [vmem:[%s16842_s11 + $0x3b8] sm:$0xf0]  ;;  %v15992_v16 = vld [vmem:[%s16842_s11 + $0x174] sm:$0xf0] }
 0x6ce   : > { %v14427_v29 = vor.u32 %v16060_v31, %v14424_v41  ;;  %v14262_v31 = vld [vmem:[%s16842_s11 + $0x258] sm:$0xf] }
 0x6cf   : > { %8854 = vmatpush.bf16.msra.mxu0 %v14159_v26  ;;  %8867 = vmatpush.bf16.msra.mxu1 %v14415_v57  ;;  %v15955_v26 = vld [vmem:[%s16842_s11 + $0x54] sm:$0xf]  ;;  %v16024_v41 = vld [vmem:[%s16842_s11 + $0x274] sm:$0xf0] }
 0x6d0   : > { %8880 = vmatpush.bf16.msra.mxu2 %v14163_v40  ;;  %8893 = vmatpush.bf16.msra.mxu3 %v14419_v55  ;;  %v14000_v57 = vld [vmem:[%s16842_s11 + $0x70] sm:$0xf0]  ;;  %v13966_v40 = vld [vmem:[%s16842_s11 + $0x10] sm:$0xf]  ;;  %v13999_v55 = vor.u32 %v15959_v38, %v13998_v5  ;;  %v16052_v5 = vld [vmem:[%s16842_s11 + $0x35c] sm:$0xf] }
 0x6d1   : > { %v14003_v33 = vor.u32 %v15955_v26, %v14000_v57  ;;  %v13967_v13 = vor.u32 %v15951_v47, %v13966_v40  ;;  %v14392_v38 = vld [vmem:[%s16842_s11 + $0x378] sm:$0xf0] }
 0x6d2   : > { %v14395_v57 = vor.u32 %v16052_v5, %v14392_v38  ;;  %v15980_v40 = vld [vmem:[%s16842_s11 + $0x11c] sm:$0xf]  ;;  %v14230_v5 = vld [vmem:[%s16842_s11 + $0x218] sm:$0xf] }
 0x6d3   : > { %8855 = vmatpush.bf16.msra.mxu0 %v14127_v7  ;;  %8868 = vmatpush.bf16.msra.mxu1 %v14383_v44  ;;  %v15947_v7 = vld [vmem:[%s16842_s11 + $0x14] sm:$0xf]  ;;  %v14360_v47 = vld [vmem:[%s16842_s11 + $0x338] sm:$0xf0]  ;;  %v16016_v38 = vld [vmem:[%s16842_s11 + $0x234] sm:$0xf0] }
 0x6d4   : > { %8881 = vmatpush.bf16.msra.mxu2 %v14131_v60  ;;  %8894 = vmatpush.bf16.msra.mxu3 %v14387_v43  ;;  %v13968_v44 = vld [vmem:[%s16842_s11 + $0x30] sm:$0xf0]  ;;  %v14198_v60 = vld [vmem:[%s16842_s11 + $0x1d8] sm:$0xf] }
 0x6d5   : > { %v16008_v43 = vld [vmem:[%s16842_s11 + $0x1f4] sm:$0xf0]  ;;  %v13971_v53 = vor.u32 %v15947_v7, %v13968_v44 }
 0x6d7   : > { %8856 = vmatpush.bf16.msra.mxu0 %v14095_v17  ;;  %8869 = vmatpush.bf16.msra.mxu1 %v14351_v0  ;;  %v16068_v17 = vld [vmem:[%s16842_s11 + $0x3dc] sm:$0xf] }
 0x6d8   : > { %8882 = vmatpush.bf16.msra.mxu2 %v14099_v27  ;;  %8895 = vmatpush.bf16.msra.mxu3 %v14355_v51  ;;  %v14456_v0 = vld [vmem:[%s16842_s11 + $0x3f8] sm:$0xf0]  ;;  %v14199_v27 = vor.u32 %v16008_v43, %v14198_v60  ;;  %v14455_v51 = vor.u32 %v16072_v48, %v14454_v37 }
 0x6d9   : > { %8809 = vmatmul.bf16.vlgmr.msrb.gmra.mxu0 %v19398_v21  ;;  %8822 = vmatmul.bf16.vlgmr.msrb.gmra.mxu1 %v19400_v36  ;;  %v14459_v39 = vor.u32 %v16068_v17, %v14456_v0  ;;  %v15972_v60 = vld [vmem:[%s16842_s11 + $0xdc] sm:$0xf] }
 0x6da   : > { %8835 = vmatmul.bf16.vlgmr.msrb.gmra.mxu2 %v19398_v21  ;;  %8848 = vmatmul.bf16.vlgmr.msrb.gmra.mxu3 %v19400_v36  ;;  %v14072_v43 = vld [vmem:[%s16842_s11 + $0xf8] sm:$0xf0] }
 0x6db   : > { %8857 = vmatpush.bf16.msra.mxu0 %v14063_v2  ;;  %8870 = vmatpush.bf16.msra.mxu1 %v14319_v62  ;;  %v15996_v2 = vld [vmem:[%s16842_s11 + $0x19c] sm:$0xf]  ;;  %v14075_v17 = vor.u32 %v15972_v60, %v14072_v43 }
 0x6dc   : > { %8883 = vmatpush.bf16.msra.mxu2 %v14067_v30  ;;  %8896 = vmatpush.bf16.msra.mxu3 %v14323_v4  ;;  %v14168_v62 = vld [vmem:[%s16842_s11 + $0x1b8] sm:$0xf0]  ;;  %v14167_v30 = vor.u32 %v16000_v25, %v14166_v24  ;;  %v14423_v4 = vor.u32 %v16064_v54, %v14422_v22  ;;  %v14006_v22 = vld [vmem:[%s16842_s11 + $0x58] sm:$0xf] }
 0x6dd   : > { %v14171_v8 = vor.u32 %v15996_v2, %v14168_v62  ;;  %v16036_v37 = vld [vmem:[%s16842_s11 + $0x2dc] sm:$0xf]  ;;  %v15960_v54 = vld [vmem:[%s16842_s11 + $0x74] sm:$0xf0] }
 0x6de   : > { %v14328_v48 = vld [vmem:[%s16842_s11 + $0x2f8] sm:$0xf0] }
 0x6df   : > { %8858 = vmatpush.bf16.msra.mxu0 %v14031_v59  ;;  %8871 = vmatpush.bf16.msra.mxu1 %v14287_v10  ;;  %v15988_v59 = vld [vmem:[%s16842_s11 + $0x15c] sm:$0xf]  ;;  %v14331_v0 = vor.u32 %v16036_v37, %v14328_v48  ;;  %v14654_v37 = vld [vmem:[%s16842_s11 + $0x180] sm:$0xf] }
 0x6e0   : > { %8884 = vmatpush.bf16.msra.mxu2 %v14035_v18  ;;  %8897 = vmatpush.bf16.msra.mxu3 %v14291_v56  ;;  %v14136_v10 = vld [vmem:[%s16842_s11 + $0x178] sm:$0xf0]  ;;  %v14135_v18 = vor.u32 %v15992_v16, %v14134_v6  ;;  %v14391_v56 = vor.u32 %v16056_v14, %v14390_v12  ;;  %v13974_v12 = vld [vmem:[%s16842_s11 + $0x18] sm:$0xf]  ;;  %v16125_v48 = vld [vmem:[%s16842_s11 + $0x19c] sm:$0xf0] }
 0x6e1   : > { %v14139_v26 = vor.u32 %v15988_v59, %v14136_v10  ;;  %v16028_v24 = vld [vmem:[%s16842_s11 + $0x29c] sm:$0xf]  ;;  %v15952_v14 = vld [vmem:[%s16842_s11 + $0x34] sm:$0xf0] }
 0x6e2   : > { %v14296_v25 = vld [vmem:[%s16842_s11 + $0x2b8] sm:$0xf0] }
 0x6e3   : > { %8859 = vmatpush.bf16.msra.mxu0 %v13999_v55  ;;  %8872 = vmatpush.bf16.msra.mxu1 %v14255_v45  ;;  %v14104_v55 = vld [vmem:[%s16842_s11 + $0x138] sm:$0xf0]  ;;  %v14299_v62 = vor.u32 %v16028_v24, %v14296_v25  ;;  %v14912_v24 = vld [vmem:[%s16842_s11 + $0x3a0] sm:$0xf0] }
 0x6e4   : > { %8885 = vmatpush.bf16.msra.mxu2 %v14003_v33  ;;  %8898 = vmatpush.bf16.msra.mxu3 %v14259_v58  ;;  %v16044_v45 = vld [vmem:[%s16842_s11 + $0x31c] sm:$0xf]  ;;  %v14070_v33 = vld [vmem:[%s16842_s11 + $0xd8] sm:$0xf]  ;;  %v14107_v7 = vor.u32 %v15980_v40, %v14104_v55 }
 0x6e5   : > { %v15976_v58 = vld [vmem:[%s16842_s11 + $0xf4] sm:$0xf0]  ;;  %v14363_v44 = vor.u32 %v16044_v45, %v14360_v47  ;;  %v16020_v6 = vld [vmem:[%s16842_s11 + $0x25c] sm:$0xf]  ;;  %v14686_v45 = vld [vmem:[%s16842_s11 + $0x1c0] sm:$0xf] }
 0x6e6   : > { %v14071_v1 = vor.u32 %v15976_v58, %v14070_v33  ;;  %v14264_v16 = vld [vmem:[%s16842_s11 + $0x278] sm:$0xf0]  ;;  %v16133_v47 = vld [vmem:[%s16842_s11 + $0x1dc] sm:$0xf0]  ;;  %v16129_v58 = vld [vmem:[%s16842_s11 + $0x1c4] sm:$0xf] }
 0x6e7   : > { %8860 = vmatpush.bf16.msra.mxu0 %v13967_v13  ;;  %8873 = vmatpush.bf16.msra.mxu1 %v14223_v3  ;;  %v14327_v13 = vor.u32 %v16040_v23, %v14326_v50  ;;  %v14038_v3 = vld [vmem:[%s16842_s11 + $0x98] sm:$0xf]  ;;  %v14267_v10 = vor.u32 %v16020_v6, %v14264_v16  ;;  %v16197_v33 = vld [vmem:[%s16842_s11 + $0x3dc] sm:$0xf0]  ;;  %v16193_v23 = vld [vmem:[%s16842_s11 + $0x3c4] sm:$0xf] }
 0x6e8   : > { %8886 = vmatpush.bf16.msra.mxu2 %v13971_v53  ;;  %8899 = vmatpush.bf16.msra.mxu3 %v14227_v32  ;;  %v14294_v53 = vld [vmem:[%s16842_s11 + $0x298] sm:$0xf] }
 0x6e9   : > { %v16032_v32 = vld [vmem:[%s16842_s11 + $0x2b4] sm:$0xf0] }
 0x6ea   : > { %8861 = vmatmul.bf16.vlgmr.msra.gmra.mxu0 %v19398_v21  ;;  %8874 = vmatmul.bf16.vlgmr.msra.gmra.mxu1 %v19400_v36 }
 0x6eb   : > { %8905 = vmatpush.bf16.msrb.mxu0 %v14199_v27  ;;  %8918 = vmatpush.bf16.msrb.mxu1 %v14455_v51  ;;  %v15964_v27 = vld [vmem:[%s16842_s11 + $0x9c] sm:$0xf] }
 0x6ec   : > { %8931 = vmatpush.bf16.msrb.mxu2 %v14203_v9  ;;  %8944 = vmatpush.bf16.msrb.mxu3 %v14459_v39  ;;  %v14040_v51 = vld [vmem:[%s16842_s11 + $0xb8] sm:$0xf0]  ;;  %v14039_v9 = vor.u32 %v15968_v35, %v14038_v3  ;;  %v14295_v39 = vor.u32 %v16032_v32, %v14294_v53  ;;  %v14655_v35 = vor.u32 %v16125_v48, %v14654_v37  ;;  %v14656_v53 = vld [vmem:[%s16842_s11 + $0x1a0] sm:$0xf0] }
 0x6ed   : > { %8887 = vmatmul.bf16.vlgmr.msra.gmra.mxu2 %v19398_v21  ;;  %8900 = vmatmul.bf16.vlgmr.msra.gmra.mxu3 %v19400_v36  ;;  %v14043_v2 = vor.u32 %v15964_v27, %v14040_v51  ;;  %v16185_v51 = vld [vmem:[%s16842_s11 + $0x384] sm:$0xf] }
 0x6ee   : > { %v14915_v25 = vor.u32 %v16185_v51, %v14912_v24 }
 0x6ef   : > { %8906 = vmatpush.bf16.msrb.mxu0 %v14167_v30  ;;  %8919 = vmatpush.bf16.msrb.mxu1 %v14423_v4  ;;  %v15956_v30 = vld [vmem:[%s16842_s11 + $0x5c] sm:$0xf] }
 0x6f0   : > { %8932 = vmatpush.bf16.msrb.mxu2 %v14171_v8  ;;  %8945 = vmatpush.bf16.msrb.mxu3 %v14427_v29  ;;  %v14008_v4 = vld [vmem:[%s16842_s11 + $0x78] sm:$0xf0]  ;;  %v14007_v8 = vor.u32 %v15960_v54, %v14006_v22  ;;  %v14263_v29 = vor.u32 %v16024_v41, %v14262_v31  ;;  %v14878_v22 = vld [vmem:[%s16842_s11 + $0x340] sm:$0xf]  ;;  %v14624_v41 = vld [vmem:[%s16842_s11 + $0x160] sm:$0xf0] }
 0x6f1   : > { %v14011_v59 = vor.u32 %v15956_v30, %v14008_v4  ;;  %v16177_v30 = vld [vmem:[%s16842_s11 + $0x344] sm:$0xf] }
 0x6f2   : > { %v14880_v4 = vld [vmem:[%s16842_s11 + $0x360] sm:$0xf0] }
 0x6f3   : > { %8907 = vmatpush.bf16.msrb.mxu0 %v14135_v18  ;;  %8920 = vmatpush.bf16.msrb.mxu1 %v14391_v56  ;;  %v15948_v18 = vld [vmem:[%s16842_s11 + $0x1c] sm:$0xf]  ;;  %v14883_v16 = vor.u32 %v16177_v30, %v14880_v4 }
 0x6f4   : > { %8933 = vmatpush.bf16.msrb.mxu2 %v14139_v26  ;;  %8946 = vmatpush.bf16.msrb.mxu3 %v14395_v57  ;;  %v13976_v56 = vld [vmem:[%s16842_s11 + $0x38] sm:$0xf0]  ;;  %v13975_v26 = vor.u32 %v15952_v14, %v13974_v12  ;;  %v14231_v57 = vor.u32 %v16016_v38, %v14230_v5  ;;  %v14590_v14 = vld [vmem:[%s16842_s11 + $0x100] sm:$0xf] }
 0x6f5   : > { %v13979_v42 = vor.u32 %v15948_v18, %v13976_v56  ;;  %v16173_v56 = vld [vmem:[%s16842_s11 + $0x31c] sm:$0xf0] }
 0x6f7   : > { %8908 = vmatpush.bf16.msrb.mxu0 %v14103_v34  ;;  %8921 = vmatpush.bf16.msrb.mxu1 %v14359_v46  ;;  %v14942_v34 = vld [vmem:[%s16842_s11 + $0x3c0] sm:$0xf]  ;;  %v14687_v46 = vor.u32 %v16133_v47, %v14686_v45  ;;  %v19970_v45 = vld [vmem:[#allocation21_spill] sm:$0xff] }
 0x6f8   : > { %8934 = vmatpush.bf16.msrb.mxu2 %v14107_v7  ;;  %8947 = vmatpush.bf16.msrb.mxu3 %v14363_v44  ;;  %v14688_v7 = vld [vmem:[%s16842_s11 + $0x1e0] sm:$0xf0]  ;;  %v14943_v44 = vor.u32 %v16197_v33, %v14942_v34  ;;  %v14558_v33 = vld [vmem:[%s16842_s11 + $0xc0] sm:$0xf] }
 0x6f9   : > { %v14691_v50 = vor.u32 %v16129_v58, %v14688_v7  ;;  %v19971_v34 = vld [vmem:[#allocation31_spill] sm:$0xff] }
 0x6fa   : > { %v16101_v58 = vld [vmem:[%s16842_s11 + $0xdc] sm:$0xf0] }
 0x6fb   : > { %8909 = vmatpush.bf16.msrb.mxu0 %v14071_v1  ;;  %8922 = vmatpush.bf16.msrb.mxu1 %v14327_v13  ;;  %v14910_v1 = vld [vmem:[%s16842_s11 + $0x380] sm:$0xf] }
 0x6fc   : > { %8935 = vmatpush.bf16.msrb.mxu2 %v14075_v17  ;;  %8948 = vmatpush.bf16.msrb.mxu3 %v14331_v0  ;;  %v16189_v17 = vld [vmem:[%s16842_s11 + $0x39c] sm:$0xf0]  ;;  %v16121_v0 = vld [vmem:[%s16842_s11 + $0x184] sm:$0xf] }
 0x6fd   : > { %v14911_v32 = vor.u32 %v16189_v17, %v14910_v1  ;;  %v14659_v27 = vor.u32 %v16121_v0, %v14656_v53  ;;  %v14814_v7 = vld [vmem:[%s16842_s11 + $0x2c0] sm:$0xf]  ;;  %v16161_v1 = vld [vmem:[%s16842_s11 + $0x2c4] sm:$0xf] }
 0x6fe   : > { %v14526_v53 = vld [vmem:[%s16842_s11 + $0x80] sm:$0xf] }
 0x6ff   : > { %8910 = vmatpush.bf16.msrb.mxu0 %v14039_v9  ;;  %8923 = vmatpush.bf16.msrb.mxu1 %v14295_v39  ;;  %v14622_v9 = vld [vmem:[%s16842_s11 + $0x140] sm:$0xf] }
 0x700   : > { %8936 = vmatpush.bf16.msrb.mxu2 %v14043_v2  ;;  %8949 = vmatpush.bf16.msrb.mxu3 %v14299_v62  ;;  %v16117_v39 = vld [vmem:[%s16842_s11 + $0x15c] sm:$0xf0]  ;;  %v16113_v62 = vld [vmem:[%s16842_s11 + $0x144] sm:$0xf] }
 0x701   : > { %v14623_v54 = vor.u32 %v16117_v39, %v14622_v9  ;;  %v16181_v2 = vld [vmem:[%s16842_s11 + $0x35c] sm:$0xf0]  ;;  %v14627_v6 = vor.u32 %v16113_v62, %v14624_v41  ;;  %v14528_v62 = vld [vmem:[%s16842_s11 + $0xa0] sm:$0xf0] }
 0x702   : > { %v14879_v31 = vor.u32 %v16181_v2, %v14878_v22  ;;  %v14782_v39 = vld [vmem:[%s16842_s11 + $0x280] sm:$0xf]  ;;  %v14784_v41 = vld [vmem:[%s16842_s11 + $0x2a0] sm:$0xf0] }
 0x703   : > { %8911 = vmatpush.bf16.msrb.mxu0 %v14007_v8  ;;  %8924 = vmatpush.bf16.msrb.mxu1 %v14263_v29  ;;  %v16157_v22 = vld [vmem:[%s16842_s11 + $0x29c] sm:$0xf0] }
 0x704   : > { %8937 = vmatpush.bf16.msrb.mxu2 %v14011_v59  ;;  %8950 = vmatpush.bf16.msrb.mxu3 %v14267_v10  ;;  %v16109_v59 = vld [vmem:[%s16842_s11 + $0x11c] sm:$0xf0]  ;;  %v14783_v2 = vor.u32 %v16157_v22, %v14782_v39  ;;  %v14662_v39 = vld [vmem:[%s16842_s11 + $0x188] sm:$0xf] }
 0x705   : > { %v14846_v10 = vld [vmem:[%s16842_s11 + $0x300] sm:$0xf]  ;;  %v14591_v18 = vor.u32 %v16109_v59, %v14590_v14  ;;  %v16081_v14 = vld [vmem:[%s16842_s11 + $0x44] sm:$0xf] }
 0x706   : > { %v14496_v59 = vld [vmem:[%s16842_s11 + $0x60] sm:$0xf0] }
 0x707   : > { %8912 = vmatpush.bf16.msrb.mxu0 %v13975_v26  ;;  %8925 = vmatpush.bf16.msrb.mxu1 %v14231_v57  ;;  %v14847_v26 = vor.u32 %v16173_v56, %v14846_v10  ;;  %v14592_v57 = vld [vmem:[%s16842_s11 + $0x120] sm:$0xf0]  ;;  %v19973_v10 = vld [vmem:[#allocation22_spill] sm:$0xff] }
 0x708   : > { %8938 = vmatpush.bf16.msrb.mxu2 %v13979_v42  ;;  %8951 = vmatpush.bf16.msrb.mxu3 %v14235_v15  ;;  %v16169_v42 = vld [vmem:[%s16842_s11 + $0x304] sm:$0xf] }
 0x709   : > { %v14848_v15 = vld [vmem:[%s16842_s11 + $0x320] sm:$0xf0] }
 0x70a   : > { %8913 = vmatmul.bf16.vlgmr.msrb.gmra.mxu0 %v19398_v21  ;;  %8926 = vmatmul.bf16.vlgmr.msrb.gmra.mxu1 %v19400_v36  ;;  %v16145_v56 = vld [vmem:[%s16842_s11 + $0x244] sm:$0xf] }
 0x70b   : > { %8939 = vmatmul.bf16.vlgmr.msrb.gmra.mxu2 %v19398_v21  ;;  %8952 = vmatmul.bf16.vlgmr.msrb.gmra.mxu3 %v19400_v36  ;;  %v14944_v21 = vld [vmem:[%s16842_s11 + $0x3e0] sm:$0xf0] }
 0x70c   : > { %9786 = vmatpush.bf16.msra.mxu0 %v14687_v46  ;;  %v14947_v36 = vor.u32 %v16193_v23, %v14944_v21  ;;  %9799 = vmatpush.bf16.msra.mxu1 %v14943_v44  ;;  %v14559_v44 = vor.u32 %v16101_v58, %v14558_v33  ;;  %v16097_v23 = vld [vmem:[%s16842_s11 + $0xc4] sm:$0xf]  ;;  %v16141_v33 = vld [vmem:[%s16842_s11 + $0x21c] sm:$0xf0] }
 0x70d   : > { %9812 = vmatpush.bf16.msra.mxu2 %v14691_v50  ;;  %v16165_v50 = vld [vmem:[%s16842_s11 + $0x2dc] sm:$0xf0]  ;;  %v14560_v21 = vld [vmem:[%s16842_s11 + $0xe0] sm:$0xf0] }
 0x70e   : > { %9825 = vmatpush.bf16.msra.mxu3 %v14947_v36  ;;  %v14815_v37 = vor.u32 %v16165_v50, %v14814_v7  ;;  %v14563_v48 = vor.u32 %v16097_v23, %v14560_v21  ;;  %v16073_v58 = vld [vmem:[%s16842_s11 + $0x4] sm:$0xf] }
 0x70f   : > { %v16137_v50 = vld [vmem:[%s16842_s11 + $0x204] sm:$0xf] }
 0x710   : > { %9787 = vmatpush.bf16.msra.mxu0 %v14655_v35  ;;  %9800 = vmatpush.bf16.msra.mxu1 %v14911_v32  ;;  %v16093_v32 = vld [vmem:[%s16842_s11 + $0x9c] sm:$0xf0]  ;;  %v14720_v23 = vld [vmem:[%s16842_s11 + $0x220] sm:$0xf0] }
 0x711   : > { %9813 = vmatpush.bf16.msra.mxu2 %v14659_v27  ;;  %v14527_v9 = vor.u32 %v16093_v32, %v14526_v53  ;;  %v16198_v53 = vld [vmem:[%s16842_s11 + $0x3e4] sm:$0xf0]  ;;  %v16130_v32 = vld [vmem:[%s16842_s11 + $0x1cc] sm:$0xf] }
 0x712   : > { %9826 = vmatpush.bf16.msra.mxu3 %v14915_v25 }
 0x714   : > { %9788 = vmatpush.bf16.msra.mxu0 %v14623_v54  ;;  %9801 = vmatpush.bf16.msra.mxu1 %v14879_v31  ;;  %v16089_v54 = vld [vmem:[%s16842_s11 + $0x84] sm:$0xf] }
 0x715   : > { %9814 = vmatpush.bf16.msra.mxu2 %v14627_v6  ;;  %v16153_v31 = vld [vmem:[%s16842_s11 + $0x284] sm:$0xf]  ;;  %v14531_v30 = vor.u32 %v16089_v54, %v14528_v62  ;;  %v14494_v6 = vld [vmem:[%s16842_s11 + $0x40] sm:$0xf] }
 0x716   : > { %9827 = vmatpush.bf16.msra.mxu3 %v14883_v16  ;;  %v14787_v4 = vor.u32 %v16153_v31, %v14784_v41  ;;  %v16085_v16 = vld [vmem:[%s16842_s11 + $0x5c] sm:$0xf0]  ;;  %v16126_v31 = vld [vmem:[%s16842_s11 + $0x1a4] sm:$0xf0] }
 0x717   : > { %v19974_v54 = vld [vmem:[#allocation43_spill] sm:$0xff] }
 0x718   : > { %9789 = vmatpush.bf16.msra.mxu0 %v14591_v18  ;;  %9802 = vmatpush.bf16.msra.mxu1 %v14847_v26  ;;  %v14499_v18 = vor.u32 %v16081_v14, %v14496_v59  ;;  %v14918_v41 = vld [vmem:[%s16842_s11 + $0x388] sm:$0xf] }
 0x71c   : > { %9790 = vmatpush.bf16.msra.mxu0 %v14559_v44  ;;  %9803 = vmatpush.bf16.msra.mxu1 %v14815_v37  ;;  %v14464_v44 = vld [vmem:[%s16842_s11 + $0x20] sm:$0xf0] }
 0x720   : > { %9791 = vmatpush.bf16.msra.mxu0 %v14527_v9  ;;  %9804 = vmatpush.bf16.msra.mxu1 %v14783_v2  ;;  %v14952_v9 = vld [vmem:[%s16842_s11 + $0x3e8] sm:$0xf0] }
 0x746   : > { %v8758_v40 = vpop.f32.mrf.mxu0  ;;  %v8771_v55 = vpop.f32.mrf.mxu1 }
 0x747   : > { %v8772_v8 = vadd.f32 %v8771_v55, %v8758_v40  ;;  %v14595_v40 = vor.u32 %v16105_v20, %v14592_v57  ;;  %v14851_v55 = vor.u32 %v16169_v42, %v14848_v15  ;;  %v14752_v20 = vld [vmem:[%s16842_s11 + $0x260] sm:$0xf0] }
 0x748   : > { %v14755_v26 = vor.u32 %v16145_v56, %v14752_v20 }
 0x749   : > { %v8957_v47 = vadd.f32 %v8772_v8, %v19970_v45  ;;  %9815 = vmatpush.bf16.msra.mxu2 %v14595_v40  ;;  %9828 = vmatpush.bf16.msra.mxu3 %v14851_v55  ;;  %v14750_v8 = vld [vmem:[%s16842_s11 + $0x240] sm:$0xf] }
 0x74a   : > { %v14462_v40 = vld [vmem:[%s16842_s11] sm:$0xf] }
 0x74b   : > { %v8965_v35 = vmul.f32 0.5, %v8957_v47  ;;  %v16077_v55 = vld [vmem:[%s16842_s11 + $0x1c] sm:$0xf0] }
 0x74c   : > { %v14718_v45 = vld [vmem:[%s16842_s11 + $0x200] sm:$0xf] }
 0x74d   : > { %v19546_v60 = vpop.f32.mrf.mxu2  ;;  %v19548_v43 = vpop.f32.mrf.mxu3  ;;  %9816 = vmatpush.bf16.msra.mxu2 %v14563_v48  ;;  %v14719_v7 = vor.u32 %v16141_v33, %v14718_v45  ;;  %v14467_v48 = vor.u32 %v16073_v58, %v14464_v44  ;;  %v19975_v44 = vld [vmem:[#allocation46_spill] sm:$0xff] }
 0x74e   : > { %v8760_v13 = vpop.f32.mrf.mxu0  ;;  %v8773_v3 = vpop.f32.mrf.mxu1  ;;  %v8798_v27 = vadd.f32 %v19548_v43, %v19546_v60  ;;  %v19972_v60 = vld [vmem:[#allocation34_spill] sm:$0xff] }
 0x74f   : > { %v14816_v13 = vld [vmem:[%s16842_s11 + $0x2e0] sm:$0xf0] }
 0x750   : > { %v14819_v3 = vor.u32 %v16161_v1, %v14816_v13  ;;  %v14723_v1 = vor.u32 %v16137_v50, %v14720_v23  ;;  %v14694_v13 = vld [vmem:[%s16842_s11 + $0x1c8] sm:$0xf] }
 0x751   : > { %9817 = vmatpush.bf16.msra.mxu2 %v14531_v30  ;;  %v16122_v30 = vld [vmem:[%s16842_s11 + $0x18c] sm:$0xf]  ;;  %v14598_v23 = vld [vmem:[%s16842_s11 + $0x108] sm:$0xf] }
 0x752   : > { %9829 = vmatpush.bf16.msra.mxu3 %v14819_v3  ;;  %v16134_v3 = vld [vmem:[%s16842_s11 + $0x1e4] sm:$0xf0] }
 0x755   : > { %v8786_v29 = vpop.f32.mrf.mxu2  ;;  %v8799_v12 = vpop.f32.mrf.mxu3  ;;  %9818 = vmatpush.bf16.msra.mxu2 %v14499_v18 }
 0x756   : > { %v8810_v5 = vpop.f32.mrf.mxu0  ;;  %v8823_v38 = vpop.f32.mrf.mxu1  ;;  %v14495_v29 = vor.u32 %v16085_v16, %v14494_v6  ;;  %v16149_v12 = vld [vmem:[%s16842_s11 + $0x25c] sm:$0xf0]  ;;  %9830 = vmatpush.bf16.msra.mxu3 %v14787_v4  ;;  %v14664_v4 = vld [vmem:[%s16842_s11 + $0x1a8] sm:$0xf0] }
 0x757   : > { %v8824_v11 = vadd.f32 %v8823_v38, %v8810_v5  ;;  %v8958_v5 = vadd.f32 %v8798_v27, %v19973_v10  ;;  %v14751_v38 = vor.u32 %v16149_v12, %v14750_v8  ;;  %v14696_v27 = vld [vmem:[%s16842_s11 + $0x1e8] sm:$0xf0]  ;;  %v14667_v8 = vor.u32 %v16122_v30, %v14664_v4  ;;  %v14630_v10 = vld [vmem:[%s16842_s11 + $0x148] sm:$0xf] }
 0x758   : > { %9792 = vmatpush.bf16.msra.mxu0 %v14495_v29  ;;  %v16186_v29 = vld [vmem:[%s16842_s11 + $0x38c] sm:$0xf] }
 0x759   : > { %v8959_v46 = vadd.f32 %v8824_v11, %v19971_v34  ;;  %9805 = vmatpush.bf16.msra.mxu1 %v14751_v38  ;;  %v8966_v47 = vmul.f32 0.5, %v8958_v5  ;;  %9819 = vmatpush.bf16.msra.mxu2 %v14467_v48  ;;  %v14920_v12 = vld [vmem:[%s16842_s11 + $0x3a8] sm:$0xf0]  ;;  %v16118_v5 = vld [vmem:[%s16842_s11 + $0x164] sm:$0xf0] }
 0x75a   : > { %9831 = vmatpush.bf16.msra.mxu3 %v14755_v26  ;;  %v14923_v59 = vor.u32 %v16186_v29, %v14920_v12  ;;  %v14886_v38 = vld [vmem:[%s16842_s11 + $0x348] sm:$0xf]  ;;  %v14631_v20 = vor.u32 %v16118_v5, %v14630_v10  ;;  %v16114_v26 = vld [vmem:[%s16842_s11 + $0x14c] sm:$0xf] }
 0x75b   : > { %v8973_v36 = vmul.f32 0.5, %v8959_v46  ;;  %v14463_v46 = vor.u32 %v16077_v55, %v14462_v40  ;;  %v16162_v4 = vld [vmem:[%s16842_s11 + $0x2cc] sm:$0xf]  ;;  %v14534_v12 = vld [vmem:[%s16842_s11 + $0x88] sm:$0xf] }
 0x75d   : > { %16412 = vtanh.f32 %v8973_v36  ;;  %v8836_v17 = vpop.f32.mrf.mxu2  ;;  %v8849_v0 = vpop.f32.mrf.mxu3  ;;  %9793 = vmatpush.bf16.msra.mxu0 %v14463_v46  ;;  %9806 = vmatpush.bf16.msra.mxu1 %v14719_v7 }
 0x75e   : > { %v8850_v51 = vadd.f32 %v8849_v0, %v8836_v17  ;;  %v8812_v24 = vpop.f32.mrf.mxu0  ;;  %v8825_v25 = vpop.f32.mrf.mxu1  ;;  %16414 = vtanh.f32 %v8965_v35  ;;  %v14950_v35 = vld [vmem:[%s16842_s11 + $0x3c8] sm:$0xf]  ;;  %v14695_v0 = vor.u32 %v16134_v3, %v14694_v13  ;;  %9832 = vmatpush.bf16.msra.mxu3 %v14723_v1  ;;  %v16106_v3 = vld [vmem:[%s16842_s11 + $0x10c] sm:$0xf] }
 0x75f   : > { %v14699_v24 = vor.u32 %v16130_v32, %v14696_v27  ;;  %v16194_v25 = vld [vmem:[%s16842_s11 + $0x3cc] sm:$0xf]  ;;  %v16174_v13 = vld [vmem:[%s16842_s11 + $0x324] sm:$0xf0] }
 0x760   : > { %v8960_v43 = vadd.f32 %v8850_v51, %v19972_v60  ;;  %v14951_v51 = vor.u32 %v16198_v53, %v14950_v35  ;;  %v14955_v62 = vor.u32 %v16194_v25, %v14952_v9  ;;  %v14663_v60 = vor.u32 %v16126_v31, %v14662_v39  ;;  %v14600_v35 = vld [vmem:[%s16842_s11 + $0x128] sm:$0xf0]  ;;  %v14566_v9 = vld [vmem:[%s16842_s11 + $0xc8] sm:$0xf] }
 0x761   : > { %9838 = vmatpush.bf16.msrb.mxu0 %v14695_v0  ;;  %9864 = vmatpush.bf16.msrb.mxu2 %v14699_v24  ;;  %v14603_v53 = vor.u32 %v16106_v3, %v14600_v35  ;;  %v16170_v32 = vld [vmem:[%s16842_s11 + $0x30c] sm:$0xf]  ;;  %v16102_v39 = vld [vmem:[%s16842_s11 + $0xe4] sm:$0xf0] }
 0x762   : > { %v8974_v57 = vmul.f32 0.5, %v8960_v43  ;;  %9851 = vmatpush.bf16.msrb.mxu1 %v14951_v51  ;;  %v16190_v43 = vld [vmem:[%s16842_s11 + $0x3a4] sm:$0xf0]  ;;  %9877 = vmatpush.bf16.msrb.mxu3 %v14955_v62  ;;  %v14856_v27 = vld [vmem:[%s16842_s11 + $0x328] sm:$0xf0]  ;;  %v14567_v62 = vor.u32 %v16102_v39, %v14566_v9 }
 0x763   : > { %v16413_v11 = vpop.eup %16412  ;;  %v14919_v16 = vor.u32 %v16190_v43, %v14918_v41  ;;  %v14859_v24 = vor.u32 %v16170_v32, %v14856_v27  ;;  %v16166_v31 = vld [vmem:[%s16842_s11 + $0x2e4] sm:$0xf0]  ;;  %v16098_v41 = vld [vmem:[%s16842_s11 + $0xcc] sm:$0xf] }
 0x764   : > { %v8977_v34 = vmul.f32 0.5, %v16413_v11  ;;  %v16415_v21 = vpop.eup %16414  ;;  %16416 = vtanh.f32 %v8974_v57  ;;  %v16182_v11 = vld [vmem:[%s16842_s11 + $0x364] sm:$0xf0]  ;;  %v14632_v57 = vld [vmem:[%s16842_s11 + $0x168] sm:$0xf0] }
 0x765   : > { %v8838_v42 = vpop.f32.mrf.mxu2  ;;  %v8851_v15 = vpop.f32.mrf.mxu3  ;;  %v8969_v22 = vmul.f32 0.5, %v16415_v21  ;;  %16418 = vtanh.f32 %v8966_v47  ;;  %9839 = vmatpush.bf16.msrb.mxu0 %v14663_v60  ;;  %9865 = vmatpush.bf16.msrb.mxu2 %v14667_v8  ;;  %v14887_v55 = vor.u32 %v16182_v11, %v14886_v38  ;;  %v14635_v45 = vor.u32 %v16114_v26, %v14632_v57  ;;  %v16178_v47 = vld [vmem:[%s16842_s11 + $0x34c] sm:$0xf]  ;;  %v16110_v21 = vld [vmem:[%s16842_s11 + $0x124] sm:$0xf0] }
 0x766   : > { %v8979_v6 = vadd.f32 0.5, %v8977_v34  ;;  %9852 = vmatpush.bf16.msrb.mxu1 %v14919_v16  ;;  %v14888_v34 = vld [vmem:[%s16842_s11 + $0x368] sm:$0xf0]  ;;  %9878 = vmatpush.bf16.msrb.mxu3 %v14923_v59  ;;  %v14599_v1 = vor.u32 %v16110_v21, %v14598_v23  ;;  %v14790_v59 = vld [vmem:[%s16842_s11 + $0x288] sm:$0xf] }
 0x767   : > { %v8862_v36 = vpop.f32.mrf.mxu0  ;;  %v8875_v37 = vpop.f32.mrf.mxu1  ;;  %v8971_v46 = vadd.f32 0.5, %v8969_v22  ;;  %v14891_v58 = vor.u32 %v16178_v47, %v14888_v34  ;;  %v14822_v22 = vld [vmem:[%s16842_s11 + $0x2c8] sm:$0xf]  ;;  %v14568_v60 = vld [vmem:[%s16842_s11 + $0xe8] sm:$0xf0] }
 0x768   : > { %v8876_v17 = vadd.f32 %v8875_v37, %v8862_v36  ;;  %v14854_v36 = vld [vmem:[%s16842_s11 + $0x308] sm:$0xf]  ;;  %v8991_v48 = vmul.f32 %v8979_v6, %v19345_v28  ;;  %v14823_v43 = vor.u32 %v16166_v31, %v14822_v22  ;;  %v14571_v30 = vor.u32 %v16098_v41, %v14568_v60  ;;  %v14824_v6 = vld [vmem:[%s16842_s11 + $0x2e8] sm:$0xf0]  ;;  %v19977_v41 = vld [vmem:[#allocation61_spill] sm:$0xff] }
 0x769   : > { %9840 = vmatpush.bf16.msrb.mxu0 %v14631_v20  ;;  %9866 = vmatpush.bf16.msrb.mxu2 %v14635_v45  ;;  %v14855_v0 = vor.u32 %v16174_v13, %v14854_v36  ;;  %v14827_v8 = vor.u32 %v16162_v4, %v14824_v6  ;;  %v14536_v20 = vld [vmem:[%s16842_s11 + $0xa8] sm:$0xf0]  ;;  %v14758_v45 = vld [vmem:[%s16842_s11 + $0x248] sm:$0xf] }
 0x76a   : > { %v8961_v2 = vadd.f32 %v8876_v17, %v19974_v54  ;;  %v16417_v14 = vpop.eup %16416  ;;  %9853 = vmatpush.bf16.msrb.mxu1 %v14887_v55  ;;  %9879 = vmatpush.bf16.msrb.mxu3 %v14891_v58  ;;  %v16154_v57 = vld [vmem:[%s16842_s11 + $0x28c] sm:$0xf]  ;;  %v16086_v55 = vld [vmem:[%s16842_s11 + $0x64] sm:$0xf0] }
 0x76b   : > { %v8978_v33 = vmul.f32 0.5, %v16417_v14  ;;  %v16419_v7 = vpop.eup %16418  ;;  %v16094_v14 = vld [vmem:[%s16842_s11 + $0xa4] sm:$0xf0]  ;;  %v16074_v13 = vld [vmem:[%s16842_s11 + $0xc] sm:$0xf] }
 0x76c   : > { %16420 = vtanh.f32 %v8961_v2  ;;  %v8970_v28 = vmul.f32 0.5, %v16419_v7  ;;  %v14535_v38 = vor.u32 %v16094_v14, %v14534_v12  ;;  %v16150_v34 = vld [vmem:[%s16842_s11 + $0x264] sm:$0xf0]  ;;  %v14472_v3 = vld [vmem:[%s16842_s11 + $0x28] sm:$0xf0] }
 0x76d   : > { %v8980_v51 = vadd.f32 0.5, %v8978_v33  ;;  %9841 = vmatpush.bf16.msrb.mxu0 %v14599_v1  ;;  %9867 = vmatpush.bf16.msrb.mxu2 %v14603_v53  ;;  %v14504_v33 = vld [vmem:[%s16842_s11 + $0x68] sm:$0xf0]  ;;  %v14759_v58 = vor.u32 %v16150_v34, %v14758_v45  ;;  %v14470_v21 = vld [vmem:[%s16842_s11 + $0x8] sm:$0xf] }
 0x76e   : > { %9854 = vmatpush.bf16.msrb.mxu1 %v14855_v0  ;;  %v8972_v16 = vadd.f32 0.5, %v8970_v28  ;;  %9880 = vmatpush.bf16.msrb.mxu3 %v14859_v24  ;;  %v16078_v36 = vld [vmem:[%s16842_s11 + $0x24] sm:$0xf0]  ;;  %v16138_v0 = vld [vmem:[%s16842_s11 + $0x20c] sm:$0xf]  ;;  %v19976_v24 = vld [vmem:[#allocation58_spill] sm:$0xff] }
 0x76f   : > { %v8864_v15 = vpop.f32.mrf.mxu0  ;;  %v8877_v40 = vpop.f32.mrf.mxu1  ;;  %v8992_v10 = vmul.f32 %v8980_v51, %v19364_v63  ;;  %v16142_v1 = vld [vmem:[%s16842_s11 + $0x224] sm:$0xf0]  ;;  %v14728_v53 = vld [vmem:[%s16842_s11 + $0x228] sm:$0xf0]  ;;  %v14960_v45 = vld [vmem:[%s16842_s11 + $0x3f0] sm:$0xf0] }
 0x770   : > { %v8888_v18 = vpop.f32.mrf.mxu2  ;;  %v8901_v56 = vpop.f32.mrf.mxu3  ;;  %v14502_v40 = vld [vmem:[%s16842_s11 + $0x48] sm:$0xf]  ;;  %v14731_v28 = vor.u32 %v16138_v0, %v14728_v53 }
 0x771   : > { %v8902_v42 = vadd.f32 %v8901_v56, %v8888_v18  ;;  %9842 = vmatpush.bf16.msrb.mxu0 %v14567_v62  ;;  %v16158_v18 = vld [vmem:[%s16842_s11 + $0x2a4] sm:$0xf0]  ;;  %v16090_v56 = vld [vmem:[%s16842_s11 + $0x8c] sm:$0xf]  ;;  %9868 = vmatpush.bf16.msrb.mxu2 %v14571_v30  ;;  %v14503_v47 = vor.u32 %v16086_v55, %v14502_v40  ;;  %v16195_v55 = vld [vmem:[%s16842_s11 + $0x3d4] sm:$0xf] }
 0x772   : > { %v16421_v37 = vpop.eup %16420  ;;  %9855 = vmatpush.bf16.msrb.mxu1 %v14823_v43  ;;  %v14791_v11 = vor.u32 %v16158_v18, %v14790_v59  ;;  %v14539_v26 = vor.u32 %v16090_v56, %v14536_v20  ;;  %9881 = vmatpush.bf16.msrb.mxu3 %v14827_v8  ;;  %v14702_v56 = vld [vmem:[%s16842_s11 + $0x1d0] sm:$0xf] }
 0x773   : > { %v8962_v50 = vadd.f32 %v8902_v42, %v19975_v44  ;;  %v8993_v17 = vmul.f32 %v16421_v37, %v8971_v46  ;;  %v14792_v42 = vld [vmem:[%s16842_s11 + $0x2a8] sm:$0xf0]  ;;  %v14726_v37 = vld [vmem:[%s16842_s11 + $0x208] sm:$0xf]  ;;  %v16135_v20 = vld [vmem:[%s16842_s11 + $0x1ec] sm:$0xf0] }
 0x774   : > { %v14795_v15 = vor.u32 %v16154_v57, %v14792_v42  ;;  %v16082_v46 = vld [vmem:[%s16842_s11 + $0x4c] sm:$0xf]  ;;  %v14727_v35 = vor.u32 %v16142_v1, %v14726_v37  ;;  %v16131_v57 = vld [vmem:[%s16842_s11 + $0x1d4] sm:$0xf] }
 0x775   : > { %16422 = vtanh.f32 %v8962_v50  ;;  %v19647_v25 = vadd.f32 %v8993_v17, %v8991_v48  ;;  %9843 = vmatpush.bf16.msrb.mxu0 %v14535_v38  ;;  %9869 = vmatpush.bf16.msrb.mxu2 %v14539_v26  ;;  %v14507_v7 = vor.u32 %v16082_v46, %v14504_v33  ;;  %v16146_v44 = vld [vmem:[%s16842_s11 + $0x24c] sm:$0xf]  ;;  %v14471_v48 = vor.u32 %v16078_v36, %v14470_v21  ;;  %v16199_v26 = vld [vmem:[%s16842_s11 + $0x3ec] sm:$0xf0]  ;;  %v14704_v42 = vld [vmem:[%s16842_s11 + $0x1f0] sm:$0xf0] }
 0x776   : > { %9856 = vmatpush.bf16.msrb.mxu1 %v14791_v11  ;;  %v14760_v50 = vld [vmem:[%s16842_s11 + $0x268] sm:$0xf0]  ;;  %9882 = vmatpush.bf16.msrb.mxu3 %v14795_v15  ;;  %v14475_v17 = vor.u32 %v16074_v13, %v14472_v3  ;;  %v14958_v11 = vld [vmem:[%s16842_s11 + $0x3d0] sm:$0xf]  ;;  %v14703_v46 = vor.u32 %v16135_v20, %v14702_v56  ;;  %v16123_v36 = vld [vmem:[%s16842_s11 + $0x194] sm:$0xf] }
 0x777   : > { %v14763_v23 = vor.u32 %v16146_v44, %v14760_v50  ;;  %v14959_v33 = vor.u32 %v16199_v26, %v14958_v11  ;;  %v14707_v44 = vor.u32 %v16131_v57, %v14704_v42  ;;  %v14963_v50 = vor.u32 %v16195_v55, %v14960_v45  ;;  %v16191_v21 = vld [vmem:[%s16842_s11 + $0x3ac] sm:$0xf0]  ;;  %v14672_v37 = vld [vmem:[%s16842_s11 + $0x1b0] sm:$0xf0] }
 0x778   : > { %v8890_v54 = vpop.f32.mrf.mxu2  ;;  %v8903_v2 = vpop.f32.mrf.mxu3  ;;  %v14928_v1 = vld [vmem:[%s16842_s11 + $0x3b0] sm:$0xf0]  ;;  %v14675_v0 = vor.u32 %v16123_v36, %v14672_v37  ;;  %v14542_v57 = vld [vmem:[%s16842_s11 + $0x90] sm:$0xf] }
 0x779   : > { %9844 = vmatpush.bf16.msrb.mxu0 %v14503_v47  ;;  %9870 = vmatpush.bf16.msrb.mxu2 %v14507_v7  ;;  %v16127_v7 = vld [vmem:[%s16842_s11 + $0x1ac] sm:$0xf0]  ;;  %v16163_v56 = vld [vmem:[%s16842_s11 + $0x2d4] sm:$0xf] }
 0x77a   : > { %9857 = vmatpush.bf16.msrb.mxu1 %v14759_v58  ;;  %9883 = vmatpush.bf16.msrb.mxu3 %v14763_v23  ;;  %v14670_v58 = vld [vmem:[%s16842_s11 + $0x190] sm:$0xf]  ;;  %v14832_v20 = vld [vmem:[%s16842_s11 + $0x2f0] sm:$0xf0] }
 0x77b   : > { %v16423_v29 = vpop.eup %16422  ;;  %v14926_v23 = vld [vmem:[%s16842_s11 + $0x390] sm:$0xf]  ;;  %v14671_v13 = vor.u32 %v16127_v7, %v14670_v58  ;;  %v16155_v58 = vld [vmem:[%s16842_s11 + $0x294] sm:$0xf] }
 0x77c   : > { %v8994_v5 = vmul.f32 %v16423_v29, %v8972_v16  ;;  %v14927_v3 = vor.u32 %v16191_v21, %v14926_v23  ;;  %v16095_v42 = vld [vmem:[%s16842_s11 + $0xac] sm:$0xf0]  ;;  %v14800_v7 = vld [vmem:[%s16842_s11 + $0x2b0] sm:$0xf0] }
 0x77d   : > { %9845 = vmatpush.bf16.msrb.mxu0 %v14471_v48  ;;  %9871 = vmatpush.bf16.msrb.mxu2 %v14475_v17  ;;  %v16187_v48 = vld [vmem:[%s16842_s11 + $0x394] sm:$0xf]  ;;  %v16119_v17 = vld [vmem:[%s16842_s11 + $0x16c] sm:$0xf0]  ;;  %v14803_v37 = vor.u32 %v16155_v58, %v14800_v7  ;;  %v14902_v58 = vld [vmem:[%s16842_s11 + $0x358] sm:$0xf] }
 0x77e   : > { %v19666_v63 = vadd.f32 %v8994_v5, %v8992_v10  ;;  %9858 = vmatpush.bf16.msrb.mxu1 %v14727_v35  ;;  %9884 = vmatpush.bf16.msrb.mxu3 %v14731_v28  ;;  %v14638_v35 = vld [vmem:[%s16842_s11 + $0x150] sm:$0xf]  ;;  %v14931_v53 = vor.u32 %v16187_v48, %v14928_v1  ;;  %v16115_v28 = vld [vmem:[%s16842_s11 + $0x154] sm:$0xf]  ;;  %v16184_v7 = vld [vmem:[%s16842_s11 + $0x374] sm:$0xf0] }
 0x77f   : > { %v14798_v55 = vld [vmem:[%s16842_s11 + $0x290] sm:$0xf] }
 0x780   : > { %v16159_v45 = vld [vmem:[%s16842_s11 + $0x2ac] sm:$0xf0] }
 0x781   : > { %v14510_v23 = vld [vmem:[%s16842_s11 + $0x50] sm:$0xf] }
 0x782   : > { %v16087_v21 = vld [vmem:[%s16842_s11 + $0x6c] sm:$0xf0] }
 0x783   : > { %v14766_v48 = vld [vmem:[%s16842_s11 + $0x250] sm:$0xf] }
 0x784   : > { %v16151_v1 = vld [vmem:[%s16842_s11 + $0x26c] sm:$0xf0] }
 0x787   : > { %v8914_v32 = vpop.f32.mrf.mxu0  ;;  %v8927_v27 = vpop.f32.mrf.mxu1 }
 0x788   : > { %v8928_v51 = vadd.f32 %v8927_v27, %v8914_v32  ;;  %v14894_v32 = vld [vmem:[%s16842_s11 + $0x350] sm:$0xf] }
 0x789   : > { %v16183_v27 = vld [vmem:[%s16842_s11 + $0x36c] sm:$0xf0] }
 0x78a   : > { %v8963_v9 = vadd.f32 %v8928_v51, %v19976_v24  ;;  %v14640_v51 = vld [vmem:[%s16842_s11 + $0x170] sm:$0xf0] }
 0x78b   : > { %v16179_v24 = vld [vmem:[%s16842_s11 + $0x354] sm:$0xf] }
 0x78c   : > { %v8983_v39 = vmul.f32 0.5, %v8963_v9  ;;  %v14896_v9 = vld [vmem:[%s16842_s11 + $0x370] sm:$0xf0] }
 0x78e   : > { %v8940_v22 = vpop.f32.mrf.mxu2  ;;  %v8953_v54 = vpop.f32.mrf.mxu3  ;;  %16424 = vtanh.f32 %v8983_v39  ;;  %v14639_v39 = vor.u32 %v16119_v17, %v14638_v35  ;;  %v16147_v35 = vld [vmem:[%s16842_s11 + $0x254] sm:$0xf] }
 0x78f   : > { %v8954_v2 = vadd.f32 %v8953_v54, %v8940_v22  ;;  %v8916_v62 = vpop.f32.mrf.mxu0  ;;  %v8929_v31 = vpop.f32.mrf.mxu1  ;;  %v14895_v22 = vor.u32 %v16183_v27, %v14894_v32  ;;  %v14606_v54 = vld [vmem:[%s16842_s11 + $0x110] sm:$0xf]  ;;  %v14768_v17 = vld [vmem:[%s16842_s11 + $0x270] sm:$0xf0]  ;;  %v14767_v32 = vor.u32 %v16151_v1, %v14766_v48  ;;  %v14614_v48 = vld [vmem:[%s16842_s11 + $0x118] sm:$0xf] }
 0x790   : > { %v14643_v62 = vor.u32 %v16115_v28, %v14640_v51  ;;  %v14899_v31 = vor.u32 %v16179_v24, %v14896_v9  ;;  %v16079_v27 = vld [vmem:[%s16842_s11 + $0x2c] sm:$0xf0]  ;;  %v14771_v9 = vor.u32 %v16147_v35, %v14768_v17  ;;  %v16112_v1 = vld [vmem:[%s16842_s11 + $0x134] sm:$0xf0] }
 0x791   : > { %v8964_v60 = vadd.f32 %v8954_v2, %v19977_v41  ;;  %v16111_v2 = vld [vmem:[%s16842_s11 + $0x12c] sm:$0xf0]  ;;  %v14870_v35 = vld [vmem:[%s16842_s11 + $0x318] sm:$0xf] }
 0x792   : > { %v14862_v41 = vld [vmem:[%s16842_s11 + $0x310] sm:$0xf]  ;;  %v16176_v17 = vld [vmem:[%s16842_s11 + $0x334] sm:$0xf0] }
 0x793   : > { %v8984_v43 = vmul.f32 0.5, %v8964_v60  ;;  %v16175_v60 = vld [vmem:[%s16842_s11 + $0x32c] sm:$0xf0] }
 0x794   : > { %v16425_v30 = vpop.eup %16424  ;;  %v14734_v28 = vld [vmem:[%s16842_s11 + $0x210] sm:$0xf] }
 0x795   : > { %16426 = vtanh.f32 %v8984_v43  ;;  %v8987_v16 = vmul.f32 0.5, %v16425_v30  ;;  %v16107_v43 = vld [vmem:[%s16842_s11 + $0x114] sm:$0xf]  ;;  %v16143_v51 = vld [vmem:[%s16842_s11 + $0x22c] sm:$0xf0] }
 0x796   : > { %v8942_v4 = vpop.f32.mrf.mxu2  ;;  %v8955_v6 = vpop.f32.mrf.mxu3  ;;  %16428 = vtanh.f32 %v19647_v25  ;;  %v14608_v30 = vld [vmem:[%s16842_s11 + $0x130] sm:$0xf0] }
 0x797   : > { %16430 = vtanh.f32 %v19666_v63  ;;  %v8989_v29 = vadd.f32 0.5, %v8987_v16  ;;  %v16171_v4 = vld [vmem:[%s16842_s11 + $0x314] sm:$0xf]  ;;  %v14607_v16 = vor.u32 %v16111_v2, %v14606_v54 }
 0x798   : > { %v14864_v6 = vld [vmem:[%s16842_s11 + $0x330] sm:$0xf0] }
 0x799   : > { %v16139_v54 = vld [vmem:[%s16842_s11 + $0x214] sm:$0xf] }
 0x79a   : > { %v14736_v2 = vld [vmem:[%s16842_s11 + $0x230] sm:$0xf0] }
 0x79b   : > { %v16427_v8 = vpop.eup %16426 }
 0x79c   : > { %v8988_v12 = vmul.f32 0.5, %v16427_v8  ;;  %v16429_v14 = vpop.eup %16428  ;;  %v14863_v8 = vor.u32 %v16175_v60, %v14862_v41  ;;  %v14966_v41 = vld [vmem:[%s16842_s11 + $0x3d8] sm:$0xf] }
 0x79d   : > { %v16431_v10 = vpop.eup %16430  ;;  %v8999_v5 = vmul.f32 %v16429_v14, %v8989_v29  ;;  %v14574_v29 = vld [vmem:[%s16842_s11 + $0xd0] sm:$0xf]  ;;  %v14611_v14 = vor.u32 %v16107_v43, %v14608_v30  ;;  %v16200_v60 = vld [vmem:[%s16842_s11 + $0x3f4] sm:$0xf0]  ;;  %v16132_v43 = vld [vmem:[%s16842_s11 + $0x1dc] sm:$0xf] }
 0x79e   : > { %v8990_v59 = vadd.f32 0.5, %v8988_v12  ;;  %v16103_v12 = vld [vmem:[%s16842_s11 + $0xec] sm:$0xf0] }
 0x79f   : > { %v14575_v11 = vor.u32 %v16103_v12, %v14574_v29  ;;  %v14739_v12 = vor.u32 %v16139_v54, %v14736_v2  ;;  %v14838_v54 = vld [vmem:[%s16842_s11 + $0x2d8] sm:$0xf] }
 0x7a0   : > { %v9000_v38 = vmul.f32 %v16431_v10, %v8990_v59  ;;  %v14867_v59 = vor.u32 %v16171_v4, %v14864_v6  ;;  %v14830_v10 = vld [vmem:[%s16842_s11 + $0x2d0] sm:$0xf]  ;;  %v14735_v4 = vor.u32 %v16143_v51, %v14734_v28  ;;  %v14712_v6 = vld [vmem:[%s16842_s11 + $0x1f8] sm:$0xf0]  ;;  %v14615_v28 = vor.u32 %v16112_v1, %v14614_v48  ;;  %v16168_v2 = vld [vmem:[%s16842_s11 + $0x2f4] sm:$0xf0] }
 0x7a1   : > { %v14871_v51 = vor.u32 %v16176_v17, %v14870_v35  ;;  %v16140_v48 = vld [vmem:[%s16842_s11 + $0x21c] sm:$0xf] }
 0x7a2   : > { %v9001_v18 = vpack.c.bf16 %v9000_v38, %v8999_v5  ;;  %v16167_v5 = vld [vmem:[%s16842_s11 + $0x2ec] sm:$0xf0]  ;;  %v16099_v38 = vld [vmem:[%s16842_s11 + $0xd4] sm:$0xf]  ;;  %v14744_v1 = vld [vmem:[%s16842_s11 + $0x238] sm:$0xf0] }
 0x7a3   : > { %v14831_v26 = vor.u32 %v16167_v5, %v14830_v10  ;;  %v14678_v10 = vld [vmem:[%s16842_s11 + $0x198] sm:$0xf]  ;;  %v14747_v17 = vor.u32 %v16140_v48, %v14744_v1 }
 0x7a4   : > { %9002 = vst [vmem:[#allocation3 + $0x30] sm:$0xff] %v9001_v18  ;;  %v9140_v15 = vunpack.c.l.b16 %v9001_v18  ;;  %v9141_v40 = vunpack.c.h.b16 %v9001_v18  ;;  %v14576_v18 = vld [vmem:[%s16842_s11 + $0xf0] sm:$0xf0]  ;;  %v16128_v5 = vld [vmem:[%s16842_s11 + $0x1b4] sm:$0xf0] }
 0x7a6   : > { %v19696_v47 = vpack.c.b16 %v9140_v15, %v9140_v15  ;;  %v19698_v34 = vpack.c.b16 %v9141_v40, %v9141_v40  ;;  %v14579_v15 = vor.u32 %v16099_v38, %v14576_v18  ;;  %v14835_v40 = vor.u32 %v16163_v56, %v14832_v20  ;;  %v14934_v56 = vld [vmem:[%s16842_s11 + $0x398] sm:$0xf] }
 0x7a7   : > { %v14715_v38 = vor.u32 %v16132_v43, %v14712_v6  ;;  %v16192_v20 = vld [vmem:[%s16842_s11 + $0x3b4] sm:$0xf0] }
 0x7a8   : > { %9794 = vmatmul.bf16.vlgmr.msra.gmra.mxu0 %v19696_v47  ;;  %9807 = vmatmul.bf16.vlgmr.msra.gmra.mxu1 %v19698_v34  ;;  %v16096_v6 = vld [vmem:[%s16842_s11 + $0xb4] sm:$0xf0] }
 0x7a9   : > { %9820 = vmatmul.bf16.vlgmr.msra.gmra.mxu2 %v19696_v47  ;;  %9833 = vmatmul.bf16.vlgmr.msra.gmra.mxu3 %v19698_v34 }
 0x7aa   : > { %9890 = vmatpush.bf16.msra.mxu0 %v14703_v46  ;;  %9903 = vmatpush.bf16.msra.mxu1 %v14959_v33  ;;  %v16091_v46 = vld [vmem:[%s16842_s11 + $0x94] sm:$0xf] }
 0x7ab   : > { %9916 = vmatpush.bf16.msra.mxu2 %v14707_v44  ;;  %9929 = vmatpush.bf16.msra.mxu3 %v14963_v50  ;;  %v14544_v33 = vld [vmem:[%s16842_s11 + $0xb0] sm:$0xf0]  ;;  %v14543_v44 = vor.u32 %v16095_v42, %v14542_v57  ;;  %v14799_v50 = vor.u32 %v16159_v45, %v14798_v55  ;;  %v16188_v57 = vld [vmem:[%s16842_s11 + $0x39c] sm:$0xf]  ;;  %v14646_v55 = vld [vmem:[%s16842_s11 + $0x158] sm:$0xf] }
 0x7ac   : > { %v14547_v36 = vor.u32 %v16091_v46, %v14544_v33  ;;  %v14936_v42 = vld [vmem:[%s16842_s11 + $0x3b8] sm:$0xf0]  ;;  %v16120_v45 = vld [vmem:[%s16842_s11 + $0x174] sm:$0xf0] }
 0x7ad   : > { %v14939_v33 = vor.u32 %v16188_v57, %v14936_v42  ;;  %v14774_v57 = vld [vmem:[%s16842_s11 + $0x258] sm:$0xf] }
 0x7ae   : > { %9891 = vmatpush.bf16.msra.mxu0 %v14671_v13  ;;  %9904 = vmatpush.bf16.msra.mxu1 %v14927_v3  ;;  %v16083_v13 = vld [vmem:[%s16842_s11 + $0x54] sm:$0xf]  ;;  %v16152_v42 = vld [vmem:[%s16842_s11 + $0x274] sm:$0xf0] }
 0x7af   : > { %9917 = vmatpush.bf16.msra.mxu2 %v14675_v0  ;;  %9930 = vmatpush.bf16.msra.mxu3 %v14931_v53  ;;  %v14512_v3 = vld [vmem:[%s16842_s11 + $0x70] sm:$0xf0]  ;;  %v14478_v0 = vld [vmem:[%s16842_s11 + $0x10] sm:$0xf]  ;;  %v14511_v53 = vor.u32 %v16087_v21, %v14510_v23  ;;  %v16180_v23 = vld [vmem:[%s16842_s11 + $0x35c] sm:$0xf] }
 0x7b0   : > { %v14515_v24 = vor.u32 %v16083_v13, %v14512_v3  ;;  %v14479_v30 = vor.u32 %v16079_v27, %v14478_v0  ;;  %v14904_v21 = vld [vmem:[%s16842_s11 + $0x378] sm:$0xf0] }
 0x7b1   : > { %v14907_v3 = vor.u32 %v16180_v23, %v14904_v21  ;;  %v16108_v0 = vld [vmem:[%s16842_s11 + $0x11c] sm:$0xf]  ;;  %v14742_v23 = vld [vmem:[%s16842_s11 + $0x218] sm:$0xf] }
 0x7b2   : > { %9892 = vmatpush.bf16.msra.mxu0 %v14639_v39  ;;  %9905 = vmatpush.bf16.msra.mxu1 %v14895_v22  ;;  %v16075_v39 = vld [vmem:[%s16842_s11 + $0x14] sm:$0xf]  ;;  %v14872_v27 = vld [vmem:[%s16842_s11 + $0x338] sm:$0xf0]  ;;  %v16144_v21 = vld [vmem:[%s16842_s11 + $0x234] sm:$0xf0] }
 0x7b3   : > { %9918 = vmatpush.bf16.msra.mxu2 %v14643_v62  ;;  %9931 = vmatpush.bf16.msra.mxu3 %v14899_v31  ;;  %v14480_v22 = vld [vmem:[%s16842_s11 + $0x30] sm:$0xf0]  ;;  %v14710_v62 = vld [vmem:[%s16842_s11 + $0x1d8] sm:$0xf] }
 0x7b4   : > { %v16136_v31 = vld [vmem:[%s16842_s11 + $0x1f4] sm:$0xf0]  ;;  %v14483_v29 = vor.u32 %v16075_v39, %v14480_v22 }
 0x7b6   : > { %9893 = vmatpush.bf16.msra.mxu0 %v14607_v16  ;;  %9906 = vmatpush.bf16.msra.mxu1 %v14863_v8  ;;  %v16196_v16 = vld [vmem:[%s16842_s11 + $0x3dc] sm:$0xf] }
 0x7b7   : > { %9919 = vmatpush.bf16.msra.mxu2 %v14611_v14  ;;  %9932 = vmatpush.bf16.msra.mxu3 %v14867_v59  ;;  %v14968_v8 = vld [vmem:[%s16842_s11 + $0x3f8] sm:$0xf0]  ;;  %v14711_v14 = vor.u32 %v16136_v31, %v14710_v62  ;;  %v14967_v59 = vor.u32 %v16200_v60, %v14966_v41 }
 0x7b8   : > { %9846 = vmatmul.bf16.vlgmr.msrb.gmra.mxu0 %v19696_v47  ;;  %9859 = vmatmul.bf16.vlgmr.msrb.gmra.mxu1 %v19698_v34  ;;  %v14971_v18 = vor.u32 %v16196_v16, %v14968_v8  ;;  %v16100_v62 = vld [vmem:[%s16842_s11 + $0xdc] sm:$0xf] }
 0x7b9   : > { %9872 = vmatmul.bf16.vlgmr.msrb.gmra.mxu2 %v19696_v47  ;;  %9885 = vmatmul.bf16.vlgmr.msrb.gmra.mxu3 %v19698_v34  ;;  %v14584_v31 = vld [vmem:[%s16842_s11 + $0xf8] sm:$0xf0] }
 0x7ba   : > { %9894 = vmatpush.bf16.msra.mxu0 %v14575_v11  ;;  %9907 = vmatpush.bf16.msra.mxu1 %v14831_v26  ;;  %v16124_v11 = vld [vmem:[%s16842_s11 + $0x19c] sm:$0xf]  ;;  %v14587_v16 = vor.u32 %v16100_v62, %v14584_v31 }
 0x7bb   : > { %9920 = vmatpush.bf16.msra.mxu2 %v14579_v15  ;;  %9933 = vmatpush.bf16.msra.mxu3 %v14835_v40  ;;  %v14680_v26 = vld [vmem:[%s16842_s11 + $0x1b8] sm:$0xf0]  ;;  %v14679_v15 = vor.u32 %v16128_v5, %v14678_v10  ;;  %v14935_v40 = vor.u32 %v16192_v20, %v14934_v56  ;;  %v14518_v56 = vld [vmem:[%s16842_s11 + $0x58] sm:$0xf] }
 0x7bc   : > { %v14683_v46 = vor.u32 %v16124_v11, %v14680_v26  ;;  %v16164_v41 = vld [vmem:[%s16842_s11 + $0x2dc] sm:$0xf]  ;;  %v16088_v20 = vld [vmem:[%s16842_s11 + $0x74] sm:$0xf0] }
 0x7bd   : > { %v14840_v60 = vld [vmem:[%s16842_s11 + $0x2f8] sm:$0xf0] }
 0x7be   : > { %9895 = vmatpush.bf16.msra.mxu0 %v14543_v44  ;;  %9908 = vmatpush.bf16.msra.mxu1 %v14799_v50  ;;  %v16116_v44 = vld [vmem:[%s16842_s11 + $0x15c] sm:$0xf]  ;;  %v14843_v8 = vor.u32 %v16164_v41, %v14840_v60  ;;  %v19980_v41 = vld [vmem:[#allocation33_spill] sm:$0xff] }
 0x7bf   : > { %9921 = vmatpush.bf16.msra.mxu2 %v14547_v36  ;;  %9934 = vmatpush.bf16.msra.mxu3 %v14803_v37  ;;  %v14648_v50 = vld [vmem:[%s16842_s11 + $0x178] sm:$0xf0]  ;;  %v14647_v36 = vor.u32 %v16120_v45, %v14646_v55  ;;  %v14903_v37 = vor.u32 %v16184_v7, %v14902_v58  ;;  %v14486_v58 = vld [vmem:[%s16842_s11 + $0x18] sm:$0xf] }
 0x7c0   : > { %v14651_v13 = vor.u32 %v16116_v44, %v14648_v50  ;;  %v16156_v10 = vld [vmem:[%s16842_s11 + $0x29c] sm:$0xf]  ;;  %v16080_v7 = vld [vmem:[%s16842_s11 + $0x34] sm:$0xf0] }
 0x7c1   : > { %v14808_v5 = vld [vmem:[%s16842_s11 + $0x2b8] sm:$0xf0] }
 0x7c2   : > { %9896 = vmatpush.bf16.msra.mxu0 %v14511_v53  ;;  %9909 = vmatpush.bf16.msra.mxu1 %v14767_v32  ;;  %v14616_v53 = vld [vmem:[%s16842_s11 + $0x138] sm:$0xf0]  ;;  %v14811_v26 = vor.u32 %v16156_v10, %v14808_v5  ;;  %v19984_v5 = vld [vmem:[#allocation36_spill] sm:$0xff] }
 0x7c3   : > { %9922 = vmatpush.bf16.msra.mxu2 %v14515_v24  ;;  %9935 = vmatpush.bf16.msra.mxu3 %v14771_v9  ;;  %v16172_v32 = vld [vmem:[%s16842_s11 + $0x31c] sm:$0xf]  ;;  %v14582_v24 = vld [vmem:[%s16842_s11 + $0xd8] sm:$0xf]  ;;  %v14619_v39 = vor.u32 %v16108_v0, %v14616_v53 }
 0x7c4   : > { %v16104_v9 = vld [vmem:[%s16842_s11 + $0xf4] sm:$0xf0]  ;;  %v14875_v22 = vor.u32 %v16172_v32, %v14872_v27  ;;  %v16148_v55 = vld [vmem:[%s16842_s11 + $0x25c] sm:$0xf] }
 0x7c5   : > { %v14583_v43 = vor.u32 %v16104_v9, %v14582_v24  ;;  %v14776_v45 = vld [vmem:[%s16842_s11 + $0x278] sm:$0xf0]  ;;  %v19978_v24 = vld [vmem:[#allocation24_spill] sm:$0xff] }
 0x7c6   : > { %9897 = vmatpush.bf16.msra.mxu0 %v14479_v30  ;;  %9910 = vmatpush.bf16.msra.mxu1 %v14735_v4  ;;  %v14839_v30 = vor.u32 %v16168_v2, %v14838_v54  ;;  %v14550_v4 = vld [vmem:[%s16842_s11 + $0x98] sm:$0xf]  ;;  %v14779_v50 = vor.u32 %v16148_v55, %v14776_v45  ;;  %v19979_v9 = vld [vmem:[#allocation32_spill] sm:$0xff] }
 0x7c7   : > { %9923 = vmatpush.bf16.msra.mxu2 %v14483_v29  ;;  %9936 = vmatpush.bf16.msra.mxu3 %v14739_v12  ;;  %v14806_v29 = vld [vmem:[%s16842_s11 + $0x298] sm:$0xf] }
 0x7c8   : > { %v16160_v12 = vld [vmem:[%s16842_s11 + $0x2b4] sm:$0xf0] }
 0x7c9   : > { %9898 = vmatmul.bf16.vlgmr.msra.gmra.mxu0 %v19696_v47  ;;  %9911 = vmatmul.bf16.vlgmr.msra.gmra.mxu1 %v19698_v34 }
 0x7ca   : > { %9942 = vmatpush.bf16.msrb.mxu0 %v14711_v14  ;;  %9955 = vmatpush.bf16.msrb.mxu1 %v14967_v59  ;;  %v16092_v14 = vld [vmem:[%s16842_s11 + $0x9c] sm:$0xf] }
 0x7cb   : > { %9968 = vmatpush.bf16.msrb.mxu2 %v14715_v38  ;;  %9981 = vmatpush.bf16.msrb.mxu3 %v14971_v18  ;;  %v14552_v59 = vld [vmem:[%s16842_s11 + $0xb8] sm:$0xf0]  ;;  %v14551_v38 = vor.u32 %v16096_v6, %v14550_v4  ;;  %v14807_v18 = vor.u32 %v16160_v12, %v14806_v29  ;;  %v19983_v6 = vld [vmem:[#allocation23_spill] sm:$0xff] }
 0x7cc   : > { %9924 = vmatmul.bf16.vlgmr.msra.gmra.mxu2 %v19696_v47  ;;  %9937 = vmatmul.bf16.vlgmr.msra.gmra.mxu3 %v19698_v34  ;;  %v14555_v11 = vor.u32 %v16092_v14, %v14552_v59 }
 0x7ce   : > { %9943 = vmatpush.bf16.msrb.mxu0 %v14679_v15  ;;  %9956 = vmatpush.bf16.msrb.mxu1 %v14935_v40  ;;  %v16084_v15 = vld [vmem:[%s16842_s11 + $0x5c] sm:$0xf] }
 0x7cf   : > { %9969 = vmatpush.bf16.msrb.mxu2 %v14683_v46  ;;  %9982 = vmatpush.bf16.msrb.mxu3 %v14939_v33  ;;  %v14520_v40 = vld [vmem:[%s16842_s11 + $0x78] sm:$0xf0]  ;;  %v14519_v46 = vor.u32 %v16088_v20, %v14518_v56  ;;  %v14775_v33 = vor.u32 %v16152_v42, %v14774_v57  ;;  %v19986_v57 = vld [vmem:[#allocation44_spill] sm:$0xff] }
 0x7d0   : > { %v14523_v44 = vor.u32 %v16084_v15, %v14520_v40  ;;  %v1482_v42 = vadd.f32 %v19986_v57, %v17457_v61 }
 0x7d2   : > { %9944 = vmatpush.bf16.msrb.mxu0 %v14647_v36  ;;  %9957 = vmatpush.bf16.msrb.mxu1 %v14903_v37  ;;  %v16076_v36 = vld [vmem:[%s16842_s11 + $0x1c] sm:$0xf] }
 0x7d3   : > { %9970 = vmatpush.bf16.msrb.mxu2 %v14651_v13  ;;  %9983 = vmatpush.bf16.msrb.mxu3 %v14907_v3  ;;  %v14488_v37 = vld [vmem:[%s16842_s11 + $0x38] sm:$0xf0]  ;;  %v14487_v13 = vor.u32 %v16080_v7, %v14486_v58  ;;  %v14743_v3 = vor.u32 %v16144_v21, %v14742_v23  ;;  %v19987_v7 = vld [vmem:[#allocation45_spill] sm:$0xff] }
 0x7d4   : > { %v14491_v35 = vor.u32 %v16076_v36, %v14488_v37  ;;  %v19988_v36 = vld [vmem:[#allocation47_spill] sm:$0xff] }
 0x7d5   : > { %v1540_v37 = vadd.f32 %v19988_v36, %v17484_v49 }
 0x7d6   : > { %9945 = vmatpush.bf16.msrb.mxu0 %v14615_v28  ;;  %9958 = vmatpush.bf16.msrb.mxu1 %v14871_v51 }
 0x7d7   : > { %9971 = vmatpush.bf16.msrb.mxu2 %v14619_v39  ;;  %9984 = vmatpush.bf16.msrb.mxu3 %v14875_v22  ;;  %v1366_v39 = vadd.f32 %v19979_v9, %v19978_v24 }
 0x7d9   : > { %v1395_v60 = vadd.f32 %v19980_v41, %v1366_v39 }
 0x7da   : > { %9946 = vmatpush.bf16.msrb.mxu0 %v14583_v43  ;;  %9959 = vmatpush.bf16.msrb.mxu1 %v14839_v30  ;;  %v19981_v30 = vld [vmem:[#allocation26_spill] sm:$0xff] }
 0x7db   : > { %9972 = vmatpush.bf16.msrb.mxu2 %v14587_v16  ;;  %9985 = vmatpush.bf16.msrb.mxu3 %v14843_v8 }
 0x7de   : > { %9947 = vmatpush.bf16.msrb.mxu0 %v14551_v38  ;;  %9960 = vmatpush.bf16.msrb.mxu1 %v14807_v18 }
 0x7df   : > { %9973 = vmatpush.bf16.msrb.mxu2 %v14555_v11  ;;  %9986 = vmatpush.bf16.msrb.mxu3 %v14811_v26  ;;  %v19985_v11 = vld [vmem:[#allocation25_spill] sm:$0xff] }
 0x7e2   : > { %9948 = vmatpush.bf16.msrb.mxu0 %v14519_v46  ;;  %9961 = vmatpush.bf16.msrb.mxu1 %v14775_v33 }
 0x7e3   : > { %9974 = vmatpush.bf16.msrb.mxu2 %v14523_v44  ;;  %9987 = vmatpush.bf16.msrb.mxu3 %v14779_v50  ;;  %v1511_v44 = vadd.f32 %v19987_v7, %v1482_v42 }
 0x7e6   : > { %9949 = vmatpush.bf16.msrb.mxu0 %v14487_v13  ;;  %9962 = vmatpush.bf16.msrb.mxu1 %v14743_v3 }
 0x7e7   : > { %9975 = vmatpush.bf16.msrb.mxu2 %v14491_v35  ;;  %9988 = vmatpush.bf16.msrb.mxu3 %v14747_v17  ;;  %v19989_v35 = vld [vmem:[#allocation48_spill] sm:$0xff] }
 0x7e8   : > { %v1569_v17 = vadd.f32 %v19989_v35, %v1540_v37 }
 0x7e9   : > { %9950 = vmatmul.bf16.vlgmr.msrb.gmra.mxu0 %v19696_v47  ;;  %9963 = vmatmul.bf16.vlgmr.msrb.gmra.mxu1 %v19698_v34 }
 0x7ea   : > { %9976 = vmatmul.bf16.vlgmr.msrb.gmra.mxu2 %v19696_v47  ;;  %9989 = vmatmul.bf16.vlgmr.msrb.gmra.mxu3 %v19698_v34  ;;  %v19982_v34 = vld [vmem:[#allocation35_spill] sm:$0xff] }
 0x7eb   : > { %v1424_v4 = vadd.f32 %v19982_v34, %v19981_v30 }
 0x7ed   : > { %v1453_v38 = vadd.f32 %v19984_v5, %v1424_v4  ;;  %v19990_v4 = vld [vmem:[#allocation59_spill] sm:$0xff] }
 0x825   : > { %v9795_v0 = vpop.f32.mrf.mxu0  ;;  %v9808_v53 = vpop.f32.mrf.mxu1 }
 0x826   : > { %v9809_v43 = vadd.f32 %v9808_v53, %v9795_v0 }
 0x828   : > { %v9994_v16 = vadd.f32 %v9809_v43, %v19983_v6  ;;  %v1598_v6 = vadd.f32 %v19990_v4, %v17659_v52 }
 0x82a   : > { %v10002_v56 = vmul.f32 0.5, %v9994_v16 }
 0x82c   : > { %v9821_v32 = vpop.f32.mrf.mxu2  ;;  %v9834_v27 = vpop.f32.mrf.mxu3 }
 0x82d   : > { %v9797_v28 = vpop.f32.mrf.mxu0  ;;  %v9810_v51 = vpop.f32.mrf.mxu1  ;;  %v9835_v18 = vadd.f32 %v9834_v27, %v9821_v32 }
 0x82f   : > { %v9995_v26 = vadd.f32 %v9835_v18, %v19985_v11 }
 0x831   : > { %v10003_v45 = vmul.f32 0.5, %v9995_v26 }
 0x834   : > { %v9823_v22 = vpop.f32.mrf.mxu2  ;;  %v9836_v54 = vpop.f32.mrf.mxu3 }
 0x835   : > { %v9847_v2 = vpop.f32.mrf.mxu0  ;;  %v9860_v62 = vpop.f32.mrf.mxu1 }
 0x836   : > { %v9861_v31 = vadd.f32 %v9860_v62, %v9847_v2 }
 0x838   : > { %v9996_v47 = vadd.f32 %v9861_v31, %v1395_v60 }
 0x83a   : > { %v10010_v10 = vmul.f32 0.5, %v9996_v47 }
 0x83c   : > { %v9873_v8 = vpop.f32.mrf.mxu2  ;;  %v9886_v29 = vpop.f32.mrf.mxu3  ;;  %16432 = vtanh.f32 %v10010_v10 }
 0x83d   : > { %v9887_v12 = vadd.f32 %v9886_v29, %v9873_v8  ;;  %v9849_v14 = vpop.f32.mrf.mxu0  ;;  %v9862_v59 = vpop.f32.mrf.mxu1  ;;  %16434 = vtanh.f32 %v10002_v56  ;;  %v19991_v29 = vld [vmem:[#allocation60_spill] sm:$0xff]  ;;  %v19993_v56 = vld [vmem:[#allocation63_spill] sm:$0xff] }
 0x83e   : > { %v19992_v59 = vld [vmem:[#allocation62_spill] sm:$0xff] }
 0x83f   : > { %v9997_v20 = vadd.f32 %v9887_v12, %v1453_v38  ;;  %v1656_v10 = vadd.f32 %v19992_v59, %v17673_v19 }
 0x841   : > { %v10011_v55 = vmul.f32 0.5, %v9997_v20 }
 0x842   : > { %v16433_v58 = vpop.eup %16432 }
 0x843   : > { %16436 = vtanh.f32 %v10011_v55  ;;  %v16435_v23 = vpop.eup %16434  ;;  %v10014_v48 = vmul.f32 0.5, %v16433_v58 }
 0x844   : > { %v9875_v15 = vpop.f32.mrf.mxu2  ;;  %v9888_v40 = vpop.f32.mrf.mxu3  ;;  %16438 = vtanh.f32 %v10003_v45  ;;  %v10006_v61 = vmul.f32 0.5, %v16435_v23 }
 0x845   : > { %v10016_v0 = vadd.f32 0.5, %v10014_v48 }
 0x846   : > { %v9899_v46 = vpop.f32.mrf.mxu0  ;;  %v9912_v33 = vpop.f32.mrf.mxu1  ;;  %v10008_v51 = vadd.f32 0.5, %v10006_v61 }
 0x847   : > { %v9913_v50 = vadd.f32 %v9912_v33, %v9899_v46  ;;  %v10028_v49 = vmul.f32 %v10016_v0, %v19647_v25  ;;  %v1627_v25 = vadd.f32 %v19991_v29, %v1598_v6 }
 0x849   : > { %v9998_v21 = vadd.f32 %v9913_v50, %v1511_v44  ;;  %v16437_v3 = vpop.eup %16436 }
 0x84a   : > { %v16439_v28 = vpop.eup %16438  ;;  %v10015_v39 = vmul.f32 0.5, %v16437_v3 }
 0x84b   : > { %16440 = vtanh.f32 %v9998_v21  ;;  %v10007_v54 = vmul.f32 0.5, %v16439_v28 }
 0x84c   : > { %v10017_v62 = vadd.f32 0.5, %v10015_v39 }
 0x84d   : > { %v10009_v60 = vadd.f32 0.5, %v10007_v54 }
 0x84e   : > { %v9901_v32 = vpop.f32.mrf.mxu0  ;;  %v9914_v27 = vpop.f32.mrf.mxu1  ;;  %v10029_v47 = vmul.f32 %v10017_v62, %v19666_v63  ;;  %v1685_v63 = vadd.f32 %v19993_v56, %v1656_v10 }
 0x84f   : > { %v9925_v1 = vpop.f32.mrf.mxu2  ;;  %v9938_v13 = vpop.f32.mrf.mxu3 }
 0x850   : > { %v9939_v53 = vadd.f32 %v9938_v13, %v9925_v1 }
 0x851   : > { %v16441_v9 = vpop.eup %16440 }
 0x852   : > { %v9999_v24 = vadd.f32 %v9939_v53, %v1569_v17  ;;  %v10030_v22 = vmul.f32 %v16441_v9, %v10008_v51 }
 0x854   : > { %16442 = vtanh.f32 %v9999_v24  ;;  %v10032_v2 = vadd.f32 %v10030_v22, %v10028_v49 }
 0x857   : > { %v9927_v31 = vpop.f32.mrf.mxu2  ;;  %v9940_v41 = vpop.f32.mrf.mxu3 }
 0x85a   : > { %v16443_v43 = vpop.eup %16442 }
 0x85b   : > { %v10031_v30 = vmul.f32 %v16443_v43, %v10009_v60 }
 0x85d   : > { %v10033_v34 = vadd.f32 %v10031_v30, %v10029_v47 }
 0x866   : > { %v9951_v16 = vpop.f32.mrf.mxu0  ;;  %v9964_v8 = vpop.f32.mrf.mxu1 }
 0x867   : > { %v9965_v12 = vadd.f32 %v9964_v8, %v9951_v16 }
 0x869   : > { %v10000_v14 = vadd.f32 %v9965_v12, %v1627_v25 }
 0x86b   : > { %v10020_v5 = vmul.f32 0.5, %v10000_v14 }
 0x86d   : > { %16444 = vtanh.f32 %v10020_v5  ;;  %v9977_v38 = vpop.f32.mrf.mxu2  ;;  %v9990_v18 = vpop.f32.mrf.mxu3 }
 0x86e   : > { %v9991_v20 = vadd.f32 %v9990_v18, %v9977_v38  ;;  %v9953_v11 = vpop.f32.mrf.mxu0  ;;  %v9966_v26 = vpop.f32.mrf.mxu1  ;;  %16446 = vtanh.f32 %v10032_v2 }
 0x870   : > { %v10001_v57 = vadd.f32 %v9991_v20, %v1685_v63 }
 0x872   : > { %v10021_v52 = vmul.f32 0.5, %v10001_v57 }
 0x873   : > { %v16445_v42 = vpop.eup %16444 }
 0x874   : > { %v10024_v15 = vmul.f32 0.5, %v16445_v42  ;;  %16448 = vtanh.f32 %v10021_v52  ;;  %v16447_v46 = vpop.eup %16446 }
 0x875   : > { %v9979_v40 = vpop.f32.mrf.mxu2  ;;  %v9992_v55 = vpop.f32.mrf.mxu3  ;;  %16450 = vtanh.f32 %v10033_v34 }
 0x876   : > { %v10026_v45 = vadd.f32 0.5, %v10024_v15 }
 0x878   : > { %v10036_v19 = vmul.f32 %v16447_v46, %v10026_v45 }
 0x87a   : > { %v16449_v33 = vpop.eup %16448 }
 0x87b   : > { %v10025_v58 = vmul.f32 0.5, %v16449_v33  ;;  %v16451_v44 = vpop.eup %16450 }
 0x87d   : > { %v10027_v7 = vadd.f32 0.5, %v10025_v58 }
 0x87f   : > { %v10037_v50 = vmul.f32 %v16451_v44, %v10027_v7  ;;  %10043 = sbr.rel (%p14972_p1) target bundleno = 2347 (0x92b), region = 72 }
 0x881   : > { %v10038_v23 = vpack.c.bf16 %v10037_v50, %v10036_v19 }
 0x883   : > { %10039 = vst [vmem:[#allocation3 + $0x38] sm:$0xff] %v10038_v23 }
 0x884   : > { %v16208_v21 = vld [vmem:[#allocation9 + $0x38] sm:$0xff]  ;;  %v16207_v37 = vld [vmem:[#allocation9 + $0x30] sm:$0xff]  ;;  %v16206_v61 = vld [vmem:[#allocation9 + $0x28] sm:$0xff] }
 0x885   : > { %v16216_v36 = vld [vmem:[#allocation9 + $0x78] sm:$0xff]  ;;  %10184 = vmatpush.bf16.msra.mxu0 %v16208_v21  ;;  %v16215_v48 = vld [vmem:[#allocation9 + $0x70] sm:$0xff]  ;;  %v16214_v1 = vld [vmem:[#allocation9 + $0x68] sm:$0xff] }
 0x886   : > { %10197 = vmatpush.bf16.msra.mxu1 %v16216_v36  ;;  %v16205_v13 = vld [vmem:[#allocation9 + $0x20] sm:$0xff]  ;;  %v16204_v35 = vld [vmem:[#allocation9 + $0x18] sm:$0xff]  ;;  %v16203_v0 = vld [vmem:[#allocation9 + $0x10] sm:$0xff] }
 0x887   : > { %v16213_v3 = vld [vmem:[#allocation9 + $0x60] sm:$0xff]  ;;  %v16212_v17 = vld [vmem:[#allocation9 + $0x58] sm:$0xff]  ;;  %v16211_v53 = vld [vmem:[#allocation9 + $0x50] sm:$0xff] }
 0x888   : > { %v16202_v32 = vld [vmem:[#allocation9 + $0x8] sm:$0xff]  ;;  %v16201_v9 = vld [vmem:[#allocation9] sm:$0xff] }
 0x889   : > { %10185 = vmatpush.bf16.msra.mxu0 %v16207_v37  ;;  %v16210_v27 = vld [vmem:[#allocation9 + $0x48] sm:$0xff]  ;;  %v16209_v39 = vld [vmem:[#allocation9 + $0x40] sm:$0xff] }
 0x88a   : > { %10198 = vmatpush.bf16.msra.mxu1 %v16215_v48  ;;  %v10044_v28 = vld [vmem:[#allocation3 + $0x38] sm:$0xff]  ;;  %v16453_v54 = vld [vmem:[#allocation11] ss:$0 sm:$0xff] }
 0x88b   : > { %v10082_v51 = vunpack.c.l.b16 %v10044_v28  ;;  %v10083_v24 = vunpack.c.h.b16 %v10044_v28 }
 0x88d   : > { %10186 = vmatpush.bf16.msra.mxu0 %v16206_v61  ;;  %v10084_v49 = vpack.c.b16 %v10082_v51, %v10082_v51  ;;  %v10085_v22 = vpack.c.b16 %v10083_v24, %v10083_v24 }
 0x88e   : > { %10199 = vmatpush.bf16.msra.mxu1 %v16214_v1 }
 0x891   : > { %10187 = vmatpush.bf16.msra.mxu0 %v16205_v13 }
 0x892   : > { %10200 = vmatpush.bf16.msra.mxu1 %v16213_v3 }
 0x895   : > { %10188 = vmatpush.bf16.msra.mxu0 %v16204_v35 }
 0x896   : > { %10201 = vmatpush.bf16.msra.mxu1 %v16212_v17 }
 0x899   : > { %10189 = vmatpush.bf16.msra.mxu0 %v16203_v0 }
 0x89a   : > { %10202 = vmatpush.bf16.msra.mxu1 %v16211_v53 }
 0x89d   : > { %10190 = vmatpush.bf16.msra.mxu0 %v16202_v32 }
 0x89e   : > { %10203 = vmatpush.bf16.msra.mxu1 %v16210_v27 }
 0x8a1   : > { %10191 = vmatpush.bf16.msra.mxu0 %v16201_v9 }
 0x8a2   : > { %10204 = vmatpush.bf16.msra.mxu1 %v16209_v39 }
 0x8a4   : > { %10192 = vmatmul.bf16.vlgmr.msra.gmra.mxu0 %v10084_v49 }
 0x8a5   : > { %10205 = vmatmul.bf16.vlgmr.msra.gmra.mxu1 %v10085_v22 }
 0x921   : > { %v10193_v2 = vpop.f32.mrf.mxu0 }
 0x922   : > { %v10206_v62 = vpop.f32.mrf.mxu1  ;;  %v10194_v31 = vadd.f32 %v16453_v54, %v10193_v2 }
 0x924   : > { %v10207_v41 = vadd.f32 %v10206_v62, %v10194_v31 }
 0x926   : > { %10210 = vst [vmem:[%s19881_s6] sm:$0xff] %v10207_v41 }
 0x929   : > { %v10195_v60 = vpop.f32.mrf.mxu0 }
 0x92a   : > { %v10208_v43 = vpop.f32.mrf.mxu1 }
 0x92b PF: > { %s19994_s2 = sld [smem:[#allocation15_spill]]  ;;  %p20_p4 = scmp.ge.s32.totalorder %s16738_s10, 5  }
 0x92c   : > { %s19995_s23 = sld [smem:[#allocation16_spill]]  ;;  %s19996_s21 = smov %s16638_s22 }
 0x92d   : > { %s19998_s24 = smov %s16738_s10  ;;  %22 = sbr.rel (!%p20_p4) target bundleno = 9 (0x9), region = 120 }
 0x931   : > { %s19997_s22 = smov %s19994_s2 }
 0x932   :  { %10222 = vsyncpa [#allocation5], 1 }
 0x933   :  { %10224 = vsyncpa [#allocation5 + $0x1], 1 }
 0x934   :  { %10225 = vsyncpa [#allocation7], 1 }
 0x935   :  { %10227 = vsyncpa [#allocation7 + $0x1], 1 }
 0x936   :  { %10228 = vsyncpa [#allocation10], 1 }

</bundles_post_ra>
